<compile_context>
chip_gen: v6e
topology: v6e:2x2x1
jax: 0.10.0
libtpu: 0.0.40
codegen_flags: <defaults>
</compile_context>

<pallas_src>
import functools

import numpy as np
import jax
import jax.numpy as jnp
from jax import lax
from jax.experimental import pallas as pl
from jax.experimental.pallas import tpu as pltpu


def _round_up(x, m):
    return (x + m - 1) // m * m


@functools.lru_cache(maxsize=None)
def _vmem_params():
    """Return (tile VMEM budget, scoped vmem_limit_bytes) for this device."""
    cap = 64 << 20                         # conservative fallback (v7x physical)
    try:
        cap = int(getattr(pltpu.get_tpu_info(), "vmem_capacity_bytes", cap))
    except Exception:
        pass
    cap = max(cap, 32 << 20)
    budget = min(cap // 4, 48 << 20)       # tiles + double buffers must fit here
    limit = min(cap // 2, 96 << 20)        # scoped VMEM limit handed to Mosaic
    return budget, limit


def _choose_tiles(M, K, C_pad, *, in_bytes, out_bytes, budget,
                  max_tm=None, max_tk=None):
    """Pick (tm, tk): biggest M tile that fits; single K step when possible."""
    M8 = _round_up(max(M, 1), 8)

    tm_cands = [t for t in (4096, 2048, 1024, 512, 256, 128, 64, 32, 16, 8)
                if t <= M8]
    if M8 <= 4096 and M8 not in tm_cands:
        tm_cands.append(M8)                # prefer one tile when M is small
    if not tm_cands:
        tm_cands = [M8]
    if max_tm is not None:
        filtered = [t for t in tm_cands if t <= max_tm]
        tm_cands = filtered or [min(M8, _round_up(max_tm, 8))]
    tm_cands = sorted(set(tm_cands), reverse=True)

    tk_cands = [K] + [t for t in (2048, 1024, 512, 256, 128) if t < K]
    if max_tk is not None:
        tk_cands = [t for t in tk_cands if t <= max_tk] or [min(K, 128)]
    tk_cands = [t for t in tk_cands if t == K or t % 128 == 0]

    def vmem_cost(tm, tk):
        nk = -(-K // tk)
        c = 2 * tm * tk * in_bytes           # patches tile (double-buffered)
        c += 2 * tk * C_pad * in_bytes       # weights tile (double-buffered)
        c += 2 * tm * C_pad * out_bytes      # output tile (double-buffered)
        if nk > 1:
            c += tm * C_pad * 4              # f32 accumulator scratch
        c += 8 * C_pad * 4                   # bias / gamma / beta / stats rows
        return c

    for tm in tm_cands:
        for tk in tk_cands:
            if vmem_cost(tm, tk) <= budget:
                return tm, tk
    return tm_cands[-1], tk_cands[-1]


# --------------------------- fused conv kernel -------------------------------

def _conv_kernel(*args, epilogue, multi_k, m_valid, m_tile, eps):
    """grid = (nm, nk); K (last axis) is the reduction axis.

    epilogue:
      "leaky"    : y = leaky_relu(z, 0.2)
      "sigmoid"  : y = sigmoid(z)
      "bn_fused" : y = leaky_relu(batchnorm(z), 0.2)          (nm == 1 only)
      "bn_stats" : store z; accumulate per-channel sum / sumsq across M tiles
    """
    acc_ref = args[-1] if multi_k else None
    if multi_k:
        args = args[:-1]
    g_ref = be_ref = s1_ref = s2_ref = None
    if epilogue == "bn_fused":
        x_ref, w_ref, b_ref, g_ref, be_ref, o_ref = args
    elif epilogue == "bn_stats":
        x_ref, w_ref, b_ref, o_ref, s1_ref, s2_ref = args
    else:
        x_ref, w_ref, b_ref, o_ref = args

    i = pl.program_id(0)
    k = pl.program_id(1)

    part = jnp.dot(x_ref[...], w_ref[...], preferred_element_type=jnp.float32)

    def finish(acc):
        z = acc + b_ref[...]                                 # (tm, C_pad) f32
        if epilogue == "leaky":
            o_ref[...] = jnp.where(z >= 0, z, 0.2 * z).astype(o_ref.dtype)
        elif epilogue == "sigmoid":
            t = jnp.exp(-jnp.abs(z))                         # exp on the EUP
            s = jnp.where(z >= 0, 1.0 / (1.0 + t), t / (1.0 + t))
            o_ref[...] = s.astype(o_ref.dtype)
        elif epilogue == "bn_fused":
            if m_valid == z.shape[0]:
                zs = z
            else:                    # mask zero-padded rows out of the stats
                row = lax.broadcasted_iota(jnp.int32, z.shape, 0)
                zs = jnp.where(row < m_valid, z, 0.0)
            inv_n = 1.0 / float(m_valid)
            mean = jnp.sum(zs, axis=0, keepdims=True) * inv_n
            var = jnp.sum(zs * zs, axis=0, keepdims=True) * inv_n - mean * mean
            scale = g_ref[...] * lax.rsqrt(var + eps)
            y = (z - mean) * scale + be_ref[...]
            o_ref[...] = jnp.where(y >= 0, y, 0.2 * y).astype(o_ref.dtype)
        else:  # "bn_stats": z out + full-batch sum/sumsq accumulated over M
            o_ref[...] = z.astype(o_ref.dtype)
            row = i * m_tile + lax.broadcasted_iota(jnp.int32, z.shape, 0)
            zs = jnp.where(row < m_valid, z, 0.0)
            psum = jnp.sum(zs, axis=0, keepdims=True)
            psq = jnp.sum(zs * zs, axis=0, keepdims=True)
            first = i == 0           # stats live in a grid-resident output block
            s1_ref[...] = jnp.where(first, psum, s1_ref[...] + psum)
            s2_ref[...] = jnp.where(first, psq, s2_ref[...] + psq)

    if multi_k:
        @pl.when(k == 0)
        def _():
            acc_ref[...] = part

        @pl.when(k != 0)
        def _():
            acc_ref[...] = acc_ref[...] + part

        @pl.when(k == pl.num_programs(1) - 1)
        def _():
            finish(acc_ref[...])
    else:
        finish(part)


def _fused_conv_call(patches, wmat, bias, gamma, beta, *, epilogue, m_valid,
                     tm, tk, out_dtype, eps, vmem_limit):
    M_pad, K_pad = patches.shape
    C_pad = wmat.shape[1]
    nm, nk = M_pad // tm, K_pad // tk
    multi_k = nk > 1

    in_arrays = [patches, wmat, bias]
    in_specs = [
        pl.BlockSpec((tm, tk), lambda i, k: (i, k)),
        pl.BlockSpec((tk, C_pad), lambda i, k: (k, 0)),
        pl.BlockSpec((1, C_pad), lambda i, k: (0, 0)),
    ]
    if epilogue == "bn_fused":
        in_arrays += [gamma, beta]
        in_specs += [pl.BlockSpec((1, C_pad), lambda i, k: (0, 0)),
                     pl.BlockSpec((1, C_pad), lambda i, k: (0, 0))]

    out_shape = jax.ShapeDtypeStruct((M_pad, C_pad), out_dtype)
    out_specs = pl.BlockSpec((tm, C_pad), lambda i, k: (i, 0))
    if epilogue == "bn_stats":
        out_shape = (out_shape,
                     jax.ShapeDtypeStruct((1, C_pad), jnp.float32),
                     jax.ShapeDtypeStruct((1, C_pad), jnp.float32))
        out_specs = (out_specs,
                     pl.BlockSpec((1, C_pad), lambda i, k: (0, 0)),
                     pl.BlockSpec((1, C_pad), lambda i, k: (0, 0)))

    scratch = [pltpu.VMEM((tm, C_pad), jnp.float32)] if multi_k else []

    # bn_stats accumulates across M tiles into grid-resident outputs, so its M
    # axis must stay "arbitrary"; all other epilogues are independent per M
    # tile and can shard across v7x's two TensorCores.
    m_sem = "arbitrary" if epilogue == "bn_stats" else "parallel"

    return pl.pallas_call(
        functools.partial(_conv_kernel, epilogue=epilogue, multi_k=multi_k,
                          m_valid=m_valid, m_tile=tm, eps=eps),
        out_shape=out_shape,
        grid=(nm, nk),
        in_specs=in_specs,
        out_specs=out_specs,
        scratch_shapes=scratch,
        compiler_params=pltpu.CompilerParams(
            dimension_semantics=(m_sem, "arbitrary"),
            vmem_limit_bytes=vmem_limit),
    )(*in_arrays)


# ------------------------ BN apply kernel (nm > 1) ----------------------------

def _bn_apply_kernel(z_ref, s1_ref, s2_ref, g_ref, be_ref, o_ref, *, m_valid, eps):
    inv_n = 1.0 / float(m_valid)
    mean = s1_ref[...] * inv_n
    var = s2_ref[...] * inv_n - mean * mean
    scale = g_ref[...] * lax.rsqrt(var + eps)
    shift = be_ref[...] - mean * scale
    y = z_ref[...].astype(jnp.float32) * scale + shift
    o_ref[...] = jnp.where(y >= 0, y, 0.2 * y).astype(o_ref.dtype)


def _bn_apply_call(z_rows, s1, s2, gamma, beta, *, m_valid, tm, out_dtype, eps,
                   vmem_limit):
    M_pad, C_pad = z_rows.shape
    nm = M_pad // tm
    return pl.pallas_call(
        functools.partial(_bn_apply_kernel, m_valid=m_valid, eps=eps),
        out_shape=jax.ShapeDtypeStruct((M_pad, C_pad), out_dtype),
        grid=(nm,),
        in_specs=[pl.BlockSpec((tm, C_pad), lambda i: (i, 0)),
                  pl.BlockSpec((1, C_pad), lambda i: (0, 0)),
                  pl.BlockSpec((1, C_pad), lambda i: (0, 0)),
                  pl.BlockSpec((1, C_pad), lambda i: (0, 0)),
                  pl.BlockSpec((1, C_pad), lambda i: (0, 0))],
        out_specs=pl.BlockSpec((tm, C_pad), lambda i: (i, 0)),
        compiler_params=pltpu.CompilerParams(
            dimension_semantics=("parallel",),
            vmem_limit_bytes=vmem_limit),
    )(z_rows, s1, s2, gamma, beta)


# ------------------------------- JAX glue --------------------------------------

def im2col_nhwc(x, ksize, stride, pad):
    """x NHWC -> (N*Ho*Wo, ksize*ksize*C) rows, K ordered (kh, kw, ci)."""
    N, H, W, C = x.shape
    if pad:
        x = jnp.pad(x, ((0, 0), (pad, pad), (pad, pad), (0, 0)))
    Ho = (H + 2 * pad - ksize) // stride + 1
    Wo = (W + 2 * pad - ksize) // stride + 1
    cols = []
    for kh in range(ksize):
        for kw in range(ksize):
            cols.append(x[:, kh:kh + stride * Ho:stride,
                          kw:kw + stride * Wo:stride, :])
    p = jnp.stack(cols, axis=3)                          # (N, Ho, Wo, k*k, C)
    return p.reshape(N * Ho * Wo, ksize * ksize * C), (N, Ho, Wo)


def conv_layer(x_nhwc, w, b, stride, pad, *, epilogue, gamma=None, beta=None,
               mxu_dtype=jnp.bfloat16, out_dtype=None, max_tm=None, max_tk=None,
               eps=1e-5):
    """x NHWC, w (Cout, Cin, KH, KW).  Returns NHWC output of the fused layer."""
    if out_dtype is None:
        out_dtype = mxu_dtype
    Cout, Cin, KH, KW = w.shape
    patches, (N, Ho, Wo) = im2col_nhwc(x_nhwc.astype(mxu_dtype), KH, stride, pad)
    M = N * Ho * Wo
    K = KH * KW * Cin                       # NOT padded to 128 (full-dim block)
    C_pad = _round_up(Cout, 128)            # lane-dense output stores

    budget, vmem_limit = _vmem_params()
    tm, tk = _choose_tiles(M, K, C_pad,
                           in_bytes=jnp.dtype(mxu_dtype).itemsize,
                           out_bytes=jnp.dtype(out_dtype).itemsize,
                           budget=budget, max_tm=max_tm, max_tk=max_tk)
    M_pad = _round_up(M, tm)
    K_pad = _round_up(K, tk)                # == K whenever tk == K
    nm = M_pad // tm

    if (M_pad, K_pad) != (M, K):
        patches = jnp.pad(patches, ((0, M_pad - M), (0, K_pad - K)))

    wmat = w.transpose(2, 3, 1, 0).reshape(K, Cout)       # (kh,kw,ci) x Cout
    if (K_pad, C_pad) != (K, Cout):
        wmat = jnp.pad(wmat, ((0, K_pad - K), (0, C_pad - Cout)))
    wmat = wmat.astype(mxu_dtype)
    b_p = jnp.pad(b, (0, C_pad - Cout)).reshape(1, C_pad).astype(jnp.float32)

    common = dict(m_valid=M, tm=tm, tk=tk, out_dtype=out_dtype, eps=eps,
                  vmem_limit=vmem_limit)
    if epilogue == "bn_leaky":
        g_p = jnp.pad(gamma, (0, C_pad - Cout)).reshape(1, C_pad).astype(jnp.float32)
        be_p = jnp.pad(beta, (0, C_pad - Cout)).reshape(1, C_pad).astype(jnp.float32)
        if nm == 1:
            rows = _fused_conv_call(patches, wmat, b_p, g_p, be_p,
                                    epilogue="bn_fused", **common)
        else:
            # Two-phase BN: conv emits z + per-channel sum/sumsq (full batch),
            # a lightweight second kernel normalizes + applies LeakyReLU.
            z_rows, s1, s2 = _fused_conv_call(patches, wmat, b_p, None, None,
                                              epilogue="bn_stats", **common)
            rows = _bn_apply_call(z_rows, s1, s2, g_p, be_p, m_valid=M, tm=tm,
                                  out_dtype=out_dtype, eps=eps,
                                  vmem_limit=vmem_limit)
    else:
        rows = _fused_conv_call(patches, wmat, b_p, None, None,
                                epilogue=epilogue, **common)

    return rows[:M, :Cout].reshape(N, Ho, Wo, Cout)


def discriminator_forward(x, p, mxu_dtype=jnp.bfloat16, max_tm=None, max_tk=None):
    """Equivalent of discriminator.forward(input); x is NCHW, output is NCHW."""
    caps = dict(max_tm=max_tm, max_tk=max_tk)
    y = x.transpose(0, 2, 3, 1)                                        # -> NHWC
    y = conv_layer(y, p["w1"], p["b1"], 2, 1, epilogue="leaky",
                   mxu_dtype=mxu_dtype, **caps)
    y = conv_layer(y, p["w2"], p["b2"], 2, 1, epilogue="bn_leaky",
                   gamma=p["g2"], beta=p["be2"], mxu_dtype=mxu_dtype, **caps)
    y = conv_layer(y, p["w3"], p["b3"], 2, 1, epilogue="bn_leaky",
                   gamma=p["g3"], beta=p["be3"], mxu_dtype=mxu_dtype, **caps)
    y = conv_layer(y, p["w4"], p["b4"], 2, 1, epilogue="bn_leaky",
                   gamma=p["g4"], beta=p["be4"], mxu_dtype=mxu_dtype, **caps)
    y = conv_layer(y, p["w5"], p["b5"], 1, 0, epilogue="sigmoid",
                   mxu_dtype=mxu_dtype, out_dtype=jnp.float32, **caps)
    return y.transpose(0, 3, 1, 2)                                     # -> NCHW


# -------------------------- pure-JAX reference --------------------------------

def reference_forward(x, p, eps=1e-5):
    def conv(x, w, b, stride, pad):
        y = lax.conv_general_dilated(x, w, (stride, stride),
                                     [(pad, pad), (pad, pad)],
                                     dimension_numbers=("NCHW", "OIHW", "NCHW"),
                                     precision=lax.Precision.HIGHEST)
        return y + b[None, :, None, None]

    def bn(y, g, be):
        mean = y.mean(axis=(0, 2, 3), keepdims=True)
        var = ((y - mean) ** 2).mean(axis=(0, 2, 3), keepdims=True)
        return (y - mean) / jnp.sqrt(var + eps) * g[None, :, None, None] \
            + be[None, :, None, None]

    lrelu = lambda v: jnp.where(v >= 0, v, 0.2 * v)
    y = lrelu(conv(x, p["w1"], p["b1"], 2, 1))
    y = lrelu(bn(conv(y, p["w2"], p["b2"], 2, 1), p["g2"], p["be2"]))
    y = lrelu(bn(conv(y, p["w3"], p["b3"], 2, 1), p["g3"], p["be3"]))
    y = lrelu(bn(conv(y, p["w4"], p["b4"], 2, 1), p["g4"], p["be4"]))
    return jax.nn.sigmoid(conv(y, p["w5"], p["b5"], 1, 0))


# ------------------------------- main -----------------------------------------

if __name__ == "__main__":
    key = jax.random.PRNGKey(0)
    nc, ndf = 1, 16                 # module default ndf=64; small ndf for demo
    N, H, W = 2, 64, 64             # discriminator geometry: 64x64 -> 1x1
    ks = jax.random.split(key, 8)

    def w_init(k, shape):           # matches weight_init(mean=0.0, std=0.02)
        return 0.02 * jax.random.normal(k, shape, jnp.float32)

    params = {
        "w1": w_init(ks[0], (ndf, nc, 4, 4)),          "b1": jnp.zeros((ndf,), jnp.float32),
        "w2": w_init(ks[1], (2 * ndf, ndf, 4, 4)),     "b2": jnp.zeros((2 * ndf,), jnp.float32),
        "w3": w_init(ks[2], (4 * ndf, 2 * ndf, 4, 4)), "b3": jnp.zeros((4 * ndf,), jnp.float32),
        "w4": w_init(ks[3], (8 * ndf, 4 * ndf, 4, 4)), "b4": jnp.zeros((8 * ndf,), jnp.float32),
        "w5": w_init(ks[4], (1, 8 * ndf, 4, 4)),       "b5": jnp.zeros((1,), jnp.float32),
        "g2": jnp.ones((2 * ndf,), jnp.float32), "be2": jnp.zeros((2 * ndf,), jnp.float32),
        "g3": jnp.ones((4 * ndf,), jnp.float32), "be3": jnp.zeros((4 * ndf,), jnp.float32),
        "g4": jnp.ones((8 * ndf,), jnp.float32), "be4": jnp.zeros((8 * ndf,), jnp.float32),
    }
    x = jax.random.normal(ks[5], (N, nc, H, W), jnp.float32)

    ref = np.asarray(reference_forward(x, params))

    # 1) shipped bf16 path, auto-sized tiles (fully fused at these shapes)
    fwd_bf16 = jax.jit(functools.partial(discriminator_forward,
                                         mxu_dtype=jnp.bfloat16))
    out_bf16 = jax.block_until_ready(fwd_bf16(x, params))
    # 2) f32 path, auto-sized tiles (tight-tolerance check of fused BN epilogue)
    fwd_f32 = jax.jit(functools.partial(discriminator_forward,
                                        mxu_dtype=jnp.float32))
    out_f32 = jax.block_until_ready(fwd_f32(x, params))
    # 3) f32 path with forced small tiles: exercises M tiling, multi-K
    #    accumulation and the two-phase full-batch BN reduction paths.
    fwd_tiled = jax.jit(functools.partial(discriminator_forward,
                                          mxu_dtype=jnp.float32,
                                          max_tm=128, max_tk=256))
    out_tiled = jax.block_until_ready(fwd_tiled(x, params))

    for name, out, tol in (("bf16", out_bf16, 3e-2),
                           ("f32", out_f32, 5e-3),
                           ("f32_tiled", out_tiled, 5e-3)):
        assert out.shape == (N, 1, 1, 1), (name, out.shape)
        err = float(np.max(np.abs(np.asarray(out) - ref)))
        assert err < tol, f"{name} path mismatch vs reference, max abs err = {err}"

    print("KERNEL_OK")
</pallas_src>

<mosaic_0001>
module attributes {stable_mosaic.version = 11 : i64} {
  func.func @_conv_kernel(%arg0: i32, %arg1: i32, %arg2: memref<2048x16xbf16, #tpu.memory_space<vmem>>, %arg3: memref<16x128xbf16, #tpu.memory_space<vmem>>, %arg4: memref<1x128xf32, #tpu.memory_space<vmem>>, %arg5: memref<2048x128xbf16, #tpu.memory_space<vmem>>) attributes {dimension_semantics = [#tpu.dimension_semantics<parallel>, #tpu.dimension_semantics<arbitrary>], iteration_bounds = array<i64: 1, 1>, scalar_prefetch = 0 : i64, scratch_operands = 0 : i64, tpu.core_type = #tpu.core_type<tc>, window_params = [{transform_indices = @transform_0, window_bounds = array<i64: 2048, 16>}, {transform_indices = @transform_1, window_bounds = array<i64: 16, 128>}, {pipeline_mode = #tpu.pipeline_mode<synchronous>, transform_indices = @transform_2, window_bounds = array<i64: 1, 128>}, {transform_indices = @transform_3, window_bounds = array<i64: 2048, 128>}]} {
    %c0 = arith.constant 0 : index
    %c0_0 = arith.constant 0 : index
    %0 = vector.load %arg2[%c0, %c0_0] : memref<2048x16xbf16, #tpu.memory_space<vmem>>, vector<2048x16xbf16>
    %c0_1 = arith.constant 0 : index
    %c0_2 = arith.constant 0 : index
    %1 = vector.load %arg3[%c0_1, %c0_2] : memref<16x128xbf16, #tpu.memory_space<vmem>>, vector<16x128xbf16>
    %cst = arith.constant dense<0.000000e+00> : vector<2048x128xf32>
    %2 = tpu.matmul %0, %1, %cst {dimension_numbers = #tpu.dot_dimension_numbers<[1], [0], [0], [1], [0, 0, 1, 1], [], []>} : vector<2048x16xbf16>, vector<16x128xbf16>, vector<2048x128xf32> -> vector<2048x128xf32>
    %c0_3 = arith.constant 0 : index
    %c0_4 = arith.constant 0 : index
    %3 = vector.load %arg4[%c0_3, %c0_4] : memref<1x128xf32, #tpu.memory_space<vmem>>, vector<1x128xf32>
    %4 = vector.broadcast %3 : vector<1x128xf32> to vector<2048x128xf32>
    %5 = arith.addf %2, %4 : vector<2048x128xf32>
    %cst_5 = arith.constant 0.000000e+00 : f32
    %6 = vector.broadcast %cst_5 : f32 to vector<2048x128xf32>
    %7 = arith.cmpf oge, %5, %6 : vector<2048x128xf32>
    %cst_6 = arith.constant 2.000000e-01 : f32
    %8 = vector.broadcast %cst_6 : f32 to vector<2048x128xf32>
    %9 = arith.mulf %8, %5 : vector<2048x128xf32>
    %10 = arith.select %7, %5, %9 : vector<2048x128xi1>, vector<2048x128xf32>
    %11 = arith.truncf %10 : vector<2048x128xf32> to vector<2048x128xbf16>
    %c0_7 = arith.constant 0 : index
    %c0_8 = arith.constant 0 : index
    %12 = vector.load %arg5[%c0_7, %c0_8] : memref<2048x128xbf16, #tpu.memory_space<vmem>>, vector<2048x128xbf16>
    tpu.vector_store %arg5[%c0_7, %c0_8], %11 {strides = array<i32>} : memref<2048x128xbf16, #tpu.memory_space<vmem>>, vector<2048x128xbf16>,
    return
  }
  func.func @transform_0(%arg0: i32, %arg1: i32) -> (i32, i32) {
    %c0_i32 = arith.constant 0 : i32
    return %arg0, %arg1 : i32, i32
  }
  func.func @transform_1(%arg0: i32, %arg1: i32) -> (i32, i32) {
    %c0_i32 = arith.constant 0 : i32
    %c0_i32_0 = arith.constant 0 : i32
    return %arg1, %c0_i32 : i32, i32
  }
  func.func @transform_2(%arg0: i32, %arg1: i32) -> (i32, i32) {
    %c0_i32 = arith.constant 0 : i32
    %c0_i32_0 = arith.constant 0 : i32
    %c0_i32_1 = arith.constant 0 : i32
    return %c0_i32, %c0_i32_0 : i32, i32
  }
  func.func @transform_3(%arg0: i32, %arg1: i32) -> (i32, i32) {
    %c0_i32 = arith.constant 0 : i32
    %c0_i32_0 = arith.constant 0 : i32
    return %arg0, %c0_i32 : i32, i32
  }
}

module attributes {stable_mosaic.version = 11 : i64} {
  func.func @_conv_kernel(%arg0: i32, %arg1: i32, %arg2: memref<512x256xbf16, #tpu.memory_space<vmem>>, %arg3: memref<256x128xbf16, #tpu.memory_space<vmem>>, %arg4: memref<1x128xf32, #tpu.memory_space<vmem>>, %arg5: memref<1x128xf32, #tpu.memory_space<vmem>>, %arg6: memref<1x128xf32, #tpu.memory_space<vmem>>, %arg7: memref<512x128xbf16, #tpu.memory_space<vmem>>) attributes {dimension_semantics = [#tpu.dimension_semantics<parallel>, #tpu.dimension_semantics<arbitrary>], iteration_bounds = array<i64: 1, 1>, scalar_prefetch = 0 : i64, scratch_operands = 0 : i64, tpu.core_type = #tpu.core_type<tc>, window_params = [{transform_indices = @transform_0, window_bounds = array<i64: 512, 256>}, {transform_indices = @transform_1, window_bounds = array<i64: 256, 128>}, {pipeline_mode = #tpu.pipeline_mode<synchronous>, transform_indices = @transform_2, window_bounds = array<i64: 1, 128>}, {pipeline_mode = #tpu.pipeline_mode<synchronous>, transform_indices = @transform_3, window_bounds = array<i64: 1, 128>}, {pipeline_mode = #tpu.pipeline_mode<synchronous>, transform_indices = @transform_4, window_bounds = array<i64: 1, 128>}, {transform_indices = @transform_5, window_bounds = array<i64: 512, 128>}]} {
    %c0 = arith.constant 0 : index
    %c0_0 = arith.constant 0 : index
    %0 = vector.load %arg2[%c0, %c0_0] : memref<512x256xbf16, #tpu.memory_space<vmem>>, vector<512x256xbf16>
    %c0_1 = arith.constant 0 : index
    %c0_2 = arith.constant 0 : index
    %1 = vector.load %arg3[%c0_1, %c0_2] : memref<256x128xbf16, #tpu.memory_space<vmem>>, vector<256x128xbf16>
    %cst = arith.constant dense<0.000000e+00> : vector<512x128xf32>
    %2 = tpu.matmul %0, %1, %cst {dimension_numbers = #tpu.dot_dimension_numbers<[1], [0], [0], [1], [0, 0, 1, 1], [], []>} : vector<512x256xbf16>, vector<256x128xbf16>, vector<512x128xf32> -> vector<512x128xf32>
    %c0_3 = arith.constant 0 : index
    %c0_4 = arith.constant 0 : index
    %3 = vector.load %arg4[%c0_3, %c0_4] : memref<1x128xf32, #tpu.memory_space<vmem>>, vector<1x128xf32>
    %4 = vector.broadcast %3 : vector<1x128xf32> to vector<512x128xf32>
    %5 = arith.addf %2, %4 : vector<512x128xf32>
    %cst_5 = arith.constant dense<0.000000e+00> : vector<128xf32>
    %6 = vector.multi_reduction <add>, %5, %cst_5 [0] : vector<512x128xf32> to vector<128xf32>
    %7 = vector.shape_cast %6 : vector<128xf32> to vector<1x128xf32>
    %cst_6 = arith.constant 0.001953125 : f32
    %8 = vector.broadcast %cst_6 : f32 to vector<1x128xf32>
    %9 = arith.mulf %7, %8 : vector<1x128xf32>
    %10 = arith.mulf %5, %5 : vector<512x128xf32>
    %cst_7 = arith.constant dense<0.000000e+00> : vector<128xf32>
    %11 = vector.multi_reduction <add>, %10, %cst_7 [0] : vector<512x128xf32> to vector<128xf32>
    %12 = vector.shape_cast %11 : vector<128xf32> to vector<1x128xf32>
    %cst_8 = arith.constant 0.001953125 : f32
    %13 = vector.broadcast %cst_8 : f32 to vector<1x128xf32>
    %14 = arith.mulf %12, %13 : vector<1x128xf32>
    %15 = arith.mulf %9, %9 : vector<1x128xf32>
    %16 = arith.subf %14, %15 : vector<1x128xf32>
    %c0_9 = arith.constant 0 : index
    %c0_10 = arith.constant 0 : index
    %17 = vector.load %arg5[%c0_9, %c0_10] : memref<1x128xf32, #tpu.memory_space<vmem>>, vector<1x128xf32>
    %cst_11 = arith.constant 9.99999974E-6 : f32
    %18 = vector.broadcast %cst_11 : f32 to vector<1x128xf32>
    %19 = arith.addf %16, %18 : vector<1x128xf32>
    %20 = math.rsqrt %19 : vector<1x128xf32>
    %21 = arith.mulf %17, %20 : vector<1x128xf32>
    %22 = vector.broadcast %9 : vector<1x128xf32> to vector<512x128xf32>
    %23 = arith.subf %5, %22 : vector<512x128xf32>
    %24 = vector.broadcast %21 : vector<1x128xf32> to vector<512x128xf32>
    %25 = arith.mulf %23, %24 : vector<512x128xf32>
    %c0_12 = arith.constant 0 : index
    %c0_13 = arith.constant 0 : index
    %26 = vector.load %arg6[%c0_12, %c0_13] : memref<1x128xf32, #tpu.memory_space<vmem>>, vector<1x128xf32>
    %27 = vector.broadcast %26 : vector<1x128xf32> to vector<512x128xf32>
    %28 = arith.addf %25, %27 : vector<512x128xf32>
    %cst_14 = arith.constant 0.000000e+00 : f32
    %29 = vector.broadcast %cst_14 : f32 to vector<512x128xf32>
    %30 = arith.cmpf oge, %28, %29 : vector<512x128xf32>
    %cst_15 = arith.constant 2.000000e-01 : f32
    %31 = vector.broadcast %cst_15 : f32 to vector<512x128xf32>
    %32 = arith.mulf %31, %28 : vector<512x128xf32>
    %33 = arith.select %30, %28, %32 : vector<512x128xi1>, vector<512x128xf32>
    %34 = arith.truncf %33 : vector<512x128xf32> to vector<512x128xbf16>
    %c0_16 = arith.constant 0 : index
    %c0_17 = arith.constant 0 : index
    %35 = vector.load %arg7[%c0_16, %c0_17] : memref<512x128xbf16, #tpu.memory_space<vmem>>, vector<512x128xbf16>
    tpu.vector_store %arg7[%c0_16, %c0_17], %34 {strides = array<i32>} : memref<512x128xbf16, #tpu.memory_space<vmem>>, vector<512x128xbf16>,
    return
  }
  func.func @transform_0(%arg0: i32, %arg1: i32) -> (i32, i32) {
    %c0_i32 = arith.constant 0 : i32
    return %arg0, %arg1 : i32, i32
  }
  func.func @transform_1(%arg0: i32, %arg1: i32) -> (i32, i32) {
    %c0_i32 = arith.constant 0 : i32
    %c0_i32_0 = arith.constant 0 : i32
    return %arg1, %c0_i32 : i32, i32
  }
  func.func @transform_2(%arg0: i32, %arg1: i32) -> (i32, i32) {
    %c0_i32 = arith.constant 0 : i32
    %c0_i32_0 = arith.constant 0 : i32
    %c0_i32_1 = arith.constant 0 : i32
    return %c0_i32, %c0_i32_0 : i32, i32
  }
  func.func @transform_3(%arg0: i32, %arg1: i32) -> (i32, i32) {
    %c0_i32 = arith.constant 0 : i32
    %c0_i32_0 = arith.constant 0 : i32
    %c0_i32_1 = arith.constant 0 : i32
    return %c0_i32, %c0_i32_0 : i32, i32
  }
  func.func @transform_4(%arg0: i32, %arg1: i32) -> (i32, i32) {
    %c0_i32 = arith.constant 0 : i32
    %c0_i32_0 = arith.constant 0 : i32
    %c0_i32_1 = arith.constant 0 : i32
    return %c0_i32, %c0_i32_0 : i32, i32
  }
  func.func @transform_5(%arg0: i32, %arg1: i32) -> (i32, i32) {
    %c0_i32 = arith.constant 0 : i32
    %c0_i32_0 = arith.constant 0 : i32
    return %arg0, %c0_i32 : i32, i32
  }
}

module attributes {stable_mosaic.version = 11 : i64} {
  func.func @_conv_kernel(%arg0: i32, %arg1: i32, %arg2: memref<128x512xbf16, #tpu.memory_space<vmem>>, %arg3: memref<512x128xbf16, #tpu.memory_space<vmem>>, %arg4: memref<1x128xf32, #tpu.memory_space<vmem>>, %arg5: memref<1x128xf32, #tpu.memory_space<vmem>>, %arg6: memref<1x128xf32, #tpu.memory_space<vmem>>, %arg7: memref<128x128xbf16, #tpu.memory_space<vmem>>) attributes {dimension_semantics = [#tpu.dimension_semantics<parallel>, #tpu.dimension_semantics<arbitrary>], iteration_bounds = array<i64: 1, 1>, scalar_prefetch = 0 : i64, scratch_operands = 0 : i64, tpu.core_type = #tpu.core_type<tc>, window_params = [{transform_indices = @transform_0, window_bounds = array<i64: 128, 512>}, {transform_indices = @transform_1, window_bounds = array<i64: 512, 128>}, {pipeline_mode = #tpu.pipeline_mode<synchronous>, transform_indices = @transform_2, window_bounds = array<i64: 1, 128>}, {pipeline_mode = #tpu.pipeline_mode<synchronous>, transform_indices = @transform_3, window_bounds = array<i64: 1, 128>}, {pipeline_mode = #tpu.pipeline_mode<synchronous>, transform_indices = @transform_4, window_bounds = array<i64: 1, 128>}, {transform_indices = @transform_5, window_bounds = array<i64: 128, 128>}]} {
    %c0 = arith.constant 0 : index
    %c0_0 = arith.constant 0 : index
    %0 = vector.load %arg2[%c0, %c0_0] : memref<128x512xbf16, #tpu.memory_space<vmem>>, vector<128x512xbf16>
    %c0_1 = arith.constant 0 : index
    %c0_2 = arith.constant 0 : index
    %1 = vector.load %arg3[%c0_1, %c0_2] : memref<512x128xbf16, #tpu.memory_space<vmem>>, vector<512x128xbf16>
    %cst = arith.constant dense<0.000000e+00> : vector<128x128xf32>
    %2 = tpu.matmul %0, %1, %cst {dimension_numbers = #tpu.dot_dimension_numbers<[1], [0], [0], [1], [0, 0, 1, 1], [], []>} : vector<128x512xbf16>, vector<512x128xbf16>, vector<128x128xf32> -> vector<128x128xf32>
    %c0_3 = arith.constant 0 : index
    %c0_4 = arith.constant 0 : index
    %3 = vector.load %arg4[%c0_3, %c0_4] : memref<1x128xf32, #tpu.memory_space<vmem>>, vector<1x128xf32>
    %4 = vector.broadcast %3 : vector<1x128xf32> to vector<128x128xf32>
    %5 = arith.addf %2, %4 : vector<128x128xf32>
    %cst_5 = arith.constant dense<0.000000e+00> : vector<128xf32>
    %6 = vector.multi_reduction <add>, %5, %cst_5 [0] : vector<128x128xf32> to vector<128xf32>
    %7 = vector.shape_cast %6 : vector<128xf32> to vector<1x128xf32>
    %cst_6 = arith.constant 7.812500e-03 : f32
    %8 = vector.broadcast %cst_6 : f32 to vector<1x128xf32>
    %9 = arith.mulf %7, %8 : vector<1x128xf32>
    %10 = arith.mulf %5, %5 : vector<128x128xf32>
    %cst_7 = arith.constant dense<0.000000e+00> : vector<128xf32>
    %11 = vector.multi_reduction <add>, %10, %cst_7 [0] : vector<128x128xf32> to vector<128xf32>
    %12 = vector.shape_cast %11 : vector<128xf32> to vector<1x128xf32>
    %cst_8 = arith.constant 7.812500e-03 : f32
    %13 = vector.broadcast %cst_8 : f32 to vector<1x128xf32>
    %14 = arith.mulf %12, %13 : vector<1x128xf32>
    %15 = arith.mulf %9, %9 : vector<1x128xf32>
    %16 = arith.subf %14, %15 : vector<1x128xf32>
    %c0_9 = arith.constant 0 : index
    %c0_10 = arith.constant 0 : index
    %17 = vector.load %arg5[%c0_9, %c0_10] : memref<1x128xf32, #tpu.memory_space<vmem>>, vector<1x128xf32>
    %cst_11 = arith.constant 9.99999974E-6 : f32
    %18 = vector.broadcast %cst_11 : f32 to vector<1x128xf32>
    %19 = arith.addf %16, %18 : vector<1x128xf32>
    %20 = math.rsqrt %19 : vector<1x128xf32>
    %21 = arith.mulf %17, %20 : vector<1x128xf32>
    %22 = vector.broadcast %9 : vector<1x128xf32> to vector<128x128xf32>
    %23 = arith.subf %5, %22 : vector<128x128xf32>
    %24 = vector.broadcast %21 : vector<1x128xf32> to vector<128x128xf32>
    %25 = arith.mulf %23, %24 : vector<128x128xf32>
    %c0_12 = arith.constant 0 : index
    %c0_13 = arith.constant 0 : index
    %26 = vector.load %arg6[%c0_12, %c0_13] : memref<1x128xf32, #tpu.memory_space<vmem>>, vector<1x128xf32>
    %27 = vector.broadcast %26 : vector<1x128xf32> to vector<128x128xf32>
    %28 = arith.addf %25, %27 : vector<128x128xf32>
    %cst_14 = arith.constant 0.000000e+00 : f32
    %29 = vector.broadcast %cst_14 : f32 to vector<128x128xf32>
    %30 = arith.cmpf oge, %28, %29 : vector<128x128xf32>
    %cst_15 = arith.constant 2.000000e-01 : f32
    %31 = vector.broadcast %cst_15 : f32 to vector<128x128xf32>
    %32 = arith.mulf %31, %28 : vector<128x128xf32>
    %33 = arith.select %30, %28, %32 : vector<128x128xi1>, vector<128x128xf32>
    %34 = arith.truncf %33 : vector<128x128xf32> to vector<128x128xbf16>
    %c0_16 = arith.constant 0 : index
    %c0_17 = arith.constant 0 : index
    %35 = vector.load %arg7[%c0_16, %c0_17] : memref<128x128xbf16, #tpu.memory_space<vmem>>, vector<128x128xbf16>
    tpu.vector_store %arg7[%c0_16, %c0_17], %34 {strides = array<i32>} : memref<128x128xbf16, #tpu.memory_space<vmem>>, vector<128x128xbf16>,
    return
  }
  func.func @transform_0(%arg0: i32, %arg1: i32) -> (i32, i32) {
    %c0_i32 = arith.constant 0 : i32
    return %arg0, %arg1 : i32, i32
  }
  func.func @transform_1(%arg0: i32, %arg1: i32) -> (i32, i32) {
    %c0_i32 = arith.constant 0 : i32
    %c0_i32_0 = arith.constant 0 : i32
    return %arg1, %c0_i32 : i32, i32
  }
  func.func @transform_2(%arg0: i32, %arg1: i32) -> (i32, i32) {
    %c0_i32 = arith.constant 0 : i32
    %c0_i32_0 = arith.constant 0 : i32
    %c0_i32_1 = arith.constant 0 : i32
    return %c0_i32, %c0_i32_0 : i32, i32
  }
  func.func @transform_3(%arg0: i32, %arg1: i32) -> (i32, i32) {
    %c0_i32 = arith.constant 0 : i32
    %c0_i32_0 = arith.constant 0 : i32
    %c0_i32_1 = arith.constant 0 : i32
    return %c0_i32, %c0_i32_0 : i32, i32
  }
  func.func @transform_4(%arg0: i32, %arg1: i32) -> (i32, i32) {
    %c0_i32 = arith.constant 0 : i32
    %c0_i32_0 = arith.constant 0 : i32
    %c0_i32_1 = arith.constant 0 : i32
    return %c0_i32, %c0_i32_0 : i32, i32
  }
  func.func @transform_5(%arg0: i32, %arg1: i32) -> (i32, i32) {
    %c0_i32 = arith.constant 0 : i32
    %c0_i32_0 = arith.constant 0 : i32
    return %arg0, %c0_i32 : i32, i32
  }
}

module attributes {stable_mosaic.version = 11 : i64} {
  func.func @_conv_kernel(%arg0: i32, %arg1: i32, %arg2: memref<32x1024xbf16, #tpu.memory_space<vmem>>, %arg3: memref<1024x128xbf16, #tpu.memory_space<vmem>>, %arg4: memref<1x128xf32, #tpu.memory_space<vmem>>, %arg5: memref<1x128xf32, #tpu.memory_space<vmem>>, %arg6: memref<1x128xf32, #tpu.memory_space<vmem>>, %arg7: memref<32x128xbf16, #tpu.memory_space<vmem>>) attributes {dimension_semantics = [#tpu.dimension_semantics<parallel>, #tpu.dimension_semantics<arbitrary>], iteration_bounds = array<i64: 1, 1>, scalar_prefetch = 0 : i64, scratch_operands = 0 : i64, tpu.core_type = #tpu.core_type<tc>, window_params = [{transform_indices = @transform_0, window_bounds = array<i64: 32, 1024>}, {transform_indices = @transform_1, window_bounds = array<i64: 1024, 128>}, {pipeline_mode = #tpu.pipeline_mode<synchronous>, transform_indices = @transform_2, window_bounds = array<i64: 1, 128>}, {pipeline_mode = #tpu.pipeline_mode<synchronous>, transform_indices = @transform_3, window_bounds = array<i64: 1, 128>}, {pipeline_mode = #tpu.pipeline_mode<synchronous>, transform_indices = @transform_4, window_bounds = array<i64: 1, 128>}, {transform_indices = @transform_5, window_bounds = array<i64: 32, 128>}]} {
    %c0 = arith.constant 0 : index
    %c0_0 = arith.constant 0 : index
    %0 = vector.load %arg2[%c0, %c0_0] : memref<32x1024xbf16, #tpu.memory_space<vmem>>, vector<32x1024xbf16>
    %c0_1 = arith.constant 0 : index
    %c0_2 = arith.constant 0 : index
    %1 = vector.load %arg3[%c0_1, %c0_2] : memref<1024x128xbf16, #tpu.memory_space<vmem>>, vector<1024x128xbf16>
    %cst = arith.constant dense<0.000000e+00> : vector<32x128xf32>
    %2 = tpu.matmul %0, %1, %cst {dimension_numbers = #tpu.dot_dimension_numbers<[1], [0], [0], [1], [0, 0, 1, 1], [], []>} : vector<32x1024xbf16>, vector<1024x128xbf16>, vector<32x128xf32> -> vector<32x128xf32>
    %c0_3 = arith.constant 0 : index
    %c0_4 = arith.constant 0 : index
    %3 = vector.load %arg4[%c0_3, %c0_4] : memref<1x128xf32, #tpu.memory_space<vmem>>, vector<1x128xf32>
    %4 = vector.broadcast %3 : vector<1x128xf32> to vector<32x128xf32>
    %5 = arith.addf %2, %4 : vector<32x128xf32>
    %cst_5 = arith.constant dense<0.000000e+00> : vector<128xf32>
    %6 = vector.multi_reduction <add>, %5, %cst_5 [0] : vector<32x128xf32> to vector<128xf32>
    %7 = vector.shape_cast %6 : vector<128xf32> to vector<1x128xf32>
    %cst_6 = arith.constant 3.125000e-02 : f32
    %8 = vector.broadcast %cst_6 : f32 to vector<1x128xf32>
    %9 = arith.mulf %7, %8 : vector<1x128xf32>
    %10 = arith.mulf %5, %5 : vector<32x128xf32>
    %cst_7 = arith.constant dense<0.000000e+00> : vector<128xf32>
    %11 = vector.multi_reduction <add>, %10, %cst_7 [0] : vector<32x128xf32> to vector<128xf32>
    %12 = vector.shape_cast %11 : vector<128xf32> to vector<1x128xf32>
    %cst_8 = arith.constant 3.125000e-02 : f32
    %13 = vector.broadcast %cst_8 : f32 to vector<1x128xf32>
    %14 = arith.mulf %12, %13 : vector<1x128xf32>
    %15 = arith.mulf %9, %9 : vector<1x128xf32>
    %16 = arith.subf %14, %15 : vector<1x128xf32>
    %c0_9 = arith.constant 0 : index
    %c0_10 = arith.constant 0 : index
    %17 = vector.load %arg5[%c0_9, %c0_10] : memref<1x128xf32, #tpu.memory_space<vmem>>, vector<1x128xf32>
    %cst_11 = arith.constant 9.99999974E-6 : f32
    %18 = vector.broadcast %cst_11 : f32 to vector<1x128xf32>
    %19 = arith.addf %16, %18 : vector<1x128xf32>
    %20 = math.rsqrt %19 : vector<1x128xf32>
    %21 = arith.mulf %17, %20 : vector<1x128xf32>
    %22 = vector.broadcast %9 : vector<1x128xf32> to vector<32x128xf32>
    %23 = arith.subf %5, %22 : vector<32x128xf32>
    %24 = vector.broadcast %21 : vector<1x128xf32> to vector<32x128xf32>
    %25 = arith.mulf %23, %24 : vector<32x128xf32>
    %c0_12 = arith.constant 0 : index
    %c0_13 = arith.constant 0 : index
    %26 = vector.load %arg6[%c0_12, %c0_13] : memref<1x128xf32, #tpu.memory_space<vmem>>, vector<1x128xf32>
    %27 = vector.broadcast %26 : vector<1x128xf32> to vector<32x128xf32>
    %28 = arith.addf %25, %27 : vector<32x128xf32>
    %cst_14 = arith.constant 0.000000e+00 : f32
    %29 = vector.broadcast %cst_14 : f32 to vector<32x128xf32>
    %30 = arith.cmpf oge, %28, %29 : vector<32x128xf32>
    %cst_15 = arith.constant 2.000000e-01 : f32
    %31 = vector.broadcast %cst_15 : f32 to vector<32x128xf32>
    %32 = arith.mulf %31, %28 : vector<32x128xf32>
    %33 = arith.select %30, %28, %32 : vector<32x128xi1>, vector<32x128xf32>
    %34 = arith.truncf %33 : vector<32x128xf32> to vector<32x128xbf16>
    %c0_16 = arith.constant 0 : index
    %c0_17 = arith.constant 0 : index
    %35 = vector.load %arg7[%c0_16, %c0_17] : memref<32x128xbf16, #tpu.memory_space<vmem>>, vector<32x128xbf16>
    tpu.vector_store %arg7[%c0_16, %c0_17], %34 {strides = array<i32>} : memref<32x128xbf16, #tpu.memory_space<vmem>>, vector<32x128xbf16>,
    return
  }
  func.func @transform_0(%arg0: i32, %arg1: i32) -> (i32, i32) {
    %c0_i32 = arith.constant 0 : i32
    return %arg0, %arg1 : i32, i32
  }
  func.func @transform_1(%arg0: i32, %arg1: i32) -> (i32, i32) {
    %c0_i32 = arith.constant 0 : i32
    %c0_i32_0 = arith.constant 0 : i32
    return %arg1, %c0_i32 : i32, i32
  }
  func.func @transform_2(%arg0: i32, %arg1: i32) -> (i32, i32) {
    %c0_i32 = arith.constant 0 : i32
    %c0_i32_0 = arith.constant 0 : i32
    %c0_i32_1 = arith.constant 0 : i32
    return %c0_i32, %c0_i32_0 : i32, i32
  }
  func.func @transform_3(%arg0: i32, %arg1: i32) -> (i32, i32) {
    %c0_i32 = arith.constant 0 : i32
    %c0_i32_0 = arith.constant 0 : i32
    %c0_i32_1 = arith.constant 0 : i32
    return %c0_i32, %c0_i32_0 : i32, i32
  }
  func.func @transform_4(%arg0: i32, %arg1: i32) -> (i32, i32) {
    %c0_i32 = arith.constant 0 : i32
    %c0_i32_0 = arith.constant 0 : i32
    %c0_i32_1 = arith.constant 0 : i32
    return %c0_i32, %c0_i32_0 : i32, i32
  }
  func.func @transform_5(%arg0: i32, %arg1: i32) -> (i32, i32) {
    %c0_i32 = arith.constant 0 : i32
    %c0_i32_0 = arith.constant 0 : i32
    return %arg0, %c0_i32 : i32, i32
  }
}

module attributes {stable_mosaic.version = 11 : i64} {
  func.func @_conv_kernel(%arg0: i32, %arg1: i32, %arg2: memref<8x2048xbf16, #tpu.memory_space<vmem>>, %arg3: memref<2048x128xbf16, #tpu.memory_space<vmem>>, %arg4: memref<1x128xf32, #tpu.memory_space<vmem>>, %arg5: memref<8x128xf32, #tpu.memory_space<vmem>>) attributes {dimension_semantics = [#tpu.dimension_semantics<parallel>, #tpu.dimension_semantics<arbitrary>], iteration_bounds = array<i64: 1, 1>, scalar_prefetch = 0 : i64, scratch_operands = 0 : i64, tpu.core_type = #tpu.core_type<tc>, window_params = [{transform_indices = @transform_0, window_bounds = array<i64: 8, 2048>}, {transform_indices = @transform_1, window_bounds = array<i64: 2048, 128>}, {pipeline_mode = #tpu.pipeline_mode<synchronous>, transform_indices = @transform_2, window_bounds = array<i64: 1, 128>}, {transform_indices = @transform_3, window_bounds = array<i64: 8, 128>}]} {
    %c0 = arith.constant 0 : index
    %c0_0 = arith.constant 0 : index
    %0 = vector.load %arg2[%c0, %c0_0] : memref<8x2048xbf16, #tpu.memory_space<vmem>>, vector<8x2048xbf16>
    %c0_1 = arith.constant 0 : index
    %c0_2 = arith.constant 0 : index
    %1 = vector.load %arg3[%c0_1, %c0_2] : memref<2048x128xbf16, #tpu.memory_space<vmem>>, vector<2048x128xbf16>
    %cst = arith.constant dense<0.000000e+00> : vector<8x128xf32>
    %2 = tpu.matmul %0, %1, %cst {dimension_numbers = #tpu.dot_dimension_numbers<[1], [0], [0], [1], [0, 0, 1, 1], [], []>} : vector<8x2048xbf16>, vector<2048x128xbf16>, vector<8x128xf32> -> vector<8x128xf32>
    %c0_3 = arith.constant 0 : index
    %c0_4 = arith.constant 0 : index
    %3 = vector.load %arg4[%c0_3, %c0_4] : memref<1x128xf32, #tpu.memory_space<vmem>>, vector<1x128xf32>
    %4 = vector.broadcast %3 : vector<1x128xf32> to vector<8x128xf32>
    %5 = arith.addf %2, %4 : vector<8x128xf32>
    %6 = math.absf %5 : vector<8x128xf32>
    %cst_5 = arith.constant 0.000000e+00 : f32
    %7 = vector.broadcast %cst_5 : f32 to vector<8x128xf32>
    %8 = arith.subf %7, %6 : vector<8x128xf32>
    %9 = math.exp %8 : vector<8x128xf32>
    %cst_6 = arith.constant 0.000000e+00 : f32
    %10 = vector.broadcast %cst_6 : f32 to vector<8x128xf32>
    %11 = arith.cmpf oge, %5, %10 : vector<8x128xf32>
    %cst_7 = arith.constant 1.000000e+00 : f32
    %12 = vector.broadcast %cst_7 : f32 to vector<8x128xf32>
    %13 = arith.addf %12, %9 : vector<8x128xf32>
    %cst_8 = arith.constant 1.000000e+00 : f32
    %14 = vector.broadcast %cst_8 : f32 to vector<8x128xf32>
    %15 = arith.divf %14, %13 : vector<8x128xf32>
    %cst_9 = arith.constant 1.000000e+00 : f32
    %16 = vector.broadcast %cst_9 : f32 to vector<8x128xf32>
    %17 = arith.addf %16, %9 : vector<8x128xf32>
    %18 = arith.divf %9, %17 : vector<8x128xf32>
    %19 = arith.select %11, %15, %18 : vector<8x128xi1>, vector<8x128xf32>
    %c0_10 = arith.constant 0 : index
    %c0_11 = arith.constant 0 : index
    %20 = vector.load %arg5[%c0_10, %c0_11] : memref<8x128xf32, #tpu.memory_space<vmem>>, vector<8x128xf32>
    tpu.vector_store %arg5[%c0_10, %c0_11], %19 {strides = array<i32>} : memref<8x128xf32, #tpu.memory_space<vmem>>, vector<8x128xf32>,
    return
  }
  func.func @transform_0(%arg0: i32, %arg1: i32) -> (i32, i32) {
    %c0_i32 = arith.constant 0 : i32
    return %arg0, %arg1 : i32, i32
  }
  func.func @transform_1(%arg0: i32, %arg1: i32) -> (i32, i32) {
    %c0_i32 = arith.constant 0 : i32
    %c0_i32_0 = arith.constant 0 : i32
    return %arg1, %c0_i32 : i32, i32
  }
  func.func @transform_2(%arg0: i32, %arg1: i32) -> (i32, i32) {
    %c0_i32 = arith.constant 0 : i32
    %c0_i32_0 = arith.constant 0 : i32
    %c0_i32_1 = arith.constant 0 : i32
    return %c0_i32, %c0_i32_0 : i32, i32
  }
  func.func @transform_3(%arg0: i32, %arg1: i32) -> (i32, i32) {
    %c0_i32 = arith.constant 0 : i32
    %c0_i32_0 = arith.constant 0 : i32
    return %arg0, %c0_i32 : i32, i32
  }
}

</mosaic_0001>

<bundles_post_ra>
// kernel: discriminator_forward.5
= control target key start
LH: loop header
LB: loop body
LE: loop exit
PB: predicated region body
PF: predicated region fallthrough
CT: control target
= control target key end

     0   :  { %vm926_vm0 = vcmask 130048   ;;  %s8155_s1 = inlined_call_operand.vmem [shape: bf16[16,128], index: 1, kind: input, shape index: {}]   ;;  %s8156_s0 = inlined_call_operand.vmem [shape: bf16[2048,16], index: 0, kind: input, shape index: {}]   ;;  %s8157_s2 = inlined_call_operand.vmem [shape: f32[1,128], index: 2, kind: input, shape index: {}]   ;;  %s8158_s3 = inlined_call_operand.vmem [shape: bf16[2048,128], index: 3, kind: output, shape index: {}]  }
   0x1   :  { %v6346_v0 = vld [vmem:[%s8155_s1] sm:$0xff]   ;;  %v6349_v3 = vld [vmem:[%s8156_s0 + $0x8] sm:$0xff]   ;;  %v6351_v5 = vld [vmem:[%s8156_s0 + $0x10] sm:$0xff]  }
   0x2   :  { %v6347_v1 = vld [vmem:[%s8156_s0] sm:$0xff]   ;;  %6086 = vmatprep.subr.bf16.mxu0 %v6346_v0  ;;  %6344 = vmatprep.subr.bf16.mxu1 %v6346_v0  ;;  %v6350_v4 = vld [vmem:[%s8156_s0 + $0x208] sm:$0xff]   ;;  %v6352_v6 = vld [vmem:[%s8156_s0 + $0x210] sm:$0xff]  }
   0x3   :  { %v6348_v2 = vld [vmem:[%s8156_s0 + $0x200] sm:$0xff]   ;;  %6087 = vmatpush3.bf16.msra.mxu0 %v6346_v0  ;;  %6345 = vmatpush3.bf16.msra.mxu1 %v6346_v0  ;;  %v6353_v7 = vld [vmem:[%s8156_s0 + $0x18] sm:$0xff]   ;;  %v6357_v11 = vld [vmem:[%s8156_s0 + $0x28] sm:$0xff]  }
   0x4   :  { %6088 = vmatprep.mubr.msk.bf16.mxu0 %vm926_vm0, %v6347_v1  ;;  %6216 = vmatprep.mubr.msk.bf16.mxu1 %vm926_vm0, %v6348_v2  ;;  %v6354_v8 = vld [vmem:[%s8156_s0 + $0x218] sm:$0xff]   ;;  %v6355_v9 = vld [vmem:[%s8156_s0 + $0x20] sm:$0xff]   ;;  %v6358_v12 = vld [vmem:[%s8156_s0 + $0x228] sm:$0xff]  }
   0x5   :  { %v6356_v10 = vld [vmem:[%s8156_s0 + $0x220] sm:$0xff]   ;;  %v6359_v13 = vld [vmem:[%s8156_s0 + $0x30] sm:$0xff]   ;;  %v6361_v15 = vld [vmem:[%s8156_s0 + $0x38] sm:$0xff]  }
   0x6   :  { %6089 = vmatmul.mubr.msk.bf16.vlgmr.msra.gmra.mxu0 %vm926_vm0, %v6349_v3  ;;  %6217 = vmatmul.mubr.msk.bf16.vlgmr.msra.gmra.mxu1 %vm926_vm0, %v6350_v4  ;;  %v6360_v14 = vld [vmem:[%s8156_s0 + $0x230] sm:$0xff]   ;;  %v6362_v16 = vld [vmem:[%s8156_s0 + $0x238] sm:$0xff]   ;;  %v6363_v17 = vld [vmem:[%s8156_s0 + $0x40] sm:$0xff]  }
   0x7   :  { %6092 = vmatprep.mubr.msk.bf16.mxu0 %vm926_vm0, %v6351_v5  ;;  %6220 = vmatprep.mubr.msk.bf16.mxu1 %vm926_vm0, %v6352_v6  ;;  %v6364_v18 = vld [vmem:[%s8156_s0 + $0x240] sm:$0xff]   ;;  %v6365_v19 = vld [vmem:[%s8156_s0 + $0x48] sm:$0xff]   ;;  %v6367_v21 = vld [vmem:[%s8156_s0 + $0x50] sm:$0xff]  }
   0x8   :  { %v6366_v20 = vld [vmem:[%s8156_s0 + $0x248] sm:$0xff]   ;;  %v6368_v22 = vld [vmem:[%s8156_s0 + $0x250] sm:$0xff]   ;;  %v6369_v23 = vld [vmem:[%s8156_s0 + $0x58] sm:$0xff]  }
   0x9   :  { %v6370_v24 = vld [vmem:[%s8156_s0 + $0x258] sm:$0xff]   ;;  %v6371_v25 = vld [vmem:[%s8156_s0 + $0x60] sm:$0xff]   ;;  %v6373_v27 = vld [vmem:[%s8156_s0 + $0x68] sm:$0xff]  }
   0xa   :  { %v6372_v26 = vld [vmem:[%s8156_s0 + $0x260] sm:$0xff]   ;;  %v6374_v28 = vld [vmem:[%s8156_s0 + $0x268] sm:$0xff]   ;;  %v6375_v29 = vld [vmem:[%s8156_s0 + $0x70] sm:$0xff]  }
   0xb   :  { %v6376_v30 = vld [vmem:[%s8156_s0 + $0x270] sm:$0xff]   ;;  %v6377_v31 = vld [vmem:[%s8156_s0 + $0x78] sm:$0xff]   ;;  %v6379_v33 = vld [vmem:[%s8156_s0 + $0x80] sm:$0xff]  }
   0xc   :  { %v6378_v32 = vld [vmem:[%s8156_s0 + $0x278] sm:$0xff]   ;;  %v6380_v34 = vld [vmem:[%s8156_s0 + $0x280] sm:$0xff]   ;;  %v6381_v35 = vld [vmem:[%s8156_s0 + $0x88] sm:$0xff]  }
   0xd   :  { %v6382_v36 = vld [vmem:[%s8156_s0 + $0x288] sm:$0xff]   ;;  %v6383_v37 = vld [vmem:[%s8156_s0 + $0x90] sm:$0xff]   ;;  %v6385_v39 = vld [vmem:[%s8156_s0 + $0x98] sm:$0xff]  }
   0xe   :  { %6093 = vmatmul.mubr.msk.bf16.gmra.mxu0 %vm926_vm0, %v6353_v7  ;;  %6221 = vmatmul.mubr.msk.bf16.gmra.mxu1 %vm926_vm0, %v6354_v8  ;;  %v6384_v38 = vld [vmem:[%s8156_s0 + $0x290] sm:$0xff]   ;;  %v6386_v40 = vld [vmem:[%s8156_s0 + $0x298] sm:$0xff]   ;;  %v6387_v41 = vld [vmem:[%s8156_s0 + $0xa0] sm:$0xff]  }
   0xf   :  { %6096 = vmatprep.mubr.msk.bf16.mxu0 %vm926_vm0, %v6355_v9  ;;  %6224 = vmatprep.mubr.msk.bf16.mxu1 %vm926_vm0, %v6356_v10  ;;  %v6388_v42 = vld [vmem:[%s8156_s0 + $0x2a0] sm:$0xff]   ;;  %v6389_v43 = vld [vmem:[%s8156_s0 + $0xa8] sm:$0xff]   ;;  %v6391_v45 = vld [vmem:[%s8156_s0 + $0xb0] sm:$0xff]  }
  0x10   :  { %v6390_v44 = vld [vmem:[%s8156_s0 + $0x2a8] sm:$0xff]   ;;  %v6392_v46 = vld [vmem:[%s8156_s0 + $0x2b0] sm:$0xff]   ;;  %v6393_v47 = vld [vmem:[%s8156_s0 + $0xb8] sm:$0xff]  }
  0x11   :  { %v6394_v48 = vld [vmem:[%s8156_s0 + $0x2b8] sm:$0xff]   ;;  %v6395_v49 = vld [vmem:[%s8156_s0 + $0xc0] sm:$0xff]   ;;  %v6397_v51 = vld [vmem:[%s8156_s0 + $0xc8] sm:$0xff]  }
  0x12   :  { %v6396_v50 = vld [vmem:[%s8156_s0 + $0x2c0] sm:$0xff]   ;;  %v6398_v52 = vld [vmem:[%s8156_s0 + $0x2c8] sm:$0xff]   ;;  %v6399_v53 = vld [vmem:[%s8156_s0 + $0xd0] sm:$0xff]  }
  0x13   :  { %v6400_v54 = vld [vmem:[%s8156_s0 + $0x2d0] sm:$0xff]   ;;  %v6401_v55 = vld [vmem:[%s8156_s0 + $0xd8] sm:$0xff]   ;;  %v6403_v57 = vld [vmem:[%s8156_s0 + $0xe0] sm:$0xff]  }
  0x14   :  { %v6402_v56 = vld [vmem:[%s8156_s0 + $0x2d8] sm:$0xff]   ;;  %v6404_v58 = vld [vmem:[%s8156_s0 + $0x2e0] sm:$0xff]   ;;  %v6405_v59 = vld [vmem:[%s8156_s0 + $0xe8] sm:$0xff]  }
  0x15   :  { %v6406_v60 = vld [vmem:[%s8156_s0 + $0x2e8] sm:$0xff]   ;;  %v6407_v61 = vld [vmem:[%s8156_s0 + $0xf0] sm:$0xff]   ;;  %v6409_v63 = vld [vmem:[%s8156_s0 + $0xf8] sm:$0xff]  }
  0x16   :  { %6097 = vmatmul.mubr.msk.bf16.gmra.mxu0 %vm926_vm0, %v6357_v11  ;;  %6225 = vmatmul.mubr.msk.bf16.gmra.mxu1 %vm926_vm0, %v6358_v12  ;;  %v6408_v62 = vld [vmem:[%s8156_s0 + $0x2f0] sm:$0xff]   ;;  %v6410_v0 = vld [vmem:[%s8156_s0 + $0x2f8] sm:$0xff]   ;;  %v6411_v1 = vld [vmem:[%s8156_s0 + $0x100] sm:$0xff]  }
  0x17   :  { %6100 = vmatprep.mubr.msk.bf16.mxu0 %vm926_vm0, %v6359_v13  ;;  %6228 = vmatprep.mubr.msk.bf16.mxu1 %vm926_vm0, %v6360_v14  ;;  %v6412_v2 = vld [vmem:[%s8156_s0 + $0x300] sm:$0xff]   ;;  %v6413_v3 = vld [vmem:[%s8156_s0 + $0x108] sm:$0xff]   ;;  %v6415_v5 = vld [vmem:[%s8156_s0 + $0x110] sm:$0xff]  }
  0x18   :  { %v6414_v4 = vld [vmem:[%s8156_s0 + $0x308] sm:$0xff]   ;;  %v6416_v6 = vld [vmem:[%s8156_s0 + $0x310] sm:$0xff]   ;;  %v6417_v7 = vld [vmem:[%s8156_s0 + $0x118] sm:$0xff]  }
  0x19   :  { %v6418_v8 = vld [vmem:[%s8156_s0 + $0x318] sm:$0xff]   ;;  %v6419_v9 = vld [vmem:[%s8156_s0 + $0x120] sm:$0xff]   ;;  %v6421_v11 = vld [vmem:[%s8156_s0 + $0x128] sm:$0xff]  }
  0x1a   :  { %v6420_v10 = vld [vmem:[%s8156_s0 + $0x320] sm:$0xff]   ;;  %v6422_v12 = vld [vmem:[%s8156_s0 + $0x328] sm:$0xff]   ;;  %v6423_v13 = vld [vmem:[%s8156_s0 + $0x130] sm:$0xff]  }
  0x1b   :  { %v6424_v14 = vld [vmem:[%s8156_s0 + $0x330] sm:$0xff]  }
  0x1e   :  { %6101 = vmatmul.mubr.msk.bf16.gmra.mxu0 %vm926_vm0, %v6361_v15  ;;  %6229 = vmatmul.mubr.msk.bf16.gmra.mxu1 %vm926_vm0, %v6362_v16  ;;  %v6425_v15 = vld [vmem:[%s8156_s0 + $0x138] sm:$0xff]  }
  0x1f   :  { %6104 = vmatprep.mubr.msk.bf16.mxu0 %vm926_vm0, %v6363_v17  ;;  %6232 = vmatprep.mubr.msk.bf16.mxu1 %vm926_vm0, %v6364_v18  ;;  %v6426_v16 = vld [vmem:[%s8156_s0 + $0x338] sm:$0xff]   ;;  %v6427_v17 = vld [vmem:[%s8156_s0 + $0x140] sm:$0xff]  }
  0x20   :  { %v6428_v18 = vld [vmem:[%s8156_s0 + $0x340] sm:$0xff]  }
  0x26   :  { %6105 = vmatmul.mubr.msk.bf16.gmra.mxu0 %vm926_vm0, %v6365_v19  ;;  %6233 = vmatmul.mubr.msk.bf16.gmra.mxu1 %vm926_vm0, %v6366_v20  ;;  %v6429_v19 = vld [vmem:[%s8156_s0 + $0x148] sm:$0xff]  }
  0x27   :  { %6108 = vmatprep.mubr.msk.bf16.mxu0 %vm926_vm0, %v6367_v21  ;;  %6236 = vmatprep.mubr.msk.bf16.mxu1 %vm926_vm0, %v6368_v22  ;;  %v6430_v20 = vld [vmem:[%s8156_s0 + $0x348] sm:$0xff]   ;;  %v6431_v21 = vld [vmem:[%s8156_s0 + $0x150] sm:$0xff]  }
  0x28   :  { %v6432_v22 = vld [vmem:[%s8156_s0 + $0x350] sm:$0xff]  }
  0x2e   :  { %6109 = vmatmul.mubr.msk.bf16.gmra.mxu0 %vm926_vm0, %v6369_v23  ;;  %6237 = vmatmul.mubr.msk.bf16.gmra.mxu1 %vm926_vm0, %v6370_v24  ;;  %v6433_v23 = vld [vmem:[%s8156_s0 + $0x158] sm:$0xff]  }
  0x2f   :  { %6112 = vmatprep.mubr.msk.bf16.mxu0 %vm926_vm0, %v6371_v25  ;;  %6240 = vmatprep.mubr.msk.bf16.mxu1 %vm926_vm0, %v6372_v26  ;;  %v6434_v24 = vld [vmem:[%s8156_s0 + $0x358] sm:$0xff]   ;;  %v6435_v25 = vld [vmem:[%s8156_s0 + $0x160] sm:$0xff]  }
  0x30   :  { %v6436_v26 = vld [vmem:[%s8156_s0 + $0x360] sm:$0xff]  }
  0x36   :  { %6113 = vmatmul.mubr.msk.bf16.gmra.mxu0 %vm926_vm0, %v6373_v27  ;;  %6241 = vmatmul.mubr.msk.bf16.gmra.mxu1 %vm926_vm0, %v6374_v28  ;;  %v6437_v27 = vld [vmem:[%s8156_s0 + $0x168] sm:$0xff]  }
  0x37   :  { %6116 = vmatprep.mubr.msk.bf16.mxu0 %vm926_vm0, %v6375_v29  ;;  %6244 = vmatprep.mubr.msk.bf16.mxu1 %vm926_vm0, %v6376_v30  ;;  %v6438_v28 = vld [vmem:[%s8156_s0 + $0x368] sm:$0xff]   ;;  %v6439_v29 = vld [vmem:[%s8156_s0 + $0x170] sm:$0xff]  }
  0x38   :  { %v6440_v30 = vld [vmem:[%s8156_s0 + $0x370] sm:$0xff]  }
  0x3e   :  { %6117 = vmatmul.mubr.msk.bf16.gmra.mxu0 %vm926_vm0, %v6377_v31  ;;  %6245 = vmatmul.mubr.msk.bf16.gmra.mxu1 %vm926_vm0, %v6378_v32  ;;  %v6441_v31 = vld [vmem:[%s8156_s0 + $0x178] sm:$0xff]  }
  0x3f   :  { %6120 = vmatprep.mubr.msk.bf16.mxu0 %vm926_vm0, %v6379_v33  ;;  %6248 = vmatprep.mubr.msk.bf16.mxu1 %vm926_vm0, %v6380_v34  ;;  %v6442_v32 = vld [vmem:[%s8156_s0 + $0x378] sm:$0xff]   ;;  %v6443_v33 = vld [vmem:[%s8156_s0 + $0x180] sm:$0xff]  }
  0x40   :  { %v6444_v34 = vld [vmem:[%s8156_s0 + $0x380] sm:$0xff]  }
  0x46   :  { %6121 = vmatmul.mubr.msk.bf16.gmra.mxu0 %vm926_vm0, %v6381_v35  ;;  %6249 = vmatmul.mubr.msk.bf16.gmra.mxu1 %vm926_vm0, %v6382_v36  ;;  %v6445_v35 = vld [vmem:[%s8156_s0 + $0x188] sm:$0xff]  }
  0x47   :  { %6124 = vmatprep.mubr.msk.bf16.mxu0 %vm926_vm0, %v6383_v37  ;;  %6252 = vmatprep.mubr.msk.bf16.mxu1 %vm926_vm0, %v6384_v38  ;;  %v6446_v36 = vld [vmem:[%s8156_s0 + $0x388] sm:$0xff]   ;;  %v6447_v37 = vld [vmem:[%s8156_s0 + $0x190] sm:$0xff]  }
  0x48   :  { %v6448_v38 = vld [vmem:[%s8156_s0 + $0x390] sm:$0xff]  }
  0x4e   :  { %6125 = vmatmul.mubr.msk.bf16.gmra.mxu0 %vm926_vm0, %v6385_v39  ;;  %6253 = vmatmul.mubr.msk.bf16.gmra.mxu1 %vm926_vm0, %v6386_v40  ;;  %v6908_v39 = vld [vmem:[%s8157_s2] ss:$0 sm:$0xff] }
  0x4f   :  { %6128 = vmatprep.mubr.msk.bf16.mxu0 %vm926_vm0, %v6387_v41  ;;  %6256 = vmatprep.mubr.msk.bf16.mxu1 %vm926_vm0, %v6388_v42 }
  0x56   :  { %6129 = vmatmul.mubr.msk.bf16.gmra.mxu0 %vm926_vm0, %v6389_v43  ;;  %6257 = vmatmul.mubr.msk.bf16.gmra.mxu1 %vm926_vm0, %v6390_v44 }
  0x57   :  { %6132 = vmatprep.mubr.msk.bf16.mxu0 %vm926_vm0, %v6391_v45  ;;  %6260 = vmatprep.mubr.msk.bf16.mxu1 %vm926_vm0, %v6392_v46 }
  0x5e   :  { %6133 = vmatmul.mubr.msk.bf16.gmra.mxu0 %vm926_vm0, %v6393_v47  ;;  %6261 = vmatmul.mubr.msk.bf16.gmra.mxu1 %vm926_vm0, %v6394_v48 }
  0x5f   :  { %6136 = vmatprep.mubr.msk.bf16.mxu0 %vm926_vm0, %v6395_v49  ;;  %6264 = vmatprep.mubr.msk.bf16.mxu1 %vm926_vm0, %v6396_v50 }
  0x66   :  { %6137 = vmatmul.mubr.msk.bf16.gmra.mxu0 %vm926_vm0, %v6397_v51  ;;  %6265 = vmatmul.mubr.msk.bf16.gmra.mxu1 %vm926_vm0, %v6398_v52  ;;  %v6449_v52 = vld [vmem:[%s8156_s0 + $0x198] sm:$0xff]  }
  0x67   :  { %6140 = vmatprep.mubr.msk.bf16.mxu0 %vm926_vm0, %v6399_v53  ;;  %6268 = vmatprep.mubr.msk.bf16.mxu1 %vm926_vm0, %v6400_v54 }
  0x6e   :  { %6141 = vmatmul.mubr.msk.bf16.gmra.mxu0 %vm926_vm0, %v6401_v55  ;;  %6269 = vmatmul.mubr.msk.bf16.gmra.mxu1 %vm926_vm0, %v6402_v56  ;;  %v6450_v56 = vld [vmem:[%s8156_s0 + $0x398] sm:$0xff]  }
  0x6f   :  { %6144 = vmatprep.mubr.msk.bf16.mxu0 %vm926_vm0, %v6403_v57  ;;  %6272 = vmatprep.mubr.msk.bf16.mxu1 %vm926_vm0, %v6404_v58 }
  0x76   :  { %6145 = vmatmul.mubr.msk.bf16.gmra.mxu0 %vm926_vm0, %v6405_v59  ;;  %6273 = vmatmul.mubr.msk.bf16.gmra.mxu1 %vm926_vm0, %v6406_v60 }
  0x77   :  { %6148 = vmatprep.mubr.msk.bf16.mxu0 %vm926_vm0, %v6407_v61  ;;  %6276 = vmatprep.mubr.msk.bf16.mxu1 %vm926_vm0, %v6408_v62  ;;  %v6451_v61 = vld [vmem:[%s8156_s0 + $0x1a0] sm:$0xff]  }
  0x78   :  { %v6452_v62 = vld [vmem:[%s8156_s0 + $0x3a0] sm:$0xff]  }
  0x7e   :  { %6149 = vmatmul.mubr.msk.bf16.gmra.mxu0 %vm926_vm0, %v6409_v63  ;;  %6277 = vmatmul.mubr.msk.bf16.gmra.mxu1 %vm926_vm0, %v6410_v0 }
  0x7f   :  { %6152 = vmatprep.mubr.msk.bf16.mxu0 %vm926_vm0, %v6411_v1  ;;  %6280 = vmatprep.mubr.msk.bf16.mxu1 %vm926_vm0, %v6412_v2 }
  0x86   :  { %6153 = vmatmul.mubr.msk.bf16.gmra.mxu0 %vm926_vm0, %v6413_v3  ;;  %6281 = vmatmul.mubr.msk.bf16.gmra.mxu1 %vm926_vm0, %v6414_v4 }
  0x87   :  { %6156 = vmatprep.mubr.msk.bf16.mxu0 %vm926_vm0, %v6415_v5  ;;  %6284 = vmatprep.mubr.msk.bf16.mxu1 %vm926_vm0, %v6416_v6 }
  0x8e   :  { %6157 = vmatmul.mubr.msk.bf16.gmra.mxu0 %vm926_vm0, %v6417_v7  ;;  %6285 = vmatmul.mubr.msk.bf16.gmra.mxu1 %vm926_vm0, %v6418_v8 }
  0x8f   :  { %6160 = vmatprep.mubr.msk.bf16.mxu0 %vm926_vm0, %v6419_v9  ;;  %6288 = vmatprep.mubr.msk.bf16.mxu1 %vm926_vm0, %v6420_v10 }
  0x96   :  { %6161 = vmatmul.mubr.msk.bf16.gmra.mxu0 %vm926_vm0, %v6421_v11  ;;  %6289 = vmatmul.mubr.msk.bf16.gmra.mxu1 %vm926_vm0, %v6422_v12 }
  0x97   :  { %6164 = vmatprep.mubr.msk.bf16.mxu0 %vm926_vm0, %v6423_v13  ;;  %6292 = vmatprep.mubr.msk.bf16.mxu1 %vm926_vm0, %v6424_v14 }
  0x9e   :  { %6165 = vmatmul.mubr.msk.bf16.gmra.mxu0 %vm926_vm0, %v6425_v15  ;;  %6293 = vmatmul.mubr.msk.bf16.gmra.mxu1 %vm926_vm0, %v6426_v16 }
  0x9f   :  { %6168 = vmatprep.mubr.msk.bf16.mxu0 %vm926_vm0, %v6427_v17  ;;  %6296 = vmatprep.mubr.msk.bf16.mxu1 %vm926_vm0, %v6428_v18 }
  0xa6   :  { %6169 = vmatmul.mubr.msk.bf16.gmra.mxu0 %vm926_vm0, %v6429_v19  ;;  %6297 = vmatmul.mubr.msk.bf16.gmra.mxu1 %vm926_vm0, %v6430_v20 }
  0xa7   :  { %6172 = vmatprep.mubr.msk.bf16.mxu0 %vm926_vm0, %v6431_v21  ;;  %6300 = vmatprep.mubr.msk.bf16.mxu1 %vm926_vm0, %v6432_v22 }
  0xae   :  { %6173 = vmatmul.mubr.msk.bf16.gmra.mxu0 %vm926_vm0, %v6433_v23  ;;  %6301 = vmatmul.mubr.msk.bf16.gmra.mxu1 %vm926_vm0, %v6434_v24  ;;  %v6453_v24 = vld [vmem:[%s8156_s0 + $0x1a8] sm:$0xff]  }
  0xaf   :  { %6176 = vmatprep.mubr.msk.bf16.mxu0 %vm926_vm0, %v6435_v25  ;;  %6304 = vmatprep.mubr.msk.bf16.mxu1 %vm926_vm0, %v6436_v26 }
  0xb6   :  { %6177 = vmatmul.mubr.msk.bf16.gmra.mxu0 %vm926_vm0, %v6437_v27  ;;  %6305 = vmatmul.mubr.msk.bf16.gmra.mxu1 %vm926_vm0, %v6438_v28  ;;  %v6454_v28 = vld [vmem:[%s8156_s0 + $0x3a8] sm:$0xff]  }
  0xb7   :  { %6180 = vmatprep.mubr.msk.bf16.mxu0 %vm926_vm0, %v6439_v29  ;;  %6308 = vmatprep.mubr.msk.bf16.mxu1 %vm926_vm0, %v6440_v30  ;;  %v6455_v29 = vld [vmem:[%s8156_s0 + $0x1b0] sm:$0xff]  }
  0xbe   :  { %6181 = vmatmul.mubr.msk.bf16.gmra.mxu0 %vm926_vm0, %v6441_v31  ;;  %6309 = vmatmul.mubr.msk.bf16.gmra.mxu1 %vm926_vm0, %v6442_v32 }
  0xbf   :  { %6184 = vmatprep.mubr.msk.bf16.mxu0 %vm926_vm0, %v6443_v33  ;;  %6312 = vmatprep.mubr.msk.bf16.mxu1 %vm926_vm0, %v6444_v34 }
  0xc6   :  { %v6090_v40 = vpop.f32.mrf.mxu0  ;;  %6185 = vmatmul.mubr.msk.bf16.gmra.mxu0 %vm926_vm0, %v6445_v35  ;;  %v6218_v41 = vpop.f32.mrf.mxu1  ;;  %6313 = vmatmul.mubr.msk.bf16.gmra.mxu1 %vm926_vm0, %v6446_v36  ;;  %v6456_v35 = vld [vmem:[%s8156_s0 + $0x3b0] sm:$0xff]  }
  0xc7   :  { %v1354_v42 = vadd.f32 %v6090_v40, %v6908_v39  ;;  %v1866_v43 = vadd.f32 %v6218_v41, %v6908_v39  ;;  %6188 = vmatprep.mubr.msk.bf16.mxu0 %vm926_vm0, %v6447_v37  ;;  %6316 = vmatprep.mubr.msk.bf16.mxu1 %vm926_vm0, %v6448_v38 }
  0xc8   :  { %v1345_v44 = vpop.f32.mrf.mxu0  ;;  %v1857_v45 = vpop.f32.mrf.mxu1 }
  0xc9   :  { %vm2370_vm1 = vcmp.ge.f32.partialorder %v1354_v42, 0.0  ;;  %v2626_v46 = vmul.f32 0.2, %v1354_v42  ;;  %vm2498_vm2 = vcmp.ge.f32.partialorder %v1866_v43, 0.0  ;;  %v2754_v47 = vmul.f32 0.2, %v1866_v43 }
  0xca   :  { %v1346_v48 = vadd.f32 %v6908_v39, %v1345_v44  ;;  %v1858_v49 = vadd.f32 %v6908_v39, %v1857_v45  ;;  %v6091_v50 = vpop.f32.mrf.mxu0  ;;  %v6219_v51 = vpop.f32.mrf.mxu1 }
  0xcb   :  { %v2882_v53 = vsel %vm2370_vm1, %v1354_v42, %v2626_v46  ;;  %v1357_v54 = vadd.f32 %v6091_v50, %v6908_v39  ;;  %v1869_v55 = vadd.f32 %v6219_v51, %v6908_v39  ;;  %v3010_v57 = vsel %vm2498_vm2, %v1866_v43, %v2754_v47 }
  0xcc   :  { %vm2368_vm3 = vcmp.ge.f32.partialorder %v1346_v48, 0.0  ;;  %v2624_v58 = vmul.f32 0.2, %v1346_v48  ;;  %vm2496_vm4 = vcmp.ge.f32.partialorder %v1858_v49, 0.0  ;;  %v1348_v59 = vpop.f32.mrf.mxu0  ;;  %v1860_v60 = vpop.f32.mrf.mxu1  ;;  %v2752_v2 = vmul.f32 0.2, %v1858_v49 }
  0xcd   :  { %vm2371_vm5 = vcmp.ge.f32.partialorder %v1357_v54, 0.0  ;;  %v2627_v63 = vmul.f32 0.2, %v1357_v54  ;;  %vm2499_vm6 = vcmp.ge.f32.partialorder %v1869_v55, 0.0  ;;  %v2755_v0 = vmul.f32 0.2, %v1869_v55 }
  0xce   :  { %v2880_v1 = vsel %vm2368_vm3, %v1346_v48, %v2624_v58  ;;  %v1349_v3 = vadd.f32 %v6908_v39, %v1348_v59  ;;  %v1861_v4 = vadd.f32 %v6908_v39, %v1860_v60  ;;  %v6094_v5 = vpop.f32.mrf.mxu0  ;;  %6189 = vmatmul.mubr.msk.bf16.gmra.mxu0 %vm926_vm0, %v6449_v52  ;;  %v6222_v6 = vpop.f32.mrf.mxu1  ;;  %6317 = vmatmul.mubr.msk.bf16.gmra.mxu1 %vm926_vm0, %v6450_v56 }
  0xcf   :  { %v2883_v7 = vsel %vm2371_vm5, %v1357_v54, %v2627_v63  ;;  %v3011_v8 = vsel %vm2499_vm6, %v1869_v55, %v2755_v0  ;;  %v1370_v9 = vadd.f32 %v6094_v5, %v6908_v39  ;;  %v1882_v10 = vadd.f32 %v6222_v6, %v6908_v39  ;;  %6192 = vmatprep.mubr.msk.bf16.mxu0 %vm926_vm0, %v6451_v61 }
  0xd0   :  { %v5198_v11 = vpack.c.bf16 %v2883_v7, %v2882_v53  ;;  %v5518_v12 = vpack.c.bf16 %v3011_v8, %v3010_v57  ;;  %vm2369_vm7 = vcmp.ge.f32.partialorder %v1349_v3, 0.0  ;;  %v2625_v13 = vmul.f32 0.2, %v1349_v3  ;;  %v1361_v14 = vpop.f32.mrf.mxu0  ;;  %v1873_v15 = vpop.f32.mrf.mxu1  ;;  %6320 = vmatprep.mubr.msk.bf16.mxu1 %vm926_vm0, %v6452_v62  ;;  %v6457_v62 = vld [vmem:[%s8156_s0 + $0x1b8] sm:$0xff]  }
  0xd1   :  { %vm2497_vm8 = vcmp.ge.f32.partialorder %v1861_v4, 0.0  ;;  %v2753_v16 = vmul.f32 0.2, %v1861_v4  ;;  %vm2374_vm9 = vcmp.ge.f32.partialorder %v1370_v9, 0.0  ;;  %v2630_v17 = vmul.f32 0.2, %v1370_v9 }
  0xd2   :  { %v3008_v18 = vsel %vm2496_vm4, %v1858_v49, %v2752_v2  ;;  %5830 = vst [vmem:[%s8158_s3 + $0x8] sm:$0xff] %v5198_v11   ;;  %5894 = vst [vmem:[%s8158_s3 + $0x208] sm:$0xff] %v5518_v12   ;;  %v2881_v19 = vsel %vm2369_vm7, %v1349_v3, %v2625_v13  ;;  %v2758_v20 = vmul.f32 0.2, %v1882_v10  ;;  %v1362_v21 = vadd.f32 %v6908_v39, %v1361_v14  ;;  %v6095_v22 = vpop.f32.mrf.mxu0  ;;  %v6223_v23 = vpop.f32.mrf.mxu1  ;;  %v6458_v2 = vld [vmem:[%s8156_s0 + $0x3b8] sm:$0xff]   ;;  %v6459_v3 = vld [vmem:[%s8156_s0 + $0x1c0] sm:$0xff]  }
  0xd3   :  { %v5193_v25 = vpack.c.bf16 %v2881_v19, %v2880_v1  ;;  %v3009_v26 = vsel %vm2497_vm8, %v1861_v4, %v2753_v16  ;;  %vm2502_vm10 = vcmp.ge.f32.partialorder %v1882_v10, 0.0  ;;  %v1874_v27 = vadd.f32 %v6908_v39, %v1873_v15 }
  0xd4   :  { %v5513_v30 = vpack.c.bf16 %v3009_v26, %v3008_v18  ;;  %v2886_v31 = vsel %vm2374_vm9, %v1370_v9, %v2630_v17  ;;  %vm2372_vm11 = vcmp.ge.f32.partialorder %v1362_v21, 0.0  ;;  %v2628_v32 = vmul.f32 0.2, %v1362_v21  ;;  %v1364_v33 = vpop.f32.mrf.mxu0  ;;  %v1876_v34 = vpop.f32.mrf.mxu1  ;;  %v6460_v9 = vld [vmem:[%s8156_s0 + $0x3c0] sm:$0xff]  }
  0xd5   :  { %5194 = vst [vmem:[%s8158_s3] sm:$0xff] %v5193_v25   ;;  %vm2500_vm12 = vcmp.ge.f32.partialorder %v1874_v27, 0.0  ;;  %v2756_v36 = vmul.f32 0.2, %v1874_v27  ;;  %v1373_v37 = vadd.f32 %v6095_v22, %v6908_v39  ;;  %v1885_v38 = vadd.f32 %v6223_v23, %v6908_v39 }
  0xd6   :  { %5893 = vst [vmem:[%s8158_s3 + $0x200] sm:$0xff] %v5513_v30   ;;  %v3014_v40 = vsel %vm2502_vm10, %v1882_v10, %v2758_v20  ;;  %v2884_v41 = vsel %vm2372_vm11, %v1362_v21, %v2628_v32  ;;  %v1365_v42 = vadd.f32 %v6908_v39, %v1364_v33  ;;  %v1877_v43 = vadd.f32 %v6908_v39, %v1876_v34  ;;  %v6098_v44 = vpop.f32.mrf.mxu0  ;;  %v6226_v45 = vpop.f32.mrf.mxu1 }
  0xd7   :  { %6193 = vmatmul.mubr.msk.bf16.gmra.mxu0 %vm926_vm0, %v6453_v24  ;;  %v3012_v46 = vsel %vm2500_vm12, %v1874_v27, %v2756_v36  ;;  %vm2375_vm13 = vcmp.ge.f32.partialorder %v1373_v37, 0.0  ;;  %v2631_v47 = vmul.f32 0.2, %v1373_v37  ;;  %vm2503_vm14 = vcmp.ge.f32.partialorder %v1885_v38, 0.0  ;;  %6321 = vmatmul.mubr.msk.bf16.gmra.mxu1 %vm926_vm0, %v6454_v28 }
  0xd8   :  { %6196 = vmatprep.mubr.msk.bf16.mxu0 %vm926_vm0, %v6455_v29  ;;  %v2759_v48 = vmul.f32 0.2, %v1885_v38  ;;  %vm2373_vm15 = vcmp.ge.f32.partialorder %v1365_v42, 0.0  ;;  %v2629_v49 = vmul.f32 0.2, %v1365_v42  ;;  %vm2501_vm1 = vcmp.ge.f32.partialorder %v1877_v43, 0.0  ;;  %v1377_v50 = vpop.f32.mrf.mxu0  ;;  %v1889_v51 = vpop.f32.mrf.mxu1  ;;  %6324 = vmatprep.mubr.msk.bf16.mxu1 %vm926_vm0, %v6456_v35 }
  0xd9   :  { %v2887_v52 = vsel %vm2375_vm13, %v1373_v37, %v2631_v47  ;;  %v2757_v53 = vmul.f32 0.2, %v1877_v43  ;;  %v1386_v54 = vadd.f32 %v6098_v44, %v6908_v39  ;;  %v1898_v55 = vadd.f32 %v6226_v45, %v6908_v39  ;;  %v6461_v35 = vld [vmem:[%s8156_s0 + $0x1c8] sm:$0xff]   ;;  %v6464_v47 = vld [vmem:[%s8156_s0 + $0x3d0] sm:$0xff]  }
  0xda   :  { %v5208_v56 = vpack.c.bf16 %v2887_v52, %v2886_v31  ;;  %v3015_v57 = vsel %vm2503_vm14, %v1885_v38, %v2759_v48  ;;  %v2885_v58 = vsel %vm2373_vm15, %v1365_v42, %v2629_v49  ;;  %v1378_v59 = vadd.f32 %v6908_v39, %v1377_v50  ;;  %v6099_v60 = vpop.f32.mrf.mxu0  ;;  %v6227_v61 = vpop.f32.mrf.mxu1 }
  0xdb   :  { %v5528_v63 = vpack.c.bf16 %v3015_v57, %v3014_v40  ;;  %v5203_v0 = vpack.c.bf16 %v2885_v58, %v2884_v41  ;;  %v3013_v1 = vsel %vm2501_vm1, %v1877_v43, %v2757_v53  ;;  %vm2378_vm2 = vcmp.ge.f32.partialorder %v1386_v54, 0.0  ;;  %v6462_v40 = vld [vmem:[%s8156_s0 + $0x3c8] sm:$0xff]   ;;  %v6463_v41 = vld [vmem:[%s8156_s0 + $0x1d0] sm:$0xff]  }
  0xdc   :  { %5832 = vst [vmem:[%s8158_s3 + $0x18] sm:$0xff] %v5208_v56   ;;  %v5523_v4 = vpack.c.bf16 %v3013_v1, %v3012_v46  ;;  %v2634_v5 = vmul.f32 0.2, %v1386_v54  ;;  %vm2506_vm3 = vcmp.ge.f32.partialorder %v1898_v55, 0.0  ;;  %v2762_v6 = vmul.f32 0.2, %v1898_v55  ;;  %v1380_v7 = vpop.f32.mrf.mxu0  ;;  %v1892_v8 = vpop.f32.mrf.mxu1 }
  0xdd   :  { %5896 = vst [vmem:[%s8158_s3 + $0x218] sm:$0xff] %v5528_v63   ;;  %5831 = vst [vmem:[%s8158_s3 + $0x10] sm:$0xff] %v5203_v0   ;;  %vm2376_vm4 = vcmp.ge.f32.partialorder %v1378_v59, 0.0  ;;  %v2632_v10 = vmul.f32 0.2, %v1378_v59  ;;  %v1890_v11 = vadd.f32 %v6908_v39, %v1889_v51  ;;  %v1389_v12 = vadd.f32 %v6099_v60, %v6908_v39 }
  0xde   :  { %5895 = vst [vmem:[%s8158_s3 + $0x210] sm:$0xff] %v5523_v4   ;;  %v2890_v13 = vsel %vm2378_vm2, %v1386_v54, %v2634_v5  ;;  %v3018_v14 = vsel %vm2506_vm3, %v1898_v55, %v2762_v6  ;;  %v1901_v15 = vadd.f32 %v6227_v61, %v6908_v39  ;;  %v1381_v16 = vadd.f32 %v6908_v39, %v1380_v7  ;;  %v6102_v17 = vpop.f32.mrf.mxu0  ;;  %v6230_v18 = vpop.f32.mrf.mxu1 }
  0xdf   :  { %6197 = vmatmul.mubr.msk.bf16.gmra.mxu0 %vm926_vm0, %v6457_v62  ;;  %v2888_v19 = vsel %vm2376_vm4, %v1378_v59, %v2632_v10  ;;  %vm2504_vm5 = vcmp.ge.f32.partialorder %v1890_v11, 0.0  ;;  %v2760_v20 = vmul.f32 0.2, %v1890_v11  ;;  %vm2379_vm6 = vcmp.ge.f32.partialorder %v1389_v12, 0.0  ;;  %6325 = vmatmul.mubr.msk.bf16.gmra.mxu1 %vm926_vm0, %v6458_v2 }
  0xe0   :  { %6200 = vmatprep.mubr.msk.bf16.mxu0 %vm926_vm0, %v6459_v3  ;;  %v2635_v21 = vmul.f32 0.2, %v1389_v12  ;;  %vm2507_vm7 = vcmp.ge.f32.partialorder %v1901_v15, 0.0  ;;  %v2763_v22 = vmul.f32 0.2, %v1901_v15  ;;  %vm2377_vm8 = vcmp.ge.f32.partialorder %v1381_v16, 0.0  ;;  %v1393_v23 = vpop.f32.mrf.mxu0  ;;  %v1905_v24 = vpop.f32.mrf.mxu1  ;;  %6328 = vmatprep.mubr.msk.bf16.mxu1 %vm926_vm0, %v6460_v9 }
  0xe1   :  { %v3016_v25 = vsel %vm2504_vm5, %v1890_v11, %v2760_v20  ;;  %v2633_v26 = vmul.f32 0.2, %v1381_v16  ;;  %v1893_v27 = vadd.f32 %v6908_v39, %v1892_v8  ;;  %v1402_v28 = vadd.f32 %v6102_v17, %v6908_v39  ;;  %v6465_v9 = vld [vmem:[%s8156_s0 + $0x1d8] sm:$0xff]  }
  0xe2   :  { %v2891_v29 = vsel %vm2379_vm6, %v1389_v12, %v2635_v21  ;;  %v3019_v30 = vsel %vm2507_vm7, %v1901_v15, %v2763_v22  ;;  %v1914_v31 = vadd.f32 %v6230_v18, %v6908_v39  ;;  %v1394_v32 = vadd.f32 %v6908_v39, %v1393_v23  ;;  %v6103_v33 = vpop.f32.mrf.mxu0  ;;  %v6231_v34 = vpop.f32.mrf.mxu1  ;;  %v6467_v18 = vld [vmem:[%s8156_s0 + $0x1e0] sm:$0xff]  }
  0xe3   :  { %v5218_v36 = vpack.c.bf16 %v2891_v29, %v2890_v13  ;;  %v5538_v37 = vpack.c.bf16 %v3019_v30, %v3018_v14  ;;  %v2889_v38 = vsel %vm2377_vm8, %v1381_v16, %v2633_v26  ;;  %vm2505_vm9 = vcmp.ge.f32.partialorder %v1893_v27, 0.0  ;;  %v6466_v13 = vld [vmem:[%s8156_s0 + $0x3d8] sm:$0xff]  }
  0xe4   :  { %v5213_v42 = vpack.c.bf16 %v2889_v38, %v2888_v19  ;;  %v2761_v43 = vmul.f32 0.2, %v1893_v27  ;;  %vm2382_vm10 = vcmp.ge.f32.partialorder %v1402_v28, 0.0  ;;  %v2638_v44 = vmul.f32 0.2, %v1402_v28  ;;  %v1396_v45 = vpop.f32.mrf.mxu0  ;;  %v1908_v46 = vpop.f32.mrf.mxu1  ;;  %v6468_v19 = vld [vmem:[%s8156_s0 + $0x3e0] sm:$0xff]  }
  0xe5   :  { %5834 = vst [vmem:[%s8158_s3 + $0x28] sm:$0xff] %v5218_v36   ;;  %5898 = vst [vmem:[%s8158_s3 + $0x228] sm:$0xff] %v5538_v37   ;;  %vm2510_vm11 = vcmp.ge.f32.partialorder %v1914_v31, 0.0  ;;  %v2766_v48 = vmul.f32 0.2, %v1914_v31  ;;  %vm2380_vm12 = vcmp.ge.f32.partialorder %v1394_v32, 0.0  ;;  %v1906_v52 = vadd.f32 %v6908_v39, %v1905_v24 }
  0xe6   :  { %v2636_v49 = vmul.f32 0.2, %v1394_v32  ;;  %5833 = vst [vmem:[%s8158_s3 + $0x20] sm:$0xff] %v5213_v42   ;;  %v3017_v50 = vsel %vm2505_vm9, %v1893_v27, %v2761_v43  ;;  %v2894_v51 = vsel %vm2382_vm10, %v1402_v28, %v2638_v44  ;;  %v1405_v53 = vadd.f32 %v6103_v33, %v6908_v39  ;;  %v6106_v54 = vpop.f32.mrf.mxu0  ;;  %v6234_v55 = vpop.f32.mrf.mxu1 }
  0xe7   :  { %6201 = vmatmul.mubr.msk.bf16.gmra.mxu0 %vm926_vm0, %v6461_v35  ;;  %v5533_v56 = vpack.c.bf16 %v3017_v50, %v3016_v25  ;;  %v3022_v57 = vsel %vm2510_vm11, %v1914_v31, %v2766_v48  ;;  %v1917_v59 = vadd.f32 %v6231_v34, %v6908_v39  ;;  %6329 = vmatmul.mubr.msk.bf16.gmra.mxu1 %vm926_vm0, %v6462_v40  ;;  %vm2508_vm13 = vcmp.ge.f32.partialorder %v1906_v52, 0.0  ;;  %v6470_v50 = vld [vmem:[%s8156_s0 + $0x3e8] sm:$0xff]  }
  0xe8   :  { %v2892_v58 = vsel %vm2380_vm12, %v1394_v32, %v2636_v49  ;;  %v2764_v60 = vmul.f32 0.2, %v1906_v52  ;;  %vm2383_vm14 = vcmp.ge.f32.partialorder %v1405_v53, 0.0  ;;  %v2639_v61 = vmul.f32 0.2, %v1405_v53  ;;  %v1409_v62 = vpop.f32.mrf.mxu0  ;;  %v1921_v63 = vpop.f32.mrf.mxu1  ;;  %6204 = vmatprep.mubr.msk.bf16.mxu0 %vm926_vm0, %v6463_v41  ;;  %6332 = vmatprep.mubr.msk.bf16.mxu1 %vm926_vm0, %v6464_v47  ;;  %v6469_v47 = vld [vmem:[%s8156_s0 + $0x1e8] sm:$0xff]  }
  0xe9   :  { %5897 = vst [vmem:[%s8158_s3 + $0x220] sm:$0xff] %v5533_v56   ;;  %vm2511_vm15 = vcmp.ge.f32.partialorder %v1917_v59, 0.0  ;;  %v2767_v0 = vmul.f32 0.2, %v1917_v59  ;;  %v1397_v1 = vadd.f32 %v6908_v39, %v1396_v45  ;;  %v1909_v2 = vadd.f32 %v6908_v39, %v1908_v46 }
  0xea   :  { %v3020_v3 = vsel %vm2508_vm13, %v1906_v52, %v2764_v60  ;;  %v2895_v4 = vsel %vm2383_vm14, %v1405_v53, %v2639_v61  ;;  %v1418_v5 = vadd.f32 %v6106_v54, %v6908_v39  ;;  %v1930_v6 = vadd.f32 %v6234_v55, %v6908_v39  ;;  %v6107_v7 = vpop.f32.mrf.mxu0  ;;  %v6235_v8 = vpop.f32.mrf.mxu1 }
  0xeb   :  { %v5228_v10 = vpack.c.bf16 %v2895_v4, %v2894_v51  ;;  %v3023_v11 = vsel %vm2511_vm15, %v1917_v59, %v2767_v0  ;;  %vm2381_vm1 = vcmp.ge.f32.partialorder %v1397_v1, 0.0  ;;  %v2637_v12 = vmul.f32 0.2, %v1397_v1  ;;  %v6471_v51 = vld [vmem:[%s8156_s0 + $0x1f0] sm:$0xff]  }
  0xec   :  { %v5548_v14 = vpack.c.bf16 %v3023_v11, %v3022_v57  ;;  %vm2509_vm2 = vcmp.ge.f32.partialorder %v1909_v2, 0.0  ;;  %v2765_v15 = vmul.f32 0.2, %v1909_v2  ;;  %vm2386_vm3 = vcmp.ge.f32.partialorder %v1418_v5, 0.0  ;;  %v1412_v16 = vpop.f32.mrf.mxu0  ;;  %v1924_v17 = vpop.f32.mrf.mxu1  ;;  %v6472_v57 = vld [vmem:[%s8156_s0 + $0x3f0] sm:$0xff]  }
  0xed   :  { %5836 = vst [vmem:[%s8158_s3 + $0x38] sm:$0xff] %v5228_v10   ;;  %v2893_v20 = vsel %vm2381_vm1, %v1397_v1, %v2637_v12  ;;  %v2642_v21 = vmul.f32 0.2, %v1418_v5  ;;  %vm2514_vm4 = vcmp.ge.f32.partialorder %v1930_v6, 0.0  ;;  %v2770_v22 = vmul.f32 0.2, %v1930_v6 }
  0xee   :  { %5900 = vst [vmem:[%s8158_s3 + $0x238] sm:$0xff] %v5548_v14   ;;  %v5223_v23 = vpack.c.bf16 %v2893_v20, %v2892_v58  ;;  %v3021_v24 = vsel %vm2509_vm2, %v1909_v2, %v2765_v15  ;;  %v1410_v25 = vadd.f32 %v6908_v39, %v1409_v62  ;;  %v1922_v26 = vadd.f32 %v6908_v39, %v1921_v63  ;;  %v6110_v27 = vpop.f32.mrf.mxu0  ;;  %v6238_v28 = vpop.f32.mrf.mxu1  ;;  %v6473_v20 = vld [vmem:[%s8156_s0 + $0x1f8] sm:$0xff]  }
  0xef   :  { %6205 = vmatmul.mubr.msk.bf16.gmra.mxu0 %vm926_vm0, %v6465_v9  ;;  %v5543_v29 = vpack.c.bf16 %v3021_v24, %v3020_v3  ;;  %v2898_v30 = vsel %vm2386_vm3, %v1418_v5, %v2642_v21  ;;  %v3026_v31 = vsel %vm2514_vm4, %v1930_v6, %v2770_v22  ;;  %v1421_v32 = vadd.f32 %v6107_v7, %v6908_v39  ;;  %v6474_v21 = vld [vmem:[%s8156_s0 + $0x3f8] sm:$0xff]  }
  0xf0   :  { %6333 = vmatmul.mubr.msk.bf16.gmra.mxu1 %vm926_vm0, %v6466_v13  ;;  %5835 = vst [vmem:[%s8158_s3 + $0x30] sm:$0xff] %v5223_v23   ;;  %vm2384_vm5 = vcmp.ge.f32.partialorder %v1410_v25, 0.0  ;;  %v2640_v33 = vmul.f32 0.2, %v1410_v25  ;;  %vm2512_vm6 = vcmp.ge.f32.partialorder %v1922_v26, 0.0  ;;  %v1425_v35 = vpop.f32.mrf.mxu0  ;;  %v1937_v36 = vpop.f32.mrf.mxu1  ;;  %6208 = vmatprep.mubr.msk.bf16.mxu0 %vm926_vm0, %v6467_v18  ;;  %v1933_v38 = vadd.f32 %v6235_v8, %v6908_v39 }
  0xf1   :  { %v2768_v34 = vmul.f32 0.2, %v1922_v26  ;;  %6336 = vmatprep.mubr.msk.bf16.mxu1 %vm926_vm0, %v6468_v19  ;;  %5899 = vst [vmem:[%s8158_s3 + $0x230] sm:$0xff] %v5543_v29   ;;  %vm2387_vm7 = vcmp.ge.f32.partialorder %v1421_v32, 0.0  ;;  %v2643_v37 = vmul.f32 0.2, %v1421_v32  ;;  %v1413_v40 = vadd.f32 %v6908_v39, %v1412_v16 }
  0xf2   :  { %v2896_v41 = vsel %vm2384_vm5, %v1410_v25, %v2640_v33  ;;  %v1925_v43 = vadd.f32 %v6908_v39, %v1924_v17  ;;  %v1434_v44 = vadd.f32 %v6110_v27, %v6908_v39  ;;  %v6111_v45 = vpop.f32.mrf.mxu0  ;;  %v6239_v46 = vpop.f32.mrf.mxu1  ;;  %vm2515_vm8 = vcmp.ge.f32.partialorder %v1933_v38, 0.0 }
  0xf3   :  { %v3024_v42 = vsel %vm2512_vm6, %v1922_v26, %v2768_v34  ;;  %v2899_v48 = vsel %vm2387_vm7, %v1421_v32, %v2643_v37  ;;  %v2771_v49 = vmul.f32 0.2, %v1933_v38  ;;  %vm2385_vm9 = vcmp.ge.f32.partialorder %v1413_v40, 0.0 }
  0xf4   :  { %v5238_v52 = vpack.c.bf16 %v2899_v48, %v2898_v30  ;;  %v2641_v53 = vmul.f32 0.2, %v1413_v40  ;;  %vm2513_vm10 = vcmp.ge.f32.partialorder %v1925_v43, 0.0  ;;  %v2769_v54 = vmul.f32 0.2, %v1925_v43  ;;  %v1428_v55 = vpop.f32.mrf.mxu0  ;;  %v1940_v56 = vpop.f32.mrf.mxu1 }
  0xf5   :  { %v3027_v58 = vsel %vm2515_vm8, %v1933_v38, %v2771_v49  ;;  %vm2390_vm11 = vcmp.ge.f32.partialorder %v1434_v44, 0.0  ;;  %v2646_v59 = vmul.f32 0.2, %v1434_v44  ;;  %v1946_v60 = vadd.f32 %v6238_v28, %v6908_v39 }
  0xf6   :  { %5838 = vst [vmem:[%s8158_s3 + $0x48] sm:$0xff] %v5238_v52   ;;  %v5558_v61 = vpack.c.bf16 %v3027_v58, %v3026_v31  ;;  %v2897_v62 = vsel %vm2385_vm9, %v1413_v40, %v2641_v53  ;;  %v3025_v63 = vsel %vm2513_vm10, %v1925_v43, %v2769_v54  ;;  %v1426_v0 = vadd.f32 %v6908_v39, %v1425_v35  ;;  %v6114_v1 = vpop.f32.mrf.mxu0  ;;  %v6242_v2 = vpop.f32.mrf.mxu1 }
  0xf7   :  { %6209 = vmatmul.mubr.msk.bf16.gmra.mxu0 %vm926_vm0, %v6469_v47  ;;  %v5233_v3 = vpack.c.bf16 %v2897_v62, %v2896_v41  ;;  %v5553_v4 = vpack.c.bf16 %v3025_v63, %v3024_v42  ;;  %v2902_v5 = vsel %vm2390_vm11, %v1434_v44, %v2646_v59  ;;  %vm2518_vm12 = vcmp.ge.f32.partialorder %v1946_v60, 0.0 }
  0xf8   :  { %6337 = vmatmul.mubr.msk.bf16.gmra.mxu1 %vm926_vm0, %v6470_v50  ;;  %6212 = vmatprep.mubr.msk.bf16.mxu0 %vm926_vm0, %v6471_v51  ;;  %5902 = vst [vmem:[%s8158_s3 + $0x248] sm:$0xff] %v5558_v61   ;;  %v2774_v6 = vmul.f32 0.2, %v1946_v60  ;;  %vm2388_vm13 = vcmp.ge.f32.partialorder %v1426_v0, 0.0  ;;  %v2644_v7 = vmul.f32 0.2, %v1426_v0  ;;  %v1938_v8 = vadd.f32 %v6908_v39, %v1937_v36  ;;  %v1441_v9 = vpop.f32.mrf.mxu0  ;;  %v1953_v10 = vpop.f32.mrf.mxu1 }
  0xf9   :  { %6340 = vmatprep.mubr.msk.bf16.mxu1 %vm926_vm0, %v6472_v57  ;;  %5837 = vst [vmem:[%s8158_s3 + $0x40] sm:$0xff] %v5233_v3   ;;  %5901 = vst [vmem:[%s8158_s3 + $0x240] sm:$0xff] %v5553_v4   ;;  %v1437_v11 = vadd.f32 %v6111_v45, %v6908_v39  ;;  %v1949_v12 = vadd.f32 %v6239_v46, %v6908_v39  ;;  %v1429_v13 = vadd.f32 %v6908_v39, %v1428_v55 }
  0xfa   :  { %v1941_v14 = vadd.f32 %v6908_v39, %v1940_v56  ;;  %v3030_v15 = vsel %vm2518_vm12, %v1946_v60, %v2774_v6  ;;  %v2900_v16 = vsel %vm2388_vm13, %v1426_v0, %v2644_v7  ;;  %vm2516_vm14 = vcmp.ge.f32.partialorder %v1938_v8, 0.0  ;;  %v6115_v18 = vpop.f32.mrf.mxu0  ;;  %v6243_v19 = vpop.f32.mrf.mxu1 }
  0xfb   :  { %v2772_v17 = vmul.f32 0.2, %v1938_v8  ;;  %vm2391_vm15 = vcmp.ge.f32.partialorder %v1437_v11, 0.0  ;;  %v2647_v22 = vmul.f32 0.2, %v1437_v11  ;;  %vm2519_vm1 = vcmp.ge.f32.partialorder %v1949_v12, 0.0 }
  0xfc   :  { %v2775_v23 = vmul.f32 0.2, %v1949_v12  ;;  %vm2389_vm2 = vcmp.ge.f32.partialorder %v1429_v13, 0.0  ;;  %v2645_v25 = vmul.f32 0.2, %v1429_v13  ;;  %vm2517_vm3 = vcmp.ge.f32.partialorder %v1941_v14, 0.0  ;;  %v1444_v26 = vpop.f32.mrf.mxu0  ;;  %v1956_v27 = vpop.f32.mrf.mxu1 }
  0xfd   :  { %v3028_v24 = vsel %vm2516_vm14, %v1938_v8, %v2772_v17  ;;  %v2903_v28 = vsel %vm2391_vm15, %v1437_v11, %v2647_v22  ;;  %v2773_v30 = vmul.f32 0.2, %v1941_v14  ;;  %v1450_v31 = vadd.f32 %v6114_v1, %v6908_v39 }
  0xfe   :  { %v3031_v29 = vsel %vm2519_vm1, %v1949_v12, %v2775_v23  ;;  %v5248_v32 = vpack.c.bf16 %v2903_v28, %v2902_v5  ;;  %v2901_v34 = vsel %vm2389_vm2, %v1429_v13, %v2645_v25  ;;  %v1962_v35 = vadd.f32 %v6242_v2, %v6908_v39  ;;  %v6118_v36 = vpop.f32.mrf.mxu0  ;;  %v6246_v37 = vpop.f32.mrf.mxu1 }
  0xff   :  { %v5568_v33 = vpack.c.bf16 %v3031_v29, %v3030_v15  ;;  %6213 = vmatmul.mubr.msk.bf16.gmra.mxu0 %vm926_vm0, %v6473_v20  ;;  %v5243_v38 = vpack.c.bf16 %v2901_v34, %v2900_v16  ;;  %v3029_v40 = vsel %vm2517_vm3, %v1941_v14, %v2773_v30  ;;  %vm2394_vm4 = vcmp.ge.f32.partialorder %v1450_v31, 0.0 }
 0x100   :  { %v2650_v41 = vmul.f32 0.2, %v1450_v31  ;;  %6341 = vmatmul.mubr.msk.bf16.gmra.mxu1 %vm926_vm0, %v6474_v21  ;;  %5840 = vst [vmem:[%s8158_s3 + $0x58] sm:$0xff] %v5248_v32   ;;  %v5563_v42 = vpack.c.bf16 %v3029_v40, %v3028_v24  ;;  %vm2522_vm5 = vcmp.ge.f32.partialorder %v1962_v35, 0.0  ;;  %v2778_v43 = vmul.f32 0.2, %v1962_v35  ;;  %v1457_v45 = vpop.f32.mrf.mxu0  ;;  %v1969_v46 = vpop.f32.mrf.mxu1 }
 0x101   :  { %5904 = vst [vmem:[%s8158_s3 + $0x258] sm:$0xff] %v5568_v33   ;;  %v1442_v44 = vadd.f32 %v6908_v39, %v1441_v9  ;;  %5839 = vst [vmem:[%s8158_s3 + $0x50] sm:$0xff] %v5243_v38   ;;  %v1954_v48 = vadd.f32 %v6908_v39, %v1953_v10  ;;  %v1453_v49 = vadd.f32 %v6115_v18, %v6908_v39 }
 0x102   :  { %v2906_v47 = vsel %vm2394_vm4, %v1450_v31, %v2650_v41  ;;  %v1965_v50 = vadd.f32 %v6243_v19, %v6908_v39  ;;  %5903 = vst [vmem:[%s8158_s3 + $0x250] sm:$0xff] %v5563_v42   ;;  %v3034_v51 = vsel %vm2522_vm5, %v1962_v35, %v2778_v43  ;;  %v1445_v53 = vadd.f32 %v6908_v39, %v1444_v26  ;;  %v6119_v54 = vpop.f32.mrf.mxu0  ;;  %v6247_v55 = vpop.f32.mrf.mxu1 }
 0x103   :  { %vm2392_vm0 = vcmp.ge.f32.partialorder %v1442_v44, 0.0  ;;  %v2648_v52 = vmul.f32 0.2, %v1442_v44  ;;  %vm2520_vm6 = vcmp.ge.f32.partialorder %v1954_v48, 0.0  ;;  %v2776_v56 = vmul.f32 0.2, %v1954_v48 }
 0x104   :  { %vm2395_vm7 = vcmp.ge.f32.partialorder %v1453_v49, 0.0  ;;  %v2651_v57 = vmul.f32 0.2, %v1453_v49  ;;  %vm2523_vm8 = vcmp.ge.f32.partialorder %v1965_v50, 0.0  ;;  %v2779_v59 = vmul.f32 0.2, %v1965_v50  ;;  %v1460_v60 = vpop.f32.mrf.mxu0  ;;  %v1972_v61 = vpop.f32.mrf.mxu1 }
 0x105   :  { %v2904_v58 = vsel %vm2392_vm0, %v1442_v44, %v2648_v52  ;;  %vm2393_vm9 = vcmp.ge.f32.partialorder %v1445_v53, 0.0  ;;  %v3032_v62 = vsel %vm2520_vm6, %v1954_v48, %v2776_v56  ;;  %v2649_v0 = vmul.f32 0.2, %v1445_v53 }
 0x106   :  { %v2907_v63 = vsel %vm2395_vm7, %v1453_v49, %v2651_v57  ;;  %v1957_v1 = vadd.f32 %v6908_v39, %v1956_v27  ;;  %v3035_v3 = vsel %vm2523_vm8, %v1965_v50, %v2779_v59  ;;  %v1466_v4 = vadd.f32 %v6118_v36, %v6908_v39  ;;  %v6122_v6 = vpop.f32.mrf.mxu0  ;;  %v6250_v7 = vpop.f32.mrf.mxu1 }
 0x107   :  { %v5258_v2 = vpack.c.bf16 %v2907_v63, %v2906_v47  ;;  %v1978_v5 = vadd.f32 %v6246_v37, %v6908_v39  ;;  %v5578_v8 = vpack.c.bf16 %v3035_v3, %v3034_v51  ;;  %v2905_v9 = vsel %vm2393_vm9, %v1445_v53, %v2649_v0 }
 0x108   :  { %vm2521_vm10 = vcmp.ge.f32.partialorder %v1957_v1, 0.0  ;;  %v2777_v10 = vmul.f32 0.2, %v1957_v1  ;;  %v5253_v11 = vpack.c.bf16 %v2905_v9, %v2904_v58  ;;  %vm2398_vm11 = vcmp.ge.f32.partialorder %v1466_v4, 0.0  ;;  %v1473_v13 = vpop.f32.mrf.mxu0  ;;  %v1985_v14 = vpop.f32.mrf.mxu1 }
 0x109   :  { %5842 = vst [vmem:[%s8158_s3 + $0x68] sm:$0xff] %v5258_v2   ;;  %v2654_v12 = vmul.f32 0.2, %v1466_v4  ;;  %vm2526_vm12 = vcmp.ge.f32.partialorder %v1978_v5, 0.0  ;;  %5906 = vst [vmem:[%s8158_s3 + $0x268] sm:$0xff] %v5578_v8   ;;  %v1458_v17 = vadd.f32 %v6908_v39, %v1457_v45  ;;  %v1970_v18 = vadd.f32 %v6908_v39, %v1969_v46 }
 0x10a   :  { %v3033_v15 = vsel %vm2521_vm10, %v1957_v1, %v2777_v10  ;;  %v2782_v16 = vmul.f32 0.2, %v1978_v5  ;;  %5841 = vst [vmem:[%s8158_s3 + $0x60] sm:$0xff] %v5253_v11   ;;  %v1469_v21 = vadd.f32 %v6119_v54, %v6908_v39  ;;  %v1981_v22 = vadd.f32 %v6247_v55, %v6908_v39  ;;  %v6123_v23 = vpop.f32.mrf.mxu0  ;;  %v6251_v24 = vpop.f32.mrf.mxu1 }
 0x10b   :  { %v5573_v19 = vpack.c.bf16 %v3033_v15, %v3032_v62  ;;  %v2910_v20 = vsel %vm2398_vm11, %v1466_v4, %v2654_v12  ;;  %vm2396_vm13 = vcmp.ge.f32.partialorder %v1458_v17, 0.0  ;;  %v2652_v26 = vmul.f32 0.2, %v1458_v17 }
 0x10c   :  { %v3038_v25 = vsel %vm2526_vm12, %v1978_v5, %v2782_v16  ;;  %vm2524_vm14 = vcmp.ge.f32.partialorder %v1970_v18, 0.0  ;;  %v2780_v27 = vmul.f32 0.2, %v1970_v18  ;;  %vm2399_vm15 = vcmp.ge.f32.partialorder %v1469_v21, 0.0  ;;  %v1476_v29 = vpop.f32.mrf.mxu0  ;;  %v1988_v30 = vpop.f32.mrf.mxu1 }
 0x10d   :  { %5905 = vst [vmem:[%s8158_s3 + $0x260] sm:$0xff] %v5573_v19   ;;  %v2655_v28 = vmul.f32 0.2, %v1469_v21  ;;  %vm2527_vm1 = vcmp.ge.f32.partialorder %v1981_v22, 0.0  ;;  %v2908_v31 = vsel %vm2396_vm13, %v1458_v17, %v2652_v26  ;;  %v2783_v32 = vmul.f32 0.2, %v1981_v22 }
 0x10e   :  { %v1461_v33 = vadd.f32 %v6908_v39, %v1460_v60  ;;  %v1973_v34 = vadd.f32 %v6908_v39, %v1972_v61  ;;  %v3036_v35 = vsel %vm2524_vm14, %v1970_v18, %v2780_v27  ;;  %v1482_v37 = vadd.f32 %v6122_v6, %v6908_v39  ;;  %v6126_v40 = vpop.f32.mrf.mxu0  ;;  %v6254_v41 = vpop.f32.mrf.mxu1 }
 0x10f   :  { %v2911_v36 = vsel %vm2399_vm15, %v1469_v21, %v2655_v28  ;;  %v1994_v38 = vadd.f32 %v6250_v7, %v6908_v39  ;;  %v3039_v43 = vsel %vm2527_vm1, %v1981_v22, %v2783_v32  ;;  %v1474_v54 = vadd.f32 %v6908_v39, %v1473_v13  ;;  %v7217_v32 = vld [vmem:[%s8157_s2] ss:$0 sm:$0xff] }
 0x110   :  { %v5268_v42 = vpack.c.bf16 %v2911_v36, %v2910_v20  ;;  %vm2397_vm2 = vcmp.ge.f32.partialorder %v1461_v33, 0.0  ;;  %v2653_v44 = vmul.f32 0.2, %v1461_v33  ;;  %v5588_v45 = vpack.c.bf16 %v3039_v43, %v3038_v25  ;;  %v1489_v47 = vpop.f32.mrf.mxu0  ;;  %v7178_v48 = vpop.f32.mrf.mxu1 }
 0x111   :  { %vm2525_vm3 = vcmp.ge.f32.partialorder %v1973_v34, 0.0  ;;  %v2781_v46 = vmul.f32 0.2, %v1973_v34  ;;  %vm2402_vm4 = vcmp.ge.f32.partialorder %v1482_v37, 0.0  ;;  %v2658_v50 = vmul.f32 0.2, %v1482_v37 }
 0x112   :  { %5844 = vst [vmem:[%s8158_s3 + $0x78] sm:$0xff] %v5268_v42   ;;  %v2909_v49 = vsel %vm2397_vm2, %v1461_v33, %v2653_v44  ;;  %vm2530_vm5 = vcmp.ge.f32.partialorder %v1994_v38, 0.0  ;;  %v2786_v51 = vmul.f32 0.2, %v1994_v38  ;;  %5908 = vst [vmem:[%s8158_s3 + $0x278] sm:$0xff] %v5588_v45   ;;  %v1986_v55 = vadd.f32 %v6908_v39, %v1985_v14  ;;  %v6127_v56 = vpop.f32.mrf.mxu0  ;;  %v6255_v57 = vpop.f32.mrf.mxu1 }
 0x113   :  { %v5263_v52 = vpack.c.bf16 %v2909_v49, %v2908_v31  ;;  %v3037_v53 = vsel %vm2525_vm3, %v1973_v34, %v2781_v46  ;;  %v2914_v59 = vsel %vm2402_vm4, %v1482_v37, %v2658_v50  ;;  %v1485_v61 = vadd.f32 %v6123_v23, %v6908_v39 }
 0x114   :  { %v5583_v58 = vpack.c.bf16 %v3037_v53, %v3036_v35  ;;  %v3042_v60 = vsel %vm2530_vm5, %v1994_v38, %v2786_v51  ;;  %vm2400_vm0 = vcmp.ge.f32.partialorder %v1474_v54, 0.0  ;;  %v2656_v62 = vmul.f32 0.2, %v1474_v54  ;;  %v1492_v0 = vpop.f32.mrf.mxu0  ;;  %v2004_v1 = vpop.f32.mrf.mxu1 }
 0x115   :  { %5843 = vst [vmem:[%s8158_s3 + $0x70] sm:$0xff] %v5263_v52   ;;  %vm2528_vm6 = vcmp.ge.f32.partialorder %v1986_v55, 0.0  ;;  %v2784_v63 = vmul.f32 0.2, %v1986_v55  ;;  %vm2403_vm7 = vcmp.ge.f32.partialorder %v1485_v61, 0.0  ;;  %v1997_v3 = vadd.f32 %v6251_v24, %v6908_v39 }
 0x116   :  { %5907 = vst [vmem:[%s8158_s3 + $0x270] sm:$0xff] %v5583_v58   ;;  %v2659_v2 = vmul.f32 0.2, %v1485_v61  ;;  %v1477_v4 = vadd.f32 %v6908_v39, %v1476_v29  ;;  %v2912_v5 = vsel %vm2400_vm0, %v1474_v54, %v2656_v62  ;;  %v1989_v7 = vadd.f32 %v6908_v39, %v1988_v30  ;;  %v6130_v9 = vpop.f32.mrf.mxu0  ;;  %v7200_v10 = vpop.f32.mrf.mxu1 }
 0x117   :  { %v3040_v6 = vsel %vm2528_vm6, %v1986_v55, %v2784_v63  ;;  %v1498_v8 = vadd.f32 %v6126_v40, %v6908_v39  ;;  %vm2531_vm8 = vcmp.ge.f32.partialorder %v1997_v3, 0.0  ;;  %v2787_v12 = vmul.f32 0.2, %v1997_v3 }
 0x118   :  { %v2915_v11 = vsel %vm2403_vm7, %v1485_v61, %v2659_v2  ;;  %vm2401_vm9 = vcmp.ge.f32.partialorder %v1477_v4, 0.0  ;;  %v2657_v14 = vmul.f32 0.2, %v1477_v4  ;;  %vm2529_vm10 = vcmp.ge.f32.partialorder %v1989_v7, 0.0  ;;  %v7202_v16 = vpop.f32.mrf.mxu0  ;;  %v7204_v17 = vpop.f32.mrf.mxu1 }
 0x119   :  { %v5278_v13 = vpack.c.bf16 %v2915_v11, %v2914_v59  ;;  %v2785_v15 = vmul.f32 0.2, %v1989_v7  ;;  %v3043_v18 = vsel %vm2531_vm8, %v1997_v3, %v2787_v12  ;;  %vm2406_vm11 = vcmp.ge.f32.partialorder %v1498_v8, 0.0 }
 0x11a   :  { %v2662_v19 = vmul.f32 0.2, %v1498_v8  ;;  %v2010_v20 = vadd.f32 %v6254_v41, %v6908_v39  ;;  %v5598_v21 = vpack.c.bf16 %v3043_v18, %v3042_v60  ;;  %v2913_v22 = vsel %vm2401_vm9, %v1477_v4, %v2657_v14  ;;  %v6131_v25 = vpop.f32.mrf.mxu0  ;;  %v6259_v26 = vpop.f32.mrf.mxu1 }
 0x11b   :  { %5846 = vst [vmem:[%s8158_s3 + $0x88] sm:$0xff] %v5278_v13   ;;  %v3041_v23 = vsel %vm2529_vm10, %v1989_v7, %v2785_v15  ;;  %v1490_v24 = vadd.f32 %v6908_v39, %v1489_v47  ;;  %v5273_v27 = vpack.c.bf16 %v2913_v22, %v2912_v5  ;;  %v2002_v39 = vadd.f32 %v7217_v32, %v7178_v48 }
 0x11c   :  { %v5593_v28 = vpack.c.bf16 %v3041_v23, %v3040_v6  ;;  %v2918_v29 = vsel %vm2406_vm11, %v1498_v8, %v2662_v19  ;;  %vm2534_vm12 = vcmp.ge.f32.partialorder %v2010_v20, 0.0  ;;  %5910 = vst [vmem:[%s8158_s3 + $0x288] sm:$0xff] %v5598_v21   ;;  %v2790_v30 = vmul.f32 0.2, %v2010_v20  ;;  %v1508_v33 = vpop.f32.mrf.mxu0  ;;  %v7221_v34 = vpop.f32.mrf.mxu1 }
 0x11d   :  { %vm2404_vm13 = vcmp.ge.f32.partialorder %v1490_v24, 0.0  ;;  %v2660_v31 = vmul.f32 0.2, %v1490_v24  ;;  %5845 = vst [vmem:[%s8158_s3 + $0x80] sm:$0xff] %v5273_v27   ;;  %v1501_v35 = vadd.f32 %v7217_v32, %v6127_v56  ;;  %v2013_v36 = vadd.f32 %v7217_v32, %v6255_v57 }
 0x11e   :  { %5909 = vst [vmem:[%s8158_s3 + $0x280] sm:$0xff] %v5593_v28   ;;  %v1493_v37 = vadd.f32 %v7217_v32, %v1492_v0  ;;  %v2005_v38 = vadd.f32 %v7217_v32, %v2004_v1  ;;  %v3046_v40 = vsel %vm2534_vm12, %v2010_v20, %v2790_v30  ;;  %vm2532_vm14 = vcmp.ge.f32.partialorder %v2002_v39, 0.0  ;;  %v7233_v43 = vpop.f32.mrf.mxu0  ;;  %v6262_v44 = vpop.f32.mrf.mxu1 }
 0x11f   :  { %v2916_v41 = vsel %vm2404_vm13, %v1490_v24, %v2660_v31  ;;  %v2788_v42 = vmul.f32 0.2, %v2002_v39  ;;  %vm2407_vm15 = vcmp.ge.f32.partialorder %v1501_v35, 0.0  ;;  %v2663_v45 = vmul.f32 0.2, %v1501_v35 }
 0x120   :  { %vm2535_vm1 = vcmp.ge.f32.partialorder %v2013_v36, 0.0  ;;  %v2791_v46 = vmul.f32 0.2, %v2013_v36  ;;  %vm2405_vm2 = vcmp.ge.f32.partialorder %v1493_v37, 0.0  ;;  %v2661_v48 = vmul.f32 0.2, %v1493_v37  ;;  %v7235_v49 = vpop.f32.mrf.mxu0  ;;  %v7237_v50 = vpop.f32.mrf.mxu1 }
 0x121   :  { %v3044_v47 = vsel %vm2532_vm14, %v2002_v39, %v2788_v42  ;;  %vm2533_vm3 = vcmp.ge.f32.partialorder %v2005_v38, 0.0  ;;  %v2919_v51 = vsel %vm2407_vm15, %v1501_v35, %v2663_v45  ;;  %v2789_v53 = vmul.f32 0.2, %v2005_v38 }
 0x122   :  { %v3047_v52 = vsel %vm2535_vm1, %v2013_v36, %v2791_v46  ;;  %v1514_v54 = vadd.f32 %v7217_v32, %v6130_v9  ;;  %v5288_v55 = vpack.c.bf16 %v2919_v51, %v2918_v29  ;;  %v2917_v57 = vsel %vm2405_vm2, %v1493_v37, %v2661_v48  ;;  %v7242_v59 = vpop.f32.mrf.mxu0  ;;  %v7244_v60 = vpop.f32.mrf.mxu1 }
 0x123   :  { %v5608_v56 = vpack.c.bf16 %v3047_v52, %v3046_v40  ;;  %v2026_v58 = vadd.f32 %v7217_v32, %v7200_v10  ;;  %v5283_v61 = vpack.c.bf16 %v2917_v57, %v2916_v41  ;;  %v3045_v62 = vsel %vm2533_vm3, %v2005_v38, %v2789_v53 }
 0x124   :  { %vm2410_vm4 = vcmp.ge.f32.partialorder %v1514_v54, 0.0  ;;  %v2666_v63 = vmul.f32 0.2, %v1514_v54  ;;  %5848 = vst [vmem:[%s8158_s3 + $0x98] sm:$0xff] %v5288_v55   ;;  %v5603_v0 = vpack.c.bf16 %v3045_v62, %v3044_v47  ;;  %v1506_v2 = vadd.f32 %v7217_v32, %v7202_v16  ;;  %v7254_v3 = vpop.f32.mrf.mxu0  ;;  %v7256_v4 = vpop.f32.mrf.mxu1 }
 0x125   :  { %5912 = vst [vmem:[%s8158_s3 + $0x298] sm:$0xff] %v5608_v56   ;;  %vm2538_vm5 = vcmp.ge.f32.partialorder %v2026_v58, 0.0  ;;  %v2794_v1 = vmul.f32 0.2, %v2026_v58  ;;  %5847 = vst [vmem:[%s8158_s3 + $0x90] sm:$0xff] %v5283_v61   ;;  %v2018_v6 = vadd.f32 %v7217_v32, %v7204_v17  ;;  %v1517_v7 = vadd.f32 %v7217_v32, %v6131_v25 }
 0x126   :  { %v2922_v5 = vsel %vm2410_vm4, %v1514_v54, %v2666_v63  ;;  %v2029_v8 = vadd.f32 %v7217_v32, %v6259_v26  ;;  %5911 = vst [vmem:[%s8158_s3 + $0x290] sm:$0xff] %v5603_v0   ;;  %vm2408_vm0 = vcmp.ge.f32.partialorder %v1506_v2, 0.0  ;;  %v2664_v10 = vmul.f32 0.2, %v1506_v2  ;;  %v7269_v12 = vpop.f32.mrf.mxu0  ;;  %v6266_v13 = vpop.f32.mrf.mxu1 }
 0x127   :  { %v3050_v9 = vsel %vm2538_vm5, %v2026_v58, %v2794_v1  ;;  %v1509_v11 = vadd.f32 %v7217_v32, %v1508_v33  ;;  %vm2536_vm6 = vcmp.ge.f32.partialorder %v2018_v6, 0.0  ;;  %v2792_v14 = vmul.f32 0.2, %v2018_v6 }
 0x128   :  { %vm2411_vm7 = vcmp.ge.f32.partialorder %v1517_v7, 0.0  ;;  %v2667_v15 = vmul.f32 0.2, %v1517_v7  ;;  %v2920_v16 = vsel %vm2408_vm0, %v1506_v2, %v2664_v10  ;;  %vm2539_vm8 = vcmp.ge.f32.partialorder %v2029_v8, 0.0  ;;  %v7271_v18 = vpop.f32.mrf.mxu0  ;;  %v7273_v19 = vpop.f32.mrf.mxu1 }
 0x129   :  { %v2795_v17 = vmul.f32 0.2, %v2029_v8  ;;  %vm2409_vm9 = vcmp.ge.f32.partialorder %v1509_v11, 0.0  ;;  %v3048_v20 = vsel %vm2536_vm6, %v2018_v6, %v2792_v14  ;;  %v2665_v22 = vmul.f32 0.2, %v1509_v11 }
 0x12a   :  { %v2923_v21 = vsel %vm2411_vm7, %v1517_v7, %v2667_v15  ;;  %v2021_v23 = vadd.f32 %v7217_v32, %v7221_v34  ;;  %v1530_v26 = vadd.f32 %v7217_v32, %v7233_v43  ;;  %v2042_v27 = vadd.f32 %v7217_v32, %v6262_v44  ;;  %v7280_v28 = vpop.f32.mrf.mxu0  ;;  %v7282_v29 = vpop.f32.mrf.mxu1 }
 0x12b   :  { %v5298_v24 = vpack.c.bf16 %v2923_v21, %v2922_v5  ;;  %v3051_v25 = vsel %vm2539_vm8, %v2029_v8, %v2795_v17  ;;  %v2921_v31 = vsel %vm2409_vm9, %v1509_v11, %v2665_v22  ;;  %v1522_v40 = vadd.f32 %v7217_v32, %v7235_v49 }
 0x12c   :  { %v5618_v30 = vpack.c.bf16 %v3051_v25, %v3050_v9  ;;  %vm2537_vm10 = vcmp.ge.f32.partialorder %v2021_v23, 0.0  ;;  %v2793_v39 = vmul.f32 0.2, %v2021_v23  ;;  %v5293_v33 = vpack.c.bf16 %v2921_v31, %v2920_v16  ;;  %v7287_v35 = vpop.f32.mrf.mxu0  ;;  %v7289_v36 = vpop.f32.mrf.mxu1 }
 0x12d   :  { %5850 = vst [vmem:[%s8158_s3 + $0xa8] sm:$0xff] %v5298_v24   ;;  %vm2414_vm11 = vcmp.ge.f32.partialorder %v1530_v26, 0.0  ;;  %v2670_v34 = vmul.f32 0.2, %v1530_v26  ;;  %vm2542_vm12 = vcmp.ge.f32.partialorder %v2042_v27, 0.0  ;;  %v2034_v41 = vadd.f32 %v7217_v32, %v7237_v50 }
 0x12e   :  { %5914 = vst [vmem:[%s8158_s3 + $0x2a8] sm:$0xff] %v5618_v30   ;;  %v3049_v37 = vsel %vm2537_vm10, %v2021_v23, %v2793_v39  ;;  %v2798_v38 = vmul.f32 0.2, %v2042_v27  ;;  %5849 = vst [vmem:[%s8158_s3 + $0xa0] sm:$0xff] %v5293_v33   ;;  %v1533_v44 = vadd.f32 %v7217_v32, %v7242_v59  ;;  %v2045_v45 = vadd.f32 %v7217_v32, %v7244_v60  ;;  %v7305_v46 = vpop.f32.mrf.mxu0  ;;  %v7307_v47 = vpop.f32.mrf.mxu1 }
 0x12f   :  { %v5613_v42 = vpack.c.bf16 %v3049_v37, %v3048_v20  ;;  %v2926_v43 = vsel %vm2414_vm11, %v1530_v26, %v2670_v34  ;;  %vm2412_vm13 = vcmp.ge.f32.partialorder %v1522_v40, 0.0  ;;  %v2668_v49 = vmul.f32 0.2, %v1522_v40 }
 0x130   :  { %v3054_v48 = vsel %vm2542_vm12, %v2042_v27, %v2798_v38  ;;  %vm2540_vm14 = vcmp.ge.f32.partialorder %v2034_v41, 0.0  ;;  %v2796_v50 = vmul.f32 0.2, %v2034_v41  ;;  %vm2415_vm15 = vcmp.ge.f32.partialorder %v1533_v44, 0.0  ;;  %v7312_v52 = vpop.f32.mrf.mxu0  ;;  %v7314_v53 = vpop.f32.mrf.mxu1 }
 0x131   :  { %5913 = vst [vmem:[%s8158_s3 + $0x2a0] sm:$0xff] %v5613_v42   ;;  %v2671_v51 = vmul.f32 0.2, %v1533_v44  ;;  %vm2543_vm1 = vcmp.ge.f32.partialorder %v2045_v45, 0.0  ;;  %v2924_v54 = vsel %vm2412_vm13, %v1522_v40, %v2668_v49  ;;  %v2799_v55 = vmul.f32 0.2, %v2045_v45 }
 0x132   :  { %v1525_v56 = vadd.f32 %v7217_v32, %v7254_v3  ;;  %v2037_v57 = vadd.f32 %v7217_v32, %v7256_v4  ;;  %v3052_v58 = vsel %vm2540_vm14, %v2034_v41, %v2796_v50  ;;  %v1546_v60 = vadd.f32 %v7217_v32, %v7269_v12  ;;  %v7323_v62 = vpop.f32.mrf.mxu0  ;;  %v7325_v63 = vpop.f32.mrf.mxu1 }
 0x133   :  { %v2927_v59 = vsel %vm2415_vm15, %v1533_v44, %v2671_v51  ;;  %v2058_v61 = vadd.f32 %v7217_v32, %v6266_v13  ;;  %v3055_v1 = vsel %vm2543_vm1, %v2045_v45, %v2799_v55  ;;  %v1538_v12 = vadd.f32 %v7217_v32, %v7271_v18 }
 0x134   :  { %v5308_v0 = vpack.c.bf16 %v2927_v59, %v2926_v43  ;;  %vm2413_vm2 = vcmp.ge.f32.partialorder %v1525_v56, 0.0  ;;  %v2669_v2 = vmul.f32 0.2, %v1525_v56  ;;  %v5628_v5 = vpack.c.bf16 %v3055_v1, %v3054_v48  ;;  %v7327_v4 = vpop.f32.mrf.mxu0  ;;  %v7329_v6 = vpop.f32.mrf.mxu1 }
 0x135   :  { %vm2541_vm3 = vcmp.ge.f32.partialorder %v2037_v57, 0.0  ;;  %v2797_v3 = vmul.f32 0.2, %v2037_v57  ;;  %vm2418_vm4 = vcmp.ge.f32.partialorder %v1546_v60, 0.0  ;;  %v2674_v8 = vmul.f32 0.2, %v1546_v60 }
 0x136   :  { %5852 = vst [vmem:[%s8158_s3 + $0xb8] sm:$0xff] %v5308_v0   ;;  %v2925_v7 = vsel %vm2413_vm2, %v1525_v56, %v2669_v2  ;;  %vm2546_vm5 = vcmp.ge.f32.partialorder %v2058_v61, 0.0  ;;  %v2802_v9 = vmul.f32 0.2, %v2058_v61  ;;  %5916 = vst [vmem:[%s8158_s3 + $0x2b8] sm:$0xff] %v5628_v5   ;;  %v2050_v13 = vadd.f32 %v7217_v32, %v7273_v19  ;;  %v7341_v14 = vpop.f32.mrf.mxu0  ;;  %v7343_v15 = vpop.f32.mrf.mxu1 }
 0x137   :  { %v5303_v10 = vpack.c.bf16 %v2925_v7, %v2924_v54  ;;  %v3053_v11 = vsel %vm2541_vm3, %v2037_v57, %v2797_v3  ;;  %v2930_v17 = vsel %vm2418_vm4, %v1546_v60, %v2674_v8  ;;  %v1549_v21 = vadd.f32 %v7217_v32, %v7280_v28 }
 0x138   :  { %v5623_v16 = vpack.c.bf16 %v3053_v11, %v3052_v58  ;;  %v3058_v20 = vsel %vm2546_vm5, %v2058_v61, %v2802_v9  ;;  %vm2416_vm0 = vcmp.ge.f32.partialorder %v1538_v12, 0.0  ;;  %v2672_v18 = vmul.f32 0.2, %v1538_v12  ;;  %v7351_v19 = vpop.f32.mrf.mxu0  ;;  %v7353_v23 = vpop.f32.mrf.mxu1 }
 0x139   :  { %5851 = vst [vmem:[%s8158_s3 + $0xb0] sm:$0xff] %v5303_v10   ;;  %vm2544_vm6 = vcmp.ge.f32.partialorder %v2050_v13, 0.0  ;;  %v2800_v22 = vmul.f32 0.2, %v2050_v13  ;;  %vm2419_vm7 = vcmp.ge.f32.partialorder %v1549_v21, 0.0  ;;  %v2061_v25 = vadd.f32 %v7217_v32, %v7282_v29 }
 0x13a   :  { %5915 = vst [vmem:[%s8158_s3 + $0x2b0] sm:$0xff] %v5623_v16   ;;  %v2675_v24 = vmul.f32 0.2, %v1549_v21  ;;  %v1541_v26 = vadd.f32 %v7217_v32, %v7287_v35  ;;  %v2928_v27 = vsel %vm2416_vm0, %v1538_v12, %v2672_v18  ;;  %v2053_v30 = vadd.f32 %v7217_v32, %v7289_v36  ;;  %v7366_v39 = vpop.f32.mrf.mxu0  ;;  %v7368_v33 = vpop.f32.mrf.mxu1 }
 0x13b   :  { %v3056_v28 = vsel %vm2544_vm6, %v2050_v13, %v2800_v22  ;;  %v1562_v31 = vadd.f32 %v7217_v32, %v7305_v46  ;;  %vm2547_vm8 = vcmp.ge.f32.partialorder %v2061_v25, 0.0  ;;  %v2803_v37 = vmul.f32 0.2, %v2061_v25 }
 0x13c   :  { %v2931_v34 = vsel %vm2419_vm7, %v1549_v21, %v2675_v24  ;;  %vm2417_vm9 = vcmp.ge.f32.partialorder %v1541_v26, 0.0  ;;  %v2673_v38 = vmul.f32 0.2, %v1541_v26  ;;  %vm2545_vm10 = vcmp.ge.f32.partialorder %v2053_v30, 0.0  ;;  %v7370_v40 = vpop.f32.mrf.mxu0  ;;  %v7372_v41 = vpop.f32.mrf.mxu1 }
 0x13d   :  { %v5318_v29 = vpack.c.bf16 %v2931_v34, %v2930_v17  ;;  %v2801_v35 = vmul.f32 0.2, %v2053_v30  ;;  %v3059_v36 = vsel %vm2547_vm8, %v2061_v25, %v2803_v37  ;;  %vm2422_vm11 = vcmp.ge.f32.partialorder %v1562_v31, 0.0 }
 0x13e   :  { %v2678_v42 = vmul.f32 0.2, %v1562_v31  ;;  %v2074_v43 = vadd.f32 %v7217_v32, %v7307_v47  ;;  %v5638_v44 = vpack.c.bf16 %v3059_v36, %v3058_v20  ;;  %v2929_v45 = vsel %vm2417_vm9, %v1541_v26, %v2673_v38  ;;  %v7381_v49 = vpop.f32.mrf.mxu0  ;;  %v7383_v50 = vpop.f32.mrf.mxu1 }
 0x13f   :  { %5854 = vst [vmem:[%s8158_s3 + $0xc8] sm:$0xff] %v5318_v29   ;;  %v3057_v46 = vsel %vm2545_vm10, %v2053_v30, %v2801_v35  ;;  %v1554_v48 = vadd.f32 %v7217_v32, %v7312_v52  ;;  %v5313_v51 = vpack.c.bf16 %v2929_v45, %v2928_v27  ;;  %v2066_v57 = vadd.f32 %v7217_v32, %v7314_v53 }
 0x140   :  { %v5633_v54 = vpack.c.bf16 %v3057_v46, %v3056_v28  ;;  %v2934_v55 = vsel %vm2422_vm11, %v1562_v31, %v2678_v42  ;;  %vm2550_vm12 = vcmp.ge.f32.partialorder %v2074_v43, 0.0  ;;  %5918 = vst [vmem:[%s8158_s3 + $0x2c8] sm:$0xff] %v5638_v44   ;;  %v2806_v47 = vmul.f32 0.2, %v2074_v43  ;;  %v7390_v58 = vpop.f32.mrf.mxu0  ;;  %v7392_v52 = vpop.f32.mrf.mxu1 }
 0x141   :  { %vm2420_vm13 = vcmp.ge.f32.partialorder %v1554_v48, 0.0  ;;  %v2676_v56 = vmul.f32 0.2, %v1554_v48  ;;  %5853 = vst [vmem:[%s8158_s3 + $0xc0] sm:$0xff] %v5313_v51   ;;  %v1565_v59 = vadd.f32 %v7217_v32, %v7323_v62  ;;  %v2077_v60 = vadd.f32 %v7217_v32, %v7325_v63 }
 0x142   :  { %5917 = vst [vmem:[%s8158_s3 + $0x2c0] sm:$0xff] %v5633_v54   ;;  %v1557_v53 = vadd.f32 %v7217_v32, %v7327_v4  ;;  %v2069_v61 = vadd.f32 %v7217_v32, %v7329_v6  ;;  %v3062_v0 = vsel %vm2550_vm12, %v2074_v43, %v2806_v47  ;;  %vm2548_vm14 = vcmp.ge.f32.partialorder %v2066_v57, 0.0  ;;  %v7408_v5 = vpop.f32.mrf.mxu0  ;;  %v7410_v3 = vpop.f32.mrf.mxu1 }
 0x143   :  { %v2932_v1 = vsel %vm2420_vm13, %v1554_v48, %v2676_v56  ;;  %v2804_v2 = vmul.f32 0.2, %v2066_v57  ;;  %vm2423_vm15 = vcmp.ge.f32.partialorder %v1565_v59, 0.0  ;;  %v2679_v7 = vmul.f32 0.2, %v1565_v59 }
 0x144   :  { %vm2551_vm1 = vcmp.ge.f32.partialorder %v2077_v60, 0.0  ;;  %v2807_v62 = vmul.f32 0.2, %v2077_v60  ;;  %vm2421_vm2 = vcmp.ge.f32.partialorder %v1557_v53, 0.0  ;;  %v2677_v63 = vmul.f32 0.2, %v1557_v53  ;;  %v7412_v4 = vpop.f32.mrf.mxu0  ;;  %v7414_v9 = vpop.f32.mrf.mxu1 }
 0x145   :  { %v3060_v8 = vsel %vm2548_vm14, %v2066_v57, %v2804_v2  ;;  %vm2549_vm3 = vcmp.ge.f32.partialorder %v2069_v61, 0.0  ;;  %v2935_v6 = vsel %vm2423_vm15, %v1565_v59, %v2679_v7  ;;  %v2805_v11 = vmul.f32 0.2, %v2069_v61 }
 0x146   :  { %v3063_v10 = vsel %vm2551_vm1, %v2077_v60, %v2807_v62  ;;  %v1578_v12 = vadd.f32 %v7217_v32, %v7341_v14  ;;  %v5328_v13 = vpack.c.bf16 %v2935_v6, %v2934_v55  ;;  %v2933_v17 = vsel %vm2421_vm2, %v1557_v53, %v2677_v63  ;;  %v7420_v21 = vpop.f32.mrf.mxu0  ;;  %v7422_v18 = vpop.f32.mrf.mxu1 }
 0x147   :  { %v5648_v16 = vpack.c.bf16 %v3063_v10, %v3062_v0  ;;  %v2090_v20 = vadd.f32 %v7217_v32, %v7343_v15  ;;  %v5323_v22 = vpack.c.bf16 %v2933_v17, %v2932_v1  ;;  %v3061_v24 = vsel %vm2549_vm3, %v2069_v61, %v2805_v11 }
 0x148   :  { %vm2426_vm4 = vcmp.ge.f32.partialorder %v1578_v12, 0.0  ;;  %v2682_v25 = vmul.f32 0.2, %v1578_v12  ;;  %5856 = vst [vmem:[%s8158_s3 + $0xd8] sm:$0xff] %v5328_v13   ;;  %v5643_v14 = vpack.c.bf16 %v3061_v24, %v3060_v8  ;;  %v1570_v15 = vadd.f32 %v7217_v32, %v7351_v19  ;;  %v7432_v27 = vpop.f32.mrf.mxu0  ;;  %v7434_v28 = vpop.f32.mrf.mxu1 }
 0x149   :  { %5920 = vst [vmem:[%s8158_s3 + $0x2d8] sm:$0xff] %v5648_v16   ;;  %vm2554_vm5 = vcmp.ge.f32.partialorder %v2090_v20, 0.0  ;;  %v2810_v26 = vmul.f32 0.2, %v2090_v20  ;;  %5855 = vst [vmem:[%s8158_s3 + $0xd0] sm:$0xff] %v5323_v22   ;;  %v2082_v31 = vadd.f32 %v7217_v32, %v7353_v23  ;;  %v1581_v34 = vadd.f32 %v7217_v32, %v7366_v39 }
 0x14a   :  { %v2938_v30 = vsel %vm2426_vm4, %v1578_v12, %v2682_v25  ;;  %v2093_v37 = vadd.f32 %v7217_v32, %v7368_v33  ;;  %5919 = vst [vmem:[%s8158_s3 + $0x2d0] sm:$0xff] %v5643_v14   ;;  %vm2424_vm0 = vcmp.ge.f32.partialorder %v1570_v15, 0.0  ;;  %v2680_v29 = vmul.f32 0.2, %v1570_v15  ;;  %v7450_v35 = vpop.f32.mrf.mxu0  ;;  %v7452_v36 = vpop.f32.mrf.mxu1 }
 0x14b   :  { %v3066_v19 = vsel %vm2554_vm5, %v2090_v20, %v2810_v26  ;;  %v1573_v38 = vadd.f32 %v7217_v32, %v7370_v40  ;;  %vm2552_vm6 = vcmp.ge.f32.partialorder %v2082_v31, 0.0  ;;  %v2808_v23 = vmul.f32 0.2, %v2082_v31 }
 0x14c   :  { %vm2427_vm7 = vcmp.ge.f32.partialorder %v1581_v34, 0.0  ;;  %v2683_v39 = vmul.f32 0.2, %v1581_v34  ;;  %v2936_v42 = vsel %vm2424_vm0, %v1570_v15, %v2680_v29  ;;  %vm2555_vm8 = vcmp.ge.f32.partialorder %v2093_v37, 0.0  ;;  %v7454_v43 = vpop.f32.mrf.mxu0  ;;  %v7456_v44 = vpop.f32.mrf.mxu1 }
 0x14d   :  { %v2811_v33 = vmul.f32 0.2, %v2093_v37  ;;  %vm2425_vm9 = vcmp.ge.f32.partialorder %v1573_v38, 0.0  ;;  %v3064_v45 = vsel %vm2552_vm6, %v2082_v31, %v2808_v23  ;;  %v2681_v48 = vmul.f32 0.2, %v1573_v38 }
 0x14e   :  { %v2939_v46 = vsel %vm2427_vm7, %v1581_v34, %v2683_v39  ;;  %v2085_v40 = vadd.f32 %v7217_v32, %v7372_v41  ;;  %v1594_v55 = vadd.f32 %v7217_v32, %v7381_v49  ;;  %v2106_v47 = vadd.f32 %v7217_v32, %v7383_v50  ;;  %v7464_v56 = vpop.f32.mrf.mxu0  ;;  %v7466_v57 = vpop.f32.mrf.mxu1 }
 0x14f   :  { %v5338_v51 = vpack.c.bf16 %v2939_v46, %v2938_v30  ;;  %v3067_v54 = vsel %vm2555_vm8, %v2093_v37, %v2811_v33  ;;  %v2937_v60 = vsel %vm2425_vm9, %v1573_v38, %v2681_v48  ;;  %v1586_v2 = vadd.f32 %v7217_v32, %v7390_v58 }
 0x150   :  { %v5658_v59 = vpack.c.bf16 %v3067_v54, %v3066_v19  ;;  %vm2553_vm10 = vcmp.ge.f32.partialorder %v2085_v40, 0.0  ;;  %v2809_v53 = vmul.f32 0.2, %v2085_v40  ;;  %v5333_v41 = vpack.c.bf16 %v2937_v60, %v2936_v42  ;;  %v7471_v49 = vpop.f32.mrf.mxu0  ;;  %v7473_v0 = vpop.f32.mrf.mxu1 }
 0x151   :  { %5858 = vst [vmem:[%s8158_s3 + $0xe8] sm:$0xff] %v5338_v51   ;;  %vm2430_vm11 = vcmp.ge.f32.partialorder %v1594_v55, 0.0  ;;  %v2686_v61 = vmul.f32 0.2, %v1594_v55  ;;  %vm2558_vm12 = vcmp.ge.f32.partialorder %v2106_v47, 0.0  ;;  %v2098_v7 = vadd.f32 %v7217_v32, %v7392_v52 }
 0x152   :  { %5922 = vst [vmem:[%s8158_s3 + $0x2e8] sm:$0xff] %v5658_v59   ;;  %v3065_v50 = vsel %vm2553_vm10, %v2085_v40, %v2809_v53  ;;  %v2814_v1 = vmul.f32 0.2, %v2106_v47  ;;  %5857 = vst [vmem:[%s8158_s3 + $0xe0] sm:$0xff] %v5333_v41   ;;  %v1597_v63 = vadd.f32 %v7217_v32, %v7408_v5  ;;  %v2109_v6 = vadd.f32 %v7217_v32, %v7410_v3  ;;  %v7489_v10 = vpop.f32.mrf.mxu0  ;;  %v7491_v11 = vpop.f32.mrf.mxu1 }
 0x153   :  { %v5653_v62 = vpack.c.bf16 %v3065_v50, %v3064_v45  ;;  %v2942_v8 = vsel %vm2430_vm11, %v1594_v55, %v2686_v61  ;;  %vm2428_vm13 = vcmp.ge.f32.partialorder %v1586_v2, 0.0  ;;  %v2684_v12 = vmul.f32 0.2, %v1586_v2 }
 0x154   :  { %v3070_v58 = vsel %vm2558_vm12, %v2106_v47, %v2814_v1  ;;  %vm2556_vm14 = vcmp.ge.f32.partialorder %v2098_v7, 0.0  ;;  %v2812_v52 = vmul.f32 0.2, %v2098_v7  ;;  %vm2431_vm15 = vcmp.ge.f32.partialorder %v1597_v63, 0.0  ;;  %v7496_v5 = vpop.f32.mrf.mxu0  ;;  %v7498_v16 = vpop.f32.mrf.mxu1 }
 0x155   :  { %5921 = vst [vmem:[%s8158_s3 + $0x2e0] sm:$0xff] %v5653_v62   ;;  %v2687_v13 = vmul.f32 0.2, %v1597_v63  ;;  %vm2559_vm1 = vcmp.ge.f32.partialorder %v2109_v6, 0.0  ;;  %v2940_v3 = vsel %vm2428_vm13, %v1586_v2, %v2684_v12  ;;  %v2815_v17 = vmul.f32 0.2, %v2109_v6 }
 0x156   :  { %v1589_v20 = vadd.f32 %v7217_v32, %v7412_v4  ;;  %v2101_v22 = vadd.f32 %v7217_v32, %v7414_v9  ;;  %v3068_v24 = vsel %vm2556_vm14, %v2098_v7, %v2812_v52  ;;  %v1610_v14 = vadd.f32 %v7217_v32, %v7420_v21  ;;  %v7508_v15 = vpop.f32.mrf.mxu0  ;;  %v7510_v30 = vpop.f32.mrf.mxu1 }
 0x157   :  { %v2943_v25 = vsel %vm2431_vm15, %v1597_v63, %v2687_v13  ;;  %v2122_v26 = vadd.f32 %v7217_v32, %v7422_v18  ;;  %v3071_v34 = vsel %vm2559_vm1, %v2109_v6, %v2815_v17  ;;  %v1602_v42 = vadd.f32 %v7217_v32, %v7432_v27 }
 0x158   :  { %v5348_v31 = vpack.c.bf16 %v2943_v25, %v2942_v8  ;;  %vm2429_vm2 = vcmp.ge.f32.partialorder %v1589_v20, 0.0  ;;  %v2685_v37 = vmul.f32 0.2, %v1589_v20  ;;  %v5668_v4 = vpack.c.bf16 %v3071_v34, %v3070_v58  ;;  %v7512_v9 = vpop.f32.mrf.mxu0  ;;  %v7514_v29 = vpop.f32.mrf.mxu1 }
 0x159   :  { %vm2557_vm3 = vcmp.ge.f32.partialorder %v2101_v22, 0.0  ;;  %v2813_v19 = vmul.f32 0.2, %v2101_v22  ;;  %vm2434_vm4 = vcmp.ge.f32.partialorder %v1610_v14, 0.0  ;;  %v2690_v18 = vmul.f32 0.2, %v1610_v14 }
 0x15a   :  { %5860 = vst [vmem:[%s8158_s3 + $0xf8] sm:$0xff] %v5348_v31   ;;  %v2941_v21 = vsel %vm2429_vm2, %v1589_v20, %v2685_v37  ;;  %vm2562_vm5 = vcmp.ge.f32.partialorder %v2122_v26, 0.0  ;;  %v2818_v38 = vmul.f32 0.2, %v2122_v26  ;;  %5924 = vst [vmem:[%s8158_s3 + $0x2f8] sm:$0xff] %v5668_v4   ;;  %v2114_v33 = vadd.f32 %v7217_v32, %v7434_v28  ;;  %v7526_v45 = vpop.f32.mrf.mxu0  ;;  %v7528_v46 = vpop.f32.mrf.mxu1 }
 0x15b   :  { %v5343_v23 = vpack.c.bf16 %v2941_v21, %v2940_v3  ;;  %v3069_v39 = vsel %vm2557_vm3, %v2101_v22, %v2813_v19  ;;  %v2946_v40 = vsel %vm2434_vm4, %v1610_v14, %v2690_v18  ;;  %v1613_v54 = vadd.f32 %v7217_v32, %v7450_v35 }
 0x15c   :  { %v5663_v48 = vpack.c.bf16 %v3069_v39, %v3068_v24  ;;  %v3074_v51 = vsel %vm2562_vm5, %v2122_v26, %v2818_v38  ;;  %vm2432_vm0 = vcmp.ge.f32.partialorder %v1602_v42, 0.0  ;;  %v2688_v27 = vmul.f32 0.2, %v1602_v42  ;;  %v7536_v28 = vpop.f32.mrf.mxu0  ;;  %v7538_v47 = vpop.f32.mrf.mxu1 }
 0x15d   :  { %5859 = vst [vmem:[%s8158_s3 + $0xf0] sm:$0xff] %v5343_v23   ;;  %vm2560_vm6 = vcmp.ge.f32.partialorder %v2114_v33, 0.0  ;;  %v2816_v55 = vmul.f32 0.2, %v2114_v33  ;;  %vm2435_vm7 = vcmp.ge.f32.partialorder %v1613_v54, 0.0  ;;  %v2125_v35 = vadd.f32 %v7217_v32, %v7452_v36 }
 0x15e   :  { %5923 = vst [vmem:[%s8158_s3 + $0x2f0] sm:$0xff] %v5663_v48   ;;  %v2691_v59 = vmul.f32 0.2, %v1613_v54  ;;  %v1605_v60 = vadd.f32 %v7217_v32, %v7454_v43  ;;  %v2944_v53 = vsel %vm2432_vm0, %v1602_v42, %v2688_v27  ;;  %v2117_v61 = vadd.f32 %v7217_v32, %v7456_v44  ;;  %v7551_v1 = vpop.f32.mrf.mxu0  ;;  %v7553_v2 = vpop.f32.mrf.mxu1 }
 0x15f   :  { %v3072_v41 = vsel %vm2560_vm6, %v2114_v33, %v2816_v55  ;;  %v1626_v50 = vadd.f32 %v7217_v32, %v7464_v56  ;;  %vm2563_vm8 = vcmp.ge.f32.partialorder %v2125_v35, 0.0  ;;  %v2819_v62 = vmul.f32 0.2, %v2125_v35 }
 0x160   :  { %v2947_v7 = vsel %vm2435_vm7, %v1613_v54, %v2691_v59  ;;  %vm2433_vm9 = vcmp.ge.f32.partialorder %v1605_v60, 0.0  ;;  %v2689_v8 = vmul.f32 0.2, %v1605_v60  ;;  %vm2561_vm10 = vcmp.ge.f32.partialorder %v2117_v61, 0.0  ;;  %v7555_v63 = vpop.f32.mrf.mxu0  ;;  %v7557_v6 = vpop.f32.mrf.mxu1 }
 0x161   :  { %v5358_v36 = vpack.c.bf16 %v2947_v7, %v2946_v40  ;;  %v2817_v43 = vmul.f32 0.2, %v2117_v61  ;;  %v3075_v44 = vsel %vm2563_vm8, %v2125_v35, %v2819_v62  ;;  %vm2438_vm11 = vcmp.ge.f32.partialorder %v1626_v50, 0.0 }
 0x162   :  { %v2694_v58 = vmul.f32 0.2, %v1626_v50  ;;  %v2138_v56 = vadd.f32 %v7217_v32, %v7466_v57  ;;  %v5678_v12 = vpack.c.bf16 %v3075_v44, %v3074_v51  ;;  %v2945_v52 = vsel %vm2433_vm9, %v1605_v60, %v2689_v8  ;;  %v7566_v17 = vpop.f32.mrf.mxu0  ;;  %v7568_v20 = vpop.f32.mrf.mxu1 }
 0x163   :  { %5862 = vst [vmem:[%s8158_s3 + $0x108] sm:$0xff] %v5358_v36   ;;  %v3073_v13 = vsel %vm2561_vm10, %v2117_v61, %v2817_v43  ;;  %v1618_v3 = vadd.f32 %v7217_v32, %v7471_v49  ;;  %v5353_v22 = vpack.c.bf16 %v2945_v52, %v2944_v53  ;;  %v2130_v26 = vadd.f32 %v7217_v32, %v7473_v0 }
 0x164   :  { %v5673_v24 = vpack.c.bf16 %v3073_v13, %v3072_v41  ;;  %v2950_v25 = vsel %vm2438_vm11, %v1626_v50, %v2694_v58  ;;  %vm2566_vm12 = vcmp.ge.f32.partialorder %v2138_v56, 0.0  ;;  %5926 = vst [vmem:[%s8158_s3 + $0x308] sm:$0xff] %v5678_v12   ;;  %v2822_v57 = vmul.f32 0.2, %v2138_v56  ;;  %v7575_v31 = vpop.f32.mrf.mxu0  ;;  %v7577_v49 = vpop.f32.mrf.mxu1 }
 0x165   :  { %vm2436_vm13 = vcmp.ge.f32.partialorder %v1618_v3, 0.0  ;;  %v2692_v14 = vmul.f32 0.2, %v1618_v3  ;;  %5861 = vst [vmem:[%s8158_s3 + $0x100] sm:$0xff] %v5353_v22   ;;  %v1629_v34 = vadd.f32 %v7217_v32, %v7489_v10  ;;  %v2141_v37 = vadd.f32 %v7217_v32, %v7491_v11 }
 0x166   :  { %5925 = vst [vmem:[%s8158_s3 + $0x300] sm:$0xff] %v5673_v24   ;;  %v1621_v0 = vadd.f32 %v7217_v32, %v7496_v5  ;;  %v2133_v4 = vadd.f32 %v7217_v32, %v7498_v16  ;;  %v3078_v19 = vsel %vm2566_vm12, %v2138_v56, %v2822_v57  ;;  %vm2564_vm14 = vcmp.ge.f32.partialorder %v2130_v26, 0.0  ;;  %v7593_v38 = vpop.f32.mrf.mxu0  ;;  %v7595_v23 = vpop.f32.mrf.mxu1 }
 0x167   :  { %v2948_v21 = vsel %vm2436_vm13, %v1618_v3, %v2692_v14  ;;  %v2820_v18 = vmul.f32 0.2, %v2130_v26  ;;  %vm2439_vm15 = vcmp.ge.f32.partialorder %v1629_v34, 0.0  ;;  %v2695_v39 = vmul.f32 0.2, %v1629_v34 }
 0x168   :  { %vm2567_vm1 = vcmp.ge.f32.partialorder %v2141_v37, 0.0  ;;  %v2823_v10 = vmul.f32 0.2, %v2141_v37  ;;  %vm2437_vm2 = vcmp.ge.f32.partialorder %v1621_v0, 0.0  ;;  %v2693_v11 = vmul.f32 0.2, %v1621_v0  ;;  %v7597_v5 = vpop.f32.mrf.mxu0  ;;  %v7599_v33 = vpop.f32.mrf.mxu1 }
 0x169   :  { %v3076_v42 = vsel %vm2564_vm14, %v2130_v26, %v2820_v18  ;;  %vm2565_vm3 = vcmp.ge.f32.partialorder %v2133_v4, 0.0  ;;  %v2951_v16 = vsel %vm2439_vm15, %v1629_v34, %v2695_v39  ;;  %v2821_v40 = vmul.f32 0.2, %v2133_v4 }
 0x16a   :  { %v3079_v48 = vsel %vm2567_vm1, %v2141_v37, %v2823_v10  ;;  %v1642_v51 = vadd.f32 %v7217_v32, %v7508_v15  ;;  %v5368_v54 = vpack.c.bf16 %v2951_v16, %v2950_v25  ;;  %v2949_v55 = vsel %vm2437_vm2, %v1621_v0, %v2693_v11  ;;  %v7605_v35 = vpop.f32.mrf.mxu0  ;;  %v7607_v60 = vpop.f32.mrf.mxu1 }
 0x16b   :  { %v5688_v27 = vpack.c.bf16 %v3079_v48, %v3078_v19  ;;  %v2154_v59 = vadd.f32 %v7217_v32, %v7510_v30  ;;  %v5363_v53 = vpack.c.bf16 %v2949_v55, %v2948_v21  ;;  %v3077_v41 = vsel %vm2565_vm3, %v2133_v4, %v2821_v40 }
 0x16c   :  { %vm2442_vm4 = vcmp.ge.f32.partialorder %v1642_v51, 0.0  ;;  %v2698_v61 = vmul.f32 0.2, %v1642_v51  ;;  %5864 = vst [vmem:[%s8158_s3 + $0x118] sm:$0xff] %v5368_v54   ;;  %v5683_v15 = vpack.c.bf16 %v3077_v41, %v3076_v42  ;;  %v1634_v30 = vadd.f32 %v7217_v32, %v7512_v9  ;;  %v7617_v7 = vpop.f32.mrf.mxu0  ;;  %v7619_v62 = vpop.f32.mrf.mxu1 }
 0x16d   :  { %5928 = vst [vmem:[%s8158_s3 + $0x318] sm:$0xff] %v5688_v27   ;;  %vm2570_vm5 = vcmp.ge.f32.partialorder %v2154_v59, 0.0  ;;  %v2826_v50 = vmul.f32 0.2, %v2154_v59  ;;  %5863 = vst [vmem:[%s8158_s3 + $0x110] sm:$0xff] %v5363_v53   ;;  %v2146_v8 = vadd.f32 %v7217_v32, %v7514_v29  ;;  %v1645_v43 = vadd.f32 %v7217_v32, %v7526_v45 }
 0x16e   :  { %v2954_v36 = vsel %vm2442_vm4, %v1642_v51, %v2698_v61  ;;  %v2157_v44 = vadd.f32 %v7217_v32, %v7528_v46  ;;  %5927 = vst [vmem:[%s8158_s3 + $0x310] sm:$0xff] %v5683_v15   ;;  %vm2440_vm0 = vcmp.ge.f32.partialorder %v1634_v30, 0.0  ;;  %v2696_v58 = vmul.f32 0.2, %v1634_v30  ;;  %v7635_v12 = vpop.f32.mrf.mxu0  ;;  %v7637_v52 = vpop.f32.mrf.mxu1 }
 0x16f   :  { %v3082_v9 = vsel %vm2570_vm5, %v2154_v59, %v2826_v50  ;;  %v1637_v56 = vadd.f32 %v7217_v32, %v7536_v28  ;;  %vm2568_vm6 = vcmp.ge.f32.partialorder %v2146_v8, 0.0  ;;  %v2824_v29 = vmul.f32 0.2, %v2146_v8 }
 0x170   :  { %vm2443_vm7 = vcmp.ge.f32.partialorder %v1645_v43, 0.0  ;;  %v2699_v45 = vmul.f32 0.2, %v1645_v43  ;;  %v2952_v13 = vsel %vm2440_vm0, %v1634_v30, %v2696_v58  ;;  %vm2571_vm8 = vcmp.ge.f32.partialorder %v2157_v44, 0.0  ;;  %v7639_v3 = vpop.f32.mrf.mxu0  ;;  %v7641_v22 = vpop.f32.mrf.mxu1 }
 0x171   :  { %v2827_v46 = vmul.f32 0.2, %v2157_v44  ;;  %vm2441_vm9 = vcmp.ge.f32.partialorder %v1637_v56, 0.0  ;;  %v3080_v24 = vsel %vm2568_vm6, %v2146_v8, %v2824_v29  ;;  %v2697_v57 = vmul.f32 0.2, %v1637_v56 }
 0x172   :  { %v2955_v25 = vsel %vm2443_vm7, %v1645_v43, %v2699_v45  ;;  %v2149_v28 = vadd.f32 %v7217_v32, %v7538_v47  ;;  %v1658_v34 = vadd.f32 %v7217_v32, %v7551_v1  ;;  %v2170_v37 = vadd.f32 %v7217_v32, %v7553_v2  ;;  %v7649_v0 = vpop.f32.mrf.mxu0  ;;  %v7651_v4 = vpop.f32.mrf.mxu1  ;;  %v7694_v43 = vld [vmem:[%s8157_s2] ss:$0 sm:$0xff] }
 0x173   :  { %v5378_v14 = vpack.c.bf16 %v2955_v25, %v2954_v36  ;;  %v3083_v26 = vsel %vm2571_vm8, %v2157_v44, %v2827_v46  ;;  %v2953_v21 = vsel %vm2441_vm9, %v1637_v56, %v2697_v57  ;;  %v1650_v11 = vadd.f32 %v7217_v32, %v7555_v63 }
 0x174   :  { %v5698_v19 = vpack.c.bf16 %v3083_v26, %v3082_v9  ;;  %vm2569_vm10 = vcmp.ge.f32.partialorder %v2149_v28, 0.0  ;;  %v2825_v18 = vmul.f32 0.2, %v2149_v28  ;;  %v5373_v47 = vpack.c.bf16 %v2953_v21, %v2952_v13  ;;  %v7656_v1 = vpop.f32.mrf.mxu0  ;;  %v7658_v10 = vpop.f32.mrf.mxu1 }
 0x175   :  { %5866 = vst [vmem:[%s8158_s3 + $0x128] sm:$0xff] %v5378_v14   ;;  %vm2446_vm11 = vcmp.ge.f32.partialorder %v1658_v34, 0.0  ;;  %v2702_v39 = vmul.f32 0.2, %v1658_v34  ;;  %vm2574_vm12 = vcmp.ge.f32.partialorder %v2170_v37, 0.0  ;;  %v2162_v16 = vadd.f32 %v7217_v32, %v7557_v6 }
 0x176   :  { %5930 = vst [vmem:[%s8158_s3 + $0x328] sm:$0xff] %v5698_v19   ;;  %v3081_v2 = vsel %vm2569_vm10, %v2149_v28, %v2825_v18  ;;  %v2830_v42 = vmul.f32 0.2, %v2170_v37  ;;  %5865 = vst [vmem:[%s8158_s3 + $0x120] sm:$0xff] %v5373_v47   ;;  %v1661_v51 = vadd.f32 %v7217_v32, %v7566_v17  ;;  %v2173_v54 = vadd.f32 %v7217_v32, %v7568_v20  ;;  %v7674_v27 = vpop.f32.mrf.mxu0  ;;  %v7676_v55 = vpop.f32.mrf.mxu1 }
 0x177   :  { %v5693_v48 = vpack.c.bf16 %v3081_v2, %v3080_v24  ;;  %v2958_v40 = vsel %vm2446_vm11, %v1658_v34, %v2702_v39  ;;  %vm2444_vm13 = vcmp.ge.f32.partialorder %v1650_v11, 0.0  ;;  %v2700_v59 = vmul.f32 0.2, %v1650_v11 }
 0x178   :  { %v3086_v63 = vsel %vm2574_vm12, %v2170_v37, %v2830_v42  ;;  %vm2572_vm14 = vcmp.ge.f32.partialorder %v2162_v16, 0.0  ;;  %v2828_v6 = vmul.f32 0.2, %v2162_v16  ;;  %vm2447_vm15 = vcmp.ge.f32.partialorder %v1661_v51, 0.0  ;;  %v7681_v17 = vpop.f32.mrf.mxu0  ;;  %v7683_v41 = vpop.f32.mrf.mxu1 }
 0x179   :  { %5929 = vst [vmem:[%s8158_s3 + $0x320] sm:$0xff] %v5693_v48   ;;  %v2703_v53 = vmul.f32 0.2, %v1661_v51  ;;  %vm2575_vm1 = vcmp.ge.f32.partialorder %v2173_v54, 0.0  ;;  %v2956_v20 = vsel %vm2444_vm13, %v1650_v11, %v2700_v59  ;;  %v2831_v61 = vmul.f32 0.2, %v2173_v54 }
 0x17a   :  { %v1653_v15 = vadd.f32 %v7217_v32, %v7575_v31  ;;  %v2165_v50 = vadd.f32 %v7217_v32, %v7577_v49  ;;  %v3084_v30 = vsel %vm2572_vm14, %v2162_v16, %v2828_v6  ;;  %v1674_v8 = vadd.f32 %v7217_v32, %v7593_v38  ;;  %v7698_v9 = vpop.f32.mrf.mxu0  ;;  %v7700_v58 = vpop.f32.mrf.mxu1 }
 0x17b   :  { %v2959_v36 = vsel %vm2447_vm15, %v1661_v51, %v2703_v53  ;;  %v2186_v44 = vadd.f32 %v7694_v43, %v7595_v23  ;;  %v3087_v56 = vsel %vm2575_vm1, %v2173_v54, %v2831_v61  ;;  %v1666_v57 = vadd.f32 %v7694_v43, %v7597_v5 }
 0x17c   :  { %v5388_v31 = vpack.c.bf16 %v2959_v36, %v2958_v40  ;;  %vm2445_vm2 = vcmp.ge.f32.partialorder %v1653_v15, 0.0  ;;  %v2701_v49 = vmul.f32 0.2, %v1653_v15  ;;  %v5708_v29 = vpack.c.bf16 %v3087_v56, %v3086_v63  ;;  %v7702_v32 = vpop.f32.mrf.mxu0  ;;  %v7704_v38 = vpop.f32.mrf.mxu1 }
 0x17d   :  { %vm2573_vm3 = vcmp.ge.f32.partialorder %v2165_v50, 0.0  ;;  %v2829_v45 = vmul.f32 0.2, %v2165_v50  ;;  %vm2450_vm4 = vcmp.ge.f32.partialorder %v1674_v8, 0.0  ;;  %v2706_v13 = vmul.f32 0.2, %v1674_v8 }
 0x17e   :  { %5868 = vst [vmem:[%s8158_s3 + $0x138] sm:$0xff] %v5388_v31   ;;  %v2957_v23 = vsel %vm2445_vm2, %v1653_v15, %v2701_v49  ;;  %vm2578_vm5 = vcmp.ge.f32.partialorder %v2186_v44, 0.0  ;;  %v2834_v46 = vmul.f32 0.2, %v2186_v44  ;;  %5932 = vst [vmem:[%s8158_s3 + $0x338] sm:$0xff] %v5708_v29   ;;  %v2178_v28 = vadd.f32 %v7694_v43, %v7599_v33  ;;  %v7716_v14 = vpop.f32.mrf.mxu0  ;;  %v7718_v26 = vpop.f32.mrf.mxu1 }
 0x17f   :  { %v5383_v24 = vpack.c.bf16 %v2957_v23, %v2956_v20  ;;  %v3085_v25 = vsel %vm2573_vm3, %v2165_v50, %v2829_v45  ;;  %v2962_v37 = vsel %vm2450_vm4, %v1674_v8, %v2706_v13  ;;  %v1677_v21 = vadd.f32 %v7694_v43, %v7605_v35 }
 0x180   :  { %v5703_v34 = vpack.c.bf16 %v3085_v25, %v3084_v30  ;;  %v3090_v19 = vsel %vm2578_vm5, %v2186_v44, %v2834_v46  ;;  %vm2448_vm0 = vcmp.ge.f32.partialorder %v1666_v57, 0.0  ;;  %v2704_v5 = vmul.f32 0.2, %v1666_v57  ;;  %v7726_v33 = vpop.f32.mrf.mxu0  ;;  %v7728_v47 = vpop.f32.mrf.mxu1 }
 0x181   :  { %5867 = vst [vmem:[%s8158_s3 + $0x130] sm:$0xff] %v5383_v24   ;;  %vm2576_vm6 = vcmp.ge.f32.partialorder %v2178_v28, 0.0  ;;  %v2832_v18 = vmul.f32 0.2, %v2178_v28  ;;  %vm2451_vm7 = vcmp.ge.f32.partialorder %v1677_v21, 0.0  ;;  %v2189_v35 = vadd.f32 %v7694_v43, %v7607_v60 }
 0x182   :  { %5931 = vst [vmem:[%s8158_s3 + $0x330] sm:$0xff] %v5703_v34   ;;  %v2707_v39 = vmul.f32 0.2, %v1677_v21  ;;  %v1669_v2 = vadd.f32 %v7694_v43, %v7617_v7  ;;  %v2960_v42 = vsel %vm2448_vm0, %v1666_v57, %v2704_v5  ;;  %v2181_v16 = vadd.f32 %v7694_v43, %v7619_v62  ;;  %v7741_v40 = vpop.f32.mrf.mxu0  ;;  %v7743_v51 = vpop.f32.mrf.mxu1 }
 0x183   :  { %v3088_v11 = vsel %vm2576_vm6, %v2178_v28, %v2832_v18  ;;  %v1690_v48 = vadd.f32 %v7694_v43, %v7635_v12  ;;  %vm2579_vm8 = vcmp.ge.f32.partialorder %v2189_v35, 0.0  ;;  %v2835_v63 = vmul.f32 0.2, %v2189_v35 }
 0x184   :  { %v2963_v54 = vsel %vm2451_vm7, %v1677_v21, %v2707_v39  ;;  %vm2449_vm9 = vcmp.ge.f32.partialorder %v1669_v2, 0.0  ;;  %v2705_v59 = vmul.f32 0.2, %v1669_v2  ;;  %vm2577_vm10 = vcmp.ge.f32.partialorder %v2181_v16, 0.0  ;;  %v7745_v6 = vpop.f32.mrf.mxu0  ;;  %v7747_v53 = vpop.f32.mrf.mxu1 }
 0x185   :  { %v5398_v60 = vpack.c.bf16 %v2963_v54, %v2962_v37  ;;  %v2833_v7 = vmul.f32 0.2, %v2181_v16  ;;  %v3091_v62 = vsel %vm2579_vm8, %v2189_v35, %v2835_v63  ;;  %vm2454_vm11 = vcmp.ge.f32.partialorder %v1690_v48, 0.0 }
 0x186   :  { %v2710_v20 = vmul.f32 0.2, %v1690_v48  ;;  %v2202_v12 = vadd.f32 %v7694_v43, %v7637_v52  ;;  %v5718_v61 = vpack.c.bf16 %v3091_v62, %v3090_v19  ;;  %v2961_v15 = vsel %vm2449_vm9, %v1669_v2, %v2705_v59  ;;  %v7756_v36 = vpop.f32.mrf.mxu0  ;;  %v7758_v8 = vpop.f32.mrf.mxu1 }
 0x187   :  { %5870 = vst [vmem:[%s8158_s3 + $0x148] sm:$0xff] %v5398_v60   ;;  %v3089_v50 = vsel %vm2577_vm10, %v2181_v16, %v2833_v7  ;;  %v1682_v30 = vadd.f32 %v7694_v43, %v7639_v3  ;;  %v5393_v44 = vpack.c.bf16 %v2961_v15, %v2960_v42  ;;  %v2194_v29 = vadd.f32 %v7694_v43, %v7641_v22 }
 0x188   :  { %v5713_v31 = vpack.c.bf16 %v3089_v50, %v3088_v11  ;;  %v2966_v56 = vsel %vm2454_vm11, %v1690_v48, %v2710_v20  ;;  %vm2582_vm12 = vcmp.ge.f32.partialorder %v2202_v12, 0.0  ;;  %5934 = vst [vmem:[%s8158_s3 + $0x348] sm:$0xff] %v5718_v61   ;;  %v2838_v52 = vmul.f32 0.2, %v2202_v12  ;;  %v7765_v45 = vpop.f32.mrf.mxu0  ;;  %v7767_v3 = vpop.f32.mrf.mxu1 }
 0x189   :  { %vm2452_vm13 = vcmp.ge.f32.partialorder %v1682_v30, 0.0  ;;  %v2708_v49 = vmul.f32 0.2, %v1682_v30  ;;  %5869 = vst [vmem:[%s8158_s3 + $0x140] sm:$0xff] %v5393_v44   ;;  %v1693_v23 = vadd.f32 %v7694_v43, %v7649_v0  ;;  %v2205_v13 = vadd.f32 %v7694_v43, %v7651_v4 }
 0x18a   :  { %5933 = vst [vmem:[%s8158_s3 + $0x340] sm:$0xff] %v5713_v31   ;;  %v1685_v22 = vadd.f32 %v7694_v43, %v7656_v1  ;;  %v2197_v46 = vadd.f32 %v7694_v43, %v7658_v10  ;;  %v3094_v24 = vsel %vm2582_vm12, %v2202_v12, %v2838_v52  ;;  %vm2580_vm14 = vcmp.ge.f32.partialorder %v2194_v29, 0.0  ;;  %v7783_v28 = vpop.f32.mrf.mxu0  ;;  %v7785_v34 = vpop.f32.mrf.mxu1 }
 0x18b   :  { %v2964_v25 = vsel %vm2452_vm13, %v1682_v30, %v2708_v49  ;;  %v2836_v57 = vmul.f32 0.2, %v2194_v29  ;;  %vm2455_vm15 = vcmp.ge.f32.partialorder %v1693_v23, 0.0  ;;  %v2711_v37 = vmul.f32 0.2, %v1693_v23 }
 0x18c   :  { %vm2583_vm1 = vcmp.ge.f32.partialorder %v2205_v13, 0.0  ;;  %v2839_v0 = vmul.f32 0.2, %v2205_v13  ;;  %vm2453_vm2 = vcmp.ge.f32.partialorder %v1685_v22, 0.0  ;;  %v2709_v4 = vmul.f32 0.2, %v1685_v22  ;;  %v7787_v1 = vpop.f32.mrf.mxu0  ;;  %v7789_v21 = vpop.f32.mrf.mxu1 }
 0x18d   :  { %v3092_v19 = vsel %vm2580_vm14, %v2194_v29, %v2836_v57  ;;  %vm2581_vm3 = vcmp.ge.f32.partialorder %v2197_v46, 0.0  ;;  %v2967_v10 = vsel %vm2455_vm15, %v1693_v23, %v2711_v37  ;;  %v2837_v18 = vmul.f32 0.2, %v2197_v46 }
 0x18e   :  { %v3095_v5 = vsel %vm2583_vm1, %v2205_v13, %v2839_v0  ;;  %v1706_v39 = vadd.f32 %v7694_v43, %v7674_v27  ;;  %v5408_v35 = vpack.c.bf16 %v2967_v10, %v2966_v56  ;;  %v2965_v42 = vsel %vm2453_vm2, %v1685_v22, %v2709_v4  ;;  %v7795_v16 = vpop.f32.mrf.mxu0  ;;  %v7797_v60 = vpop.f32.mrf.mxu1 }
 0x18f   :  { %v5728_v2 = vpack.c.bf16 %v3095_v5, %v3094_v24  ;;  %v2218_v11 = vadd.f32 %v7694_v43, %v7676_v55  ;;  %v5403_v48 = vpack.c.bf16 %v2965_v42, %v2964_v25  ;;  %v3093_v54 = vsel %vm2581_vm3, %v2197_v46, %v2837_v18 }
 0x190   :  { %vm2458_vm4 = vcmp.ge.f32.partialorder %v1706_v39, 0.0  ;;  %v2714_v63 = vmul.f32 0.2, %v1706_v39  ;;  %5872 = vst [vmem:[%s8158_s3 + $0x158] sm:$0xff] %v5408_v35   ;;  %v5723_v27 = vpack.c.bf16 %v3093_v54, %v3092_v19  ;;  %v1698_v55 = vadd.f32 %v7694_v43, %v7681_v17  ;;  %v7807_v7 = vpop.f32.mrf.mxu0  ;;  %v7818_v15 = vpop.f32.mrf.mxu1 }
 0x191   :  { %5936 = vst [vmem:[%s8158_s3 + $0x358] sm:$0xff] %v5728_v2   ;;  %vm2586_vm5 = vcmp.ge.f32.partialorder %v2218_v11, 0.0  ;;  %v2842_v59 = vmul.f32 0.2, %v2218_v11  ;;  %5871 = vst [vmem:[%s8158_s3 + $0x150] sm:$0xff] %v5403_v48   ;;  %v2210_v20 = vadd.f32 %v7694_v43, %v7683_v41  ;;  %v1709_v12 = vadd.f32 %v7694_v43, %v7698_v9 }
 0x192   :  { %v2970_v62 = vsel %vm2458_vm4, %v1706_v39, %v2714_v63  ;;  %v2221_v61 = vadd.f32 %v7694_v43, %v7700_v58  ;;  %5935 = vst [vmem:[%s8158_s3 + $0x350] sm:$0xff] %v5723_v27   ;;  %vm2456_vm0 = vcmp.ge.f32.partialorder %v1698_v55, 0.0  ;;  %v2712_v50 = vmul.f32 0.2, %v1698_v55  ;;  %v7825_v44 = vpop.f32.mrf.mxu0  ;;  %v7827_v31 = vpop.f32.mrf.mxu1 }
 0x193   :  { %v3098_v17 = vsel %vm2586_vm5, %v2218_v11, %v2842_v59  ;;  %v1701_v30 = vadd.f32 %v7694_v43, %v7702_v32  ;;  %vm2584_vm6 = vcmp.ge.f32.partialorder %v2210_v20, 0.0  ;;  %v2840_v41 = vmul.f32 0.2, %v2210_v20 }
 0x194   :  { %vm2459_vm7 = vcmp.ge.f32.partialorder %v1709_v12, 0.0  ;;  %v2715_v9 = vmul.f32 0.2, %v1709_v12  ;;  %v2968_v58 = vsel %vm2456_vm0, %v1698_v55, %v2712_v50  ;;  %vm2587_vm8 = vcmp.ge.f32.partialorder %v2221_v61, 0.0  ;;  %v7829_v52 = vpop.f32.mrf.mxu0  ;;  %v7833_v13 = vpop.f32.mrf.mxu1 }
 0x195   :  { %v2843_v56 = vmul.f32 0.2, %v2221_v61  ;;  %vm2457_vm9 = vcmp.ge.f32.partialorder %v1701_v30, 0.0  ;;  %v3096_v49 = vsel %vm2584_vm6, %v2210_v20, %v2840_v41  ;;  %v2713_v23 = vmul.f32 0.2, %v1701_v30 }
 0x196   :  { %v2971_v29 = vsel %vm2459_vm7, %v1709_v12, %v2715_v9  ;;  %v2213_v32 = vadd.f32 %v7694_v43, %v7704_v38  ;;  %v1722_v24 = vadd.f32 %v7694_v43, %v7716_v14  ;;  %v2234_v25 = vadd.f32 %v7694_v43, %v7718_v26 }
 0x197   :  { %v5418_v22 = vpack.c.bf16 %v2971_v29, %v2970_v62  ;;  %v3099_v46 = vsel %vm2587_vm8, %v2221_v61, %v2843_v56  ;;  %v7839_v57 = vpop.f32.mrf.mxu0  ;;  %v2969_v0 = vsel %vm2457_vm9, %v1701_v30, %v2713_v23  ;;  %v7841_v4 = vpop.f32.mrf.mxu1  ;;  %v1714_v18 = vadd.f32 %v7694_v43, %v7726_v33 }
 0x198   :  { %v5738_v37 = vpack.c.bf16 %v3099_v46, %v3098_v17  ;;  %vm2585_vm10 = vcmp.ge.f32.partialorder %v2213_v32, 0.0  ;;  %v2841_v19 = vmul.f32 0.2, %v2213_v32  ;;  %v5413_v38 = vpack.c.bf16 %v2969_v0, %v2968_v58 }
 0x199   :  { %5874 = vst [vmem:[%s8158_s3 + $0x168] sm:$0xff] %v5418_v22   ;;  %vm2462_vm11 = vcmp.ge.f32.partialorder %v1722_v24, 0.0  ;;  %v2718_v10 = vmul.f32 0.2, %v1722_v24  ;;  %vm2590_vm12 = vcmp.ge.f32.partialorder %v2234_v25, 0.0  ;;  %v7846_v14 = vpop.f32.mrf.mxu0  ;;  %v2226_v39 = vadd.f32 %v7694_v43, %v7728_v47  ;;  %v7855_v35 = vpop.f32.mrf.mxu1 }
 0x19a   :  { %5938 = vst [vmem:[%s8158_s3 + $0x368] sm:$0xff] %v5738_v37   ;;  %v3097_v26 = vsel %vm2585_vm10, %v2213_v32, %v2841_v19  ;;  %v2846_v5 = vmul.f32 0.2, %v2234_v25  ;;  %5873 = vst [vmem:[%s8158_s3 + $0x160] sm:$0xff] %v5413_v38   ;;  %v1725_v11 = vadd.f32 %v7694_v43, %v7741_v40  ;;  %v2237_v48 = vadd.f32 %v7694_v43, %v7743_v51 }
 0x19b   :  { %v5733_v2 = vpack.c.bf16 %v3097_v26, %v3096_v49  ;;  %v2974_v42 = vsel %vm2462_vm11, %v1722_v24, %v2718_v10  ;;  %v7864_v54 = vpop.f32.mrf.mxu0  ;;  %vm2460_vm13 = vcmp.ge.f32.partialorder %v1714_v18, 0.0  ;;  %v2716_v63 = vmul.f32 0.2, %v1714_v18  ;;  %v7866_v47 = vpop.f32.mrf.mxu1 }
 0x19c   :  { %v3102_v33 = vsel %vm2590_vm12, %v2234_v25, %v2846_v5  ;;  %vm2588_vm14 = vcmp.ge.f32.partialorder %v2226_v39, 0.0  ;;  %v2844_v27 = vmul.f32 0.2, %v2226_v39  ;;  %vm2463_vm15 = vcmp.ge.f32.partialorder %v1725_v11, 0.0 }
 0x19d   :  { %5937 = vst [vmem:[%s8158_s3 + $0x360] sm:$0xff] %v5733_v2   ;;  %v2719_v59 = vmul.f32 0.2, %v1725_v11  ;;  %vm2591_vm1 = vcmp.ge.f32.partialorder %v2237_v48, 0.0  ;;  %v7871_v40 = vpop.f32.mrf.mxu0  ;;  %v2972_v55 = vsel %vm2460_vm13, %v1714_v18, %v2716_v63  ;;  %v2847_v51 = vmul.f32 0.2, %v2237_v48  ;;  %v7877_v12 = vpop.f32.mrf.mxu1 }
 0x19e   :  { %v1717_v62 = vadd.f32 %v7694_v43, %v7745_v6  ;;  %v2229_v20 = vadd.f32 %v7694_v43, %v7747_v53  ;;  %v3100_v61 = vsel %vm2588_vm14, %v2226_v39, %v2844_v27  ;;  %v1738_v50 = vadd.f32 %v7694_v43, %v7756_v36 }
 0x19f   :  { %v2975_v17 = vsel %vm2463_vm15, %v1725_v11, %v2719_v59  ;;  %v2250_v30 = vadd.f32 %v7694_v43, %v7758_v8  ;;  %v7883_v41 = vpop.f32.mrf.mxu0  ;;  %v3103_v58 = vsel %vm2591_vm1, %v2237_v48, %v2847_v51  ;;  %v7885_v6 = vpop.f32.mrf.mxu1  ;;  %v1730_v24 = vadd.f32 %v7694_v43, %v7765_v45 }
 0x1a0   :  { %v5428_v9 = vpack.c.bf16 %v2975_v17, %v2974_v42  ;;  %vm2461_vm2 = vcmp.ge.f32.partialorder %v1717_v62, 0.0  ;;  %v2717_v56 = vmul.f32 0.2, %v1717_v62  ;;  %v5748_v49 = vpack.c.bf16 %v3103_v58, %v3102_v33 }
 0x1a1   :  { %vm2589_vm3 = vcmp.ge.f32.partialorder %v2229_v20, 0.0  ;;  %v2845_v53 = vmul.f32 0.2, %v2229_v20  ;;  %vm2466_vm4 = vcmp.ge.f32.partialorder %v1738_v50, 0.0  ;;  %v7887_v29 = vpop.f32.mrf.mxu0  ;;  %v2722_v8 = vmul.f32 0.2, %v1738_v50  ;;  %v7892_v32 = vpop.f32.mrf.mxu1 }
 0x1a2   :  { %5876 = vst [vmem:[%s8158_s3 + $0x178] sm:$0xff] %v5428_v9   ;;  %v2973_v36 = vsel %vm2461_vm2, %v1717_v62, %v2717_v56  ;;  %vm2594_vm5 = vcmp.ge.f32.partialorder %v2250_v30, 0.0  ;;  %v2850_v23 = vmul.f32 0.2, %v2250_v30  ;;  %5940 = vst [vmem:[%s8158_s3 + $0x378] sm:$0xff] %v5748_v49   ;;  %v2242_v25 = vadd.f32 %v7694_v43, %v7767_v3 }
 0x1a3   :  { %v5423_v22 = vpack.c.bf16 %v2973_v36, %v2972_v55  ;;  %v3101_v46 = vsel %vm2589_vm3, %v2229_v20, %v2845_v53  ;;  %v7901_v37 = vpop.f32.mrf.mxu0  ;;  %v2978_v19 = vsel %vm2466_vm4, %v1738_v50, %v2722_v8  ;;  %v1741_v10 = vadd.f32 %v7694_v43, %v7783_v28  ;;  %v7905_v26 = vpop.f32.mrf.mxu1 }
 0x1a4   :  { %v5743_v0 = vpack.c.bf16 %v3101_v46, %v3100_v61  ;;  %v3106_v38 = vsel %vm2594_vm5, %v2250_v30, %v2850_v23  ;;  %vm2464_vm0 = vcmp.ge.f32.partialorder %v1730_v24, 0.0  ;;  %v2720_v5 = vmul.f32 0.2, %v1730_v24 }
 0x1a5   :  { %5875 = vst [vmem:[%s8158_s3 + $0x170] sm:$0xff] %v5423_v22   ;;  %vm2592_vm6 = vcmp.ge.f32.partialorder %v2242_v25, 0.0  ;;  %v2848_v45 = vmul.f32 0.2, %v2242_v25  ;;  %v7910_v18 = vpop.f32.mrf.mxu0  ;;  %vm2467_vm7 = vcmp.ge.f32.partialorder %v1741_v10, 0.0  ;;  %v2253_v28 = vadd.f32 %v7694_v43, %v7785_v34  ;;  %v7919_v2 = vpop.f32.mrf.mxu1 }
 0x1a6   :  { %5939 = vst [vmem:[%s8158_s3 + $0x370] sm:$0xff] %v5743_v0   ;;  %v2723_v3 = vmul.f32 0.2, %v1741_v10  ;;  %v1733_v39 = vadd.f32 %v7694_v43, %v7787_v1  ;;  %v2976_v42 = vsel %vm2464_vm0, %v1730_v24, %v2720_v5  ;;  %v2245_v48 = vadd.f32 %v7694_v43, %v7789_v21 }
 0x1a7   :  { %v3104_v11 = vsel %vm2592_vm6, %v2242_v25, %v2848_v45  ;;  %v1754_v33 = vadd.f32 %v7694_v43, %v7795_v16  ;;  %v7925_v63 = vpop.f32.mrf.mxu0  ;;  %vm2595_vm8 = vcmp.ge.f32.partialorder %v2253_v28, 0.0  ;;  %v2851_v59 = vmul.f32 0.2, %v2253_v28  ;;  %v7927_v34 = vpop.f32.mrf.mxu1 }
 0x1a8   :  { %v2979_v27 = vsel %vm2467_vm7, %v1741_v10, %v2723_v3  ;;  %vm2465_vm9 = vcmp.ge.f32.partialorder %v1733_v39, 0.0  ;;  %v2721_v1 = vmul.f32 0.2, %v1733_v39  ;;  %vm2593_vm10 = vcmp.ge.f32.partialorder %v2245_v48, 0.0 }
 0x1a9   :  { %v5438_v55 = vpack.c.bf16 %v2979_v27, %v2978_v19  ;;  %v2849_v51 = vmul.f32 0.2, %v2245_v48  ;;  %v3107_v62 = vsel %vm2595_vm8, %v2253_v28, %v2851_v59  ;;  %vm2470_vm11 = vcmp.ge.f32.partialorder %v1754_v33, 0.0  ;;  %v7936_v30 = vpop.f32.mrf.mxu0  ;;  %v7938_v9 = vpop.f32.mrf.mxu1 }
 0x1aa   :  { %v2726_v20 = vmul.f32 0.2, %v1754_v33  ;;  %v2266_v21 = vadd.f32 %v7694_v43, %v7797_v60  ;;  %v5758_v16 = vpack.c.bf16 %v3107_v62, %v3106_v38  ;;  %v2977_v61 = vsel %vm2465_vm9, %v1733_v39, %v2721_v1 }
 0x1ab   :  { %5878 = vst [vmem:[%s8158_s3 + $0x188] sm:$0xff] %v5438_v55   ;;  %v3105_v17 = vsel %vm2593_vm10, %v2245_v48, %v2849_v51  ;;  %v1746_v50 = vadd.f32 %v7694_v43, %v7807_v7  ;;  %v5433_v58 = vpack.c.bf16 %v2977_v61, %v2976_v42  ;;  %v2258_v36 = vadd.f32 %v7694_v43, %v7818_v15  ;;  %v7959_v25 = vpop.f32.mrf.mxu0  ;;  %v7961_v0 = vpop.f32.mrf.mxu1 }
 0x1ac   :  { %v5753_v56 = vpack.c.bf16 %v3105_v17, %v3104_v11  ;;  %v2982_v49 = vsel %vm2470_vm11, %v1754_v33, %v2726_v20  ;;  %vm2598_vm12 = vcmp.ge.f32.partialorder %v2266_v21, 0.0  ;;  %5942 = vst [vmem:[%s8158_s3 + $0x388] sm:$0xff] %v5758_v16   ;;  %v2854_v60 = vmul.f32 0.2, %v2266_v21 }
 0x1ad   :  { %vm2468_vm13 = vcmp.ge.f32.partialorder %v1746_v50, 0.0  ;;  %v2724_v53 = vmul.f32 0.2, %v1746_v50  ;;  %5877 = vst [vmem:[%s8158_s3 + $0x180] sm:$0xff] %v5433_v58   ;;  %v1757_v7 = vadd.f32 %v7694_v43, %v7825_v44  ;;  %v2269_v8 = vadd.f32 %v7694_v43, %v7827_v31  ;;  %v7967_v42 = vpop.f32.mrf.mxu0  ;;  %v7969_v11 = vpop.f32.mrf.mxu1 }
 0x1ae   :  { %5941 = vst [vmem:[%s8158_s3 + $0x380] sm:$0xff] %v5753_v56   ;;  %v1749_v23 = vadd.f32 %v7694_v43, %v7829_v52  ;;  %v2261_v15 = vadd.f32 %v7694_v43, %v7833_v13  ;;  %v3110_v22 = vsel %vm2598_vm12, %v2266_v21, %v2854_v60  ;;  %vm2596_vm14 = vcmp.ge.f32.partialorder %v2258_v36, 0.0 }
 0x1af   :  { %v2980_v46 = vsel %vm2468_vm13, %v1746_v50, %v2724_v53  ;;  %v2852_v24 = vmul.f32 0.2, %v2258_v36  ;;  %vm2471_vm15 = vcmp.ge.f32.partialorder %v1757_v7, 0.0  ;;  %v2727_v19 = vmul.f32 0.2, %v1757_v7  ;;  %v7993_v16 = vpop.f32.mrf.mxu0 }
 0x1b0   :  { %vm2599_vm1 = vcmp.ge.f32.partialorder %v2269_v8, 0.0  ;;  %v2855_v44 = vmul.f32 0.2, %v2269_v8  ;;  %vm2469_vm2 = vcmp.ge.f32.partialorder %v1749_v23, 0.0  ;;  %v2725_v31 = vmul.f32 0.2, %v1749_v23  ;;  %v7995_v61 = vpop.f32.mrf.mxu1 }
 0x1b1   :  { %v3108_v38 = vsel %vm2596_vm14, %v2258_v36, %v2852_v24  ;;  %vm2597_vm3 = vcmp.ge.f32.partialorder %v2261_v15, 0.0  ;;  %v2983_v52 = vsel %vm2471_vm15, %v1757_v7, %v2727_v19  ;;  %v2853_v5 = vmul.f32 0.2, %v2261_v15  ;;  %v8003_v7 = vpop.f32.mrf.mxu0 }
 0x1b2   :  { %v3111_v10 = vsel %vm2599_vm1, %v2269_v8, %v2855_v44  ;;  %v1770_v13 = vadd.f32 %v7694_v43, %v7839_v57  ;;  %v5448_v45 = vpack.c.bf16 %v2983_v52, %v2982_v49  ;;  %v2981_v28 = vsel %vm2469_vm2, %v1749_v23, %v2725_v31  ;;  %v8005_v8 = vpop.f32.mrf.mxu1 }
 0x1b3   :  { %v5768_v3 = vpack.c.bf16 %v3111_v10, %v3110_v22  ;;  %v2282_v39 = vadd.f32 %v7694_v43, %v7841_v4  ;;  %v5443_v48 = vpack.c.bf16 %v2981_v28, %v2980_v46  ;;  %v3109_v33 = vsel %vm2597_vm3, %v2261_v15, %v2853_v5  ;;  %v8024_v10 = vpop.f32.mrf.mxu0 }
 0x1b4   :  { %vm2474_vm4 = vcmp.ge.f32.partialorder %v1770_v13, 0.0  ;;  %v2730_v27 = vmul.f32 0.2, %v1770_v13  ;;  %5880 = vst [vmem:[%s8158_s3 + $0x198] sm:$0xff] %v5448_v45   ;;  %v5763_v57 = vpack.c.bf16 %v3109_v33, %v3108_v38  ;;  %v1762_v4 = vadd.f32 %v7694_v43, %v7846_v14  ;;  %v8026_v5 = vpop.f32.mrf.mxu1 }
 0x1b5   :  { %5944 = vst [vmem:[%s8158_s3 + $0x398] sm:$0xff] %v5768_v3   ;;  %vm2602_vm5 = vcmp.ge.f32.partialorder %v2282_v39, 0.0  ;;  %v2858_v59 = vmul.f32 0.2, %v2282_v39  ;;  %5879 = vst [vmem:[%s8158_s3 + $0x190] sm:$0xff] %v5443_v48   ;;  %v2274_v1 = vadd.f32 %v7694_v43, %v7855_v35  ;;  %v1773_v51 = vadd.f32 %v7694_v43, %v7864_v54 }
 0x1b6   :  { %v2986_v55 = vsel %vm2474_vm4, %v1770_v13, %v2730_v27  ;;  %v2285_v62 = vadd.f32 %v7694_v43, %v7866_v47  ;;  %5943 = vst [vmem:[%s8158_s3 + $0x390] sm:$0xff] %v5763_v57   ;;  %vm2472_vm0 = vcmp.ge.f32.partialorder %v1762_v4, 0.0  ;;  %v2728_v14 = vmul.f32 0.2, %v1762_v4  ;;  %v8039_v57 = vpop.f32.mrf.mxu0 }
 0x1b7   :  { %v3114_v20 = vsel %vm2602_vm5, %v2282_v39, %v2858_v59  ;;  %v1765_v21 = vadd.f32 %v7694_v43, %v7871_v40  ;;  %vm2600_vm6 = vcmp.ge.f32.partialorder %v2274_v1, 0.0  ;;  %v2856_v35 = vmul.f32 0.2, %v2274_v1  ;;  %v8041_v59 = vpop.f32.mrf.mxu1 }
 0x1b8   :  { %vm2475_vm7 = vcmp.ge.f32.partialorder %v1773_v51, 0.0  ;;  %v2731_v54 = vmul.f32 0.2, %v1773_v51  ;;  %v2984_v17 = vsel %vm2472_vm0, %v1762_v4, %v2728_v14  ;;  %vm2603_vm8 = vcmp.ge.f32.partialorder %v2285_v62, 0.0 }
 0x1b9   :  { %v2859_v47 = vmul.f32 0.2, %v2285_v62  ;;  %vm2473_vm9 = vcmp.ge.f32.partialorder %v1765_v21, 0.0  ;;  %v3112_v50 = vsel %vm2600_vm6, %v2274_v1, %v2856_v35  ;;  %v2729_v56 = vmul.f32 0.2, %v1765_v21  ;;  %v8053_v35 = vpop.f32.mrf.mxu0 }
 0x1ba   :  { %v2987_v58 = vsel %vm2475_vm7, %v1773_v51, %v2731_v54  ;;  %v2277_v49 = vadd.f32 %v7694_v43, %v7877_v12  ;;  %v1786_v53 = vadd.f32 %v7694_v43, %v7883_v41  ;;  %v2298_v36 = vadd.f32 %v7694_v43, %v7885_v6  ;;  %v8055_v54 = vpop.f32.mrf.mxu1 }
 0x1bb   :  { %v5458_v60 = vpack.c.bf16 %v2987_v58, %v2986_v55  ;;  %v3115_v40 = vsel %vm2603_vm8, %v2285_v62, %v2859_v47  ;;  %v2985_v15 = vsel %vm2473_vm9, %v1765_v21, %v2729_v56  ;;  %v1778_v24 = vadd.f32 %v7694_v43, %v7887_v29 }
 0x1bc   :  { %v5778_v23 = vpack.c.bf16 %v3115_v40, %v3114_v20  ;;  %vm2601_vm10 = vcmp.ge.f32.partialorder %v2277_v49, 0.0  ;;  %v2857_v22 = vmul.f32 0.2, %v2277_v49  ;;  %v5453_v12 = vpack.c.bf16 %v2985_v15, %v2984_v17  ;;  %v8075_v15 = vpop.f32.mrf.mxu1 }
 0x1bd   :  { %5882 = vst [vmem:[%s8158_s3 + $0x1a8] sm:$0xff] %v5458_v60   ;;  %vm2478_vm11 = vcmp.ge.f32.partialorder %v1786_v53, 0.0  ;;  %v2734_v46 = vmul.f32 0.2, %v1786_v53  ;;  %vm2606_vm12 = vcmp.ge.f32.partialorder %v2298_v36, 0.0  ;;  %v2290_v19 = vadd.f32 %v7694_v43, %v7892_v32 }
 0x1be   :  { %5946 = vst [vmem:[%s8158_s3 + $0x3a8] sm:$0xff] %v5778_v23   ;;  %v3113_v41 = vsel %vm2601_vm10, %v2277_v49, %v2857_v22  ;;  %v2862_v6 = vmul.f32 0.2, %v2298_v36  ;;  %5881 = vst [vmem:[%s8158_s3 + $0x1a0] sm:$0xff] %v5453_v12   ;;  %v1789_v31 = vadd.f32 %v7694_v43, %v7901_v37  ;;  %v2301_v52 = vadd.f32 %v7694_v43, %v7905_v26  ;;  %v8073_v23 = vpop.f32.mrf.mxu0 }
 0x1bf   :  { %v5773_v44 = vpack.c.bf16 %v3113_v41, %v3112_v50  ;;  %v2990_v38 = vsel %vm2478_vm11, %v1786_v53, %v2734_v46  ;;  %vm2476_vm13 = vcmp.ge.f32.partialorder %v1778_v24, 0.0  ;;  %v2732_v13 = vmul.f32 0.2, %v1778_v24 }
 0x1c0   :  { %v3118_v29 = vsel %vm2606_vm12, %v2298_v36, %v2862_v6  ;;  %vm2604_vm14 = vcmp.ge.f32.partialorder %v2290_v19, 0.0  ;;  %v2860_v32 = vmul.f32 0.2, %v2290_v19  ;;  %vm2479_vm15 = vcmp.ge.f32.partialorder %v1789_v31, 0.0 }
 0x1c1   :  { %5945 = vst [vmem:[%s8158_s3 + $0x3a0] sm:$0xff] %v5773_v44   ;;  %v2735_v45 = vmul.f32 0.2, %v1789_v31  ;;  %vm2607_vm1 = vcmp.ge.f32.partialorder %v2301_v52, 0.0  ;;  %v2988_v37 = vsel %vm2476_vm13, %v1778_v24, %v2732_v13  ;;  %v2863_v3 = vmul.f32 0.2, %v2301_v52 }
 0x1c2   :  { %v1781_v26 = vadd.f32 %v7694_v43, %v7910_v18  ;;  %v2293_v28 = vadd.f32 %v7694_v43, %v7919_v2  ;;  %v3116_v39 = vsel %vm2604_vm14, %v2290_v19, %v2860_v32  ;;  %v1802_v33 = vadd.f32 %v7694_v43, %v7925_v63 }
 0x1c3   :  { %v2991_v48 = vsel %vm2479_vm15, %v1789_v31, %v2735_v45  ;;  %v2314_v27 = vadd.f32 %v7694_v43, %v7927_v34  ;;  %v3119_v55 = vsel %vm2607_vm1, %v2301_v52, %v2863_v3  ;;  %v1794_v14 = vadd.f32 %v7694_v43, %v7936_v30  ;;  %v6339_v31 = vpop.f32.mrf.mxu1 }
 0x1c4   :  { %v5468_v4 = vpack.c.bf16 %v2991_v48, %v2990_v38  ;;  %vm2477_vm2 = vcmp.ge.f32.partialorder %v1781_v26, 0.0  ;;  %v2733_v1 = vmul.f32 0.2, %v1781_v26  ;;  %v5788_v18 = vpack.c.bf16 %v3119_v55, %v3118_v29  ;;  %v6211_v38 = vpop.f32.mrf.mxu0 }
 0x1c5   :  { %vm2605_vm3 = vcmp.ge.f32.partialorder %v2293_v28, 0.0  ;;  %v2861_v51 = vmul.f32 0.2, %v2293_v28  ;;  %vm2482_vm4 = vcmp.ge.f32.partialorder %v1802_v33, 0.0  ;;  %v2738_v63 = vmul.f32 0.2, %v1802_v33 }
 0x1c6   :  { %5884 = vst [vmem:[%s8158_s3 + $0x1b8] sm:$0xff] %v5468_v4   ;;  %v2989_v2 = vsel %vm2477_vm2, %v1781_v26, %v2733_v1  ;;  %vm2610_vm5 = vcmp.ge.f32.partialorder %v2314_v27, 0.0  ;;  %v2866_v34 = vmul.f32 0.2, %v2314_v27  ;;  %5948 = vst [vmem:[%s8158_s3 + $0x3b8] sm:$0xff] %v5788_v18   ;;  %v2306_v21 = vadd.f32 %v7694_v43, %v7938_v9  ;;  %v1828_v48 = vpop.f32.mrf.mxu0 }
 0x1c7   :  { %v5463_v62 = vpack.c.bf16 %v2989_v2, %v2988_v37  ;;  %v3117_v20 = vsel %vm2605_vm3, %v2293_v28, %v2861_v51  ;;  %v2994_v47 = vsel %vm2482_vm4, %v1802_v33, %v2738_v63  ;;  %v1805_v58 = vadd.f32 %v7694_v43, %v7959_v25  ;;  %v2340_v33 = vpop.f32.mrf.mxu1 }
 0x1c8   :  { %v5783_v17 = vpack.c.bf16 %v3117_v20, %v3116_v39  ;;  %v3122_v50 = vsel %vm2610_vm5, %v2314_v27, %v2866_v34  ;;  %vm2480_vm0 = vcmp.ge.f32.partialorder %v1794_v14, 0.0  ;;  %v2736_v56 = vmul.f32 0.2, %v1794_v14  ;;  %v6214_v34 = vpop.f32.mrf.mxu0 }
 0x1c9   :  { %5883 = vst [vmem:[%s8158_s3 + $0x1b0] sm:$0xff] %v5463_v62   ;;  %vm2608_vm6 = vcmp.ge.f32.partialorder %v2306_v21, 0.0  ;;  %v2864_v30 = vmul.f32 0.2, %v2306_v21  ;;  %vm2483_vm7 = vcmp.ge.f32.partialorder %v1805_v58, 0.0  ;;  %v2317_v49 = vadd.f32 %v7694_v43, %v7961_v0  ;;  %v6342_v62 = vpop.f32.mrf.mxu1 }
 0x1ca   :  { %5947 = vst [vmem:[%s8158_s3 + $0x3b0] sm:$0xff] %v5783_v17   ;;  %v2739_v9 = vmul.f32 0.2, %v1805_v58  ;;  %v1797_v25 = vadd.f32 %v7694_v43, %v7967_v42  ;;  %v2992_v60 = vsel %vm2480_vm0, %v1794_v14, %v2736_v56  ;;  %v2309_v53 = vadd.f32 %v7694_v43, %v7969_v11 }
 0x1cb   :  { %v3120_v40 = vsel %vm2608_vm6, %v2306_v21, %v2864_v30  ;;  %v1818_v36 = vadd.f32 %v7694_v43, %v7993_v16  ;;  %vm2611_vm8 = vcmp.ge.f32.partialorder %v2317_v49, 0.0  ;;  %v2867_v12 = vmul.f32 0.2, %v2317_v49 }
 0x1cc   :  { %v2995_v22 = vsel %vm2483_vm7, %v1805_v58, %v2739_v9  ;;  %vm2481_vm9 = vcmp.ge.f32.partialorder %v1797_v25, 0.0  ;;  %v2737_v46 = vmul.f32 0.2, %v1797_v25  ;;  %vm2609_vm10 = vcmp.ge.f32.partialorder %v2309_v53, 0.0 }
 0x1cd   :  { %v5478_v0 = vpack.c.bf16 %v2995_v22, %v2994_v47  ;;  %v2865_v42 = vmul.f32 0.2, %v2309_v53  ;;  %v3123_v41 = vsel %vm2611_vm8, %v2317_v49, %v2867_v12  ;;  %vm2486_vm11 = vcmp.ge.f32.partialorder %v1818_v36, 0.0  ;;  %v1841_v49 = vpop.f32.mrf.mxu0 }
 0x1ce   :  { %v2742_v6 = vmul.f32 0.2, %v1818_v36  ;;  %v2330_v11 = vadd.f32 %v7694_v43, %v7995_v61  ;;  %v5798_v16 = vpack.c.bf16 %v3123_v41, %v3122_v50  ;;  %v2993_v24 = vsel %vm2481_vm9, %v1797_v25, %v2737_v46  ;;  %v2353_v25 = vpop.f32.mrf.mxu1 }
 0x1cf   :  { %5886 = vst [vmem:[%s8158_s3 + $0x1c8] sm:$0xff] %v5478_v0   ;;  %v3121_v19 = vsel %vm2609_vm10, %v2309_v53, %v2865_v42  ;;  %v1810_v44 = vadd.f32 %v7694_v43, %v8003_v7  ;;  %v5473_v52 = vpack.c.bf16 %v2993_v24, %v2992_v60  ;;  %v2322_v45 = vadd.f32 %v7694_v43, %v8005_v8  ;;  %v6477_v42 = vld [vmem:[%s8157_s2] ss:$0 sm:$0xff] }
 0x1d0   :  { %v5793_v29 = vpack.c.bf16 %v3121_v19, %v3120_v40  ;;  %v2998_v13 = vsel %vm2486_vm11, %v1818_v36, %v2742_v6  ;;  %vm2614_vm12 = vcmp.ge.f32.partialorder %v2330_v11, 0.0  ;;  %5950 = vst [vmem:[%s8158_s3 + $0x3c8] sm:$0xff] %v5798_v16   ;;  %v2870_v61 = vmul.f32 0.2, %v2330_v11  ;;  %v6343_v16 = vpop.f32.mrf.mxu1 }
 0x1d1   :  { %vm2484_vm13 = vcmp.ge.f32.partialorder %v1810_v44, 0.0  ;;  %v2740_v32 = vmul.f32 0.2, %v1810_v44  ;;  %5885 = vst [vmem:[%s8158_s3 + $0x1c0] sm:$0xff] %v5473_v52   ;;  %v1821_v7 = vadd.f32 %v7694_v43, %v8024_v10  ;;  %v2333_v37 = vadd.f32 %v7694_v43, %v8026_v5 }
 0x1d2   :  { %5949 = vst [vmem:[%s8158_s3 + $0x3c0] sm:$0xff] %v5793_v29   ;;  %v1813_v3 = vadd.f32 %v7694_v43, %v8039_v57  ;;  %v2325_v8 = vadd.f32 %v7694_v43, %v8041_v59  ;;  %v3126_v26 = vsel %vm2614_vm12, %v2330_v11, %v2870_v61  ;;  %vm2612_vm14 = vcmp.ge.f32.partialorder %v2322_v45, 0.0  ;;  %v6215_v11 = vpop.f32.mrf.mxu0 }
 0x1d3   :  { %v2996_v28 = vsel %vm2484_vm13, %v1810_v44, %v2740_v32  ;;  %v2868_v39 = vmul.f32 0.2, %v2322_v45  ;;  %vm2487_vm15 = vcmp.ge.f32.partialorder %v1821_v7, 0.0  ;;  %v2743_v27 = vmul.f32 0.2, %v1821_v7 }
 0x1d4   :  { %vm2615_vm1 = vcmp.ge.f32.partialorder %v2333_v37, 0.0  ;;  %v2871_v4 = vmul.f32 0.2, %v2333_v37  ;;  %vm2485_vm2 = vcmp.ge.f32.partialorder %v1813_v3, 0.0  ;;  %v2741_v55 = vmul.f32 0.2, %v1813_v3 }
 0x1d5   :  { %v3124_v10 = vsel %vm2612_vm14, %v2322_v45, %v2868_v39  ;;  %vm2613_vm3 = vcmp.ge.f32.partialorder %v2325_v8, 0.0  ;;  %v2999_v5 = vsel %vm2487_vm15, %v1821_v7, %v2743_v27  ;;  %v2869_v57 = vmul.f32 0.2, %v2325_v8 }
 0x1d6   :  { %v3127_v1 = vsel %vm2615_vm1, %v2333_v37, %v2871_v4  ;;  %v1834_v59 = vadd.f32 %v7694_v43, %v8053_v35  ;;  %v5488_v18 = vpack.c.bf16 %v2999_v5, %v2998_v13  ;;  %v2997_v2 = vsel %vm2485_vm2, %v1813_v3, %v2741_v55  ;;  %v1844_v37 = vpop.f32.mrf.mxu0  ;;  %v2356_v3 = vpop.f32.mrf.mxu1 }
 0x1d7   :  { %v5808_v51 = vpack.c.bf16 %v3127_v1, %v3126_v26  ;;  %v2346_v63 = vadd.f32 %v7694_v43, %v8055_v54  ;;  %v5483_v20 = vpack.c.bf16 %v2997_v2, %v2996_v28  ;;  %v3125_v14 = vsel %vm2613_vm3, %v2325_v8, %v2869_v57 }
 0x1d8   :  { %vm2490_vm4 = vcmp.ge.f32.partialorder %v1834_v59, 0.0  ;;  %v2746_v21 = vmul.f32 0.2, %v1834_v59  ;;  %5888 = vst [vmem:[%s8158_s3 + $0x1d8] sm:$0xff] %v5488_v18   ;;  %v5803_v35 = vpack.c.bf16 %v3125_v14, %v3124_v10  ;;  %v1826_v54 = vadd.f32 %v7694_v43, %v8073_v23 }
 0x1d9   :  { %5952 = vst [vmem:[%s8158_s3 + $0x3d8] sm:$0xff] %v5808_v51   ;;  %vm2618_vm5 = vcmp.ge.f32.partialorder %v2346_v63, 0.0  ;;  %v2874_v17 = vmul.f32 0.2, %v2346_v63  ;;  %5887 = vst [vmem:[%s8158_s3 + $0x1d0] sm:$0xff] %v5483_v20   ;;  %v2338_v47 = vadd.f32 %v7694_v43, %v8075_v15  ;;  %v1837_v50 = vadd.f32 %v7694_v43, %v6211_v38 }
 0x1da   :  { %v2349_v58 = vadd.f32 %v7694_v43, %v6339_v31  ;;  %5951 = vst [vmem:[%s8158_s3 + $0x3d0] sm:$0xff] %v5803_v35   ;;  %v3002_v56 = vsel %vm2490_vm4, %v1834_v59, %v2746_v21  ;;  %vm2488_vm0 = vcmp.ge.f32.partialorder %v1826_v54, 0.0  ;;  %v2744_v30 = vmul.f32 0.2, %v1826_v54 }
 0x1db   :  { %v1829_v9 = vadd.f32 %v7694_v43, %v1828_v48  ;;  %v3130_v60 = vsel %vm2618_vm5, %v2346_v63, %v2874_v17  ;;  %vm2616_vm6 = vcmp.ge.f32.partialorder %v2338_v47, 0.0  ;;  %vm2491_vm7 = vcmp.ge.f32.partialorder %v1837_v50, 0.0 }
 0x1dc   :  { %v2747_v40 = vmul.f32 0.2, %v1837_v50  ;;  %v2872_v53 = vmul.f32 0.2, %v2338_v47  ;;  %vm2619_vm8 = vcmp.ge.f32.partialorder %v2349_v58, 0.0  ;;  %v3000_v23 = vsel %vm2488_vm0, %v1826_v54, %v2744_v30 }
 0x1dd   :  { %v2875_v36 = vmul.f32 0.2, %v2349_v58  ;;  %vm2489_vm9 = vcmp.ge.f32.partialorder %v1829_v9, 0.0  ;;  %v2745_v22 = vmul.f32 0.2, %v1829_v9  ;;  %v2341_v12 = vadd.f32 %v7694_v43, %v2340_v33 }
 0x1de   :  { %v3003_v15 = vsel %vm2491_vm7, %v1837_v50, %v2747_v40  ;;  %v1850_v41 = vadd.f32 %v6477_v42, %v6214_v34  ;;  %v2362_v6 = vadd.f32 %v6477_v42, %v6342_v62  ;;  %v3128_v38 = vsel %vm2616_vm6, %v2338_v47, %v2872_v53 }
 0x1df   :  { %v5498_v0 = vpack.c.bf16 %v3003_v15, %v3002_v56  ;;  %v3131_v46 = vsel %vm2619_vm8, %v2349_v58, %v2875_v36  ;;  %v3001_v19 = vsel %vm2489_vm9, %v1829_v9, %v2745_v22  ;;  %vm2617_vm10 = vcmp.ge.f32.partialorder %v2341_v12, 0.0 }
 0x1e0   :  { %v5818_v24 = vpack.c.bf16 %v3131_v46, %v3130_v60  ;;  %v2873_v44 = vmul.f32 0.2, %v2341_v12  ;;  %v5493_v43 = vpack.c.bf16 %v3001_v19, %v3000_v23  ;;  %vm2494_vm11 = vcmp.ge.f32.partialorder %v1850_v41, 0.0 }
 0x1e1   :  { %5890 = vst [vmem:[%s8158_s3 + $0x1e8] sm:$0xff] %v5498_v0   ;;  %v2750_v31 = vmul.f32 0.2, %v1850_v41  ;;  %vm2622_vm12 = vcmp.ge.f32.partialorder %v2362_v6, 0.0  ;;  %v2878_v29 = vmul.f32 0.2, %v2362_v6  ;;  %v1842_v13 = vadd.f32 %v6477_v42, %v1841_v49 }
 0x1e2   :  { %5954 = vst [vmem:[%s8158_s3 + $0x3e8] sm:$0xff] %v5818_v24   ;;  %v3129_v52 = vsel %vm2617_vm10, %v2341_v12, %v2873_v44  ;;  %5889 = vst [vmem:[%s8158_s3 + $0x1e0] sm:$0xff] %v5493_v43   ;;  %v2354_v32 = vadd.f32 %v6477_v42, %v2353_v25  ;;  %v1853_v45 = vadd.f32 %v6477_v42, %v6215_v11 }
 0x1e3   :  { %v5813_v61 = vpack.c.bf16 %v3129_v52, %v3128_v38  ;;  %v2365_v7 = vadd.f32 %v6477_v42, %v6343_v16  ;;  %v3006_v8 = vsel %vm2494_vm11, %v1850_v41, %v2750_v31  ;;  %v3134_v26 = vsel %vm2622_vm12, %v2362_v6, %v2878_v29 }
 0x1e4   :  { %vm2495_vm13 = vcmp.ge.f32.partialorder %v1853_v45, 0.0  ;;  %v2751_v28 = vmul.f32 0.2, %v1853_v45  ;;  %v2748_v39 = vmul.f32 0.2, %v1842_v13  ;;  %v1845_v33 = vadd.f32 %v6477_v42, %v1844_v37 }
 0x1e5   :  { %5953 = vst [vmem:[%s8158_s3 + $0x3e0] sm:$0xff] %v5813_v61   ;;  %vm2623_vm14 = vcmp.ge.f32.partialorder %v2365_v7, 0.0  ;;  %v2879_v48 = vmul.f32 0.2, %v2365_v7  ;;  %v2357_v27 = vadd.f32 %v6477_v42, %v2356_v3  ;;  %vm2492_vm15 = vcmp.ge.f32.partialorder %v1842_v13, 0.0 }
 0x1e6   :  { %vm2620_vm1 = vcmp.ge.f32.partialorder %v2354_v32, 0.0  ;;  %v2876_v4 = vmul.f32 0.2, %v2354_v32  ;;  %v3007_v10 = vsel %vm2495_vm13, %v1853_v45, %v2751_v28  ;;  %vm2493_vm2 = vcmp.ge.f32.partialorder %v1845_v33, 0.0 }
 0x1e7   :  { %v5508_v55 = vpack.c.bf16 %v3007_v10, %v3006_v8  ;;  %v3135_v5 = vsel %vm2623_vm14, %v2365_v7, %v2879_v48  ;;  %v2749_v1 = vmul.f32 0.2, %v1845_v33  ;;  %vm2621_vm3 = vcmp.ge.f32.partialorder %v2357_v27, 0.0 }
 0x1e8   :  { %v5828_v57 = vpack.c.bf16 %v3135_v5, %v3134_v26  ;;  %v2877_v59 = vmul.f32 0.2, %v2357_v27  ;;  %v3004_v18 = vsel %vm2492_vm15, %v1842_v13, %v2748_v39  ;;  %v3132_v2 = vsel %vm2620_vm1, %v2354_v32, %v2876_v4 }
 0x1e9   :  { %5892 = vst [vmem:[%s8158_s3 + $0x1f8] sm:$0xff] %v5508_v55   ;;  %v3005_v51 = vsel %vm2493_vm2, %v1845_v33, %v2749_v1 }
 0x1ea   :  { %5956 = vst [vmem:[%s8158_s3 + $0x3f8] sm:$0xff] %v5828_v57   ;;  %v5503_v63 = vpack.c.bf16 %v3005_v51, %v3004_v18  ;;  %v3133_v34 = vsel %vm2621_vm3, %v2357_v27, %v2877_v59 }
 0x1eb   :  { %v5823_v62 = vpack.c.bf16 %v3133_v34, %v3132_v2 }
 0x1ec   :  { %5891 = vst [vmem:[%s8158_s3 + $0x1f0] sm:$0xff] %v5503_v63  }
 0x1ed   :  { %5955 = vst [vmem:[%s8158_s3 + $0x3f0] sm:$0xff] %v5823_v62  }

// kernel: discriminator_forward.6
= control target key start
LH: loop header
LB: loop body
LE: loop exit
PB: predicated region body
PF: predicated region fallthrough
CT: control target
= control target key end

     0   :  { %v2308_v0 = vmov 0   ;;  %s4593_s1 = inlined_call_operand.vmem [shape: bf16[256,128], index: 1, kind: input, shape index: {}]   ;;  %s4594_s0 = inlined_call_operand.vmem [shape: bf16[512,256], index: 0, kind: input, shape index: {}]   ;;  %s4595_s2 = inlined_call_operand.vmem [shape: f32[1,128], index: 2, kind: input, shape index: {}]   ;;  %s4596_s3 = inlined_call_operand.vmem [shape: f32[1,128], index: 3, kind: input, shape index: {}]   ;;  %s4597_s4 = inlined_call_operand.vmem [shape: f32[1,128], index: 4, kind: input, shape index: {}]   ;;  %s4598_s5 = inlined_call_operand.vmem [shape: bf16[512,128], index: 5, kind: output, shape index: {}]  }
   0x1   :  { %540 = vmatprep.subr.bf16.mxu0 %v2308_v0  ;;  %v2194_v1 = vld [vmem:[%s4593_s1 + $0x38] sm:$0xff]   ;;  %2161 = vmatprep.subr.bf16.mxu1 %v2308_v0  ;;  %v2195_v2 = vld [vmem:[%s4593_s1 + $0x30] sm:$0xff]   ;;  %v2196_v3 = vld [vmem:[%s4593_s1 + $0x28] sm:$0xff]  }
   0x2   :  { %541 = vmatpush1.bf16.msra.mxu0 %v2194_v1  ;;  %2177 = vmatpush1.bf16.msra.mxu1 %v2194_v1  ;;  %v2197_v4 = vld [vmem:[%s4593_s1 + $0x20] sm:$0xff]   ;;  %v2198_v5 = vld [vmem:[%s4593_s1 + $0x18] sm:$0xff]   ;;  %v2199_v7 = vld [vmem:[%s4593_s1 + $0x10] sm:$0xff]  }
   0x3   :  { %542 = vmatprep.subr.bf16.mxu0 %v2308_v0  ;;  %2162 = vmatprep.subr.bf16.mxu1 %v2308_v0  ;;  %v2212_v6 = vld [vmem:[%s4594_s0 + $0x4] ss:$8 sps:$4 sm:$0xff]   ;;  %v2202_v11 = vld [vmem:[%s4593_s1 + $0x78] sm:$0xff]   ;;  %v2203_v12 = vld [vmem:[%s4593_s1 + $0x70] sm:$0xff]  }
   0x4   :  { %572 = vmatprep.mubr.bf16.mxu0 %v2212_v6  ;;  %v2200_v8 = vld [vmem:[%s4593_s1 + $0x8] sm:$0xff]   ;;  %v2201_v9 = vld [vmem:[%s4593_s1] sm:$0xff]   ;;  %v2206_v15 = vld [vmem:[%s4593_s1 + $0x58] sm:$0xff]  }
   0x5   :  { %v2236_v10 = vld [vmem:[%s4594_s0 + $0x104] ss:$8 sps:$4 sm:$0xff]   ;;  %v2207_v16 = vld [vmem:[%s4593_s1 + $0x50] sm:$0xff]   ;;  %v2210_v19 = vld [vmem:[%s4594_s0] ss:$8 sps:$4 sm:$0xff]  }
   0x6   :  { %543 = vmatpush1.bf16.msra.mxu0 %v2195_v2  ;;  %2178 = vmatpush1.bf16.msra.mxu1 %v2195_v2  ;;  %v2204_v13 = vld [vmem:[%s4593_s1 + $0x68] sm:$0xff]   ;;  %v2205_v14 = vld [vmem:[%s4593_s1 + $0x60] sm:$0xff]   ;;  %v2213_v21 = vld [vmem:[%s4594_s0 + $0x14] ss:$8 sps:$4 sm:$0xff]  }
   0x7   :  { %544 = vmatprep.subr.bf16.mxu0 %v2308_v0  ;;  %2163 = vmatprep.subr.bf16.mxu1 %v2308_v0  ;;  %v2208_v17 = vld [vmem:[%s4593_s1 + $0x48] sm:$0xff]   ;;  %v2209_v18 = vld [vmem:[%s4593_s1 + $0x40] sm:$0xff]   ;;  %v2240_v22 = vld [vmem:[%s4594_s0 + $0x114] ss:$8 sps:$4 sm:$0xff]  }
   0x8   :  { %700 = vmatprep.mubr.bf16.mxu1 %v2236_v10  ;;  %v2234_v20 = vld [vmem:[%s4594_s0 + $0x100] ss:$8 sps:$4 sm:$0xff]   ;;  %v2215_v23 = vld [vmem:[%s4594_s0 + $0x10] ss:$8 sps:$4 sm:$0xff]   ;;  %v2216_v25 = vld [vmem:[%s4594_s0 + $0x24] ss:$8 sps:$4 sm:$0xff]  }
   0x9   :  { %v2242_v24 = vld [vmem:[%s4594_s0 + $0x110] ss:$8 sps:$4 sm:$0xff]   ;;  %v2246_v26 = vld [vmem:[%s4594_s0 + $0x124] ss:$8 sps:$4 sm:$0xff]   ;;  %v2218_v27 = vld [vmem:[%s4594_s0 + $0x20] ss:$8 sps:$4 sm:$0xff]  }
   0xa   :  { %545 = vmatpush1.bf16.msra.mxu0 %v2196_v3  ;;  %2179 = vmatpush1.bf16.msra.mxu1 %v2196_v3  ;;  %v2248_v28 = vld [vmem:[%s4594_s0 + $0x120] ss:$8 sps:$4 sm:$0xff]   ;;  %v2219_v29 = vld [vmem:[%s4594_s0 + $0x34] ss:$8 sps:$4 sm:$0xff]   ;;  %v2221_v31 = vld [vmem:[%s4594_s0 + $0x30] ss:$8 sps:$4 sm:$0xff]  }
   0xb   :  { %546 = vmatprep.subr.bf16.mxu0 %v2308_v0  ;;  %2164 = vmatprep.subr.bf16.mxu1 %v2308_v0  ;;  %v2252_v30 = vld [vmem:[%s4594_s0 + $0x134] ss:$8 sps:$4 sm:$0xff]   ;;  %v2254_v32 = vld [vmem:[%s4594_s0 + $0x130] ss:$8 sps:$4 sm:$0xff]   ;;  %v2222_v33 = vld [vmem:[%s4594_s0 + $0x44] ss:$8 sps:$4 sm:$0xff]  }
   0xc   :  { %v2258_v34 = vld [vmem:[%s4594_s0 + $0x144] ss:$8 sps:$4 sm:$0xff]   ;;  %v2224_v35 = vld [vmem:[%s4594_s0 + $0x40] ss:$8 sps:$4 sm:$0xff]   ;;  %v2225_v37 = vld [vmem:[%s4594_s0 + $0x54] ss:$8 sps:$4 sm:$0xff]  }
   0xd   :  { %v2260_v36 = vld [vmem:[%s4594_s0 + $0x140] ss:$8 sps:$4 sm:$0xff]   ;;  %v2264_v38 = vld [vmem:[%s4594_s0 + $0x154] ss:$8 sps:$4 sm:$0xff]   ;;  %v2227_v39 = vld [vmem:[%s4594_s0 + $0x50] ss:$8 sps:$4 sm:$0xff]  }
   0xe   :  { %547 = vmatpush1.bf16.msra.mxu0 %v2197_v4  ;;  %2180 = vmatpush1.bf16.msra.mxu1 %v2197_v4  ;;  %v2266_v40 = vld [vmem:[%s4594_s0 + $0x150] ss:$8 sps:$4 sm:$0xff]   ;;  %v2228_v41 = vld [vmem:[%s4594_s0 + $0x64] ss:$8 sps:$4 sm:$0xff]   ;;  %v2230_v43 = vld [vmem:[%s4594_s0 + $0x60] ss:$8 sps:$4 sm:$0xff]  }
   0xf   :  { %548 = vmatprep.subr.bf16.mxu0 %v2308_v0  ;;  %2165 = vmatprep.subr.bf16.mxu1 %v2308_v0  ;;  %v2270_v42 = vld [vmem:[%s4594_s0 + $0x164] ss:$8 sps:$4 sm:$0xff]   ;;  %v2272_v44 = vld [vmem:[%s4594_s0 + $0x160] ss:$8 sps:$4 sm:$0xff]   ;;  %v2231_v45 = vld [vmem:[%s4594_s0 + $0x74] ss:$8 sps:$4 sm:$0xff]  }
  0x10   :  { %v2276_v46 = vld [vmem:[%s4594_s0 + $0x174] ss:$8 sps:$4 sm:$0xff]   ;;  %v2233_v47 = vld [vmem:[%s4594_s0 + $0x70] ss:$8 sps:$4 sm:$0xff]   ;;  %v2237_v49 = vld [vmem:[%s4594_s0 + $0x84] ss:$8 sps:$4 sm:$0xff]  }
  0x11   :  { %v2278_v48 = vld [vmem:[%s4594_s0 + $0x170] ss:$8 sps:$4 sm:$0xff]   ;;  %v2282_v50 = vld [vmem:[%s4594_s0 + $0x184] ss:$8 sps:$4 sm:$0xff]   ;;  %v2239_v51 = vld [vmem:[%s4594_s0 + $0x80] ss:$8 sps:$4 sm:$0xff]  }
  0x12   :  { %549 = vmatpush1.bf16.msra.mxu0 %v2198_v5  ;;  %2181 = vmatpush1.bf16.msra.mxu1 %v2198_v5  ;;  %v2284_v52 = vld [vmem:[%s4594_s0 + $0x180] ss:$8 sps:$4 sm:$0xff]   ;;  %v2243_v53 = vld [vmem:[%s4594_s0 + $0x94] ss:$8 sps:$4 sm:$0xff]   ;;  %v2245_v55 = vld [vmem:[%s4594_s0 + $0x90] ss:$8 sps:$4 sm:$0xff]  }
  0x13   :  { %550 = vmatprep.subr.bf16.mxu0 %v2308_v0  ;;  %2166 = vmatprep.subr.bf16.mxu1 %v2308_v0  ;;  %v2285_v54 = vld [vmem:[%s4594_s0 + $0x194] ss:$8 sps:$4 sm:$0xff]   ;;  %v2287_v56 = vld [vmem:[%s4594_s0 + $0x190] ss:$8 sps:$4 sm:$0xff]   ;;  %v2249_v57 = vld [vmem:[%s4594_s0 + $0xa4] ss:$8 sps:$4 sm:$0xff]  }
  0x14   :  { %v2288_v58 = vld [vmem:[%s4594_s0 + $0x1a4] ss:$8 sps:$4 sm:$0xff]   ;;  %v2251_v59 = vld [vmem:[%s4594_s0 + $0xa0] ss:$8 sps:$4 sm:$0xff]   ;;  %v2255_v61 = vld [vmem:[%s4594_s0 + $0xb4] ss:$8 sps:$4 sm:$0xff]  }
  0x15   :  { %v2290_v60 = vld [vmem:[%s4594_s0 + $0x1a0] ss:$8 sps:$4 sm:$0xff]   ;;  %v2291_v62 = vld [vmem:[%s4594_s0 + $0x1b4] ss:$8 sps:$4 sm:$0xff]   ;;  %v2257_v63 = vld [vmem:[%s4594_s0 + $0xb0] ss:$8 sps:$4 sm:$0xff]  }
  0x16   :  { %551 = vmatpush1.bf16.msra.mxu0 %v2199_v7  ;;  %2182 = vmatpush1.bf16.msra.mxu1 %v2199_v7  ;;  %v2261_v1 = vld [vmem:[%s4594_s0 + $0xc4] ss:$8 sps:$4 sm:$0xff]   ;;  %v2263_v3 = vld [vmem:[%s4594_s0 + $0xc0] ss:$8 sps:$4 sm:$0xff]   ;;  %v2267_v5 = vld [vmem:[%s4594_s0 + $0xd4] ss:$8 sps:$4 sm:$0xff]  }
  0x17   :  { %552 = vmatprep.subr.bf16.mxu0 %v2308_v0  ;;  %2167 = vmatprep.subr.bf16.mxu1 %v2308_v0  ;;  %v2294_v2 = vld [vmem:[%s4594_s0 + $0x1c4] ss:$8 sps:$4 sm:$0xff]   ;;  %v2296_v4 = vld [vmem:[%s4594_s0 + $0x1c0] ss:$8 sps:$4 sm:$0xff]   ;;  %v2297_v6 = vld [vmem:[%s4594_s0 + $0x1d4] ss:$8 sps:$4 sm:$0xff]  }
  0x18   :  { %v2269_v7 = vld [vmem:[%s4594_s0 + $0xd0] ss:$8 sps:$4 sm:$0xff]   ;;  %v2300_v10 = vld [vmem:[%s4594_s0 + $0x1e4] ss:$8 sps:$4 sm:$0xff]  }
  0x1a   :  { %553 = vmatpush1.bf16.msra.mxu0 %v2200_v8  ;;  %2183 = vmatpush1.bf16.msra.mxu1 %v2200_v8  ;;  %v2299_v8 = vld [vmem:[%s4594_s0 + $0x1d0] ss:$8 sps:$4 sm:$0xff]  }
  0x1b   :  { %554 = vmatprep.subr.bf16.mxu0 %v2308_v0  ;;  %2168 = vmatprep.subr.bf16.mxu1 %v2308_v0 }
  0x1e   :  { %555 = vmatpush1.bf16.msra.mxu0 %v2201_v9  ;;  %2184 = vmatpush1.bf16.msra.mxu1 %v2201_v9  ;;  %v2273_v9 = vld [vmem:[%s4594_s0 + $0xe4] ss:$8 sps:$4 sm:$0xff]  }
  0x1f   :  { %556 = vmatprep.subr.bf16.mxu0 %v2308_v0  ;;  %2169 = vmatprep.subr.bf16.mxu1 %v2308_v0 }
  0x22   :  { %557 = vmatpush2.bf16.msra.mxu0 %v2202_v11  ;;  %2185 = vmatpush2.bf16.msra.mxu1 %v2202_v11  ;;  %v2275_v11 = vld [vmem:[%s4594_s0 + $0xe0] ss:$8 sps:$4 sm:$0xff]  }
  0x23   :  { %558 = vmatprep.subr.bf16.mxu0 %v2308_v0  ;;  %2170 = vmatprep.subr.bf16.mxu1 %v2308_v0 }
  0x26   :  { %559 = vmatpush2.bf16.msra.mxu0 %v2203_v12  ;;  %2186 = vmatpush2.bf16.msra.mxu1 %v2203_v12  ;;  %v2302_v12 = vld [vmem:[%s4594_s0 + $0x1e0] ss:$8 sps:$4 sm:$0xff]  }
  0x27   :  { %560 = vmatprep.subr.bf16.mxu0 %v2308_v0  ;;  %2171 = vmatprep.subr.bf16.mxu1 %v2308_v0 }
  0x2a   :  { %561 = vmatpush2.bf16.msra.mxu0 %v2204_v13  ;;  %2187 = vmatpush2.bf16.msra.mxu1 %v2204_v13  ;;  %v2279_v13 = vld [vmem:[%s4594_s0 + $0xf4] ss:$8 sps:$4 sm:$0xff]  }
  0x2b   :  { %562 = vmatprep.subr.bf16.mxu0 %v2308_v0  ;;  %2172 = vmatprep.subr.bf16.mxu1 %v2308_v0 }
  0x2e   :  { %563 = vmatpush2.bf16.msra.mxu0 %v2205_v14  ;;  %2188 = vmatpush2.bf16.msra.mxu1 %v2205_v14  ;;  %v2303_v14 = vld [vmem:[%s4594_s0 + $0x1f4] ss:$8 sps:$4 sm:$0xff]  }
  0x2f   :  { %564 = vmatprep.subr.bf16.mxu0 %v2308_v0  ;;  %2173 = vmatprep.subr.bf16.mxu1 %v2308_v0 }
  0x32   :  { %565 = vmatpush2.bf16.msra.mxu0 %v2206_v15  ;;  %2189 = vmatpush2.bf16.msra.mxu1 %v2206_v15  ;;  %v2281_v15 = vld [vmem:[%s4594_s0 + $0xf0] ss:$8 sps:$4 sm:$0xff]  }
  0x33   :  { %566 = vmatprep.subr.bf16.mxu0 %v2308_v0  ;;  %2174 = vmatprep.subr.bf16.mxu1 %v2308_v0 }
  0x36   :  { %567 = vmatpush2.bf16.msra.mxu0 %v2207_v16  ;;  %2190 = vmatpush2.bf16.msra.mxu1 %v2207_v16  ;;  %v2305_v16 = vld [vmem:[%s4594_s0 + $0x1f0] ss:$8 sps:$4 sm:$0xff]  }
  0x37   :  { %568 = vmatprep.subr.bf16.mxu0 %v2308_v0  ;;  %2175 = vmatprep.subr.bf16.mxu1 %v2308_v0 }
  0x3a   :  { %569 = vmatpush2.bf16.msra.mxu0 %v2208_v17  ;;  %2191 = vmatpush2.bf16.msra.mxu1 %v2208_v17 }
  0x3b   :  { %570 = vmatprep.subr.bf16.mxu0 %v2308_v0  ;;  %2176 = vmatprep.subr.bf16.mxu1 %v2308_v0  ;;  %v2293_v0 = vld [vmem:[%s4594_s0 + $0x1b0] ss:$8 sps:$4 sm:$0xff]  }
  0x3e   :  { %571 = vmatpush2.bf16.msra.mxu0 %v2209_v18  ;;  %2192 = vmatpush2.bf16.msra.mxu1 %v2209_v18 }
  0x41   :  { %573 = vmatmul.mubr.bf16.vlgmr.msra.gmra.mxu0 %v2210_v19  ;;  %701 = vmatmul.mubr.bf16.vlgmr.msra.gmra.mxu1 %v2234_v20 }
  0x42   :  { %580 = vmatprep.mubr.bf16.mxu0 %v2213_v21  ;;  %708 = vmatprep.mubr.bf16.mxu1 %v2240_v22 }
  0x49   :  { %581 = vmatmul.mubr.bf16.gmra.mxu0 %v2215_v23  ;;  %709 = vmatmul.mubr.bf16.gmra.mxu1 %v2242_v24 }
  0x4a   :  { %588 = vmatprep.mubr.bf16.mxu0 %v2216_v25  ;;  %716 = vmatprep.mubr.bf16.mxu1 %v2246_v26 }
  0x51   :  { %589 = vmatmul.mubr.bf16.gmra.mxu0 %v2218_v27  ;;  %717 = vmatmul.mubr.bf16.gmra.mxu1 %v2248_v28 }
  0x52   :  { %596 = vmatprep.mubr.bf16.mxu0 %v2219_v29  ;;  %724 = vmatprep.mubr.bf16.mxu1 %v2252_v30 }
  0x59   :  { %597 = vmatmul.mubr.bf16.gmra.mxu0 %v2221_v31  ;;  %725 = vmatmul.mubr.bf16.gmra.mxu1 %v2254_v32 }
  0x5a   :  { %604 = vmatprep.mubr.bf16.mxu0 %v2222_v33  ;;  %732 = vmatprep.mubr.bf16.mxu1 %v2258_v34 }
  0x61   :  { %605 = vmatmul.mubr.bf16.gmra.mxu0 %v2224_v35  ;;  %733 = vmatmul.mubr.bf16.gmra.mxu1 %v2260_v36 }
  0x62   :  { %612 = vmatprep.mubr.bf16.mxu0 %v2225_v37  ;;  %740 = vmatprep.mubr.bf16.mxu1 %v2264_v38 }
  0x69   :  { %613 = vmatmul.mubr.bf16.gmra.mxu0 %v2227_v39  ;;  %741 = vmatmul.mubr.bf16.gmra.mxu1 %v2266_v40 }
  0x6a   :  { %620 = vmatprep.mubr.bf16.mxu0 %v2228_v41  ;;  %748 = vmatprep.mubr.bf16.mxu1 %v2270_v42 }
  0x71   :  { %621 = vmatmul.mubr.bf16.gmra.mxu0 %v2230_v43  ;;  %749 = vmatmul.mubr.bf16.gmra.mxu1 %v2272_v44 }
  0x72   :  { %628 = vmatprep.mubr.bf16.mxu0 %v2231_v45  ;;  %756 = vmatprep.mubr.bf16.mxu1 %v2276_v46 }
  0x79   :  { %629 = vmatmul.mubr.bf16.gmra.mxu0 %v2233_v47  ;;  %757 = vmatmul.mubr.bf16.gmra.mxu1 %v2278_v48 }
  0x7a   :  { %636 = vmatprep.mubr.bf16.mxu0 %v2237_v49  ;;  %764 = vmatprep.mubr.bf16.mxu1 %v2282_v50 }
  0x81   :  { %637 = vmatmul.mubr.bf16.gmra.mxu0 %v2239_v51  ;;  %765 = vmatmul.mubr.bf16.gmra.mxu1 %v2284_v52 }
  0x82   :  { %644 = vmatprep.mubr.bf16.mxu0 %v2243_v53  ;;  %772 = vmatprep.mubr.bf16.mxu1 %v2285_v54 }
  0x89   :  { %645 = vmatmul.mubr.bf16.gmra.mxu0 %v2245_v55  ;;  %773 = vmatmul.mubr.bf16.gmra.mxu1 %v2287_v56 }
  0x8a   :  { %652 = vmatprep.mubr.bf16.mxu0 %v2249_v57  ;;  %780 = vmatprep.mubr.bf16.mxu1 %v2288_v58 }
  0x91   :  { %653 = vmatmul.mubr.bf16.gmra.mxu0 %v2251_v59  ;;  %781 = vmatmul.mubr.bf16.gmra.mxu1 %v2290_v60 }
  0x92   :  { %660 = vmatprep.mubr.bf16.mxu0 %v2255_v61  ;;  %788 = vmatprep.mubr.bf16.mxu1 %v2291_v62 }
  0x99   :  { %661 = vmatmul.mubr.bf16.gmra.mxu0 %v2257_v63  ;;  %789 = vmatmul.mubr.bf16.gmra.mxu1 %v2293_v0 }
  0x9a   :  { %668 = vmatprep.mubr.bf16.mxu0 %v2261_v1  ;;  %796 = vmatprep.mubr.bf16.mxu1 %v2294_v2 }
  0xa1   :  { %669 = vmatmul.mubr.bf16.gmra.mxu0 %v2263_v3  ;;  %797 = vmatmul.mubr.bf16.gmra.mxu1 %v2296_v4 }
  0xa2   :  { %676 = vmatprep.mubr.bf16.mxu0 %v2267_v5  ;;  %804 = vmatprep.mubr.bf16.mxu1 %v2297_v6 }
  0xa9   :  { %677 = vmatmul.mubr.bf16.gmra.mxu0 %v2269_v7  ;;  %805 = vmatmul.mubr.bf16.gmra.mxu1 %v2299_v8 }
  0xaa   :  { %684 = vmatprep.mubr.bf16.mxu0 %v2273_v9  ;;  %812 = vmatprep.mubr.bf16.mxu1 %v2300_v10 }
  0xb1   :  { %685 = vmatmul.mubr.bf16.gmra.mxu0 %v2275_v11  ;;  %813 = vmatmul.mubr.bf16.gmra.mxu1 %v2302_v12 }
  0xb2   :  { %692 = vmatprep.mubr.bf16.mxu0 %v2279_v13  ;;  %820 = vmatprep.mubr.bf16.mxu1 %v2303_v14  ;;  %v2666_v13 = vld [vmem:[%s4595_s2] ss:$0 sm:$0xff] }
  0xb9   :  { %693 = vmatmul.mubr.bf16.gmra.mxu0 %v2281_v15  ;;  %821 = vmatmul.mubr.bf16.gmra.mxu1 %v2305_v16 }
 0x101   :  { %v2611_v17 = vpop.f32.mrf.mxu0  ;;  %v2613_v18 = vpop.f32.mrf.mxu1 }
 0x103   :  { %v576_v19 = vpop.f32.mrf.mxu0  ;;  %v704_v20 = vpop.f32.mrf.mxu1 }
 0x105   :  { %v577_v21 = vpop.f32.mrf.mxu0  ;;  %v2615_v22 = vpop.f32.mrf.mxu1 }
 0x106   :  { %v2673_v16 = vadd.f32 %v2666_v13, %v577_v21 }
 0x107   :  { %v579_v23 = vpop.f32.mrf.mxu0  ;;  %v707_v24 = vpop.f32.mrf.mxu1 }
 0x108   :  { %v2677_v23 = vadd.f32 %v2666_v13, %v2611_v17 }
 0x109   :  { %v582_v25 = vpop.f32.mrf.mxu0  ;;  %v2617_v26 = vpop.f32.mrf.mxu1 }
 0x10a   :  { %v2680_v24 = vadd.f32 %v2666_v13, %v582_v25  ;;  %v829_v17 = vadd.f32 %v2673_v16, %v2677_v23 }
 0x10b   :  { %v584_v27 = vpop.f32.mrf.mxu0  ;;  %v712_v28 = vpop.f32.mrf.mxu1 }
 0x10c   :  { %v901_v25 = vmul.f32 %v2680_v24, %v2680_v24 }
 0x10d   :  { %v585_v29 = vpop.f32.mrf.mxu0  ;;  %v2619_v30 = vpop.f32.mrf.mxu1 }
 0x10f   :  { %v587_v31 = vpop.f32.mrf.mxu0  ;;  %v715_v32 = vpop.f32.mrf.mxu1 }
 0x110   :  { %v900_v31 = vmul.f32 %v2673_v16, %v2673_v16  ;;  %v2689_v32 = vadd.f32 %v2666_v13, %v585_v29 }
 0x111   :  { %v590_v33 = vpop.f32.mrf.mxu0  ;;  %v2621_v34 = vpop.f32.mrf.mxu1 }
 0x113   :  { %v592_v35 = vpop.f32.mrf.mxu0  ;;  %v720_v36 = vpop.f32.mrf.mxu1 }
 0x114   :  { %v899_v36 = vmul.f32 %v2677_v23, %v2677_v23 }
 0x115   :  { %v2623_v37 = vpop.f32.mrf.mxu0  ;;  %v2625_v38 = vpop.f32.mrf.mxu1 }
 0x116   :  { %v963_v29 = vadd.f32 %v900_v31, %v899_v36 }
 0x117   :  { %v595_v39 = vpop.f32.mrf.mxu0  ;;  %v723_v40 = vpop.f32.mrf.mxu1 }
 0x118   :  { %v2698_v39 = vadd.f32 %v2666_v13, %v590_v33 }
 0x119   :  { %v2627_v41 = vpop.f32.mrf.mxu0  ;;  %v2629_v42 = vpop.f32.mrf.mxu1 }
 0x11b   :  { %v600_v43 = vpop.f32.mrf.mxu0  ;;  %v728_v44 = vpop.f32.mrf.mxu1 }
 0x11c   :  { %v830_v44 = vadd.f32 %v829_v17, %v2680_v24 }
 0x11d   :  { %v2631_v45 = vpop.f32.mrf.mxu0  ;;  %v2633_v46 = vpop.f32.mrf.mxu1 }
 0x11e   :  { %v831_v33 = vadd.f32 %v830_v44, %v2689_v32 }
 0x11f   :  { %v603_v47 = vpop.f32.mrf.mxu0  ;;  %v731_v48 = vpop.f32.mrf.mxu1 }
 0x120   :  { %v902_v47 = vmul.f32 %v2689_v32, %v2689_v32  ;;  %v2709_v48 = vadd.f32 %v2666_v13, %v2623_v37  ;;  %v832_v37 = vadd.f32 %v831_v33, %v2698_v39 }
 0x121   :  { %v2635_v49 = vpop.f32.mrf.mxu0  ;;  %v2637_v50 = vpop.f32.mrf.mxu1 }
 0x123   :  { %v608_v51 = vpop.f32.mrf.mxu0  ;;  %v736_v52 = vpop.f32.mrf.mxu1 }
 0x125   :  { %v2639_v53 = vpop.f32.mrf.mxu0  ;;  %v2641_v54 = vpop.f32.mrf.mxu1 }
 0x126   :  { %v2745_v36 = vadd.f32 %v2666_v13, %v2639_v53 }
 0x127   :  { %v611_v55 = vpop.f32.mrf.mxu0  ;;  %v739_v56 = vpop.f32.mrf.mxu1 }
 0x128   :  { %v964_v55 = vadd.f32 %v963_v29, %v901_v25  ;;  %v903_v56 = vmul.f32 %v2698_v39, %v2698_v39  ;;  %v908_v53 = vmul.f32 %v2745_v36, %v2745_v36 }
 0x129   :  { %v2643_v57 = vpop.f32.mrf.mxu0  ;;  %v2645_v58 = vpop.f32.mrf.mxu1 }
 0x12b   :  { %v616_v59 = vpop.f32.mrf.mxu0  ;;  %v744_v60 = vpop.f32.mrf.mxu1 }
 0x12c   :  { %v2716_v59 = vadd.f32 %v2666_v13, %v2627_v41  ;;  %v833_v41 = vadd.f32 %v832_v37, %v2709_v48 }
 0x12d   :  { %v2647_v61 = vpop.f32.mrf.mxu0  ;;  %v2649_v62 = vpop.f32.mrf.mxu1 }
 0x12f   :  { %v619_v63 = vpop.f32.mrf.mxu0  ;;  %v747_v0 = vpop.f32.mrf.mxu1 }
 0x130   :  { %v965_v0 = vadd.f32 %v964_v55, %v902_v47  ;;  %v2752_v47 = vadd.f32 %v2666_v13, %v2643_v57 }
 0x131   :  { %v2651_v1 = vpop.f32.mrf.mxu0  ;;  %v2653_v2 = vpop.f32.mrf.mxu1 }
 0x132   :  { %v909_v57 = vmul.f32 %v2752_v47, %v2752_v47 }
 0x133   :  { %v624_v3 = vpop.f32.mrf.mxu0  ;;  %v752_v4 = vpop.f32.mrf.mxu1 }
 0x134   :  { %v904_v3 = vmul.f32 %v2709_v48, %v2709_v48  ;;  %v2727_v4 = vadd.f32 %v2666_v13, %v2631_v45  ;;  %v834_v45 = vadd.f32 %v833_v41, %v2716_v59 }
 0x135   :  { %v2655_v5 = vpop.f32.mrf.mxu0  ;;  %v2657_v6 = vpop.f32.mrf.mxu1 }
 0x137   :  { %v627_v7 = vpop.f32.mrf.mxu0  ;;  %v755_v8 = vpop.f32.mrf.mxu1 }
 0x139   :  { %v2659_v9 = vpop.f32.mrf.mxu0  ;;  %v2661_v10 = vpop.f32.mrf.mxu1 }
 0x13b   :  { %v632_v11 = vpop.f32.mrf.mxu0  ;;  %v760_v12 = vpop.f32.mrf.mxu1 }
 0x13c   :  { %v966_v11 = vadd.f32 %v965_v0, %v903_v56  ;;  %v905_v12 = vmul.f32 %v2716_v59, %v2716_v59  ;;  %v2761_v56 = vadd.f32 %v2666_v13, %v2647_v61 }
 0x13d   :  { %v2668_v14 = vpop.f32.mrf.mxu0  ;;  %v2670_v15 = vpop.f32.mrf.mxu1 }
 0x13e   :  { %v910_v61 = vmul.f32 %v2761_v56, %v2761_v56 }
 0x13f   :  { %v635_v19 = vpop.f32.mrf.mxu0  ;;  %v763_v20 = vpop.f32.mrf.mxu1 }
 0x140   :  { %v2734_v19 = vadd.f32 %v2666_v13, %v2635_v49  ;;  %v835_v49 = vadd.f32 %v834_v45, %v2727_v4  ;;  %v2777_v45 = vadd.f32 %v2666_v13, %v2655_v5 }
 0x141   :  { %v2682_v27 = vpop.f32.mrf.mxu0  ;;  %v2684_v28 = vpop.f32.mrf.mxu1 }
 0x142   :  { %v907_v44 = vmul.f32 %v2734_v19, %v2734_v19  ;;  %v836_v33 = vadd.f32 %v835_v49, %v2734_v19  ;;  %v2784_v49 = vadd.f32 %v2666_v13, %v2659_v9  ;;  %v912_v5 = vmul.f32 %v2777_v45, %v2777_v45 }
 0x143   :  { %v640_v21 = vpop.f32.mrf.mxu0  ;;  %v768_v35 = vpop.f32.mrf.mxu1 }
 0x144   :  { %v967_v21 = vadd.f32 %v966_v11, %v904_v3  ;;  %v906_v35 = vmul.f32 %v2727_v4, %v2727_v4  ;;  %4674 = vst [vmem:[#allocation2_spill] sm:$0xff] %v2784_v49  ;;  %v913_v9 = vmul.f32 %v2784_v49, %v2784_v49 }
 0x145   :  { %v2700_v40 = vpop.f32.mrf.mxu0  ;;  %v2702_v43 = vpop.f32.mrf.mxu1 }
 0x146   :  { %v968_v29 = vadd.f32 %v967_v21, %v905_v12 }
 0x147   :  { %v643_v51 = vpop.f32.mrf.mxu0  ;;  %v771_v52 = vpop.f32.mrf.mxu1 }
 0x148   :  { %v969_v55 = vadd.f32 %v968_v29, %v906_v35 }
 0x149   :  { %v2718_v60 = vpop.f32.mrf.mxu0  ;;  %v2720_v63 = vpop.f32.mrf.mxu1 }
 0x14a   :  { %v970_v3 = vadd.f32 %v969_v55, %v907_v44 }
 0x14b   :  { %v648_v7 = vpop.f32.mrf.mxu0  ;;  %v776_v8 = vpop.f32.mrf.mxu1 }
 0x14c   :  { %v837_v7 = vadd.f32 %v836_v33, %v2745_v36  ;;  %v2768_v8 = vadd.f32 %v2666_v13, %v2651_v1  ;;  %v971_v12 = vadd.f32 %v970_v3, %v908_v53 }
 0x14d   :  { %v2736_v20 = vpop.f32.mrf.mxu0  ;;  %v2738_v31 = vpop.f32.mrf.mxu1 }
 0x14e   :  { %v838_v21 = vadd.f32 %v837_v7, %v2752_v47  ;;  %v911_v1 = vmul.f32 %v2768_v8, %v2768_v8 }
 0x14f   :  { %v651_v17 = vpop.f32.mrf.mxu0  ;;  %v779_v25 = vpop.f32.mrf.mxu1 }
 0x150   :  { %v972_v25 = vadd.f32 %v971_v12, %v909_v57  ;;  %v839_v29 = vadd.f32 %v838_v21, %v2761_v56  ;;  %v2800_v12 = vadd.f32 %v2666_v13, %v2682_v27 }
 0x151   :  { %v654_v51 = vpop.f32.mrf.mxu0  ;;  %v2754_v52 = vpop.f32.mrf.mxu1 }
 0x152   :  { %v973_v33 = vadd.f32 %v972_v25, %v910_v61  ;;  %v840_v53 = vadd.f32 %v839_v29, %v2768_v8  ;;  %4676 = vst [vmem:[#allocation4_spill] sm:$0xff] %v2800_v12  ;;  %v2809_v25 = vadd.f32 %v2666_v13, %v2700_v40  ;;  %v915_v27 = vmul.f32 %v2800_v12, %v2800_v12 }
 0x153   :  { %v656_v0 = vpop.f32.mrf.mxu0  ;;  %v784_v37 = vpop.f32.mrf.mxu1 }
 0x154   :  { %v2793_v0 = vadd.f32 %v2666_v13, %v2668_v14  ;;  %v974_v7 = vadd.f32 %v973_v33, %v911_v1  ;;  %v841_v57 = vadd.f32 %v840_v53, %v2777_v45  ;;  %4677 = vst [vmem:[#allocation5_spill] sm:$0xff] %v2809_v25  ;;  %v916_v40 = vmul.f32 %v2809_v25, %v2809_v25 }
 0x155   :  { %v657_v11 = vpop.f32.mrf.mxu0  ;;  %v2770_v41 = vpop.f32.mrf.mxu1 }
 0x156   :  { %4675 = vst [vmem:[#allocation3_spill] sm:$0xff] %v2793_v0  ;;  %v914_v14 = vmul.f32 %v2793_v0, %v2793_v0 }
 0x157   :  { %v659_v35 = vpop.f32.mrf.mxu0  ;;  %v787_v17 = vpop.f32.mrf.mxu1 }
 0x158   :  { %v975_v35 = vadd.f32 %v974_v7, %v912_v5  ;;  %v842_v17 = vadd.f32 %v841_v57, %v2784_v49  ;;  %v2816_v5 = vadd.f32 %v2666_v13, %v2718_v60 }
 0x159   :  { %v662_v44 = vpop.f32.mrf.mxu0  ;;  %v2786_v55 = vpop.f32.mrf.mxu1 }
 0x15a   :  { %v976_v33 = vadd.f32 %v975_v35, %v913_v9  ;;  %v843_v53 = vadd.f32 %v842_v17, %v2793_v0  ;;  %4678 = vst [vmem:[#allocation6_spill] sm:$0xff] %v2816_v5  ;;  %v2825_v9 = vadd.f32 %v2666_v13, %v2736_v20  ;;  %v917_v60 = vmul.f32 %v2816_v5, %v2816_v5 }
 0x15b   :  { %v664_v37 = vpop.f32.mrf.mxu0  ;;  %v792_v3 = vpop.f32.mrf.mxu1  ;;  %v2831_v0 = vadd.f32 %v2666_v13, %v654_v51 }
 0x15c   :  { %v977_v7 = vadd.f32 %v976_v33, %v914_v14  ;;  %v844_v57 = vadd.f32 %v843_v53, %v2800_v12  ;;  %4679 = vst [vmem:[#allocation7_spill] sm:$0xff] %v2825_v9  ;;  %v918_v20 = vmul.f32 %v2825_v9, %v2825_v9 }
 0x15d   :  { %v665_v21 = vpop.f32.mrf.mxu0  ;;  %v2802_v61 = vpop.f32.mrf.mxu1  ;;  %4680 = vst [vmem:[#allocation8_spill] sm:$0xff] %v2831_v0  ;;  %v919_v51 = vmul.f32 %v2831_v0, %v2831_v0 }
 0x15f   :  { %v667_v29 = vpop.f32.mrf.mxu0  ;;  %v795_v1 = vpop.f32.mrf.mxu1 }
 0x160   :  { %v978_v29 = vadd.f32 %v977_v7, %v915_v27  ;;  %v845_v1 = vadd.f32 %v844_v57, %v2809_v25  ;;  %v2845_v25 = vadd.f32 %v2666_v13, %v662_v44 }
 0x161   :  { %v670_v37 = vpop.f32.mrf.mxu0  ;;  %v2818_v3 = vpop.f32.mrf.mxu1 }
 0x162   :  { %v979_v53 = vadd.f32 %v978_v29, %v916_v40  ;;  %v846_v12 = vadd.f32 %v845_v1, %v2816_v5  ;;  %4682 = vst [vmem:[#allocation10_spill] sm:$0xff] %v2845_v25  ;;  %v921_v44 = vmul.f32 %v2845_v25, %v2845_v25 }
 0x163   :  { %v672_v35 = vpop.f32.mrf.mxu0  ;;  %v800_v17 = vpop.f32.mrf.mxu1 }
 0x164   :  { %v2839_v35 = vadd.f32 %v2666_v13, %v657_v11  ;;  %v980_v57 = vadd.f32 %v979_v53, %v917_v60  ;;  %v847_v17 = vadd.f32 %v846_v12, %v2825_v9  ;;  %v2859_v9 = vadd.f32 %v2666_v13, %v670_v37 }
 0x165   :  { %v673_v14 = vpop.f32.mrf.mxu0  ;;  %v2833_v33 = vpop.f32.mrf.mxu1 }
 0x166   :  { %4681 = vst [vmem:[#allocation9_spill] sm:$0xff] %v2839_v35  ;;  %v981_v1 = vadd.f32 %v980_v57, %v918_v20  ;;  %v848_v5 = vadd.f32 %v847_v17, %v2831_v0  ;;  %v920_v11 = vmul.f32 %v2839_v35, %v2839_v35  ;;  %4684 = vst [vmem:[#allocation12_spill] sm:$0xff] %v2859_v9 }
 0x167   :  { %v675_v27 = vpop.f32.mrf.mxu0  ;;  %v803_v7 = vpop.f32.mrf.mxu1  ;;  %v923_v37 = vmul.f32 %v2859_v9, %v2859_v9 }
 0x168   :  { %v2853_v27 = vadd.f32 %v2666_v13, %v665_v21  ;;  %v982_v53 = vadd.f32 %v981_v1, %v919_v51  ;;  %v849_v7 = vadd.f32 %v848_v5, %v2839_v35 }
 0x169   :  { %v678_v40 = vpop.f32.mrf.mxu0  ;;  %v2847_v29 = vpop.f32.mrf.mxu1 }
 0x16a   :  { %4683 = vst [vmem:[#allocation11_spill] sm:$0xff] %v2853_v27  ;;  %v983_v17 = vadd.f32 %v982_v53, %v920_v11  ;;  %v850_v0 = vadd.f32 %v849_v7, %v2845_v25  ;;  %v922_v21 = vmul.f32 %v2853_v27, %v2853_v27  ;;  %v2873_v35 = vadd.f32 %v2666_v13, %v678_v40 }
 0x16b   :  { %v680_v60 = vpop.f32.mrf.mxu0  ;;  %v808_v12 = vpop.f32.mrf.mxu1 }
 0x16c   :  { %v2867_v60 = vadd.f32 %v2666_v13, %v673_v14  ;;  %v984_v1 = vadd.f32 %v983_v17, %v921_v44  ;;  %v851_v12 = vadd.f32 %v850_v0, %v2853_v27  ;;  %4686 = vst [vmem:[#allocation14_spill] sm:$0xff] %v2873_v35  ;;  %v925_v40 = vmul.f32 %v2873_v35, %v2873_v35 }
 0x16d   :  { %v681_v20 = vpop.f32.mrf.mxu0  ;;  %v2861_v57 = vpop.f32.mrf.mxu1 }
 0x16e   :  { %4685 = vst [vmem:[#allocation13_spill] sm:$0xff] %v2867_v60  ;;  %v985_v7 = vadd.f32 %v984_v1, %v922_v21  ;;  %v852_v25 = vadd.f32 %v851_v12, %v2859_v9  ;;  %v924_v14 = vmul.f32 %v2867_v60, %v2867_v60 }
 0x16f   :  { %v683_v51 = vpop.f32.mrf.mxu0  ;;  %v811_v5 = vpop.f32.mrf.mxu1 }
 0x170   :  { %v2881_v51 = vadd.f32 %v2666_v13, %v681_v20  ;;  %v986_v17 = vadd.f32 %v985_v7, %v923_v37  ;;  %v853_v5 = vadd.f32 %v852_v25, %v2867_v60 }
 0x171   :  { %v686_v11 = vpop.f32.mrf.mxu0  ;;  %v2875_v53 = vpop.f32.mrf.mxu1 }
 0x172   :  { %4687 = vst [vmem:[#allocation15_spill] sm:$0xff] %v2881_v51  ;;  %v2887_v27 = vadd.f32 %v2666_v13, %v686_v11  ;;  %v987_v12 = vadd.f32 %v986_v17, %v924_v14  ;;  %v854_v9 = vadd.f32 %v853_v5, %v2873_v35  ;;  %v926_v20 = vmul.f32 %v2881_v51, %v2881_v51 }
 0x173   :  { %v688_v44 = vpop.f32.mrf.mxu0  ;;  %v816_v0 = vpop.f32.mrf.mxu1 }
 0x174   :  { %v988_v7 = vadd.f32 %v987_v12, %v925_v40  ;;  %v855_v0 = vadd.f32 %v854_v9, %v2881_v51  ;;  %v927_v11 = vmul.f32 %v2887_v27, %v2887_v27 }
 0x175   :  { %v689_v21 = vpop.f32.mrf.mxu0  ;;  %v2889_v1 = vpop.f32.mrf.mxu1 }
 0x176   :  { %v2895_v44 = vadd.f32 %v2666_v13, %v689_v21  ;;  %v989_v14 = vadd.f32 %v988_v7, %v926_v20  ;;  %v856_v17 = vadd.f32 %v855_v0, %v2887_v27  ;;  %v2915_v20 = vadd.f32 %v2666_v13, %v2613_v18 }
 0x177   :  { %v691_v37 = vpop.f32.mrf.mxu0  ;;  %v819_v25 = vpop.f32.mrf.mxu1 }
 0x178   :  { %4688 = vst [vmem:[#allocation16_spill] sm:$0xff] %v2895_v44  ;;  %v928_v5 = vmul.f32 %v2895_v44, %v2895_v44  ;;  %v990_v40 = vadd.f32 %v989_v14, %v927_v11  ;;  %v857_v9 = vadd.f32 %v856_v17, %v2895_v44  ;;  %v2923_v14 = vadd.f32 %v2666_v13, %v2615_v22 }
 0x179   :  { %v694_v60 = vpop.f32.mrf.mxu0  ;;  %v2900_v49 = vpop.f32.mrf.mxu1  ;;  %v931_v18 = vmul.f32 %v2915_v20, %v2915_v20 }
 0x17a   :  { %v2906_v21 = vadd.f32 %v2666_v13, %v694_v60  ;;  %v991_v7 = vadd.f32 %v990_v40, %v928_v5  ;;  %v2932_v5 = vadd.f32 %v2666_v13, %v2617_v26  ;;  %v932_v22 = vmul.f32 %v2923_v14, %v2923_v14 }
 0x17b   :  { %v696_v37 = vpop.f32.mrf.mxu0  ;;  %v824_v25 = vpop.f32.mrf.mxu1  ;;  %v2946_v26 = vadd.f32 %v2666_v13, %v2621_v34  ;;  %v2960_v34 = vadd.f32 %v2666_v13, %v2629_v42  ;;  %v2974_v42 = vadd.f32 %v2666_v13, %v2637_v50  ;;  %v2988_v50 = vadd.f32 %v2666_v13, %v2645_v58 }
 0x17c   :  { %v929_v12 = vmul.f32 %v2906_v21, %v2906_v21  ;;  %v858_v0 = vadd.f32 %v857_v9, %v2906_v21  ;;  %v2939_v9 = vadd.f32 %v2666_v13, %v2619_v30  ;;  %v2953_v30 = vadd.f32 %v2666_v13, %v2625_v38 }
 0x17d   :  { %v697_v51 = vpop.f32.mrf.mxu0  ;;  %v2911_v35 = vpop.f32.mrf.mxu1  ;;  %v2967_v38 = vadd.f32 %v2666_v13, %v2633_v46  ;;  %v2981_v46 = vadd.f32 %v2666_v13, %v2641_v54  ;;  %v2995_v54 = vadd.f32 %v2666_v13, %v2649_v62  ;;  %v3002_v58 = vadd.f32 %v2666_v13, %v2653_v2 }
 0x17e   :  { %v2919_v60 = vadd.f32 %v2666_v13, %v697_v51  ;;  %v992_v17 = vadd.f32 %v991_v7, %v929_v12  ;;  %v3009_v62 = vadd.f32 %v2666_v13, %v2657_v6  ;;  %v3016_v2 = vadd.f32 %v2666_v13, %v2661_v10 }
 0x17f   :  { %v699_v37 = vpop.f32.mrf.mxu0  ;;  %v827_v11 = vpop.f32.mrf.mxu1  ;;  %v3023_v6 = vadd.f32 %v2666_v13, %v2670_v15  ;;  %v3030_v10 = vadd.f32 %v2666_v13, %v2684_v28  ;;  %v3037_v15 = vadd.f32 %v2666_v13, %v2702_v43 }
 0x180   :  { %v859_v25 = vadd.f32 %v858_v0, %v2919_v60  ;;  %v930_v44 = vmul.f32 %v2919_v60, %v2919_v60  ;;  %v933_v0 = vmul.f32 %v2932_v5, %v2932_v5  ;;  %v934_v11 = vmul.f32 %v2939_v9, %v2939_v9 }
 0x181   :  { %4689 = vst [vmem:[#allocation17_spill] sm:$0xff] %v3030_v10  ;;  %4690 = vst [vmem:[#allocation18_spill] sm:$0xff] %v3037_v15 }
 0x182   :  { %v860_v51 = vadd.f32 %v859_v25, %v2915_v20  ;;  %v993_v40 = vadd.f32 %v992_v17, %v930_v44 }
 0x184   :  { %v861_v12 = vadd.f32 %v860_v51, %v2923_v14  ;;  %v994_v7 = vadd.f32 %v993_v40, %v931_v18  ;;  %v935_v18 = vmul.f32 %v2946_v26, %v2946_v26 }
 0x186   :  { %v862_v37 = vadd.f32 %v861_v12, %v2932_v5  ;;  %v995_v44 = vadd.f32 %v994_v7, %v932_v22  ;;  %v936_v22 = vmul.f32 %v2953_v30, %v2953_v30 }
 0x188   :  { %v863_v17 = vadd.f32 %v862_v37, %v2939_v9  ;;  %v996_v25 = vadd.f32 %v995_v44, %v933_v0  ;;  %v937_v0 = vmul.f32 %v2960_v34, %v2960_v34 }
 0x18a   :  { %v864_v51 = vadd.f32 %v863_v17, %v2946_v26  ;;  %v997_v40 = vadd.f32 %v996_v25, %v934_v11  ;;  %v938_v11 = vmul.f32 %v2967_v38, %v2967_v38 }
 0x18c   :  { %v865_v12 = vadd.f32 %v864_v51, %v2953_v30  ;;  %v998_v7 = vadd.f32 %v997_v40, %v935_v18  ;;  %v939_v18 = vmul.f32 %v2974_v42, %v2974_v42 }
 0x18e   :  { %v866_v37 = vadd.f32 %v865_v12, %v2960_v34  ;;  %v999_v44 = vadd.f32 %v998_v7, %v936_v22  ;;  %v940_v22 = vmul.f32 %v2981_v46, %v2981_v46 }
 0x190   :  { %v867_v17 = vadd.f32 %v866_v37, %v2967_v38  ;;  %v1000_v25 = vadd.f32 %v999_v44, %v937_v0  ;;  %v941_v0 = vmul.f32 %v2988_v50, %v2988_v50 }
 0x192   :  { %v1001_v51 = vadd.f32 %v1000_v25, %v938_v11  ;;  %v868_v40 = vadd.f32 %v867_v17, %v2974_v42  ;;  %v942_v11 = vmul.f32 %v2995_v54, %v2995_v54 }
 0x194   :  { %v869_v12 = vadd.f32 %v868_v40, %v2981_v46  ;;  %v1002_v7 = vadd.f32 %v1001_v51, %v939_v18  ;;  %v943_v18 = vmul.f32 %v3002_v58, %v3002_v58 }
 0x196   :  { %v870_v37 = vadd.f32 %v869_v12, %v2988_v50  ;;  %v1003_v44 = vadd.f32 %v1002_v7, %v940_v22  ;;  %v944_v22 = vmul.f32 %v3009_v62, %v3009_v62 }
 0x198   :  { %v871_v17 = vadd.f32 %v870_v37, %v2995_v54  ;;  %v1004_v25 = vadd.f32 %v1003_v44, %v941_v0  ;;  %v945_v0 = vmul.f32 %v3016_v2, %v3016_v2 }
 0x19a   :  { %v872_v51 = vadd.f32 %v871_v17, %v3002_v58  ;;  %v1005_v40 = vadd.f32 %v1004_v25, %v942_v11  ;;  %v946_v11 = vmul.f32 %v3023_v6, %v3023_v6 }
 0x19c   :  { %v873_v12 = vadd.f32 %v872_v51, %v3009_v62  ;;  %v1006_v7 = vadd.f32 %v1005_v40, %v943_v18  ;;  %v947_v18 = vmul.f32 %v3030_v10, %v3030_v10  ;;  %v3045_v40 = vadd.f32 %v2666_v13, %v2720_v63 }
 0x19d   :  { %v3059_v63 = vadd.f32 %v2666_v13, %v2754_v52  ;;  %v3073_v52 = vadd.f32 %v2666_v13, %v2786_v55  ;;  %v3087_v55 = vadd.f32 %v2666_v13, %v2818_v3  ;;  %v3101_v3 = vadd.f32 %v2666_v13, %v2847_v29 }
 0x19e   :  { %v874_v37 = vadd.f32 %v873_v12, %v3016_v2  ;;  %v1007_v44 = vadd.f32 %v1006_v7, %v944_v22  ;;  %4691 = vst [vmem:[#allocation19_spill] sm:$0xff] %v3045_v40  ;;  %v948_v12 = vmul.f32 %v3037_v15, %v3037_v15  ;;  %v3052_v7 = vadd.f32 %v2666_v13, %v2738_v31 }
 0x19f   :  { %4693 = vst [vmem:[#allocation21_spill] sm:$0xff] %v3059_v63  ;;  %v3066_v31 = vadd.f32 %v2666_v13, %v2770_v41  ;;  %v3080_v41 = vadd.f32 %v2666_v13, %v2802_v61  ;;  %4696 = vst [vmem:[#allocation24_spill] sm:$0xff] %v3087_v55  ;;  %v3094_v61 = vadd.f32 %v2666_v13, %v2833_v33 }
 0x1a0   :  { %v875_v17 = vadd.f32 %v874_v37, %v3023_v6  ;;  %v1008_v25 = vadd.f32 %v1007_v44, %v945_v0  ;;  %4692 = vst [vmem:[#allocation20_spill] sm:$0xff] %v3052_v7  ;;  %v949_v44 = vmul.f32 %v3045_v40, %v3045_v40  ;;  %4698 = vst [vmem:[#allocation26_spill] sm:$0xff] %v3101_v3 }
 0x1a1   :  { %4694 = vst [vmem:[#allocation22_spill] sm:$0xff] %v3066_v31  ;;  %4695 = vst [vmem:[#allocation23_spill] sm:$0xff] %v3080_v41  ;;  %v3108_v33 = vadd.f32 %v2666_v13, %v2861_v57  ;;  %v3115_v29 = vadd.f32 %v2666_v13, %v2875_v53  ;;  %v3122_v57 = vadd.f32 %v2666_v13, %v2889_v1 }
 0x1a2   :  { %v876_v51 = vadd.f32 %v875_v17, %v3030_v10  ;;  %v1009_v28 = vadd.f32 %v1008_v25, %v946_v11  ;;  %v950_v25 = vmul.f32 %v3052_v7, %v3052_v7  ;;  %4697 = vst [vmem:[#allocation25_spill] sm:$0xff] %v3094_v61  ;;  %v3129_v53 = vadd.f32 %v2666_v13, %v2900_v49 }
 0x1a3   :  { %4699 = vst [vmem:[#allocation27_spill] sm:$0xff] %v3108_v33  ;;  %4700 = vst [vmem:[#allocation28_spill] sm:$0xff] %v3115_v29  ;;  %v3136_v1 = vadd.f32 %v2666_v13, %v2911_v35 }
 0x1a4   :  { %v877_v22 = vadd.f32 %v876_v51, %v3037_v15  ;;  %v1010_v43 = vadd.f32 %v1009_v28, %v947_v18  ;;  %v951_v28 = vmul.f32 %v3059_v63, %v3059_v63  ;;  %4701 = vst [vmem:[#allocation29_spill] sm:$0xff] %v3122_v57  ;;  %4702 = vst [vmem:[#allocation30_spill] sm:$0xff] %v3129_v53 }
 0x1a5   :  { %4703 = vst [vmem:[#allocation31_spill] sm:$0xff] %v3136_v1 }
 0x1a6   :  { %v1011_v0 = vadd.f32 %v1010_v43, %v948_v12  ;;  %v878_v37 = vadd.f32 %v877_v22, %v3045_v40  ;;  %v952_v43 = vmul.f32 %v3066_v31, %v3066_v31 }
 0x1a8   :  { %v1012_v11 = vadd.f32 %v1011_v0, %v949_v44  ;;  %v879_v17 = vadd.f32 %v878_v37, %v3052_v7  ;;  %v953_v44 = vmul.f32 %v3073_v52, %v3073_v52 }
 0x1aa   :  { %v1013_v18 = vadd.f32 %v1012_v11, %v950_v25  ;;  %v880_v51 = vadd.f32 %v879_v17, %v3059_v63  ;;  %v954_v25 = vmul.f32 %v3080_v41, %v3080_v41 }
 0x1ac   :  { %v1014_v22 = vadd.f32 %v1013_v18, %v951_v28  ;;  %v881_v12 = vadd.f32 %v880_v51, %v3066_v31  ;;  %v955_v28 = vmul.f32 %v3087_v55, %v3087_v55 }
 0x1ae   :  { %v1015_v0 = vadd.f32 %v1014_v22, %v952_v43  ;;  %v882_v37 = vadd.f32 %v881_v12, %v3073_v52  ;;  %v956_v43 = vmul.f32 %v3094_v61, %v3094_v61 }
 0x1b0   :  { %v1016_v11 = vadd.f32 %v1015_v0, %v953_v44  ;;  %v883_v17 = vadd.f32 %v882_v37, %v3080_v41  ;;  %v957_v44 = vmul.f32 %v3101_v3, %v3101_v3 }
 0x1b2   :  { %v1017_v18 = vadd.f32 %v1016_v11, %v954_v25  ;;  %v884_v51 = vadd.f32 %v883_v17, %v3087_v55  ;;  %v958_v25 = vmul.f32 %v3108_v33, %v3108_v33 }
 0x1b4   :  { %v1018_v22 = vadd.f32 %v1017_v18, %v955_v28  ;;  %v885_v12 = vadd.f32 %v884_v51, %v3094_v61  ;;  %v959_v28 = vmul.f32 %v3115_v29, %v3115_v29 }
 0x1b6   :  { %v1019_v0 = vadd.f32 %v1018_v22, %v956_v43  ;;  %v886_v37 = vadd.f32 %v885_v12, %v3101_v3  ;;  %v960_v43 = vmul.f32 %v3122_v57, %v3122_v57 }
 0x1b8   :  { %v1020_v11 = vadd.f32 %v1019_v0, %v957_v44  ;;  %v887_v17 = vadd.f32 %v886_v37, %v3108_v33  ;;  %v961_v44 = vmul.f32 %v3129_v53, %v3129_v53 }
 0x1ba   :  { %v1021_v18 = vadd.f32 %v1020_v11, %v958_v25  ;;  %v888_v51 = vadd.f32 %v887_v17, %v3115_v29  ;;  %v962_v17 = vmul.f32 %v3136_v1, %v3136_v1 }
 0x1bc   :  { %v1022_v22 = vadd.f32 %v1021_v18, %v959_v28  ;;  %v889_v12 = vadd.f32 %v888_v51, %v3122_v57 }
 0x1be   :  { %v1023_v0 = vadd.f32 %v1022_v22, %v960_v43  ;;  %v890_v37 = vadd.f32 %v889_v12, %v3129_v53 }
 0x1c0   :  { %v1024_v11 = vadd.f32 %v1023_v0, %v961_v44  ;;  %v891_v49 = vadd.f32 %v890_v37, %v3136_v1  ;;  %v1104_v44 = vlaneseq }
 0x1c2   :  { %v892_v25 = vrot.slane %v891_v49, 4  ;;  %v1025_v18 = vadd.f32 %v1024_v11, %v962_v17  ;;  %v3148_v11 = vshrl.u32 %v1104_v44, 7  ;;  %v4711_v44 = vld [vmem:[#allocation9_spill] sm:$0xff]  ;;  %v4718_v17 = vld [vmem:[#allocation16_spill] sm:$0xff] }
 0x1c4   :  { %v893_v51 = vadd.f32 %v892_v25, %v891_v49  ;;  %v1026_v28 = vrot.slane %v1025_v18, 4 }
 0x1c6   :  { %v894_v31 = vrot.slane %v893_v51, 2  ;;  %v1027_v63 = vadd.f32 %v1026_v28, %v1025_v18  ;;  %v4713_v28 = vld [vmem:[#allocation11_spill] sm:$0xff]  ;;  %v4715_v18 = vld [vmem:[#allocation13_spill] sm:$0xff] }
 0x1c8   :  { %v895_v13 = vadd.f32 %v894_v31, %v893_v51  ;;  %v1028_v35 = vrot.slane %v1027_v63, 2  ;;  %v4714_v51 = vld [vmem:[#allocation12_spill] sm:$0xff]  ;;  %v1035_v31 = vld [vmem:[%s4596_s3] sm:$0x1] }
 0x1ca   :  { %v896_v22 = vrot.slane %v895_v13, 1  ;;  %v1029_v43 = vadd.f32 %v1028_v35, %v1027_v63  ;;  %v4707_v35 = vld [vmem:[#allocation5_spill] sm:$0xff] }
 0x1cc   :  { %v897_v12 = vadd.f32 %v896_v22, %v895_v13  ;;  %v1030_v7 = vrot.slane %v1029_v43, 1  ;;  %v4706_v13 = vld [vmem:[#allocation4_spill] sm:$0xff]  ;;  %v4708_v22 = vld [vmem:[#allocation6_spill] sm:$0xff] }
 0x1ce   :  { %v3144_v40 = vmul.f32 0.001953125, %v897_v12  ;;  %v1031_v0 = vadd.f32 %v1030_v7, %v1029_v43 }
 0x1d0   :  { %v1032_v37 = vmul.f32 0.001953125, %v1031_v0  ;;  %v1033_v15 = vmul.f32 %v3144_v40, %v3144_v40  ;;  %v4704_v0 = vld [vmem:[#allocation2_spill] sm:$0xff]  ;;  %v1068_v61 = vsub.f32 %v4718_v17, %v3144_v40  ;;  %v1069_v43 = vsub.f32 %v2906_v21, %v3144_v40 }
 0x1d1   :  { %v1070_v12 = vsub.f32 %v2919_v60, %v3144_v40  ;;  %v1071_v7 = vsub.f32 %v2915_v20, %v3144_v40  ;;  %v1072_v63 = vsub.f32 %v2923_v14, %v3144_v40  ;;  %v1073_v53 = vsub.f32 %v2932_v5, %v3144_v40 }
 0x1d2   :  { %v1034_v10 = vsub.f32 %v1032_v37, %v1033_v15  ;;  %v4705_v37 = vld [vmem:[#allocation3_spill] sm:$0xff]  ;;  %v1074_v17 = vsub.f32 %v2939_v9, %v3144_v40  ;;  %v1075_v21 = vsub.f32 %v2946_v26, %v3144_v40  ;;  %v1076_v60 = vsub.f32 %v2953_v30, %v3144_v40 }
 0x1d3   :  { %v4717_v15 = vld [vmem:[#allocation15_spill] sm:$0xff]  ;;  %v1077_v25 = vsub.f32 %v2960_v34, %v3144_v40  ;;  %v1078_v20 = vsub.f32 %v2967_v38, %v3144_v40  ;;  %v1079_v5 = vsub.f32 %v2974_v42, %v3144_v40  ;;  %v1080_v9 = vsub.f32 %v2981_v46, %v3144_v40  ;;  %v4719_v46 = vld [vmem:[#allocation17_spill] sm:$0xff] }
 0x1d4   :  { %v1036_v49 = vadd.f32 1e-05, %v1034_v10  ;;  %v4716_v10 = vld [vmem:[#allocation14_spill] sm:$0xff]  ;;  %v1081_v1 = vsub.f32 %v2988_v50, %v3144_v40  ;;  %v1082_v26 = vsub.f32 %v2995_v54, %v3144_v40  ;;  %v1083_v30 = vsub.f32 %v3002_v58, %v3144_v40  ;;  %v4722_v58 = vld [vmem:[#allocation19_spill] sm:$0xff] }
 0x1d5   :  { %v1084_v34 = vsub.f32 %v3009_v62, %v3144_v40  ;;  %v1085_v38 = vsub.f32 %v3016_v2, %v3144_v40  ;;  %v1086_v42 = vsub.f32 %v3023_v6, %v3144_v40  ;;  %v4720_v50 = vld [vmem:[#allocation18_spill] sm:$0xff]  ;;  %v4721_v54 = vsub.s32 0, %v3148_v11  ;;  %v4723_v62 = vld [vmem:[#allocation20_spill] sm:$0xff]  ;;  %v4724_v2 = vld [vmem:[#allocation21_spill] sm:$0xff] }
 0x1d6   :  { %2306 = vrsqrt.f32 %v1036_v49  ;;  %v4712_v49 = vld [vmem:[#allocation10_spill] sm:$0xff]  ;;  %v1089_v33 = vsub.f32 %v4722_v58, %v3144_v40  ;;  %v1090_v3 = vsub.f32 %v4723_v62, %v3144_v40  ;;  %v1091_v55 = vsub.f32 %v4724_v2, %v3144_v40 }
 0x1d7   :  { %v4725_v6 = vld [vmem:[#allocation22_spill] sm:$0xff]  ;;  %v4727_v11 = vsub.f32 %v2673_v16, %v3144_v40  ;;  %v4729_v62 = vsub.f32 %v2689_v32, %v3144_v40  ;;  %v4730_v2 = vsub.f32 %v2698_v39, %v3144_v40 }
 0x1d8   :  { %v1092_v41 = vsub.f32 %v4725_v6, %v3144_v40  ;;  %v4731_v6 = vsub.f32 %v2709_v48, %v3144_v40 }
 0x1e3   :  { %v2307_v57 = vpop.eup %2306 }
 0x1e4   :  { %v1038_v14 = vmul.f32 %v2307_v57, %v1035_v31  ;;  %v1087_v57 = vsub.f32 %v4719_v46, %v3144_v40  ;;  %v1088_v31 = vsub.f32 %v4720_v50, %v3144_v40  ;;  %v4726_v46 = vsub.f32 %v2677_v23, %v3144_v40 }
 0x1e6   :  { %v3276_v29 = vrot.slane %v1038_v14, %v4721_v54  ;;  %v4728_v54 = vsub.f32 %v2680_v24, %v3144_v40 }
 0x1e8   :  { %v3290_v50 = vmul.f32 %v3276_v29, %v4726_v46  ;;  %v3296_v14 = vmul.f32 %v3276_v29, %v4727_v11  ;;  %v3302_v58 = vmul.f32 %v3276_v29, %v4728_v54  ;;  %v3308_v23 = vmul.f32 %v3276_v29, %v4729_v62 }
 0x1e9   :  { %v3314_v16 = vmul.f32 %v3276_v29, %v4730_v2  ;;  %v3320_v24 = vmul.f32 %v3276_v29, %v4731_v6  ;;  %v4732_v46 = vsub.f32 %v2716_v59, %v3144_v40  ;;  %v4733_v11 = vsub.f32 %v2727_v4, %v3144_v40 }
 0x1ea   :  { %v4734_v54 = vsub.f32 %v2734_v19, %v3144_v40  ;;  %v4735_v62 = vsub.f32 %v2745_v36, %v3144_v40  ;;  %v4736_v2 = vsub.f32 %v2752_v47, %v3144_v40  ;;  %v4737_v6 = vsub.f32 %v2761_v56, %v3144_v40 }
 0x1eb   :  { %v3326_v32 = vmul.f32 %v3276_v29, %v4732_v46  ;;  %v3332_v39 = vmul.f32 %v3276_v29, %v4733_v11  ;;  %v4738_v46 = vsub.f32 %v2768_v8, %v3144_v40  ;;  %v4739_v11 = vsub.f32 %v2777_v45, %v3144_v40 }
 0x1ec   :  { %v3338_v48 = vmul.f32 %v3276_v29, %v4734_v54  ;;  %v3344_v59 = vmul.f32 %v3276_v29, %v4735_v62  ;;  %v3350_v4 = vmul.f32 %v3276_v29, %v4736_v2  ;;  %v3356_v19 = vmul.f32 %v3276_v29, %v4737_v6 }
 0x1ed   :  { %v3362_v36 = vmul.f32 %v3276_v29, %v4738_v46  ;;  %v3368_v47 = vmul.f32 %v3276_v29, %v4739_v11  ;;  %v4740_v54 = vsub.f32 %v4704_v0, %v3144_v40  ;;  %v4741_v62 = vsub.f32 %v4705_v37, %v3144_v40  ;;  %v4745_v11 = vld [vmem:[#allocation7_spill] sm:$0xff] }
 0x1ee   :  { %v4742_v2 = vsub.f32 %v4706_v13, %v3144_v40  ;;  %v4743_v6 = vsub.f32 %v4707_v35, %v3144_v40  ;;  %v4744_v46 = vsub.f32 %v4708_v22, %v3144_v40 }
 0x1ef   :  { %v3374_v56 = vmul.f32 %v3276_v29, %v4740_v54  ;;  %v3380_v8 = vmul.f32 %v3276_v29, %v4741_v62  ;;  %v4746_v54 = vsub.f32 %v4745_v11, %v3144_v40  ;;  %v4747_v62 = vld [vmem:[#allocation8_spill] sm:$0xff] }
 0x1f0   :  { %v3386_v45 = vmul.f32 %v3276_v29, %v4742_v2  ;;  %v3392_v0 = vmul.f32 %v3276_v29, %v4743_v6  ;;  %v3398_v37 = vmul.f32 %v3276_v29, %v4744_v46  ;;  %v4748_v2 = vsub.f32 %v4747_v62, %v3144_v40 }
 0x1f1   :  { %v3404_v13 = vmul.f32 %v3276_v29, %v4746_v54  ;;  %v4749_v6 = vsub.f32 %v4711_v44, %v3144_v40  ;;  %v4750_v46 = vsub.f32 %v4712_v49, %v3144_v40  ;;  %v4751_v54 = vsub.f32 %v4713_v28, %v3144_v40 }
 0x1f2   :  { %v3410_v35 = vmul.f32 %v3276_v29, %v4748_v2  ;;  %v4752_v2 = vsub.f32 %v4714_v51, %v3144_v40 }
 0x1f3   :  { %v3416_v22 = vmul.f32 %v3276_v29, %v4749_v6  ;;  %v3422_v11 = vmul.f32 %v3276_v29, %v4750_v46  ;;  %v3428_v62 = vmul.f32 %v3276_v29, %v4751_v54  ;;  %v4753_v6 = vsub.f32 %v4715_v18, %v3144_v40 }
 0x1f4   :  { %v3434_v44 = vmul.f32 %v3276_v29, %v4752_v2  ;;  %v4754_v46 = vsub.f32 %v4716_v10, %v3144_v40  ;;  %v4755_v54 = vsub.f32 %v4717_v15, %v3144_v40  ;;  %v4756_v2 = vsub.f32 %v2887_v27, %v3144_v40 }
 0x1f5   :  { %v3440_v49 = vmul.f32 %v3276_v29, %v4753_v6  ;;  %v3461_v6 = vmul.f32 %v3276_v29, %v1068_v61  ;;  %v3464_v10 = vmul.f32 %v3276_v29, %v1069_v43  ;;  %v3470_v15 = vmul.f32 %v3276_v29, %v1071_v7 }
 0x1f6   :  { %v3446_v28 = vmul.f32 %v3276_v29, %v4754_v46  ;;  %v3452_v51 = vmul.f32 %v3276_v29, %v4755_v54  ;;  %v3458_v18 = vmul.f32 %v3276_v29, %v4756_v2  ;;  %v3467_v46 = vmul.f32 %v3276_v29, %v1070_v12 }
 0x1f7   :  { %v3473_v54 = vmul.f32 %v3276_v29, %v1072_v63  ;;  %v3476_v27 = vmul.f32 %v3276_v29, %v1073_v53  ;;  %v3479_v2 = vmul.f32 %v3276_v29, %v1074_v17  ;;  %v3482_v61 = vmul.f32 %v3276_v29, %v1075_v21 }
 0x1f8   :  { %v3485_v43 = vmul.f32 %v3276_v29, %v1076_v60  ;;  %v3488_v12 = vmul.f32 %v3276_v29, %v1077_v25  ;;  %v3491_v7 = vmul.f32 %v3276_v29, %v1078_v20  ;;  %v3494_v63 = vmul.f32 %v3276_v29, %v1079_v5 }
 0x1f9   :  { %v3497_v53 = vmul.f32 %v3276_v29, %v1080_v9  ;;  %v3500_v17 = vmul.f32 %v3276_v29, %v1081_v1  ;;  %v3503_v21 = vmul.f32 %v3276_v29, %v1082_v26  ;;  %v3506_v60 = vmul.f32 %v3276_v29, %v1083_v30 }
 0x1fa   :  { %v3509_v25 = vmul.f32 %v3276_v29, %v1084_v34  ;;  %v3512_v20 = vmul.f32 %v3276_v29, %v1085_v38  ;;  %v3515_v5 = vmul.f32 %v3276_v29, %v1086_v42  ;;  %v3518_v9 = vmul.f32 %v3276_v29, %v1087_v57 }
 0x1fb   :  { %v3521_v1 = vmul.f32 %v3276_v29, %v1088_v31  ;;  %v3524_v26 = vmul.f32 %v3276_v29, %v1089_v33  ;;  %v3527_v30 = vmul.f32 %v3276_v29, %v1090_v3  ;;  %v3530_v34 = vmul.f32 %v3276_v29, %v1091_v55  ;;  %v4762_v31 = vld [vmem:[#allocation23_spill] sm:$0xff]  ;;  %v4765_v3 = vld [vmem:[#allocation24_spill] sm:$0xff] }
 0x1fc   :  { %v3533_v38 = vmul.f32 %v3276_v29, %v1092_v41  ;;  %v4760_v42 = vsub.f32 %v3073_v52, %v3144_v40  ;;  %v4768_v41 = vld [vmem:[#allocation25_spill] sm:$0xff] }
 0x1fd   :  { %4757 = vst [vmem:[#allocation2_spill] sm:$0xff] %v3521_v1  ;;  %4758 = vst [vmem:[#allocation3_spill] sm:$0xff] %v3527_v30  ;;  %v4763_v1 = vsub.f32 %v4762_v31, %v3144_v40  ;;  %v4766_v30 = vsub.f32 %v4765_v3, %v3144_v40 }
 0x1fe   :  { %4759 = vst [vmem:[#allocation4_spill] sm:$0xff] %v3533_v38  ;;  %v3539_v57 = vmul.f32 %v3276_v29, %v4760_v42  ;;  %v4769_v38 = vsub.f32 %v4768_v41, %v3144_v40  ;;  %v4771_v42 = vld [vmem:[#allocation26_spill] sm:$0xff] }
 0x1ff   :  { %v3545_v33 = vmul.f32 %v3276_v29, %v4763_v1  ;;  %v3551_v55 = vmul.f32 %v3276_v29, %v4766_v30  ;;  %v4774_v1 = vld [vmem:[#allocation27_spill] sm:$0xff]  ;;  %v4777_v30 = vld [vmem:[#allocation28_spill] sm:$0xff] }
 0x200   :  { %4761 = vst [vmem:[#allocation5_spill] sm:$0xff] %v3539_v57  ;;  %v3557_v52 = vmul.f32 %v3276_v29, %v4769_v38  ;;  %v4772_v57 = vsub.f32 %v4771_v42, %v3144_v40  ;;  %v4779_v38 = vld [vmem:[#allocation29_spill] sm:$0xff] }
 0x201   :  { %4764 = vst [vmem:[#allocation6_spill] sm:$0xff] %v3545_v33  ;;  %4767 = vst [vmem:[#allocation9_spill] sm:$0xff] %v3551_v55  ;;  %v4775_v33 = vsub.f32 %v4774_v1, %v3144_v40  ;;  %v4778_v55 = vsub.f32 %v4777_v30, %v3144_v40 }
 0x202   :  { %4770 = vst [vmem:[#allocation10_spill] sm:$0xff] %v3557_v52  ;;  %v3563_v31 = vmul.f32 %v3276_v29, %v4772_v57  ;;  %v4780_v52 = vsub.f32 %v4779_v38, %v3144_v40  ;;  %v4781_v57 = vld [vmem:[#allocation30_spill] sm:$0xff] }
 0x203   :  { %v3569_v3 = vmul.f32 %v3276_v29, %v4775_v33  ;;  %v3575_v41 = vmul.f32 %v3276_v29, %v4778_v55  ;;  %v4783_v33 = vld [vmem:[#allocation31_spill] sm:$0xff]  ;;  %v3598_v55 = vld [vmem:[%s4597_s4] ss:$0 sm:$0xff] }
 0x204   :  { %4773 = vst [vmem:[#allocation11_spill] sm:$0xff] %v3563_v31  ;;  %v3581_v42 = vmul.f32 %v3276_v29, %v4780_v52  ;;  %v4782_v31 = vsub.f32 %v4781_v57, %v3144_v40  ;;  %v3602_v52 = vadd.f32 %v3598_v55, %v3290_v50  ;;  %v3606_v38 = vadd.f32 %v3598_v55, %v3296_v14  ;;  %v4790_v57 = vld [vmem:[#allocation3_spill] sm:$0xff] }
 0x205   :  { %4776 = vst [vmem:[#allocation12_spill] sm:$0xff] %v3569_v3  ;;  %v4784_v3 = vsub.f32 %v4783_v33, %v3144_v40  ;;  %v3614_v40 = vadd.f32 %v3598_v55, %v3308_v23  ;;  %v3622_v50 = vadd.f32 %v3598_v55, %v3320_v24  ;;  %v3626_v14 = vadd.f32 %v3598_v55, %v3326_v32  ;;  %v4793_v33 = vld [vmem:[#allocation4_spill] sm:$0xff] }
 0x206   :  { %v3587_v1 = vmul.f32 %v3276_v29, %v4782_v31  ;;  %v3610_v31 = vadd.f32 %v3598_v55, %v3302_v58  ;;  %v3630_v58 = vadd.f32 %v3598_v55, %v3332_v39  ;;  %v3634_v23 = vadd.f32 %v3598_v55, %v3338_v48 }
 0x207   :  { %v3593_v30 = vmul.f32 %v3276_v29, %v4784_v3  ;;  %v3618_v29 = vadd.f32 %v3598_v55, %v3314_v16  ;;  %v3638_v16 = vadd.f32 %v3598_v55, %v3344_v59  ;;  %v3642_v24 = vadd.f32 %v3598_v55, %v3350_v4  ;;  %v4787_v3 = vld [vmem:[#allocation2_spill] sm:$0xff] }
 0x208   :  { %v3646_v32 = vadd.f32 %v3598_v55, %v3356_v19  ;;  %v3650_v39 = vadd.f32 %v3598_v55, %v3362_v36  ;;  %v3654_v48 = vadd.f32 %v3598_v55, %v3368_v47  ;;  %v3658_v59 = vadd.f32 %v3598_v55, %v3374_v56 }
 0x209   :  { %v3662_v4 = vadd.f32 %v3598_v55, %v3380_v8  ;;  %v3666_v19 = vadd.f32 %v3598_v55, %v3386_v45  ;;  %v3670_v36 = vadd.f32 %v3598_v55, %v3392_v0  ;;  %v3674_v47 = vadd.f32 %v3598_v55, %v3398_v37 }
 0x20a   :  { %v3678_v56 = vadd.f32 %v3598_v55, %v3404_v13  ;;  %v3682_v8 = vadd.f32 %v3598_v55, %v3410_v35  ;;  %v3686_v45 = vadd.f32 %v3598_v55, %v3416_v22  ;;  %v3690_v0 = vadd.f32 %v3598_v55, %v3422_v11 }
 0x20b   :  { %v3694_v37 = vadd.f32 %v3598_v55, %v3428_v62  ;;  %v3698_v13 = vadd.f32 %v3598_v55, %v3434_v44  ;;  %v3702_v35 = vadd.f32 %v3598_v55, %v3440_v49  ;;  %v3706_v22 = vadd.f32 %v3598_v55, %v3446_v28 }
 0x20c   :  { %v3710_v11 = vadd.f32 %v3598_v55, %v3452_v51  ;;  %v3714_v62 = vadd.f32 %v3598_v55, %v3458_v18  ;;  %v3718_v44 = vadd.f32 %v3598_v55, %v3461_v6  ;;  %v3722_v49 = vadd.f32 %v3598_v55, %v3464_v10 }
 0x20d   :  { %v3726_v28 = vadd.f32 %v3598_v55, %v3467_v46  ;;  %v3730_v51 = vadd.f32 %v3598_v55, %v3470_v15  ;;  %v3734_v18 = vadd.f32 %v3598_v55, %v3473_v54  ;;  %v3738_v6 = vadd.f32 %v3598_v55, %v3476_v27 }
 0x20e   :  { %v3742_v10 = vadd.f32 %v3598_v55, %v3479_v2  ;;  %v3746_v46 = vadd.f32 %v3598_v55, %v3482_v61  ;;  %v3750_v15 = vadd.f32 %v3598_v55, %v3485_v43  ;;  %v3754_v54 = vadd.f32 %v3598_v55, %v3488_v12 }
 0x20f   :  { %v3758_v27 = vadd.f32 %v3598_v55, %v3491_v7  ;;  %v3762_v2 = vadd.f32 %v3598_v55, %v3494_v63  ;;  %v3766_v61 = vadd.f32 %v3598_v55, %v3497_v53  ;;  %v3770_v43 = vadd.f32 %v3598_v55, %v3500_v17 }
 0x210   :  { %v3774_v12 = vadd.f32 %v3598_v55, %v3503_v21  ;;  %v3778_v7 = vadd.f32 %v3598_v55, %v3506_v60  ;;  %v3782_v63 = vadd.f32 %v3598_v55, %v3509_v25  ;;  %v3786_v53 = vadd.f32 %v3598_v55, %v3512_v20 }
 0x211   :  { %v3790_v17 = vadd.f32 %v3598_v55, %v3515_v5  ;;  %v3794_v21 = vadd.f32 %v3598_v55, %v3518_v9  ;;  %v3798_v60 = vadd.f32 %v3598_v55, %v4787_v3  ;;  %v3802_v25 = vadd.f32 %v3598_v55, %v3524_v26 }
 0x212   :  { %4785 = vst [vmem:[#allocation13_spill] sm:$0xff] %v3782_v63  ;;  %v3806_v20 = vadd.f32 %v3598_v55, %v4790_v57  ;;  %v3810_v5 = vadd.f32 %v3598_v55, %v3530_v34  ;;  %v3814_v9 = vadd.f32 %v3598_v55, %v4793_v33  ;;  %vm1244_vm0 = vcmp.ge.f32.partialorder %v3602_v52, 0.0 }
 0x213   :  { %4786 = vst [vmem:[#allocation14_spill] sm:$0xff] %v3794_v21  ;;  %4788 = vst [vmem:[#allocation15_spill] sm:$0xff] %v3798_v60  ;;  %v4795_v21 = vld [vmem:[#allocation5_spill] sm:$0xff]  ;;  %v4797_v60 = vld [vmem:[#allocation6_spill] sm:$0xff]  ;;  %vm1245_vm1 = vcmp.ge.f32.partialorder %v3606_v38, 0.0  ;;  %vm1246_vm2 = vcmp.ge.f32.partialorder %v3610_v31, 0.0 }
 0x214   :  { %4789 = vst [vmem:[#allocation16_spill] sm:$0xff] %v3802_v25  ;;  %4791 = vst [vmem:[#allocation17_spill] sm:$0xff] %v3806_v20  ;;  %v3818_v3 = vadd.f32 %v3598_v55, %v4795_v21  ;;  %v3822_v26 = vadd.f32 %v3598_v55, %v4797_v60  ;;  %v4799_v25 = vld [vmem:[#allocation9_spill] sm:$0xff]  ;;  %v4801_v20 = vld [vmem:[#allocation10_spill] sm:$0xff]  ;;  %v3842_v60 = vadd.f32 %v3598_v55, %v3575_v41  ;;  %vm1247_vm3 = vcmp.ge.f32.partialorder %v3614_v40, 0.0 }
 0x215   :  { %4792 = vst [vmem:[#allocation18_spill] sm:$0xff] %v3810_v5  ;;  %4794 = vst [vmem:[#allocation19_spill] sm:$0xff] %v3814_v9  ;;  %v3826_v57 = vadd.f32 %v3598_v55, %v4799_v25  ;;  %v3830_v34 = vadd.f32 %v3598_v55, %v4801_v20  ;;  %v4803_v5 = vld [vmem:[#allocation11_spill] sm:$0xff]  ;;  %v4805_v9 = vld [vmem:[#allocation12_spill] sm:$0xff]  ;;  %v3846_v25 = vadd.f32 %v3598_v55, %v3581_v42  ;;  %vm1248_vm4 = vcmp.ge.f32.partialorder %v3618_v29, 0.0 }
 0x216   :  { %4796 = vst [vmem:[#allocation20_spill] sm:$0xff] %v3818_v3  ;;  %4798 = vst [vmem:[#allocation21_spill] sm:$0xff] %v3822_v26  ;;  %v3834_v33 = vadd.f32 %v3598_v55, %v4803_v5  ;;  %v3838_v21 = vadd.f32 %v3598_v55, %v4805_v9  ;;  %vm1249_vm5 = vcmp.ge.f32.partialorder %v3622_v50, 0.0  ;;  %vm1250_vm6 = vcmp.ge.f32.partialorder %v3626_v14, 0.0 }
 0x217   :  { %4800 = vst [vmem:[#allocation22_spill] sm:$0xff] %v3826_v57  ;;  %4802 = vst [vmem:[#allocation7_spill] sm:$0xff] %v3830_v34  ;;  %vm1251_vm7 = vcmp.ge.f32.partialorder %v3630_v58, 0.0  ;;  %vm1252_vm8 = vcmp.ge.f32.partialorder %v3634_v23, 0.0  ;;  %v3859_v41 = vadd.f32 %v3598_v55, %v3587_v1  ;;  %vm1253_vm9 = vcmp.ge.f32.partialorder %v3638_v16, 0.0 }
 0x218   :  { %4804 = vst [vmem:[#allocation8_spill] sm:$0xff] %v3834_v33  ;;  %4806 = vst [vmem:[#allocation23_spill] sm:$0xff] %v3838_v21  ;;  %v1308_v42 = vmul.f32 0.2, %v3602_v52  ;;  %v1309_v20 = vmul.f32 0.2, %v3606_v38  ;;  %v3867_v9 = vadd.f32 %v3598_v55, %v3593_v30 }
 0x219   :  { %4807 = vst [vmem:[#allocation24_spill] sm:$0xff] %v3842_v60  ;;  %4808 = vst [vmem:[#allocation25_spill] sm:$0xff] %v3846_v25  ;;  %v1310_v5 = vmul.f32 0.2, %v3610_v31  ;;  %vm1254_vm10 = vcmp.ge.f32.partialorder %v3642_v24, 0.0  ;;  %vm1255_vm11 = vcmp.ge.f32.partialorder %v3646_v32, 0.0 }
 0x21a   :  { %4809 = vst [vmem:[#allocation26_spill] sm:$0xff] %v3859_v41  ;;  %4810 = vst [vmem:[#allocation27_spill] sm:$0xff] %v3867_v9  ;;  %v1311_v25 = vmul.f32 0.2, %v3614_v40  ;;  %v1312_v60 = vmul.f32 0.2, %v3618_v29  ;;  %v3880_v30 = vsel %vm1244_vm0, %v3602_v52, %v1308_v42  ;;  %v3891_v57 = vsel %vm1245_vm1, %v3606_v38, %v1309_v20 }
 0x21b   :  { %v1313_v1 = vmul.f32 0.2, %v3622_v50  ;;  %v1314_v41 = vmul.f32 0.2, %v3626_v14  ;;  %v1315_v21 = vmul.f32 0.2, %v3630_v58 }
 0x21c   :  { %v1316_v33 = vmul.f32 0.2, %v3634_v23  ;;  %4811 = vst [vmem:[#allocation28_spill] sm:$0xff] %v3880_v30  ;;  %vm1256_vm12 = vcmp.ge.f32.partialorder %v3650_v39, 0.0  ;;  %v1317_v55 = vmul.f32 0.2, %v3638_v16  ;;  %v3906_v30 = vsel %vm1246_vm2, %v3610_v31, %v1310_v5 }
 0x21d   :  { %v1318_v9 = vmul.f32 0.2, %v3642_v24  ;;  %v3886_v34 = vmul.f32 0.2, %v3646_v32  ;;  %4812 = vst [vmem:[#allocation29_spill] sm:$0xff] %v3891_v57  ;;  %vm1257_vm13 = vcmp.ge.f32.partialorder %v3654_v48, 0.0  ;;  %v3921_v3 = vsel %vm1247_vm3, %v3614_v40, %v1311_v25 }
 0x21e   :  { %v3895_v26 = vmul.f32 0.2, %v3650_v39  ;;  %v3898_v52 = vmul.f32 0.2, %v3654_v48  ;;  %v3901_v42 = vmul.f32 0.2, %v3658_v59 }
 0x21f   :  { %4813 = vst [vmem:[#allocation30_spill] sm:$0xff] %v3906_v30  ;;  %vm1258_vm14 = vcmp.ge.f32.partialorder %v3658_v59, 0.0  ;;  %v3910_v38 = vmul.f32 0.2, %v3662_v4  ;;  %v3913_v20 = vmul.f32 0.2, %v3666_v19 }
 0x220   :  { %v3916_v57 = vmul.f32 0.2, %v3670_v36  ;;  %4815 = vst [vmem:[#allocation2_spill] sm:$0xff] %v3921_v3  ;;  %vm1259_vm15 = vcmp.ge.f32.partialorder %v3662_v4, 0.0  ;;  %v3925_v31 = vmul.f32 0.2, %v3674_v47 }
 0x221   :  { %v3928_v5 = vmul.f32 0.2, %v3678_v56  ;;  %v3931_v30 = vmul.f32 0.2, %v3682_v8  ;;  %vm1260_vm0 = vcmp.ge.f32.partialorder %v3666_v19, 0.0  ;;  %vm1261_vm1 = vcmp.ge.f32.partialorder %v3670_v36, 0.0 }
 0x222   :  { %4814 = vst [vmem:[#allocation31_spill] sm:$0xff] %v3916_v57  ;;  %v3936_v57 = vsel %vm1248_vm4, %v3618_v29, %v1312_v60  ;;  %v3940_v40 = vmul.f32 0.2, %v3686_v45  ;;  %v3943_v25 = vmul.f32 0.2, %v3690_v0  ;;  %vm1262_vm2 = vcmp.ge.f32.partialorder %v3674_v47, 0.0 }
 0x223   :  { %4816 = vst [vmem:[#allocation3_spill] sm:$0xff] %v3931_v30  ;;  %4817 = vst [vmem:[#allocation4_spill] sm:$0xff] %v3936_v57  ;;  %v3946_v3 = vmul.f32 0.2, %v3694_v37  ;;  %v3951_v30 = vsel %vm1249_vm5, %v3622_v50, %v1313_v1  ;;  %v3955_v29 = vmul.f32 0.2, %v3698_v13 }
 0x224   :  { %4819 = vst [vmem:[#allocation6_spill] sm:$0xff] %v3951_v30  ;;  %v3958_v60 = vmul.f32 0.2, %v3702_v35  ;;  %v3961_v57 = vmul.f32 0.2, %v3706_v22  ;;  %vm1263_vm3 = vcmp.ge.f32.partialorder %v3678_v56, 0.0 }
 0x225   :  { %4818 = vst [vmem:[#allocation5_spill] sm:$0xff] %v3946_v3  ;;  %v3966_v3 = vsel %vm1250_vm6, %v3626_v14, %v1314_v41  ;;  %v3970_v50 = vmul.f32 0.2, %v3710_v11  ;;  %v3973_v1 = vmul.f32 0.2, %v3714_v62  ;;  %vm1266_vm6 = vcmp.ge.f32.partialorder %v3690_v0, 0.0 }
 0x226   :  { %4820 = vst [vmem:[#allocation9_spill] sm:$0xff] %v3961_v57  ;;  %4821 = vst [vmem:[#allocation10_spill] sm:$0xff] %v3966_v3  ;;  %v3976_v30 = vmul.f32 0.2, %v3718_v44  ;;  %v3981_v57 = vsel %vm1251_vm7, %v3630_v58, %v1315_v21  ;;  %v3987_v14 = vmul.f32 0.2, %v3722_v49  ;;  %v3998_v58 = vsel %vm1252_vm8, %v3634_v23, %v1316_v33 }
 0x227   :  { %4822 = vst [vmem:[#allocation11_spill] sm:$0xff] %v3981_v57  ;;  %v3990_v41 = vmul.f32 0.2, %v3726_v28  ;;  %v3993_v3 = vmul.f32 0.2, %v3730_v51  ;;  %4824 = vst [vmem:[#allocation32_spill] sm:$0xff] %v3998_v58  ;;  %v4016_v23 = vsel %vm1253_vm9, %v3638_v16, %v1317_v55  ;;  %v4034_v16 = vsel %vm1254_vm10, %v3642_v24, %v1318_v9 }
 0x228   :  { %v4005_v21 = vmul.f32 0.2, %v3734_v18  ;;  %v4008_v57 = vmul.f32 0.2, %v3738_v6  ;;  %4826 = vst [vmem:[#allocation34_spill] sm:$0xff] %v4016_v23  ;;  %vm1270_vm8 = vcmp.ge.f32.partialorder %v3706_v22, 0.0  ;;  %v4053_v24 = vsel %vm1255_vm11, %v3646_v32, %v3886_v34 }
 0x229   :  { %4823 = vst [vmem:[#allocation12_spill] sm:$0xff] %v3993_v3  ;;  %v4011_v3 = vmul.f32 0.2, %v3742_v10  ;;  %v4023_v33 = vmul.f32 0.2, %v3746_v46  ;;  %4828 = vst [vmem:[#allocation36_spill] sm:$0xff] %v4034_v16  ;;  %v4072_v32 = vsel %vm1256_vm12, %v3650_v39, %v3895_v26  ;;  %v4091_v39 = vsel %vm1257_vm13, %v3654_v48, %v3898_v52 }
 0x22a   :  { %v4026_v58 = vmul.f32 0.2, %v3750_v15  ;;  %vm1274_vm9 = vcmp.ge.f32.partialorder %v3722_v49, 0.0  ;;  %v4041_v55 = vmul.f32 0.2, %v3758_v27  ;;  %4830 = vst [vmem:[#allocation38_spill] sm:$0xff] %v4053_v24  ;;  %v4110_v48 = vsel %vm1258_vm14, %v3658_v59, %v3901_v42 }
 0x22b   :  { %4825 = vst [vmem:[#allocation33_spill] sm:$0xff] %v4011_v3  ;;  %v4029_v3 = vmul.f32 0.2, %v3754_v54  ;;  %v4044_v23 = vmul.f32 0.2, %v3762_v2  ;;  %vm1278_vm10 = vcmp.ge.f32.partialorder %v3738_v6, 0.0  ;;  %v4129_v59 = vsel %vm1259_vm15, %v3662_v4, %v3910_v38 }
 0x22c   :  { %v4060_v9 = vmul.f32 0.2, %v3770_v43  ;;  %v4063_v16 = vmul.f32 0.2, %v3774_v12  ;;  %4833 = vst [vmem:[#allocation41_spill] sm:$0xff] %v4072_v32  ;;  %vm1282_vm11 = vcmp.ge.f32.partialorder %v3754_v54, 0.0  ;;  %v4142_v4 = vsel %vm1260_vm0, %v3666_v19, %v3913_v20 }
 0x22d   :  { %4827 = vst [vmem:[#allocation35_spill] sm:$0xff] %v4029_v3  ;;  %v4047_v3 = vmul.f32 0.2, %v3766_v61  ;;  %v4079_v34 = vmul.f32 0.2, %v3782_v63  ;;  %4837 = vst [vmem:[#allocation45_spill] sm:$0xff] %v4091_v39 }
 0x22e   :  { %4831 = vst [vmem:[#allocation39_spill] sm:$0xff] %v4063_v16  ;;  %v4082_v24 = vmul.f32 0.2, %v3786_v53  ;;  %vm1286_vm12 = vcmp.ge.f32.partialorder %v3770_v43, 0.0  ;;  %v4838_v26 = vld [vmem:[#allocation14_spill] sm:$0xff]  ;;  %4844 = vst [vmem:[#allocation49_spill] sm:$0xff] %v4110_v48 }
 0x22f   :  { %4829 = vst [vmem:[#allocation37_spill] sm:$0xff] %v4047_v3  ;;  %v4066_v3 = vmul.f32 0.2, %v3778_v7  ;;  %4834 = vst [vmem:[#allocation42_spill] sm:$0xff] %v4079_v34  ;;  %v4098_v32 = vmul.f32 0.2, %v4838_v26 }
 0x230   :  { %4835 = vst [vmem:[#allocation43_spill] sm:$0xff] %v4082_v24  ;;  %v4840_v24 = vld [vmem:[#allocation15_spill] sm:$0xff]  ;;  %vm1290_vm13 = vcmp.ge.f32.partialorder %v3786_v53, 0.0  ;;  %v4845_v52 = vld [vmem:[#allocation17_spill] sm:$0xff]  ;;  %4851 = vst [vmem:[#allocation53_spill] sm:$0xff] %v4129_v59  ;;  %vm4866_vm7 = vcmp.ge.f32.partialorder %v3682_v8, 0.0 }
 0x231   :  { %4832 = vst [vmem:[#allocation40_spill] sm:$0xff] %v4066_v3  ;;  %v4085_v3 = vmul.f32 0.2, %v3790_v17  ;;  %4839 = vst [vmem:[#allocation46_spill] sm:$0xff] %v4098_v32  ;;  %v4101_v34 = vmul.f32 0.2, %v4840_v24 }
 0x232   :  { %v4117_v39 = vmul.f32 0.2, %v4845_v52  ;;  %v4852_v42 = vld [vmem:[#allocation20_spill] sm:$0xff]  ;;  %v4854_v24 = vld [vmem:[#allocation22_spill] sm:$0xff]  ;;  %4855 = vst [vmem:[#allocation54_spill] sm:$0xff] %v4142_v4  ;;  %v4856_v38 = vld [vmem:[#allocation7_spill] sm:$0xff] }
 0x233   :  { %4836 = vst [vmem:[#allocation44_spill] sm:$0xff] %v4085_v3  ;;  %4841 = vst [vmem:[#allocation47_spill] sm:$0xff] %v4101_v34  ;;  %v4842_v3 = vld [vmem:[#allocation16_spill] sm:$0xff]  ;;  %v4847_v34 = vld [vmem:[#allocation18_spill] sm:$0xff]  ;;  %v1362_v48 = vmul.f32 0.2, %v4852_v42 }
 0x234   :  { %v4104_v16 = vmul.f32 0.2, %v4842_v3  ;;  %4846 = vst [vmem:[#allocation50_spill] sm:$0xff] %v4117_v39  ;;  %v4120_v32 = vmul.f32 0.2, %v4847_v34  ;;  %vm1294_vm14 = vcmp.ge.f32.partialorder %v4842_v3, 0.0 }
 0x235   :  { %vm1298_vm15 = vcmp.ge.f32.partialorder %v4852_v42, 0.0  ;;  %v1365_v59 = vmul.f32 0.2, %v4856_v38  ;;  %v4858_v52 = vld [vmem:[#allocation23_spill] sm:$0xff]  ;;  %v4861_v20 = vld [vmem:[#allocation24_spill] sm:$0xff]  ;;  %v4862_v4 = vld [vmem:[#allocation25_spill] sm:$0xff] }
 0x236   :  { %4843 = vst [vmem:[#allocation48_spill] sm:$0xff] %v4104_v16  ;;  %4848 = vst [vmem:[#allocation51_spill] sm:$0xff] %v4120_v32  ;;  %v4849_v16 = vld [vmem:[#allocation19_spill] sm:$0xff]  ;;  %v4853_v32 = vld [vmem:[#allocation21_spill] sm:$0xff]  ;;  %v1367_v3 = vmul.f32 0.2, %v4858_v52 }
 0x237   :  { %v4123_v63 = vmul.f32 0.2, %v4849_v16  ;;  %v1363_v39 = vmul.f32 0.2, %v4853_v32  ;;  %v4857_v16 = vld [vmem:[#allocation8_spill] sm:$0xff]  ;;  %v4859_v26 = vld [vmem:[#allocation31_spill] sm:$0xff] }
 0x238   :  { %v1366_v34 = vmul.f32 0.2, %v4857_v16  ;;  %v4155_v19 = vsel %vm1261_vm1, %v3670_v36, %v4859_v26  ;;  %vm1302_vm0 = vcmp.ge.f32.partialorder %v4857_v16, 0.0  ;;  %vm1304_vm4 = vcmp.ge.f32.partialorder %v4861_v20, 0.0  ;;  %v4863_v32 = vld [vmem:[#allocation26_spill] sm:$0xff]  ;;  %v4864_v26 = vld [vmem:[#allocation27_spill] sm:$0xff] }
 0x239   :  { %4850 = vst [vmem:[#allocation52_spill] sm:$0xff] %v4123_v63  ;;  %v1364_v63 = vmul.f32 0.2, %v4854_v24  ;;  %4860 = vst [vmem:[#allocation8_spill] sm:$0xff] %v4155_v19  ;;  %v1368_v38 = vmul.f32 0.2, %v4861_v20  ;;  %v4168_v36 = vsel %vm1262_vm2, %v3674_v47, %v3925_v31  ;;  %v4177_v20 = vsel %vm1263_vm3, %v3678_v56, %v3928_v5 }
 0x23a   :  { %v1369_v24 = vmul.f32 0.2, %v4862_v4  ;;  %v1370_v42 = vmul.f32 0.2, %v4863_v32  ;;  %vm1306_vm1 = vcmp.ge.f32.partialorder %v4863_v32, 0.0  ;;  %vm1307_vm5 = vcmp.ge.f32.partialorder %v4864_v26, 0.0 }
 0x23b   :  { %v1371_v19 = vmul.f32 0.2, %v4864_v26  ;;  %v4865_v4 = vld [vmem:[#allocation3_spill] sm:$0xff]  ;;  %vm4867_vm2 = vcmp.ge.f32.partialorder %v3686_v45, 0.0  ;;  %v4195_v31 = vsel %vm1266_vm6, %v3690_v0, %v3943_v25  ;;  %v4868_v56 = vld [vmem:[#allocation5_spill] sm:$0xff]  ;;  %vm4869_vm3 = vcmp.ge.f32.partialorder %v3694_v37, 0.0 }
 0x23c   :  { %v4183_v52 = vsel %vm4866_vm7, %v3682_v8, %v4865_v4  ;;  %v4189_v47 = vsel %vm4867_vm2, %v3686_v45, %v3940_v40  ;;  %v4201_v5 = vsel %vm4869_vm3, %v3694_v37, %v4868_v56  ;;  %vm4870_vm7 = vcmp.ge.f32.partialorder %v3698_v13, 0.0  ;;  %v4872_v0 = vld [vmem:[#allocation9_spill] sm:$0xff]  ;;  %v4906_v4 = vld [vmem:[#allocation16_spill] sm:$0xff] }
 0x23d   :  { %v4207_v8 = vsel %vm4870_vm7, %v3698_v13, %v3955_v29  ;;  %vm4871_vm2 = vcmp.ge.f32.partialorder %v3702_v35, 0.0  ;;  %v4219_v40 = vsel %vm1270_vm8, %v3706_v22, %v4872_v0  ;;  %vm4873_vm6 = vcmp.ge.f32.partialorder %v3710_v11, 0.0  ;;  %v4908_v0 = vld [vmem:[#allocation17_spill] sm:$0xff] }
 0x23e   :  { %v4213_v45 = vsel %vm4871_vm2, %v3702_v35, %v3958_v60  ;;  %v4225_v37 = vsel %vm4873_vm6, %v3710_v11, %v3970_v50  ;;  %vm4874_vm3 = vcmp.ge.f32.partialorder %v3714_v62, 0.0  ;;  %vm4875_vm7 = vcmp.ge.f32.partialorder %v3718_v44, 0.0 }
 0x23f   :  { %v4231_v13 = vsel %vm4874_vm3, %v3714_v62, %v3973_v1  ;;  %v4237_v35 = vsel %vm4875_vm7, %v3718_v44, %v3976_v30  ;;  %v4243_v22 = vsel %vm1274_vm9, %v3722_v49, %v3987_v14  ;;  %vm4876_vm8 = vcmp.ge.f32.partialorder %v3726_v28, 0.0  ;;  %v4877_v62 = vld [vmem:[#allocation12_spill] sm:$0xff]  ;;  %v4894_v1 = vld [vmem:[#allocation13_spill] sm:$0xff] }
 0x240   :  { %v4249_v11 = vsel %vm4876_vm8, %v3726_v28, %v3990_v41  ;;  %vm4878_vm2 = vcmp.ge.f32.partialorder %v3730_v51, 0.0  ;;  %vm4879_vm6 = vcmp.ge.f32.partialorder %v3734_v18, 0.0  ;;  %v4267_v49 = vsel %vm1278_vm10, %v3738_v6, %v4008_v57  ;;  %v4880_v28 = vld [vmem:[#allocation33_spill] sm:$0xff]  ;;  %v4884_v6 = vld [vmem:[#allocation35_spill] sm:$0xff] }
 0x241   :  { %v4255_v25 = vsel %vm4878_vm2, %v3730_v51, %v4877_v62  ;;  %v4261_v44 = vsel %vm4879_vm6, %v3734_v18, %v4005_v21  ;;  %vm4881_vm9 = vcmp.ge.f32.partialorder %v3742_v10, 0.0  ;;  %vm4882_vm3 = vcmp.ge.f32.partialorder %v3746_v46, 0.0  ;;  %v4900_v21 = vld [vmem:[#allocation14_spill] sm:$0xff] }
 0x242   :  { %v4273_v30 = vsel %vm4881_vm9, %v3742_v10, %v4880_v28  ;;  %v4279_v51 = vsel %vm4882_vm3, %v3746_v46, %v4023_v33  ;;  %vm4883_vm7 = vcmp.ge.f32.partialorder %v3750_v15, 0.0  ;;  %v4291_v57 = vsel %vm1282_vm11, %v3754_v54, %v4884_v6  ;;  %v4902_v33 = vld [vmem:[#allocation47_spill] sm:$0xff]  ;;  %v4911_v6 = vld [vmem:[#allocation18_spill] sm:$0xff] }
 0x243   :  { %v4285_v18 = vsel %vm4883_vm7, %v3750_v15, %v4026_v58  ;;  %vm4885_vm10 = vcmp.ge.f32.partialorder %v3758_v27, 0.0  ;;  %vm4886_vm8 = vcmp.ge.f32.partialorder %v3762_v2, 0.0  ;;  %v4887_v15 = vld [vmem:[#allocation37_spill] sm:$0xff]  ;;  %vm4888_vm2 = vcmp.ge.f32.partialorder %v3766_v61, 0.0  ;;  %v4910_v28 = vld [vmem:[#allocation51_spill] sm:$0xff] }
 0x244   :  { %v4297_v10 = vsel %vm4885_vm10, %v3758_v27, %v4041_v55  ;;  %v4303_v46 = vsel %vm4886_vm8, %v3762_v2, %v4044_v23  ;;  %v4309_v29 = vsel %vm4888_vm2, %v3766_v61, %v4887_v15  ;;  %v4315_v54 = vsel %vm1286_vm12, %v3770_v43, %v4060_v9  ;;  %v4889_v27 = vld [vmem:[#allocation39_spill] sm:$0xff]  ;;  %v4891_v2 = vld [vmem:[#allocation40_spill] sm:$0xff]  ;;  %v4893_v61 = vld [vmem:[#allocation42_spill] sm:$0xff] }
 0x245   :  { %vm4890_vm11 = vcmp.ge.f32.partialorder %v3774_v12, 0.0  ;;  %vm4892_vm6 = vcmp.ge.f32.partialorder %v3778_v7, 0.0  ;;  %vm4895_vm9 = vcmp.ge.f32.partialorder %v4894_v1, 0.0  ;;  %v4896_v43 = vld [vmem:[#allocation43_spill] sm:$0xff]  ;;  %vm4898_vm12 = vcmp.ge.f32.partialorder %v3790_v17, 0.0 }
 0x246   :  { %v4321_v60 = vsel %vm4890_vm11, %v3774_v12, %v4889_v27  ;;  %v4327_v50 = vsel %vm4892_vm6, %v3778_v7, %v4891_v2  ;;  %v4333_v14 = vsel %vm4895_vm9, %v4894_v1, %v4893_v61  ;;  %v4339_v41 = vsel %vm1290_vm13, %v3786_v53, %v4896_v43  ;;  %v4897_v12 = vld [vmem:[#allocation44_spill] sm:$0xff]  ;;  %v4899_v7 = vld [vmem:[#allocation46_spill] sm:$0xff]  ;;  %v4903_v55 = vld [vmem:[#allocation15_spill] sm:$0xff] }
 0x247   :  { %v4345_v58 = vsel %vm4898_vm12, %v3790_v17, %v4897_v12  ;;  %vm4901_vm3 = vcmp.ge.f32.partialorder %v4900_v21, 0.0  ;;  %vm4904_vm7 = vcmp.ge.f32.partialorder %v4903_v55, 0.0  ;;  %v4905_v53 = vld [vmem:[#allocation48_spill] sm:$0xff]  ;;  %v4907_v17 = vld [vmem:[#allocation50_spill] sm:$0xff]  ;;  %vm4909_vm13 = vcmp.ge.f32.partialorder %v4908_v0, 0.0  ;;  %v4914_v2 = vld [vmem:[#allocation19_spill] sm:$0xff] }
 0x248   :  { %v4351_v23 = vsel %vm4901_vm3, %v4900_v21, %v4899_v7  ;;  %v4357_v9 = vsel %vm4904_vm7, %v4903_v55, %v4902_v33  ;;  %v4363_v56 = vsel %vm1294_vm14, %v4906_v4, %v4905_v53  ;;  %v4369_v62 = vsel %vm4909_vm13, %v4908_v0, %v4907_v17  ;;  %v4913_v27 = vld [vmem:[#allocation52_spill] sm:$0xff]  ;;  %v4917_v12 = vld [vmem:[#allocation21_spill] sm:$0xff]  ;;  %v4919_v21 = vld [vmem:[#allocation22_spill] sm:$0xff] }
 0x249   :  { %vm4912_vm10 = vcmp.ge.f32.partialorder %v4911_v6, 0.0  ;;  %vm4915_vm8 = vcmp.ge.f32.partialorder %v4914_v2, 0.0  ;;  %v4916_v1 = vld [vmem:[#allocation20_spill] sm:$0xff]  ;;  %vm4918_vm14 = vcmp.ge.f32.partialorder %v4917_v12, 0.0  ;;  %vm4920_vm2 = vcmp.ge.f32.partialorder %v4919_v21, 0.0  ;;  %v4921_v55 = vld [vmem:[#allocation7_spill] sm:$0xff] }
 0x24a   :  { %v4375_v15 = vsel %vm4912_vm10, %v4911_v6, %v4910_v28  ;;  %v4381_v61 = vsel %vm4915_vm8, %v4914_v2, %v4913_v27  ;;  %v4386_v43 = vsel %vm1298_vm15, %v4916_v1, %v1362_v48  ;;  %v4391_v7 = vsel %vm4918_vm14, %v4917_v12, %v1363_v39  ;;  %v4923_v4 = vld [vmem:[#allocation23_spill] sm:$0xff]  ;;  %v4925_v17 = vld [vmem:[#allocation24_spill] sm:$0xff]  ;;  %v4926_v0 = vld [vmem:[#allocation25_spill] sm:$0xff] }
 0x24b   :  { %v4396_v33 = vsel %vm4920_vm2, %v4919_v21, %v1364_v63  ;;  %vm4922_vm11 = vcmp.ge.f32.partialorder %v4921_v55, 0.0  ;;  %v4406_v48 = vsel %vm1302_vm0, %v4857_v16, %v1366_v34  ;;  %vm4924_vm15 = vcmp.ge.f32.partialorder %v4923_v4, 0.0  ;;  %v4930_v34 = vld [vmem:[#allocation28_spill] sm:$0xff]  ;;  %v4931_v28 = vld [vmem:[#allocation29_spill] sm:$0xff]  ;;  %v4933_v27 = vld [vmem:[#allocation2_spill] sm:$0xff] }
 0x24c   :  { %v4401_v53 = vsel %vm4922_vm11, %v4921_v55, %v1365_v59  ;;  %v4411_v39 = vsel %vm4924_vm15, %v4923_v4, %v1367_v3  ;;  %v4416_v63 = vsel %vm1304_vm4, %v4925_v17, %v1368_v38  ;;  %vm4927_vm6 = vcmp.ge.f32.partialorder %v4926_v0, 0.0  ;;  %v4932_v38 = vld [vmem:[#allocation30_spill] sm:$0xff]  ;;  %v4934_v1 = vld [vmem:[#allocation4_spill] sm:$0xff]  ;;  %v4937_v55 = vld [vmem:[#allocation11_spill] sm:$0xff] }
 0x24d   :  { %v4421_v59 = vsel %vm4927_vm6, %v4926_v0, %v1369_v24  ;;  %v4426_v16 = vsel %vm1306_vm1, %v4863_v32, %v1370_v42  ;;  %v4431_v3 = vsel %vm1307_vm5, %v4864_v26, %v1371_v19  ;;  %v1973_v6 = vpack.c.bf16 %v4931_v28, %v4930_v34  ;;  %v4935_v12 = vld [vmem:[#allocation6_spill] sm:$0xff]  ;;  %v4938_v17 = vld [vmem:[#allocation32_spill] sm:$0xff]  ;;  %v4942_v19 = vld [vmem:[#allocation41_spill] sm:$0xff] }
 0x24e   :  { %4928 = vst [vmem:[#allocation31_spill] sm:$0xff] %v4421_v59  ;;  %4929 = vst [vmem:[#allocation26_spill] sm:$0xff] %v4426_v16  ;;  %v1978_v2 = vpack.c.bf16 %v4933_v27, %v4932_v38  ;;  %v1983_v24 = vpack.c.bf16 %v4935_v12, %v4934_v1  ;;  %v4936_v21 = vld [vmem:[#allocation10_spill] sm:$0xff]  ;;  %v4940_v0 = vld [vmem:[#allocation36_spill] sm:$0xff] }
 0x24f   :  { %v1988_v4 = vpack.c.bf16 %v4937_v55, %v4936_v21  ;;  %v4939_v32 = vld [vmem:[#allocation34_spill] sm:$0xff]  ;;  %1974 = vst [vmem:[%s4598_s5] sm:$0xff] %v1973_v6   ;;  %v4943_v26 = vld [vmem:[#allocation45_spill] sm:$0xff]  ;;  %v4947_v12 = vld [vmem:[#allocation8_spill] sm:$0xff]  ;;  %v2023_v6 = vpack.c.bf16 %v4189_v47, %v4183_v52  ;;  %v2043_v52 = vpack.c.bf16 %v4237_v35, %v4231_v13  ;;  %v2048_v47 = vpack.c.bf16 %v4249_v11, %v4243_v22 }
 0x250   :  { %v1993_v42 = vpack.c.bf16 %v4939_v32, %v4938_v17  ;;  %v4941_v16 = vld [vmem:[#allocation38_spill] sm:$0xff]  ;;  %2130 = vst [vmem:[%s4598_s5 + $0x8] sm:$0xff] %v1978_v2   ;;  %v2003_v34 = vpack.c.bf16 %v4943_v26, %v4942_v19  ;;  %v4944_v28 = vld [vmem:[#allocation49_spill] sm:$0xff]  ;;  %2131 = vst [vmem:[%s4598_s5 + $0x10] sm:$0xff] %v1983_v24   ;;  %v2038_v2 = vpack.c.bf16 %v4225_v37, %v4219_v40 }
 0x251   :  { %v1998_v59 = vpack.c.bf16 %v4941_v16, %v4940_v0  ;;  %v4945_v38 = vld [vmem:[#allocation53_spill] sm:$0xff]  ;;  %v4946_v1 = vld [vmem:[#allocation54_spill] sm:$0xff]  ;;  %v2018_v16 = vpack.c.bf16 %v4177_v20, %v4168_v36  ;;  %2132 = vst [vmem:[%s4598_s5 + $0x18] sm:$0xff] %v1988_v4   ;;  %v2028_v20 = vpack.c.bf16 %v4201_v5, %v4195_v31  ;;  %v2033_v36 = vpack.c.bf16 %v4213_v45, %v4207_v8 }
 0x252   :  { %v2008_v27 = vpack.c.bf16 %v4945_v38, %v4944_v28  ;;  %v2013_v21 = vpack.c.bf16 %v4947_v12, %v4946_v1  ;;  %2133 = vst [vmem:[%s4598_s5 + $0x20] sm:$0xff] %v1993_v42   ;;  %2135 = vst [vmem:[%s4598_s5 + $0x30] sm:$0xff] %v2003_v34   ;;  %v2053_v31 = vpack.c.bf16 %v4261_v44, %v4255_v25 }
 0x253   :  { %2134 = vst [vmem:[%s4598_s5 + $0x28] sm:$0xff] %v1998_v59   ;;  %2138 = vst [vmem:[%s4598_s5 + $0x48] sm:$0xff] %v2018_v16   ;;  %v2058_v5 = vpack.c.bf16 %v4273_v30, %v4267_v49  ;;  %v2063_v8 = vpack.c.bf16 %v4285_v18, %v4279_v51  ;;  %v2068_v45 = vpack.c.bf16 %v4297_v10, %v4291_v57 }
 0x254   :  { %2136 = vst [vmem:[%s4598_s5 + $0x38] sm:$0xff] %v2008_v27   ;;  %2137 = vst [vmem:[%s4598_s5 + $0x40] sm:$0xff] %v2013_v21   ;;  %v2073_v40 = vpack.c.bf16 %v4309_v29, %v4303_v46  ;;  %v2078_v37 = vpack.c.bf16 %v4321_v60, %v4315_v54  ;;  %v2083_v13 = vpack.c.bf16 %v4333_v14, %v4327_v50 }
 0x255   :  { %2139 = vst [vmem:[%s4598_s5 + $0x50] sm:$0xff] %v2023_v6   ;;  %2140 = vst [vmem:[%s4598_s5 + $0x58] sm:$0xff] %v2028_v20   ;;  %v2088_v35 = vpack.c.bf16 %v4345_v58, %v4339_v41  ;;  %v2093_v22 = vpack.c.bf16 %v4357_v9, %v4351_v23  ;;  %v2098_v11 = vpack.c.bf16 %v4369_v62, %v4363_v56  ;;  %v4948_v51 = vld [vmem:[#allocation31_spill] sm:$0xff]  ;;  %v4949_v57 = vld [vmem:[#allocation26_spill] sm:$0xff] }
 0x256   :  { %2141 = vst [vmem:[%s4598_s5 + $0x60] sm:$0xff] %v2033_v36   ;;  %2142 = vst [vmem:[%s4598_s5 + $0x68] sm:$0xff] %v2038_v2   ;;  %v2103_v25 = vpack.c.bf16 %v4381_v61, %v4375_v15  ;;  %v2108_v44 = vpack.c.bf16 %v4391_v7, %v4386_v43  ;;  %v2113_v49 = vpack.c.bf16 %v4401_v53, %v4396_v33 }
 0x257   :  { %2143 = vst [vmem:[%s4598_s5 + $0x70] sm:$0xff] %v2043_v52   ;;  %2144 = vst [vmem:[%s4598_s5 + $0x78] sm:$0xff] %v2048_v47   ;;  %v2118_v30 = vpack.c.bf16 %v4411_v39, %v4406_v48  ;;  %v2123_v18 = vpack.c.bf16 %v4948_v51, %v4416_v63  ;;  %v2128_v10 = vpack.c.bf16 %v4431_v3, %v4949_v57 }
 0x258   :  { %2145 = vst [vmem:[%s4598_s5 + $0x80] sm:$0xff] %v2053_v31   ;;  %2146 = vst [vmem:[%s4598_s5 + $0x88] sm:$0xff] %v2058_v5  }
 0x259   :  { %2147 = vst [vmem:[%s4598_s5 + $0x90] sm:$0xff] %v2063_v8   ;;  %2148 = vst [vmem:[%s4598_s5 + $0x98] sm:$0xff] %v2068_v45  }
 0x25a   :  { %2149 = vst [vmem:[%s4598_s5 + $0xa0] sm:$0xff] %v2073_v40   ;;  %2150 = vst [vmem:[%s4598_s5 + $0xa8] sm:$0xff] %v2078_v37  }
 0x25b   :  { %2151 = vst [vmem:[%s4598_s5 + $0xb0] sm:$0xff] %v2083_v13   ;;  %2152 = vst [vmem:[%s4598_s5 + $0xb8] sm:$0xff] %v2088_v35  }
 0x25c   :  { %2153 = vst [vmem:[%s4598_s5 + $0xc0] sm:$0xff] %v2093_v22   ;;  %2154 = vst [vmem:[%s4598_s5 + $0xc8] sm:$0xff] %v2098_v11  }
 0x25d   :  { %2155 = vst [vmem:[%s4598_s5 + $0xd0] sm:$0xff] %v2103_v25   ;;  %2156 = vst [vmem:[%s4598_s5 + $0xd8] sm:$0xff] %v2108_v44  }
 0x25e   :  { %2157 = vst [vmem:[%s4598_s5 + $0xe0] sm:$0xff] %v2113_v49   ;;  %2158 = vst [vmem:[%s4598_s5 + $0xe8] sm:$0xff] %v2118_v30  }
 0x25f   :  { %2159 = vst [vmem:[%s4598_s5 + $0xf0] sm:$0xff] %v2123_v18   ;;  %2160 = vst [vmem:[%s4598_s5 + $0xf8] sm:$0xff] %v2128_v10  }

// kernel: discriminator_forward.7
= control target key start
LH: loop header
LB: loop body
LE: loop exit
PB: predicated region body
PF: predicated region fallthrough
CT: control target
= control target key end

     0   :  { %s1669_s1 = inlined_call_operand.vmem [shape: bf16[512,128], index: 1, kind: input, shape index: {}]   ;;  %s1670_s0 = inlined_call_operand.vmem [shape: bf16[128,512], index: 0, kind: input, shape index: {}]   ;;  %s1671_s2 = inlined_call_operand.vmem [shape: f32[1,128], index: 2, kind: input, shape index: {}]   ;;  %s1672_s3 = inlined_call_operand.vmem [shape: f32[1,128], index: 3, kind: input, shape index: {}]   ;;  %s1673_s4 = inlined_call_operand.vmem [shape: f32[1,128], index: 4, kind: input, shape index: {}]   ;;  %s1674_s5 = inlined_call_operand.vmem [shape: bf16[128,128], index: 5, kind: output, shape index: {}]  }
   0x1   :  { %v1202_v0 = vld [vmem:[%s1669_s1 + $0x78] sm:$0xff]   ;;  %v1206_v4 = vld [vmem:[%s1669_s1 + $0x70] sm:$0xff]   ;;  %v1210_v8 = vld [vmem:[%s1669_s1 + $0x68] sm:$0xff]  }
   0x2   :  { %v1203_v1 = vld [vmem:[%s1669_s1 + $0xf8] sm:$0xff]   ;;  %1074 = vmatprep.subr.bf16.mxu0 %v1202_v0  ;;  %v1207_v5 = vld [vmem:[%s1669_s1 + $0xf0] sm:$0xff]   ;;  %v1211_v9 = vld [vmem:[%s1669_s1 + $0xe8] sm:$0xff]  }
   0x3   :  { %v1204_v2 = vld [vmem:[%s1669_s1 + $0x38] sm:$0xff]   ;;  %1138 = vmatprep.subr.bf16.mxu1 %v1203_v1  ;;  %v1208_v6 = vld [vmem:[%s1669_s1 + $0x30] sm:$0xff]   ;;  %v1212_v10 = vld [vmem:[%s1669_s1 + $0x28] sm:$0xff]  }
   0x4   :  { %v1205_v3 = vld [vmem:[%s1669_s1 + $0xb8] sm:$0xff]   ;;  %1075 = vmatpush3.bf16.msra.mxu0 %v1204_v2  ;;  %v1209_v7 = vld [vmem:[%s1669_s1 + $0xb0] sm:$0xff]   ;;  %v1213_v11 = vld [vmem:[%s1669_s1 + $0xa8] sm:$0xff]  }
   0x5   :  { %1139 = vmatpush3.bf16.msra.mxu1 %v1205_v3  ;;  %1076 = vmatprep.subr.bf16.mxu0 %v1206_v4  ;;  %v1214_v12 = vld [vmem:[%s1669_s1 + $0x60] sm:$0xff]   ;;  %v1218_v16 = vld [vmem:[%s1669_s1 + $0x58] sm:$0xff]   ;;  %v1222_v20 = vld [vmem:[%s1669_s1 + $0x50] sm:$0xff]  }
   0x6   :  { %1140 = vmatprep.subr.bf16.mxu1 %v1207_v5  ;;  %v1215_v13 = vld [vmem:[%s1669_s1 + $0xe0] sm:$0xff]   ;;  %v1219_v17 = vld [vmem:[%s1669_s1 + $0xd8] sm:$0xff]   ;;  %v1223_v21 = vld [vmem:[%s1669_s1 + $0xd0] sm:$0xff]  }
   0x7   :  { %v1216_v14 = vld [vmem:[%s1669_s1 + $0x20] sm:$0xff]   ;;  %v1220_v18 = vld [vmem:[%s1669_s1 + $0x18] sm:$0xff]   ;;  %v1224_v22 = vld [vmem:[%s1669_s1 + $0x10] sm:$0xff]  }
   0x8   :  { %1077 = vmatpush3.bf16.msra.mxu0 %v1208_v6  ;;  %v1217_v15 = vld [vmem:[%s1669_s1 + $0xa0] sm:$0xff]   ;;  %v1221_v19 = vld [vmem:[%s1669_s1 + $0x98] sm:$0xff]   ;;  %v1225_v23 = vld [vmem:[%s1669_s1 + $0x90] sm:$0xff]  }
   0x9   :  { %1141 = vmatpush3.bf16.msra.mxu1 %v1209_v7  ;;  %1078 = vmatprep.subr.bf16.mxu0 %v1210_v8  ;;  %v1226_v24 = vld [vmem:[%s1669_s1 + $0x48] sm:$0xff]   ;;  %v1230_v28 = vld [vmem:[%s1669_s1 + $0x40] sm:$0xff]  }
   0xa   :  { %1142 = vmatprep.subr.bf16.mxu1 %v1211_v9  ;;  %v1227_v25 = vld [vmem:[%s1669_s1 + $0xc8] sm:$0xff]   ;;  %v1231_v29 = vld [vmem:[%s1669_s1 + $0xc0] sm:$0xff]  }
   0xb   :  { %v1228_v26 = vld [vmem:[%s1669_s1 + $0x8] sm:$0xff]   ;;  %v1232_v30 = vld [vmem:[%s1669_s1] sm:$0xff]  }
   0xc   :  { %1079 = vmatpush3.bf16.msra.mxu0 %v1212_v10  ;;  %v1229_v27 = vld [vmem:[%s1669_s1 + $0x88] sm:$0xff]   ;;  %v1233_v31 = vld [vmem:[%s1669_s1 + $0x80] sm:$0xff]  }
   0xd   :  { %1143 = vmatpush3.bf16.msra.mxu1 %v1213_v11  ;;  %1080 = vmatprep.subr.bf16.mxu0 %v1214_v12  ;;  %v1234_v32 = vld [vmem:[%s1670_s0] ss:$16 sps:$4 sm:$0xff]   ;;  %v1236_v33 = vld [vmem:[%s1670_s0 + $0x4] ss:$16 sps:$4 sm:$0xff]   ;;  %v1237_v34 = vld [vmem:[%s1670_s0 + $0x8] ss:$16 sps:$4 sm:$0xff]  }
   0xe   :  { %1144 = vmatprep.subr.bf16.mxu1 %v1215_v13  ;;  %v1239_v35 = vld [vmem:[%s1670_s0 + $0xc] ss:$16 sps:$4 sm:$0xff]   ;;  %508 = vmatprep.mubr.bf16.mxu0 %v1236_v33  ;;  %v1240_v36 = vld [vmem:[%s1670_s0 + $0x24] ss:$16 sps:$4 sm:$0xff]   ;;  %v1244_v38 = vld [vmem:[%s1670_s0 + $0x20] ss:$16 sps:$4 sm:$0xff]  }
   0xf   :  { %605 = vmatprep.mubr.bf16.mxu1 %v1239_v35  ;;  %v1242_v37 = vld [vmem:[%s1670_s0 + $0x2c] ss:$16 sps:$4 sm:$0xff]   ;;  %v1245_v39 = vld [vmem:[%s1670_s0 + $0x28] ss:$16 sps:$4 sm:$0xff]   ;;  %v1246_v40 = vld [vmem:[%s1670_s0 + $0x44] ss:$16 sps:$4 sm:$0xff]  }
  0x10   :  { %1081 = vmatpush3.bf16.msra.mxu0 %v1216_v14  ;;  %v1248_v41 = vld [vmem:[%s1670_s0 + $0x4c] ss:$16 sps:$4 sm:$0xff]   ;;  %v1250_v42 = vld [vmem:[%s1670_s0 + $0x40] ss:$16 sps:$4 sm:$0xff]   ;;  %v1251_v43 = vld [vmem:[%s1670_s0 + $0x48] ss:$16 sps:$4 sm:$0xff]  }
  0x11   :  { %1145 = vmatpush3.bf16.msra.mxu1 %v1217_v15  ;;  %1082 = vmatprep.subr.bf16.mxu0 %v1218_v16  ;;  %v1252_v44 = vld [vmem:[%s1670_s0 + $0x64] ss:$16 sps:$4 sm:$0xff]   ;;  %v1254_v45 = vld [vmem:[%s1670_s0 + $0x6c] ss:$16 sps:$4 sm:$0xff]   ;;  %v1256_v46 = vld [vmem:[%s1670_s0 + $0x60] ss:$16 sps:$4 sm:$0xff]  }
  0x12   :  { %1146 = vmatprep.subr.bf16.mxu1 %v1219_v17  ;;  %v1257_v47 = vld [vmem:[%s1670_s0 + $0x68] ss:$16 sps:$4 sm:$0xff]   ;;  %v1258_v48 = vld [vmem:[%s1670_s0 + $0x84] ss:$16 sps:$4 sm:$0xff]   ;;  %v1260_v49 = vld [vmem:[%s1670_s0 + $0x8c] ss:$16 sps:$4 sm:$0xff]  }
  0x13   :  { %v1262_v50 = vld [vmem:[%s1670_s0 + $0x80] ss:$16 sps:$4 sm:$0xff]   ;;  %v1263_v51 = vld [vmem:[%s1670_s0 + $0x88] ss:$16 sps:$4 sm:$0xff]   ;;  %v1264_v52 = vld [vmem:[%s1670_s0 + $0xa4] ss:$16 sps:$4 sm:$0xff]  }
  0x14   :  { %1083 = vmatpush3.bf16.msra.mxu0 %v1220_v18  ;;  %v1266_v53 = vld [vmem:[%s1670_s0 + $0xac] ss:$16 sps:$4 sm:$0xff]   ;;  %v1268_v54 = vld [vmem:[%s1670_s0 + $0xa0] ss:$16 sps:$4 sm:$0xff]   ;;  %v1269_v55 = vld [vmem:[%s1670_s0 + $0xa8] ss:$16 sps:$4 sm:$0xff]  }
  0x15   :  { %1147 = vmatpush3.bf16.msra.mxu1 %v1221_v19  ;;  %1084 = vmatprep.subr.bf16.mxu0 %v1222_v20  ;;  %v1270_v56 = vld [vmem:[%s1670_s0 + $0xc4] ss:$16 sps:$4 sm:$0xff]   ;;  %v1272_v57 = vld [vmem:[%s1670_s0 + $0xcc] ss:$16 sps:$4 sm:$0xff]   ;;  %v1274_v58 = vld [vmem:[%s1670_s0 + $0xc0] ss:$16 sps:$4 sm:$0xff]  }
  0x16   :  { %1148 = vmatprep.subr.bf16.mxu1 %v1223_v21  ;;  %v1275_v59 = vld [vmem:[%s1670_s0 + $0xc8] ss:$16 sps:$4 sm:$0xff]   ;;  %v1276_v60 = vld [vmem:[%s1670_s0 + $0xe4] ss:$16 sps:$4 sm:$0xff]   ;;  %v1278_v61 = vld [vmem:[%s1670_s0 + $0xec] ss:$16 sps:$4 sm:$0xff]  }
  0x17   :  { %v1280_v62 = vld [vmem:[%s1670_s0 + $0xe0] ss:$16 sps:$4 sm:$0xff]   ;;  %v1281_v63 = vld [vmem:[%s1670_s0 + $0xe8] ss:$16 sps:$4 sm:$0xff]  }
  0x18   :  { %1085 = vmatpush3.bf16.msra.mxu0 %v1224_v22 }
  0x19   :  { %1149 = vmatpush3.bf16.msra.mxu1 %v1225_v23  ;;  %1086 = vmatprep.subr.bf16.mxu0 %v1226_v24 }
  0x1a   :  { %1150 = vmatprep.subr.bf16.mxu1 %v1227_v25 }
  0x1c   :  { %1087 = vmatpush3.bf16.msra.mxu0 %v1228_v26 }
  0x1d   :  { %1151 = vmatpush3.bf16.msra.mxu1 %v1229_v27  ;;  %1088 = vmatprep.subr.bf16.mxu0 %v1230_v28 }
  0x1e   :  { %1152 = vmatprep.subr.bf16.mxu1 %v1231_v29 }
  0x20   :  { %1089 = vmatpush3.bf16.msra.mxu0 %v1232_v30 }
  0x21   :  { %1153 = vmatpush3.bf16.msra.mxu1 %v1233_v31  ;;  %v1509_v31 = vld [vmem:[%s1671_s2] ss:$0 sm:$0xff] }
  0x23   :  { %509 = vmatmul.mubr.bf16.vlgmr.msra.gmra.mxu0 %v1234_v32 }
  0x24   :  { %606 = vmatmul.mubr.bf16.vlgmr.msra.gmra.mxu1 %v1237_v34  ;;  %516 = vmatprep.mubr.bf16.mxu0 %v1240_v36 }
  0x25   :  { %613 = vmatprep.mubr.bf16.mxu1 %v1242_v37 }
  0x2b   :  { %517 = vmatmul.mubr.bf16.gmra.mxu0 %v1244_v38 }
  0x2c   :  { %614 = vmatmul.mubr.bf16.gmra.mxu1 %v1245_v39  ;;  %524 = vmatprep.mubr.bf16.mxu0 %v1246_v40 }
  0x2d   :  { %621 = vmatprep.mubr.bf16.mxu1 %v1248_v41 }
  0x33   :  { %525 = vmatmul.mubr.bf16.gmra.mxu0 %v1250_v42 }
  0x34   :  { %622 = vmatmul.mubr.bf16.gmra.mxu1 %v1251_v43  ;;  %532 = vmatprep.mubr.bf16.mxu0 %v1252_v44 }
  0x35   :  { %629 = vmatprep.mubr.bf16.mxu1 %v1254_v45 }
  0x3b   :  { %533 = vmatmul.mubr.bf16.gmra.mxu0 %v1256_v46 }
  0x3c   :  { %630 = vmatmul.mubr.bf16.gmra.mxu1 %v1257_v47  ;;  %540 = vmatprep.mubr.bf16.mxu0 %v1258_v48 }
  0x3d   :  { %637 = vmatprep.mubr.bf16.mxu1 %v1260_v49 }
  0x43   :  { %541 = vmatmul.mubr.bf16.gmra.mxu0 %v1262_v50 }
  0x44   :  { %638 = vmatmul.mubr.bf16.gmra.mxu1 %v1263_v51  ;;  %548 = vmatprep.mubr.bf16.mxu0 %v1264_v52 }
  0x45   :  { %645 = vmatprep.mubr.bf16.mxu1 %v1266_v53 }
  0x4b   :  { %549 = vmatmul.mubr.bf16.gmra.mxu0 %v1268_v54 }
  0x4c   :  { %646 = vmatmul.mubr.bf16.gmra.mxu1 %v1269_v55  ;;  %556 = vmatprep.mubr.bf16.mxu0 %v1270_v56 }
  0x4d   :  { %653 = vmatprep.mubr.bf16.mxu1 %v1272_v57 }
  0x53   :  { %557 = vmatmul.mubr.bf16.gmra.mxu0 %v1274_v58 }
  0x54   :  { %654 = vmatmul.mubr.bf16.gmra.mxu1 %v1275_v59  ;;  %564 = vmatprep.mubr.bf16.mxu0 %v1276_v60 }
  0x55   :  { %661 = vmatprep.mubr.bf16.mxu1 %v1278_v61 }
  0x5b   :  { %565 = vmatmul.mubr.bf16.gmra.mxu0 %v1280_v62 }
  0x5c   :  { %662 = vmatmul.mubr.bf16.gmra.mxu1 %v1281_v63 }
  0xe3   :  { %v1090_v0 = vpop.f32.mrf.mxu0 }
  0xe4   :  { %v1154_v1 = vpop.f32.mrf.mxu1 }
  0xe5   :  { %v1091_v2 = vpop.f32.mrf.mxu0 }
  0xe6   :  { %v1155_v3 = vpop.f32.mrf.mxu1  ;;  %v1092_v28 = vadd.f32 %v1091_v2, %v1090_v0 }
  0xe7   :  { %v1093_v4 = vpop.f32.mrf.mxu0  ;;  %v1156_v42 = vadd.f32 %v1155_v3, %v1154_v1 }
  0xe8   :  { %v1157_v5 = vpop.f32.mrf.mxu1  ;;  %v511_v37 = vadd.f32 %v1092_v28, %v1509_v31 }
  0xe9   :  { %v1094_v6 = vpop.f32.mrf.mxu0 }
  0xea   :  { %v1158_v7 = vpop.f32.mrf.mxu1  ;;  %v1095_v25 = vadd.f32 %v1094_v6, %v1093_v4  ;;  %v1517_v50 = vadd.f32 %v1156_v42, %v511_v37 }
  0xeb   :  { %v1096_v8 = vpop.f32.mrf.mxu0  ;;  %v1159_v38 = vadd.f32 %v1158_v7, %v1157_v5 }
  0xec   :  { %v1160_v9 = vpop.f32.mrf.mxu1  ;;  %v514_v33 = vadd.f32 %v1095_v25, %v1509_v31  ;;  %v692_v0 = vmul.f32 %v1517_v50, %v1517_v50 }
  0xed   :  { %v1097_v10 = vpop.f32.mrf.mxu0 }
  0xee   :  { %v1161_v11 = vpop.f32.mrf.mxu1  ;;  %v1098_v29 = vadd.f32 %v1097_v10, %v1096_v8  ;;  %v1514_v44 = vadd.f32 %v1159_v38, %v514_v33 }
  0xef   :  { %v1099_v12 = vpop.f32.mrf.mxu0  ;;  %v1162_v45 = vadd.f32 %v1161_v11, %v1160_v9 }
  0xf0   :  { %v1163_v13 = vpop.f32.mrf.mxu1  ;;  %v519_v39 = vadd.f32 %v1098_v29, %v1509_v31  ;;  %v693_v57 = vmul.f32 %v1514_v44, %v1514_v44  ;;  %v670_v8 = vadd.f32 %v1514_v44, %v1517_v50 }
  0xf1   :  { %v1100_v14 = vpop.f32.mrf.mxu0 }
  0xf2   :  { %v1164_v15 = vpop.f32.mrf.mxu1  ;;  %v1101_v34 = vadd.f32 %v1100_v14, %v1099_v12  ;;  %v1519_v51 = vadd.f32 %v1162_v45, %v519_v39  ;;  %v708_v9 = vadd.f32 %v693_v57, %v692_v0 }
  0xf3   :  { %v1102_v16 = vpop.f32.mrf.mxu0  ;;  %v1165_v52 = vadd.f32 %v1164_v15, %v1163_v13 }
  0xf4   :  { %v1166_v17 = vpop.f32.mrf.mxu1  ;;  %v522_v46 = vadd.f32 %v1101_v34, %v1509_v31  ;;  %v694_v1 = vmul.f32 %v1519_v51, %v1519_v51 }
  0xf5   :  { %v1103_v18 = vpop.f32.mrf.mxu0 }
  0xf6   :  { %v1167_v19 = vpop.f32.mrf.mxu1  ;;  %v1104_v40 = vadd.f32 %v1103_v18, %v1102_v16  ;;  %v1524_v58 = vadd.f32 %v1165_v52, %v522_v46  ;;  %v709_v18 = vadd.f32 %v708_v9, %v694_v1 }
  0xf7   :  { %v1105_v20 = vpop.f32.mrf.mxu0  ;;  %v1168_v59 = vadd.f32 %v1167_v19, %v1166_v17  ;;  %v671_v17 = vadd.f32 %v670_v8, %v1519_v51 }
  0xf8   :  { %v1169_v21 = vpop.f32.mrf.mxu1  ;;  %v527_v53 = vadd.f32 %v1104_v40, %v1509_v31  ;;  %v695_v10 = vmul.f32 %v1524_v58, %v1524_v58 }
  0xf9   :  { %v1106_v22 = vpop.f32.mrf.mxu0 }
  0xfa   :  { %v1170_v23 = vpop.f32.mrf.mxu1  ;;  %v1107_v47 = vadd.f32 %v1106_v22, %v1105_v20  ;;  %v1531_v2 = vadd.f32 %v1168_v59, %v527_v53 }
  0xfb   :  { %v1108_v24 = vpop.f32.mrf.mxu0  ;;  %v1171_v3 = vadd.f32 %v1170_v23, %v1169_v21 }
  0xfc   :  { %v1172_v26 = vpop.f32.mrf.mxu1  ;;  %v530_v60 = vadd.f32 %v1107_v47, %v1509_v31  ;;  %v696_v19 = vmul.f32 %v1531_v2, %v1531_v2 }
  0xfd   :  { %v1109_v27 = vpop.f32.mrf.mxu0 }
  0xfe   :  { %v1173_v30 = vpop.f32.mrf.mxu1  ;;  %v1110_v55 = vadd.f32 %v1109_v27, %v1108_v24  ;;  %v1538_v11 = vadd.f32 %v1171_v3, %v530_v60  ;;  %v710_v27 = vadd.f32 %v709_v18, %v695_v10 }
  0xff   :  { %v1111_v32 = vpop.f32.mrf.mxu0  ;;  %v1174_v13 = vadd.f32 %v1173_v30, %v1172_v26  ;;  %v672_v26 = vadd.f32 %v671_v17, %v1524_v58 }
 0x100   :  { %v1175_v35 = vpop.f32.mrf.mxu1  ;;  %v535_v5 = vadd.f32 %v1110_v55, %v1509_v31  ;;  %v697_v28 = vmul.f32 %v1538_v11, %v1538_v11 }
 0x101   :  { %v1112_v36 = vpop.f32.mrf.mxu0 }
 0x102   :  { %v1176_v41 = vpop.f32.mrf.mxu1  ;;  %v1113_v62 = vadd.f32 %v1112_v36, %v1111_v32  ;;  %v1544_v21 = vadd.f32 %v1174_v13, %v535_v5  ;;  %v673_v36 = vadd.f32 %v672_v26, %v1531_v2 }
 0x103   :  { %v1114_v43 = vpop.f32.mrf.mxu0  ;;  %v1177_v22 = vadd.f32 %v1176_v41, %v1175_v35  ;;  %v711_v35 = vadd.f32 %v710_v27, %v696_v19 }
 0x104   :  { %v1178_v48 = vpop.f32.mrf.mxu1  ;;  %v538_v14 = vadd.f32 %v1113_v62, %v1509_v31  ;;  %v698_v39 = vmul.f32 %v1544_v21, %v1544_v21  ;;  %v674_v45 = vadd.f32 %v673_v36, %v1538_v11 }
 0x105   :  { %v1115_v49 = vpop.f32.mrf.mxu0  ;;  %v712_v46 = vadd.f32 %v711_v35, %v697_v28 }
 0x106   :  { %v1179_v54 = vpop.f32.mrf.mxu1  ;;  %v1116_v6 = vadd.f32 %v1115_v49, %v1114_v43  ;;  %v1550_v30 = vadd.f32 %v1177_v22, %v538_v14  ;;  %v675_v55 = vadd.f32 %v674_v45, %v1544_v21 }
 0x107   :  { %v1117_v56 = vpop.f32.mrf.mxu0  ;;  %v1180_v32 = vadd.f32 %v1179_v54, %v1178_v48  ;;  %v713_v59 = vadd.f32 %v712_v46, %v698_v39 }
 0x108   :  { %v1181_v61 = vpop.f32.mrf.mxu1  ;;  %v543_v23 = vadd.f32 %v1116_v6, %v1509_v31  ;;  %v699_v48 = vmul.f32 %v1550_v30, %v1550_v30  ;;  %v676_v0 = vadd.f32 %v675_v55, %v1550_v30 }
 0x109   :  { %v1118_v63 = vpop.f32.mrf.mxu0 }
 0x10a   :  { %v1182_v4 = vpop.f32.mrf.mxu1  ;;  %v1119_v15 = vadd.f32 %v1118_v63, %v1117_v56  ;;  %v1556_v40 = vadd.f32 %v1180_v32, %v543_v23 }
 0x10b   :  { %v1120_v7 = vpop.f32.mrf.mxu0  ;;  %v1183_v41 = vadd.f32 %v1182_v4, %v1181_v61  ;;  %v714_v4 = vadd.f32 %v713_v59, %v699_v48 }
 0x10c   :  { %v1184_v12 = vpop.f32.mrf.mxu1  ;;  %v546_v33 = vadd.f32 %v1119_v15, %v1509_v31  ;;  %v700_v60 = vmul.f32 %v1556_v40, %v1556_v40  ;;  %v677_v9 = vadd.f32 %v676_v0, %v1556_v40 }
 0x10d   :  { %v1121_v16 = vpop.f32.mrf.mxu0 }
 0x10e   :  { %v1185_v20 = vpop.f32.mrf.mxu1  ;;  %v1122_v24 = vadd.f32 %v1121_v16, %v1120_v7  ;;  %v1562_v49 = vadd.f32 %v1183_v41, %v546_v33  ;;  %v715_v13 = vadd.f32 %v714_v4, %v700_v60 }
 0x10f   :  { %v1123_v25 = vpop.f32.mrf.mxu0  ;;  %v1186_v52 = vadd.f32 %v1185_v20, %v1184_v12 }
 0x110   :  { %v1187_v29 = vpop.f32.mrf.mxu1  ;;  %v551_v42 = vadd.f32 %v1122_v24, %v1509_v31  ;;  %v701_v5 = vmul.f32 %v1562_v49, %v1562_v49  ;;  %v678_v17 = vadd.f32 %v677_v9, %v1562_v49 }
 0x111   :  { %v1124_v34 = vpop.f32.mrf.mxu0 }
 0x112   :  { %v1125_v37 = vadd.f32 %v1124_v34, %v1123_v25  ;;  %v1188_v38 = vpop.f32.mrf.mxu1  ;;  %v1568_v61 = vadd.f32 %v1186_v52, %v551_v42  ;;  %v716_v22 = vadd.f32 %v715_v13, %v701_v5 }
 0x113   :  { %v1126_v43 = vpop.f32.mrf.mxu0  ;;  %v1189_v62 = vadd.f32 %v1188_v38, %v1187_v29 }
 0x114   :  { %v1190_v47 = vpop.f32.mrf.mxu1  ;;  %v554_v53 = vadd.f32 %v1125_v37, %v1509_v31  ;;  %v702_v14 = vmul.f32 %v1568_v61, %v1568_v61  ;;  %v679_v25 = vadd.f32 %v678_v17, %v1568_v61 }
 0x115   :  { %v1127_v54 = vpop.f32.mrf.mxu0 }
 0x116   :  { %v1128_v56 = vadd.f32 %v1127_v54, %v1126_v43  ;;  %v1191_v57 = vpop.f32.mrf.mxu1  ;;  %v1574_v6 = vadd.f32 %v1189_v62, %v554_v53  ;;  %v717_v29 = vadd.f32 %v716_v22, %v702_v14 }
 0x117   :  { %v1129_v63 = vpop.f32.mrf.mxu0  ;;  %v1192_v7 = vadd.f32 %v1191_v57, %v1190_v47 }
 0x118   :  { %v559_v1 = vadd.f32 %v1128_v56, %v1509_v31  ;;  %v1193_v3 = vpop.f32.mrf.mxu1  ;;  %v703_v23 = vmul.f32 %v1574_v6, %v1574_v6  ;;  %v680_v34 = vadd.f32 %v679_v25, %v1574_v6 }
 0x119   :  { %v1130_v8 = vpop.f32.mrf.mxu0 }
 0x11a   :  { %v1131_v10 = vadd.f32 %v1130_v8, %v1129_v63  ;;  %v1194_v12 = vpop.f32.mrf.mxu1  ;;  %v1579_v15 = vadd.f32 %v1192_v7, %v559_v1  ;;  %v718_v38 = vadd.f32 %v717_v29, %v703_v23  ;;  %v732_v23 = vld [vmem:[%s1672_s3] sm:$0x1] }
 0x11b   :  { %v1132_v16 = vpop.f32.mrf.mxu0  ;;  %v1195_v19 = vadd.f32 %v1194_v12, %v1193_v3 }
 0x11c   :  { %v562_v18 = vadd.f32 %v1131_v10, %v1509_v31  ;;  %v1196_v20 = vpop.f32.mrf.mxu1  ;;  %v704_v32 = vmul.f32 %v1579_v15, %v1579_v15  ;;  %v681_v41 = vadd.f32 %v680_v34, %v1579_v15 }
 0x11d   :  { %v1133_v24 = vpop.f32.mrf.mxu0 }
 0x11e   :  { %v1586_v26 = vadd.f32 %v1195_v19, %v562_v18  ;;  %v1134_v27 = vadd.f32 %v1133_v24, %v1132_v16  ;;  %v1197_v28 = vpop.f32.mrf.mxu1  ;;  %v719_v47 = vadd.f32 %v718_v38, %v704_v32 }
 0x11f   :  { %v1135_v33 = vpop.f32.mrf.mxu0  ;;  %v1198_v35 = vadd.f32 %v1197_v28, %v1196_v20  ;;  %v753_v20 = vlaneseq }
 0x120   :  { %v567_v36 = vadd.f32 %v1134_v27, %v1509_v31  ;;  %v1199_v37 = vpop.f32.mrf.mxu1  ;;  %v705_v42 = vmul.f32 %v1586_v26, %v1586_v26  ;;  %v682_v48 = vadd.f32 %v681_v41, %v1586_v26 }
 0x121   :  { %v1136_v39 = vpop.f32.mrf.mxu0  ;;  %v754_v22 = vshrl.u32 %v753_v20, 7 }
 0x122   :  { %v1595_v43 = vadd.f32 %v1198_v35, %v567_v36  ;;  %v1137_v45 = vadd.f32 %v1136_v39, %v1135_v33  ;;  %v1200_v46 = vpop.f32.mrf.mxu1  ;;  %v720_v55 = vadd.f32 %v719_v47, %v705_v42 }
 0x123   :  { %v1201_v54 = vadd.f32 %v1200_v46, %v1199_v37  ;;  %v755_v24 = vsub.s32 0, %v754_v22 }
 0x124   :  { %v706_v52 = vmul.f32 %v1595_v43, %v1595_v43  ;;  %v570_v53 = vadd.f32 %v1137_v45, %v1509_v31  ;;  %v683_v56 = vadd.f32 %v682_v48, %v1595_v43 }
 0x126   :  { %v1602_v57 = vadd.f32 %v1201_v54, %v570_v53  ;;  %v721_v59 = vadd.f32 %v720_v55, %v706_v52 }
 0x128   :  { %v684_v60 = vadd.f32 %v683_v56, %v1602_v57  ;;  %v707_v62 = vmul.f32 %v1602_v57, %v1602_v57 }
 0x12a   :  { %v685_v63 = vrot.slane %v684_v60, 4  ;;  %v722_v0 = vadd.f32 %v721_v59, %v707_v62 }
 0x12c   :  { %v686_v1 = vadd.f32 %v685_v63, %v684_v60  ;;  %v723_v3 = vrot.slane %v722_v0, 4 }
 0x12e   :  { %v687_v4 = vrot.slane %v686_v1, 2  ;;  %v724_v5 = vadd.f32 %v723_v3, %v722_v0 }
 0x130   :  { %v688_v7 = vadd.f32 %v687_v4, %v686_v1  ;;  %v725_v31 = vrot.slane %v724_v5, 2 }
 0x132   :  { %v689_v8 = vrot.slane %v688_v7, 1  ;;  %v726_v9 = vadd.f32 %v725_v31, %v724_v5 }
 0x134   :  { %v690_v10 = vadd.f32 %v689_v8, %v688_v7  ;;  %v727_v12 = vrot.slane %v726_v9, 1 }
 0x136   :  { %v691_v13 = vmul.f32 0.0078125, %v690_v10  ;;  %v728_v14 = vadd.f32 %v727_v12, %v726_v9 }
 0x138   :  { %v729_v16 = vmul.f32 0.0078125, %v728_v14  ;;  %v730_v17 = vmul.f32 %v691_v13, %v691_v13  ;;  %v736_v27 = vsub.f32 %v1517_v50, %v691_v13  ;;  %v737_v28 = vsub.f32 %v1514_v44, %v691_v13 }
 0x139   :  { %v738_v32 = vsub.f32 %v1519_v51, %v691_v13  ;;  %v739_v33 = vsub.f32 %v1524_v58, %v691_v13  ;;  %v740_v34 = vsub.f32 %v1531_v2, %v691_v13  ;;  %v741_v36 = vsub.f32 %v1538_v11, %v691_v13 }
 0x13a   :  { %v731_v18 = vsub.f32 %v729_v16, %v730_v17  ;;  %v742_v35 = vsub.f32 %v1544_v21, %v691_v13  ;;  %v743_v37 = vsub.f32 %v1550_v30, %v691_v13  ;;  %v744_v38 = vsub.f32 %v1556_v40, %v691_v13 }
 0x13b   :  { %v745_v39 = vsub.f32 %v1562_v49, %v691_v13  ;;  %v746_v50 = vsub.f32 %v1568_v61, %v691_v13  ;;  %v747_v44 = vsub.f32 %v1574_v6, %v691_v13  ;;  %v748_v51 = vsub.f32 %v1579_v15, %v691_v13  ;;  %v994_v61 = vld [vmem:[%s1673_s4] ss:$0 sm:$0xff] }
 0x13c   :  { %v733_v19 = vadd.f32 1e-05, %v731_v18  ;;  %v749_v58 = vsub.f32 %v1586_v26, %v691_v13  ;;  %v750_v2 = vsub.f32 %v1595_v43, %v691_v13  ;;  %v751_v11 = vsub.f32 %v1602_v57, %v691_v13 }
 0x13e   :  { %1282 = vrsqrt.f32 %v733_v19 }
 0x14b   :  { %v1283_v25 = vpop.eup %1282 }
 0x14c   :  { %v735_v29 = vmul.f32 %v1283_v25, %v732_v23 }
 0x14e   :  { %v756_v41 = vrot.slane %v735_v29, %v755_v24 }
 0x150   :  { %v758_v21 = vmul.f32 %v756_v41, %v736_v27  ;;  %v759_v42 = vmul.f32 %v756_v41, %v737_v28  ;;  %v760_v30 = vmul.f32 %v756_v41, %v738_v32  ;;  %v761_v45 = vmul.f32 %v756_v41, %v739_v33 }
 0x151   :  { %v762_v40 = vmul.f32 %v756_v41, %v740_v34  ;;  %v763_v46 = vmul.f32 %v756_v41, %v741_v36  ;;  %v764_v49 = vmul.f32 %v756_v41, %v742_v35  ;;  %v765_v47 = vmul.f32 %v756_v41, %v743_v37 }
 0x152   :  { %v766_v6 = vmul.f32 %v756_v41, %v744_v38  ;;  %v767_v15 = vmul.f32 %v756_v41, %v745_v39  ;;  %v768_v48 = vmul.f32 %v756_v41, %v746_v50  ;;  %v769_v26 = vmul.f32 %v756_v41, %v747_v44 }
 0x153   :  { %v770_v52 = vmul.f32 %v756_v41, %v748_v51  ;;  %v771_v43 = vmul.f32 %v756_v41, %v749_v58  ;;  %v772_v53 = vmul.f32 %v756_v41, %v750_v2  ;;  %v773_v54 = vmul.f32 %v756_v41, %v751_v11 }
 0x154   :  { %v781_v55 = vadd.f32 %v994_v61, %v758_v21  ;;  %v782_v56 = vadd.f32 %v994_v61, %v759_v42  ;;  %v783_v57 = vadd.f32 %v994_v61, %v760_v30  ;;  %v784_v59 = vadd.f32 %v994_v61, %v761_v45 }
 0x155   :  { %v785_v60 = vadd.f32 %v994_v61, %v762_v40  ;;  %v786_v62 = vadd.f32 %v994_v61, %v763_v46  ;;  %v787_v63 = vadd.f32 %v994_v61, %v764_v49  ;;  %v788_v0 = vadd.f32 %v994_v61, %v765_v47 }
 0x156   :  { %v789_v1 = vadd.f32 %v994_v61, %v766_v6  ;;  %v790_v3 = vadd.f32 %v994_v61, %v767_v15  ;;  %v791_v4 = vadd.f32 %v994_v61, %v768_v48  ;;  %v792_v5 = vadd.f32 %v994_v61, %v769_v26 }
 0x157   :  { %v793_v7 = vadd.f32 %v994_v61, %v770_v52  ;;  %v794_v31 = vadd.f32 %v994_v61, %v771_v43  ;;  %v795_v8 = vadd.f32 %v994_v61, %v772_v53  ;;  %v796_v9 = vadd.f32 %v994_v61, %v773_v54 }
 0x158   :  { %vm797_vm0 = vcmp.ge.f32.partialorder %v781_v55, 0.0  ;;  %vm798_vm1 = vcmp.ge.f32.partialorder %v782_v56, 0.0  ;;  %vm799_vm2 = vcmp.ge.f32.partialorder %v783_v57, 0.0  ;;  %vm800_vm3 = vcmp.ge.f32.partialorder %v784_v59, 0.0 }
 0x159   :  { %vm801_vm4 = vcmp.ge.f32.partialorder %v785_v60, 0.0  ;;  %vm802_vm5 = vcmp.ge.f32.partialorder %v786_v62, 0.0  ;;  %vm803_vm6 = vcmp.ge.f32.partialorder %v787_v63, 0.0  ;;  %vm804_vm7 = vcmp.ge.f32.partialorder %v788_v0, 0.0 }
 0x15a   :  { %vm805_vm8 = vcmp.ge.f32.partialorder %v789_v1, 0.0  ;;  %vm806_vm9 = vcmp.ge.f32.partialorder %v790_v3, 0.0  ;;  %vm807_vm10 = vcmp.ge.f32.partialorder %v791_v4, 0.0  ;;  %vm808_vm11 = vcmp.ge.f32.partialorder %v792_v5, 0.0 }
 0x15b   :  { %vm809_vm12 = vcmp.ge.f32.partialorder %v793_v7, 0.0  ;;  %vm810_vm13 = vcmp.ge.f32.partialorder %v794_v31, 0.0  ;;  %vm811_vm14 = vcmp.ge.f32.partialorder %v795_v8, 0.0  ;;  %vm812_vm15 = vcmp.ge.f32.partialorder %v796_v9, 0.0 }
 0x15c   :  { %v813_v10 = vmul.f32 0.2, %v781_v55  ;;  %v814_v12 = vmul.f32 0.2, %v782_v56  ;;  %v815_v13 = vmul.f32 0.2, %v783_v57 }
 0x15d   :  { %v816_v14 = vmul.f32 0.2, %v784_v59  ;;  %v817_v16 = vmul.f32 0.2, %v785_v60  ;;  %v818_v17 = vmul.f32 0.2, %v786_v62 }
 0x15e   :  { %v819_v18 = vmul.f32 0.2, %v787_v63  ;;  %v820_v19 = vmul.f32 0.2, %v788_v0  ;;  %v821_v20 = vmul.f32 0.2, %v789_v1  ;;  %v829_v22 = vsel %vm797_vm0, %v781_v55, %v813_v10 }
 0x15f   :  { %v822_v23 = vmul.f32 0.2, %v790_v3  ;;  %v823_v24 = vmul.f32 0.2, %v791_v4  ;;  %v824_v25 = vmul.f32 0.2, %v792_v5  ;;  %v830_v27 = vsel %vm798_vm1, %v782_v56, %v814_v12 }
 0x160   :  { %v825_v28 = vmul.f32 0.2, %v793_v7  ;;  %v826_v29 = vmul.f32 0.2, %v794_v31  ;;  %v827_v32 = vmul.f32 0.2, %v795_v8  ;;  %v831_v33 = vsel %vm799_vm2, %v783_v57, %v815_v13 }
 0x161   :  { %v828_v34 = vmul.f32 0.2, %v796_v9  ;;  %v832_v36 = vsel %vm800_vm3, %v784_v59, %v816_v14  ;;  %v833_v35 = vsel %vm801_vm4, %v785_v60, %v817_v16  ;;  %v834_v37 = vsel %vm802_vm5, %v786_v62, %v818_v17 }
 0x162   :  { %v835_v38 = vsel %vm803_vm6, %v787_v63, %v819_v18  ;;  %v836_v39 = vsel %vm804_vm7, %v788_v0, %v820_v19  ;;  %v837_v50 = vsel %vm805_vm8, %v789_v1, %v821_v20  ;;  %v838_v44 = vsel %vm806_vm9, %v790_v3, %v822_v23 }
 0x163   :  { %v839_v41 = vsel %vm807_vm10, %v791_v4, %v823_v24  ;;  %v840_v51 = vsel %vm808_vm11, %v792_v5, %v824_v25  ;;  %v841_v58 = vsel %vm809_vm12, %v793_v7, %v825_v28  ;;  %v842_v2 = vsel %vm810_vm13, %v794_v31, %v826_v29 }
 0x164   :  { %v843_v11 = vsel %vm811_vm14, %v795_v8, %v827_v32  ;;  %v844_v21 = vsel %vm812_vm15, %v796_v9, %v828_v34  ;;  %v1030_v42 = vpack.c.bf16 %v830_v27, %v829_v22  ;;  %v1035_v30 = vpack.c.bf16 %v832_v36, %v831_v33 }
 0x165   :  { %v1040_v45 = vpack.c.bf16 %v834_v37, %v833_v35  ;;  %v1045_v40 = vpack.c.bf16 %v836_v39, %v835_v38  ;;  %v1050_v46 = vpack.c.bf16 %v838_v44, %v837_v50  ;;  %v1055_v49 = vpack.c.bf16 %v840_v51, %v839_v41 }
 0x166   :  { %1031 = vst [vmem:[%s1674_s5] sm:$0xff] %v1030_v42   ;;  %1067 = vst [vmem:[%s1674_s5 + $0x8] sm:$0xff] %v1035_v30   ;;  %v1060_v47 = vpack.c.bf16 %v842_v2, %v841_v58  ;;  %v1065_v61 = vpack.c.bf16 %v844_v21, %v843_v11 }
 0x167   :  { %1068 = vst [vmem:[%s1674_s5 + $0x10] sm:$0xff] %v1040_v45   ;;  %1069 = vst [vmem:[%s1674_s5 + $0x18] sm:$0xff] %v1045_v40  }
 0x168   :  { %1070 = vst [vmem:[%s1674_s5 + $0x20] sm:$0xff] %v1050_v46   ;;  %1071 = vst [vmem:[%s1674_s5 + $0x28] sm:$0xff] %v1055_v49  }
 0x169   :  { %1072 = vst [vmem:[%s1674_s5 + $0x30] sm:$0xff] %v1060_v47   ;;  %1073 = vst [vmem:[%s1674_s5 + $0x38] sm:$0xff] %v1065_v61  }

// kernel: discriminator_forward.8
= control target key start
LH: loop header
LB: loop body
LE: loop exit
PB: predicated region body
PF: predicated region fallthrough
CT: control target
= control target key end

     0   :  { %s1487_s1 = inlined_call_operand.vmem [shape: bf16[1024,128], index: 1, kind: input, shape index: {}]   ;;  %s1488_s0 = inlined_call_operand.vmem [shape: bf16[32,1024], index: 0, kind: input, shape index: {}]   ;;  %s1489_s2 = inlined_call_operand.vmem [shape: f32[1,128], index: 2, kind: input, shape index: {}]   ;;  %s1490_s3 = inlined_call_operand.vmem [shape: f32[1,128], index: 3, kind: input, shape index: {}]   ;;  %s1491_s4 = inlined_call_operand.vmem [shape: f32[1,128], index: 4, kind: input, shape index: {}]   ;;  %s1492_s5 = inlined_call_operand.vmem [shape: bf16[32,128], index: 5, kind: output, shape index: {}]  }
   0x1   :  { %v1136_v0 = vld [vmem:[%s1487_s1 + $0x78] sm:$0xff]   ;;  %v1140_v4 = vld [vmem:[%s1487_s1 + $0x70] sm:$0xff]   ;;  %v1144_v8 = vld [vmem:[%s1487_s1 + $0x68] sm:$0xff]  }
   0x2   :  { %v1137_v1 = vld [vmem:[%s1487_s1 + $0xf8] sm:$0xff]   ;;  %1024 = vmatprep.subr.bf16.mxu0 %v1136_v0  ;;  %v1141_v5 = vld [vmem:[%s1487_s1 + $0xf0] sm:$0xff]   ;;  %v1145_v9 = vld [vmem:[%s1487_s1 + $0xe8] sm:$0xff]  }
   0x3   :  { %v1138_v2 = vld [vmem:[%s1487_s1 + $0x38] sm:$0xff]   ;;  %1052 = vmatprep.subr.bf16.mxu1 %v1137_v1  ;;  %v1142_v6 = vld [vmem:[%s1487_s1 + $0x30] sm:$0xff]   ;;  %v1146_v10 = vld [vmem:[%s1487_s1 + $0x28] sm:$0xff]  }
   0x4   :  { %v1139_v3 = vld [vmem:[%s1487_s1 + $0xb8] sm:$0xff]   ;;  %1025 = vmatpush3.bf16.msra.mxu0 %v1138_v2  ;;  %v1143_v7 = vld [vmem:[%s1487_s1 + $0xb0] sm:$0xff]   ;;  %v1147_v11 = vld [vmem:[%s1487_s1 + $0xa8] sm:$0xff]  }
   0x5   :  { %1053 = vmatpush3.bf16.msra.mxu1 %v1139_v3  ;;  %1026 = vmatprep.subr.bf16.mxu0 %v1140_v4  ;;  %v1148_v12 = vld [vmem:[%s1487_s1 + $0x60] sm:$0xff]   ;;  %v1152_v16 = vld [vmem:[%s1487_s1 + $0x58] sm:$0xff]   ;;  %v1156_v20 = vld [vmem:[%s1487_s1 + $0x50] sm:$0xff]  }
   0x6   :  { %1054 = vmatprep.subr.bf16.mxu1 %v1141_v5  ;;  %v1149_v13 = vld [vmem:[%s1487_s1 + $0xe0] sm:$0xff]   ;;  %v1153_v17 = vld [vmem:[%s1487_s1 + $0xd8] sm:$0xff]   ;;  %v1157_v21 = vld [vmem:[%s1487_s1 + $0xd0] sm:$0xff]  }
   0x7   :  { %v1150_v14 = vld [vmem:[%s1487_s1 + $0x20] sm:$0xff]   ;;  %v1154_v18 = vld [vmem:[%s1487_s1 + $0x18] sm:$0xff]   ;;  %v1158_v22 = vld [vmem:[%s1487_s1 + $0x10] sm:$0xff]  }
   0x8   :  { %1027 = vmatpush3.bf16.msra.mxu0 %v1142_v6  ;;  %v1151_v15 = vld [vmem:[%s1487_s1 + $0xa0] sm:$0xff]   ;;  %v1155_v19 = vld [vmem:[%s1487_s1 + $0x98] sm:$0xff]   ;;  %v1159_v23 = vld [vmem:[%s1487_s1 + $0x90] sm:$0xff]  }
   0x9   :  { %1055 = vmatpush3.bf16.msra.mxu1 %v1143_v7  ;;  %1028 = vmatprep.subr.bf16.mxu0 %v1144_v8  ;;  %v1160_v24 = vld [vmem:[%s1487_s1 + $0x48] sm:$0xff]   ;;  %v1164_v28 = vld [vmem:[%s1487_s1 + $0x40] sm:$0xff]   ;;  %v1168_v40 = vld [vmem:[%s1487_s1 + $0x178] sm:$0xff]  }
   0xa   :  { %1056 = vmatprep.subr.bf16.mxu1 %v1145_v9  ;;  %v1161_v25 = vld [vmem:[%s1487_s1 + $0xc8] sm:$0xff]   ;;  %v1165_v29 = vld [vmem:[%s1487_s1 + $0xc0] sm:$0xff]   ;;  %v1169_v41 = vld [vmem:[%s1487_s1 + $0x1f8] sm:$0xff]  }
   0xb   :  { %v1162_v26 = vld [vmem:[%s1487_s1 + $0x8] sm:$0xff]   ;;  %v1166_v30 = vld [vmem:[%s1487_s1] sm:$0xff]   ;;  %v1170_v42 = vld [vmem:[%s1487_s1 + $0x138] sm:$0xff]  }
   0xc   :  { %1029 = vmatpush3.bf16.msra.mxu0 %v1146_v10  ;;  %v1163_v27 = vld [vmem:[%s1487_s1 + $0x88] sm:$0xff]   ;;  %v1167_v31 = vld [vmem:[%s1487_s1 + $0x80] sm:$0xff]   ;;  %v1171_v43 = vld [vmem:[%s1487_s1 + $0x1b8] sm:$0xff]  }
   0xd   :  { %1057 = vmatpush3.bf16.msra.mxu1 %v1147_v11  ;;  %1030 = vmatprep.subr.bf16.mxu0 %v1148_v12  ;;  %v21_v32 = vld [vmem:[%s1488_s0] sm:$0xff]  ;;  %v22_v34 = vld [vmem:[%s1488_s0 + $0x8] sm:$0xff]  ;;  %v1172_v44 = vld [vmem:[%s1487_s1 + $0x170] sm:$0xff]  }
   0xe   :  { %1058 = vmatprep.subr.bf16.mxu1 %v1149_v13  ;;  %v25_v33 = vld [vmem:[%s1488_s0 + $0x20] sm:$0xff]  ;;  %v26_v37 = vld [vmem:[%s1488_s0 + $0x28] sm:$0xff]  ;;  %v1173_v45 = vld [vmem:[%s1487_s1 + $0x1f0] sm:$0xff]  }
   0xf   :  { %v924_v35 = vcombine.low %v21_v32, %v25_v33  ;;  %v925_v36 = vcombine.high %v21_v32, %v25_v33  ;;  %v926_v38 = vcombine.low %v22_v34, %v26_v37  ;;  %v927_v39 = vcombine.high %v22_v34, %v26_v37  ;;  %v1174_v46 = vld [vmem:[%s1487_s1 + $0x130] sm:$0xff]   ;;  %v1176_v48 = vld [vmem:[%s1487_s1 + $0x168] sm:$0xff]   ;;  %v1180_v52 = vld [vmem:[%s1487_s1 + $0x160] sm:$0xff]  }
  0x10   :  { %1031 = vmatpush3.bf16.msra.mxu0 %v1150_v14  ;;  %v1175_v47 = vld [vmem:[%s1487_s1 + $0x1b0] sm:$0xff]   ;;  %v1177_v49 = vld [vmem:[%s1487_s1 + $0x1e8] sm:$0xff]   ;;  %v1181_v53 = vld [vmem:[%s1487_s1 + $0x1e0] sm:$0xff]  }
  0x11   :  { %1059 = vmatpush3.bf16.msra.mxu1 %v1151_v15  ;;  %1032 = vmatprep.subr.bf16.mxu0 %v1152_v16  ;;  %v1178_v50 = vld [vmem:[%s1487_s1 + $0x128] sm:$0xff]   ;;  %v1182_v54 = vld [vmem:[%s1487_s1 + $0x120] sm:$0xff]   ;;  %v1184_v56 = vld [vmem:[%s1487_s1 + $0x158] sm:$0xff]  }
  0x12   :  { %1060 = vmatprep.subr.bf16.mxu1 %v1153_v17  ;;  %668 = vmatprep.mubr.bf16.mxu0 %v925_v36  ;;  %v1179_v51 = vld [vmem:[%s1487_s1 + $0x1a8] sm:$0xff]   ;;  %v1183_v55 = vld [vmem:[%s1487_s1 + $0x1a0] sm:$0xff]   ;;  %v1185_v57 = vld [vmem:[%s1487_s1 + $0x1d8] sm:$0xff]  }
  0x13   :  { %717 = vmatprep.mubr.bf16.mxu1 %v927_v39  ;;  %v29_v58 = vld [vmem:[%s1488_s0 + $0x40] sm:$0xff]  ;;  %v1186_v61 = vld [vmem:[%s1487_s1 + $0x118] sm:$0xff]   ;;  %v30_v0 = vld [vmem:[%s1488_s0 + $0x48] sm:$0xff] }
  0x14   :  { %1033 = vmatpush3.bf16.msra.mxu0 %v1154_v18  ;;  %v33_v59 = vld [vmem:[%s1488_s0 + $0x60] sm:$0xff]  ;;  %v1187_v63 = vld [vmem:[%s1487_s1 + $0x198] sm:$0xff]   ;;  %v34_v1 = vld [vmem:[%s1488_s0 + $0x68] sm:$0xff] }
  0x15   :  { %1061 = vmatpush3.bf16.msra.mxu1 %v1155_v19  ;;  %1034 = vmatprep.subr.bf16.mxu0 %v1156_v20  ;;  %v933_v60 = vcombine.high %v29_v58, %v33_v59  ;;  %v932_v62 = vcombine.low %v29_v58, %v33_v59  ;;  %v935_v2 = vcombine.high %v30_v0, %v34_v1  ;;  %v1188_v4 = vld [vmem:[%s1487_s1 + $0x150] sm:$0xff]   ;;  %v1192_v8 = vld [vmem:[%s1487_s1 + $0x148] sm:$0xff]   ;;  %v1196_v12 = vld [vmem:[%s1487_s1 + $0x140] sm:$0xff]  }
  0x16   :  { %1062 = vmatprep.subr.bf16.mxu1 %v1157_v21  ;;  %v934_v3 = vcombine.low %v30_v0, %v34_v1  ;;  %v1189_v5 = vld [vmem:[%s1487_s1 + $0x1d0] sm:$0xff]   ;;  %v1193_v9 = vld [vmem:[%s1487_s1 + $0x1c8] sm:$0xff]   ;;  %v1197_v13 = vld [vmem:[%s1487_s1 + $0x1c0] sm:$0xff]  }
  0x17   :  { %v1190_v6 = vld [vmem:[%s1487_s1 + $0x110] sm:$0xff]   ;;  %v1194_v10 = vld [vmem:[%s1487_s1 + $0x108] sm:$0xff]   ;;  %v1198_v14 = vld [vmem:[%s1487_s1 + $0x100] sm:$0xff]  }
  0x18   :  { %1035 = vmatpush3.bf16.msra.mxu0 %v1158_v22  ;;  %v1191_v7 = vld [vmem:[%s1487_s1 + $0x190] sm:$0xff]   ;;  %v1195_v11 = vld [vmem:[%s1487_s1 + $0x188] sm:$0xff]   ;;  %v1199_v15 = vld [vmem:[%s1487_s1 + $0x180] sm:$0xff]  }
  0x19   :  { %1063 = vmatpush3.bf16.msra.mxu1 %v1159_v23  ;;  %1036 = vmatprep.subr.bf16.mxu0 %v1160_v24  ;;  %v23_v16 = vld [vmem:[%s1488_s0 + $0x10] sm:$0xff]  ;;  %v24_v18 = vld [vmem:[%s1488_s0 + $0x18] sm:$0xff] }
  0x1a   :  { %1064 = vmatprep.subr.bf16.mxu1 %v1161_v25  ;;  %v27_v17 = vld [vmem:[%s1488_s0 + $0x30] sm:$0xff]  ;;  %v28_v19 = vld [vmem:[%s1488_s0 + $0x38] sm:$0xff] }
  0x1b   :  { %v928_v20 = vcombine.low %v23_v16, %v27_v17  ;;  %v929_v21 = vcombine.high %v23_v16, %v27_v17  ;;  %v930_v22 = vcombine.low %v24_v18, %v28_v19  ;;  %v931_v23 = vcombine.high %v24_v18, %v28_v19  ;;  %v31_v24 = vld [vmem:[%s1488_s0 + $0x50] sm:$0xff] }
  0x1c   :  { %1037 = vmatpush3.bf16.msra.mxu0 %v1162_v26  ;;  %v35_v25 = vld [vmem:[%s1488_s0 + $0x70] sm:$0xff]  ;;  %v32_v26 = vld [vmem:[%s1488_s0 + $0x58] sm:$0xff] }
  0x1d   :  { %1065 = vmatpush3.bf16.msra.mxu1 %v1163_v27  ;;  %1038 = vmatprep.subr.bf16.mxu0 %v1164_v28  ;;  %v937_v27 = vcombine.high %v31_v24, %v35_v25  ;;  %v36_v28 = vld [vmem:[%s1488_s0 + $0x78] sm:$0xff] }
  0x1e   :  { %1066 = vmatprep.subr.bf16.mxu1 %v1165_v29  ;;  %v939_v29 = vcombine.high %v32_v26, %v36_v28 }
  0x20   :  { %1039 = vmatpush3.bf16.msra.mxu0 %v1166_v30  ;;  %v936_v30 = vcombine.low %v31_v24, %v35_v25 }
  0x21   :  { %1067 = vmatpush3.bf16.msra.mxu1 %v1167_v31  ;;  %1080 = vmatprep.subr.bf16.mxu0 %v1168_v40  ;;  %v938_v31 = vcombine.low %v32_v26, %v36_v28 }
  0x22   :  { %1108 = vmatprep.subr.bf16.mxu1 %v1169_v41 }
  0x23   :  { %669 = vmatmul.mubr.bf16.vlgmr.msra.gmra.mxu0 %v924_v35 }
  0x24   :  { %718 = vmatmul.mubr.bf16.vlgmr.msra.gmra.mxu1 %v926_v38  ;;  %1081 = vmatpush3.bf16.msra.mxu0 %v1170_v42 }
  0x25   :  { %1109 = vmatpush3.bf16.msra.mxu1 %v1171_v43  ;;  %1082 = vmatprep.subr.bf16.mxu0 %v1172_v44 }
  0x26   :  { %1110 = vmatprep.subr.bf16.mxu1 %v1173_v45  ;;  %676 = vmatprep.mubr.bf16.mxu0 %v933_v60 }
  0x27   :  { %725 = vmatprep.mubr.bf16.mxu1 %v935_v2 }
  0x28   :  { %1083 = vmatpush3.bf16.msra.mxu0 %v1174_v46 }
  0x29   :  { %1111 = vmatpush3.bf16.msra.mxu1 %v1175_v47  ;;  %1084 = vmatprep.subr.bf16.mxu0 %v1176_v48 }
  0x2a   :  { %1112 = vmatprep.subr.bf16.mxu1 %v1177_v49  ;;  %v923_v49 = vld [vmem:[%s1489_s2] ss:$0 sm:$0xff] }
  0x2b   :  { %677 = vmatmul.mubr.bf16.gmra.mxu0 %v932_v62 }
  0x2c   :  { %1085 = vmatpush3.bf16.msra.mxu0 %v1178_v50  ;;  %726 = vmatmul.mubr.bf16.gmra.mxu1 %v934_v3 }
  0x2d   :  { %1113 = vmatpush3.bf16.msra.mxu1 %v1179_v51  ;;  %1086 = vmatprep.subr.bf16.mxu0 %v1180_v52 }
  0x2e   :  { %1114 = vmatprep.subr.bf16.mxu1 %v1181_v53  ;;  %766 = vmatprep.mubr.bf16.mxu0 %v929_v21 }
  0x2f   :  { %815 = vmatprep.mubr.bf16.mxu1 %v931_v23 }
  0x30   :  { %1087 = vmatpush3.bf16.msra.mxu0 %v1182_v54 }
  0x31   :  { %1115 = vmatpush3.bf16.msra.mxu1 %v1183_v55  ;;  %1088 = vmatprep.subr.bf16.mxu0 %v1184_v56 }
  0x32   :  { %1116 = vmatprep.subr.bf16.mxu1 %v1185_v57 }
  0x34   :  { %1089 = vmatpush3.bf16.msra.mxu0 %v1186_v61 }
  0x35   :  { %1117 = vmatpush3.bf16.msra.mxu1 %v1187_v63  ;;  %1090 = vmatprep.subr.bf16.mxu0 %v1188_v4 }
  0x36   :  { %1118 = vmatprep.subr.bf16.mxu1 %v1189_v5 }
  0x38   :  { %1091 = vmatpush3.bf16.msra.mxu0 %v1190_v6 }
  0x39   :  { %1119 = vmatpush3.bf16.msra.mxu1 %v1191_v7  ;;  %1092 = vmatprep.subr.bf16.mxu0 %v1192_v8 }
  0x3a   :  { %1120 = vmatprep.subr.bf16.mxu1 %v1193_v9 }
  0x3c   :  { %1093 = vmatpush3.bf16.msra.mxu0 %v1194_v10 }
  0x3d   :  { %1121 = vmatpush3.bf16.msra.mxu1 %v1195_v11  ;;  %1094 = vmatprep.subr.bf16.mxu0 %v1196_v12 }
  0x3e   :  { %1122 = vmatprep.subr.bf16.mxu1 %v1197_v13 }
  0x40   :  { %1095 = vmatpush3.bf16.msra.mxu0 %v1198_v14 }
  0x41   :  { %1123 = vmatpush3.bf16.msra.mxu1 %v1199_v15 }
  0x43   :  { %767 = vmatmul.mubr.bf16.vlgmr.msra.gmra.mxu0 %v928_v20 }
  0x44   :  { %816 = vmatmul.mubr.bf16.vlgmr.msra.gmra.mxu1 %v930_v22  ;;  %774 = vmatprep.mubr.bf16.mxu0 %v937_v27 }
  0x45   :  { %823 = vmatprep.mubr.bf16.mxu1 %v939_v29 }
  0x4b   :  { %775 = vmatmul.mubr.bf16.gmra.mxu0 %v936_v30 }
  0x4c   :  { %824 = vmatmul.mubr.bf16.gmra.mxu1 %v938_v31 }
  0xe3   :  { %v1040_v32 = vpop.f32.mrf.mxu0 }
  0xe4   :  { %v1068_v33 = vpop.f32.mrf.mxu1 }
  0xe5   :  { %v1041_v34 = vpop.f32.mrf.mxu0 }
  0xe6   :  { %v1069_v35 = vpop.f32.mrf.mxu1  ;;  %v1042_v46 = vadd.f32 %v1041_v34, %v1040_v32 }
  0xe7   :  { %v1043_v36 = vpop.f32.mrf.mxu0  ;;  %v1070_v54 = vadd.f32 %v1069_v35, %v1068_v33 }
  0xe8   :  { %v1071_v37 = vpop.f32.mrf.mxu1  ;;  %v671_v53 = vadd.f32 %v1042_v46, %v923_v49 }
  0xe9   :  { %v1044_v38 = vpop.f32.mrf.mxu0 }
  0xea   :  { %v1072_v39 = vpop.f32.mrf.mxu1  ;;  %v1045_v50 = vadd.f32 %v1044_v38, %v1043_v36  ;;  %v720_v63 = vadd.f32 %v1070_v54, %v671_v53 }
  0xeb   :  { %v1046_v40 = vpop.f32.mrf.mxu0  ;;  %v1073_v62 = vadd.f32 %v1072_v39, %v1071_v37 }
  0xec   :  { %v1074_v41 = vpop.f32.mrf.mxu1  ;;  %v674_v58 = vadd.f32 %v1045_v50, %v923_v49 }
  0xed   :  { %v1047_v42 = vpop.f32.mrf.mxu0 }
  0xee   :  { %v1075_v43 = vpop.f32.mrf.mxu1  ;;  %v1048_v55 = vadd.f32 %v1047_v42, %v1046_v40  ;;  %v723_v4 = vadd.f32 %v1073_v62, %v674_v58  ;;  %v858_v62 = vld [vmem:[%s1490_s3] sm:$0x1] }
  0xef   :  { %v1049_v44 = vpop.f32.mrf.mxu0  ;;  %v1076_v1 = vadd.f32 %v1075_v43, %v1074_v41 }
  0xf0   :  { %v1077_v45 = vpop.f32.mrf.mxu1  ;;  %v679_v0 = vadd.f32 %v1048_v55, %v923_v49 }
  0xf1   :  { %v1050_v47 = vpop.f32.mrf.mxu0 }
  0xf2   :  { %v1078_v48 = vpop.f32.mrf.mxu1  ;;  %v1051_v5 = vadd.f32 %v1050_v47, %v1049_v44  ;;  %v728_v12 = vadd.f32 %v1076_v1, %v679_v0 }
  0xf3   :  { %v1079_v17 = vadd.f32 %v1078_v48, %v1077_v45 }
  0xf4   :  { %v682_v16 = vadd.f32 %v1051_v5, %v923_v49 }
  0xf6   :  { %v731_v27 = vadd.f32 %v1079_v17, %v682_v16 }
 0x103   :  { %v1096_v51 = vpop.f32.mrf.mxu0 }
 0x104   :  { %v1124_v52 = vpop.f32.mrf.mxu1 }
 0x105   :  { %v1097_v56 = vpop.f32.mrf.mxu0 }
 0x106   :  { %v1125_v57 = vpop.f32.mrf.mxu1  ;;  %v1098_v59 = vadd.f32 %v1097_v56, %v1096_v51 }
 0x107   :  { %v1099_v60 = vpop.f32.mrf.mxu0  ;;  %v1126_v13 = vadd.f32 %v1125_v57, %v1124_v52 }
 0x108   :  { %v1127_v61 = vpop.f32.mrf.mxu1  ;;  %v769_v7 = vadd.f32 %v1098_v59, %v720_v63 }
 0x109   :  { %v1100_v2 = vpop.f32.mrf.mxu0 }
 0x10a   :  { %v1128_v3 = vpop.f32.mrf.mxu1  ;;  %v1101_v6 = vadd.f32 %v1100_v2, %v1099_v60  ;;  %v818_v20 = vadd.f32 %v1126_v13, %v769_v7  ;;  %v867_v60 = vlaneseq  ;;  %v1004_v7 = vld [vmem:[%s1491_s4] ss:$0 sm:$0xff] }
 0x10b   :  { %v1102_v8 = vpop.f32.mrf.mxu0  ;;  %v1129_v11 = vadd.f32 %v1128_v3, %v1127_v61 }
 0x10c   :  { %v1130_v9 = vpop.f32.mrf.mxu1  ;;  %v772_v10 = vadd.f32 %v1101_v6, %v723_v4  ;;  %v842_v31 = vmul.f32 %v818_v20, %v818_v20  ;;  %v868_v61 = vshrl.u32 %v867_v60, 7 }
 0x10d   :  { %v1103_v14 = vpop.f32.mrf.mxu0 }
 0x10e   :  { %v1131_v15 = vpop.f32.mrf.mxu1  ;;  %v821_v18 = vadd.f32 %v1129_v11, %v772_v10  ;;  %v1104_v19 = vadd.f32 %v1103_v14, %v1102_v8  ;;  %v869_v63 = vsub.s32 0, %v868_v61 }
 0x10f   :  { %v1105_v21 = vpop.f32.mrf.mxu0  ;;  %v1132_v24 = vadd.f32 %v1131_v15, %v1130_v9 }
 0x110   :  { %v1133_v22 = vpop.f32.mrf.mxu1  ;;  %v777_v23 = vadd.f32 %v1104_v19, %v728_v12  ;;  %v843_v28 = vmul.f32 %v821_v18, %v821_v18  ;;  %v832_v32 = vadd.f32 %v821_v18, %v818_v20 }
 0x111   :  { %v1106_v25 = vpop.f32.mrf.mxu0 }
 0x112   :  { %v1134_v26 = vpop.f32.mrf.mxu1  ;;  %v826_v29 = vadd.f32 %v1132_v24, %v777_v23  ;;  %v1107_v30 = vadd.f32 %v1106_v25, %v1105_v21  ;;  %v846_v36 = vadd.f32 %v843_v28, %v842_v31 }
 0x113   :  { %v1135_v35 = vadd.f32 %v1134_v26, %v1133_v22 }
 0x114   :  { %v844_v33 = vmul.f32 %v826_v29, %v826_v29  ;;  %v780_v34 = vadd.f32 %v1107_v30, %v731_v27  ;;  %v833_v37 = vadd.f32 %v832_v32, %v826_v29 }
 0x116   :  { %v829_v38 = vadd.f32 %v1135_v35, %v780_v34  ;;  %v847_v39 = vadd.f32 %v846_v36, %v844_v33 }
 0x118   :  { %v834_v40 = vadd.f32 %v833_v37, %v829_v38  ;;  %v845_v41 = vmul.f32 %v829_v38, %v829_v38 }
 0x11a   :  { %v835_v42 = vrot.slane %v834_v40, 4  ;;  %v848_v43 = vadd.f32 %v847_v39, %v845_v41 }
 0x11c   :  { %v836_v44 = vadd.f32 %v835_v42, %v834_v40  ;;  %v849_v45 = vrot.slane %v848_v43, 4 }
 0x11e   :  { %v837_v46 = vrot.slane %v836_v44, 2  ;;  %v850_v47 = vadd.f32 %v849_v45, %v848_v43 }
 0x120   :  { %v838_v48 = vadd.f32 %v837_v46, %v836_v44  ;;  %v851_v49 = vrot.slane %v850_v47, 2 }
 0x122   :  { %v839_v50 = vrot.slane %v838_v48, 1  ;;  %v852_v51 = vadd.f32 %v851_v49, %v850_v47 }
 0x124   :  { %v840_v52 = vadd.f32 %v839_v50, %v838_v48  ;;  %v853_v53 = vrot.slane %v852_v51, 1 }
 0x126   :  { %v841_v54 = vmul.f32 0.03125, %v840_v52  ;;  %v854_v55 = vadd.f32 %v853_v53, %v852_v51 }
 0x128   :  { %v855_v56 = vmul.f32 0.03125, %v854_v55  ;;  %v856_v57 = vmul.f32 %v841_v54, %v841_v54  ;;  %v862_v2 = vsub.f32 %v818_v20, %v841_v54  ;;  %v863_v3 = vsub.f32 %v821_v18, %v841_v54 }
 0x129   :  { %v864_v4 = vsub.f32 %v826_v29, %v841_v54  ;;  %v865_v5 = vsub.f32 %v829_v38, %v841_v54 }
 0x12a   :  { %v857_v58 = vsub.f32 %v855_v56, %v856_v57 }
 0x12c   :  { %v859_v59 = vadd.f32 1e-05, %v857_v58 }
 0x12e   :  { %1200 = vrsqrt.f32 %v859_v59 }
 0x13b   :  { %v1201_v0 = vpop.eup %1200 }
 0x13c   :  { %v861_v1 = vmul.f32 %v1201_v0, %v858_v62 }
 0x13e   :  { %v870_v6 = vrot.slane %v861_v1, %v869_v63 }
 0x140   :  { %v872_v8 = vmul.f32 %v870_v6, %v862_v2  ;;  %v873_v9 = vmul.f32 %v870_v6, %v863_v3  ;;  %v874_v10 = vmul.f32 %v870_v6, %v864_v4  ;;  %v875_v11 = vmul.f32 %v870_v6, %v865_v5 }
 0x142   :  { %v883_v12 = vadd.f32 %v1004_v7, %v872_v8  ;;  %v884_v13 = vadd.f32 %v1004_v7, %v873_v9  ;;  %v885_v14 = vadd.f32 %v1004_v7, %v874_v10  ;;  %v886_v15 = vadd.f32 %v1004_v7, %v875_v11 }
 0x144   :  { %vm887_vm0 = vcmp.ge.f32.partialorder %v883_v12, 0.0  ;;  %vm888_vm1 = vcmp.ge.f32.partialorder %v884_v13, 0.0  ;;  %vm889_vm2 = vcmp.ge.f32.partialorder %v885_v14, 0.0  ;;  %vm890_vm3 = vcmp.ge.f32.partialorder %v886_v15, 0.0 }
 0x145   :  { %v891_v16 = vmul.f32 0.2, %v883_v12  ;;  %v892_v17 = vmul.f32 0.2, %v884_v13  ;;  %v893_v18 = vmul.f32 0.2, %v885_v14 }
 0x146   :  { %v894_v19 = vmul.f32 0.2, %v886_v15 }
 0x147   :  { %v895_v20 = vsel %vm887_vm0, %v883_v12, %v891_v16  ;;  %v896_v21 = vsel %vm888_vm1, %v884_v13, %v892_v17  ;;  %v897_v22 = vsel %vm889_vm2, %v885_v14, %v893_v18 }
 0x148   :  { %v898_v23 = vsel %vm890_vm3, %v886_v15, %v894_v19  ;;  %v1016_v24 = vpack.c.bf16 %v896_v21, %v895_v20 }
 0x149   :  { %v1021_v25 = vpack.c.bf16 %v898_v23, %v897_v22 }
 0x14a   :  { %1017 = vst [vmem:[%s1492_s5] sm:$0xff] %v1016_v24  }
 0x14b   :  { %1023 = vst [vmem:[%s1492_s5 + $0x8] sm:$0xff] %v1021_v25  }

// kernel: discriminator_forward.9
= control target key start
LH: loop header
LB: loop body
LE: loop exit
PB: predicated region body
PF: predicated region fallthrough
CT: control target
= control target key end

     0   :  { %s2348_s1 = inlined_call_operand.vmem [shape: bf16[2048,128], index: 1, kind: input, shape index: {}]   ;;  %s2349_s0 = inlined_call_operand.vmem [shape: bf16[8,2048], index: 0, kind: input, shape index: {}]   ;;  %s2350_s2 = inlined_call_operand.vmem [shape: f32[1,128], index: 2, kind: input, shape index: {}]   ;;  %s2351_s3 = inlined_call_operand.vmem [shape: f32[8,128], index: 3, kind: output, shape index: {}]  }
   0x1   :  { %v1766_v0 = vld [vmem:[%s2348_s1 + $0x78] sm:$0xff]   ;;  %v1770_v4 = vld [vmem:[%s2348_s1 + $0x70] sm:$0xff]   ;;  %v1774_v8 = vld [vmem:[%s2348_s1 + $0x68] sm:$0xff]  }
   0x2   :  { %v1767_v1 = vld [vmem:[%s2348_s1 + $0xf8] sm:$0xff]   ;;  %1590 = vmatprep.subr.bf16.mxu0 %v1766_v0  ;;  %v1771_v5 = vld [vmem:[%s2348_s1 + $0xf0] sm:$0xff]   ;;  %v1775_v9 = vld [vmem:[%s2348_s1 + $0xe8] sm:$0xff]  }
   0x3   :  { %v1768_v2 = vld [vmem:[%s2348_s1 + $0x38] sm:$0xff]   ;;  %1612 = vmatprep.subr.bf16.mxu1 %v1767_v1  ;;  %v1772_v6 = vld [vmem:[%s2348_s1 + $0x30] sm:$0xff]   ;;  %v1776_v10 = vld [vmem:[%s2348_s1 + $0x28] sm:$0xff]  }
   0x4   :  { %v1769_v3 = vld [vmem:[%s2348_s1 + $0xb8] sm:$0xff]   ;;  %1591 = vmatpush3.bf16.msra.mxu0 %v1768_v2  ;;  %v1773_v7 = vld [vmem:[%s2348_s1 + $0xb0] sm:$0xff]   ;;  %v1777_v11 = vld [vmem:[%s2348_s1 + $0xa8] sm:$0xff]  }
   0x5   :  { %1613 = vmatpush3.bf16.msra.mxu1 %v1769_v3  ;;  %1592 = vmatprep.subr.bf16.mxu0 %v1770_v4  ;;  %v1778_v12 = vld [vmem:[%s2348_s1 + $0x60] sm:$0xff]   ;;  %v1782_v16 = vld [vmem:[%s2348_s1 + $0x58] sm:$0xff]   ;;  %v1786_v20 = vld [vmem:[%s2348_s1 + $0x50] sm:$0xff]  }
   0x6   :  { %1614 = vmatprep.subr.bf16.mxu1 %v1771_v5  ;;  %v1779_v13 = vld [vmem:[%s2348_s1 + $0xe0] sm:$0xff]   ;;  %v1783_v17 = vld [vmem:[%s2348_s1 + $0xd8] sm:$0xff]   ;;  %v1787_v21 = vld [vmem:[%s2348_s1 + $0xd0] sm:$0xff]  }
   0x7   :  { %v1780_v14 = vld [vmem:[%s2348_s1 + $0x20] sm:$0xff]   ;;  %v1784_v18 = vld [vmem:[%s2348_s1 + $0x18] sm:$0xff]   ;;  %v1788_v22 = vld [vmem:[%s2348_s1 + $0x10] sm:$0xff]  }
   0x8   :  { %1593 = vmatpush3.bf16.msra.mxu0 %v1772_v6  ;;  %v1781_v15 = vld [vmem:[%s2348_s1 + $0xa0] sm:$0xff]   ;;  %v1785_v19 = vld [vmem:[%s2348_s1 + $0x98] sm:$0xff]   ;;  %v1789_v23 = vld [vmem:[%s2348_s1 + $0x90] sm:$0xff]  }
   0x9   :  { %1615 = vmatpush3.bf16.msra.mxu1 %v1773_v7  ;;  %1594 = vmatprep.subr.bf16.mxu0 %v1774_v8  ;;  %v1790_v24 = vld [vmem:[%s2348_s1 + $0x48] sm:$0xff]   ;;  %v1794_v28 = vld [vmem:[%s2348_s1 + $0x40] sm:$0xff]   ;;  %v1802_v38 = vld [vmem:[%s2348_s1 + $0x178] sm:$0xff]  }
   0xa   :  { %1616 = vmatprep.subr.bf16.mxu1 %v1775_v9  ;;  %v1791_v25 = vld [vmem:[%s2348_s1 + $0xc8] sm:$0xff]   ;;  %v1795_v29 = vld [vmem:[%s2348_s1 + $0xc0] sm:$0xff]   ;;  %v1803_v39 = vld [vmem:[%s2348_s1 + $0x1f8] sm:$0xff]  }
   0xb   :  { %v1792_v26 = vld [vmem:[%s2348_s1 + $0x8] sm:$0xff]   ;;  %v1796_v30 = vld [vmem:[%s2348_s1] sm:$0xff]   ;;  %v1804_v40 = vld [vmem:[%s2348_s1 + $0x138] sm:$0xff]  }
   0xc   :  { %1595 = vmatpush3.bf16.msra.mxu0 %v1776_v10  ;;  %v1793_v27 = vld [vmem:[%s2348_s1 + $0x88] sm:$0xff]   ;;  %v1797_v31 = vld [vmem:[%s2348_s1 + $0x80] sm:$0xff]   ;;  %v1805_v41 = vld [vmem:[%s2348_s1 + $0x1b8] sm:$0xff]  }
   0xd   :  { %1617 = vmatpush3.bf16.msra.mxu1 %v1777_v11  ;;  %1596 = vmatprep.subr.bf16.mxu0 %v1778_v12  ;;  %v15_v32 = vld [vmem:[%s2349_s0] sm:$0xff]  ;;  %v16_v33 = vld [vmem:[%s2349_s0 + $0x8] sm:$0xff]  ;;  %v1806_v42 = vld [vmem:[%s2348_s1 + $0x170] sm:$0xff]  }
   0xe   :  { %1618 = vmatprep.subr.bf16.mxu1 %v1779_v13  ;;  %v1446_v34 = vcombine.low %v15_v32, %v15_v32  ;;  %v1447_v35 = vcombine.high %v15_v32, %v15_v32  ;;  %v1448_v36 = vcombine.low %v16_v33, %v16_v33  ;;  %v1449_v37 = vcombine.high %v16_v33, %v16_v33  ;;  %v1807_v43 = vld [vmem:[%s2348_s1 + $0x1f0] sm:$0xff]   ;;  %v1810_v46 = vld [vmem:[%s2348_s1 + $0x168] sm:$0xff]   ;;  %v1814_v50 = vld [vmem:[%s2348_s1 + $0x160] sm:$0xff]  }
   0xf   :  { %v1808_v44 = vld [vmem:[%s2348_s1 + $0x130] sm:$0xff]   ;;  %v1811_v47 = vld [vmem:[%s2348_s1 + $0x1e8] sm:$0xff]   ;;  %v1815_v51 = vld [vmem:[%s2348_s1 + $0x1e0] sm:$0xff]  }
  0x10   :  { %1597 = vmatpush3.bf16.msra.mxu0 %v1780_v14  ;;  %1142 = vmatprep.mubr.bf16.mxu0 %v1447_v35  ;;  %v1809_v45 = vld [vmem:[%s2348_s1 + $0x1b0] sm:$0xff]   ;;  %v1812_v48 = vld [vmem:[%s2348_s1 + $0x128] sm:$0xff]   ;;  %v1816_v52 = vld [vmem:[%s2348_s1 + $0x120] sm:$0xff]  }
  0x11   :  { %1619 = vmatpush3.bf16.msra.mxu1 %v1781_v15  ;;  %1598 = vmatprep.subr.bf16.mxu0 %v1782_v16  ;;  %v1813_v49 = vld [vmem:[%s2348_s1 + $0x1a8] sm:$0xff]   ;;  %v1817_v53 = vld [vmem:[%s2348_s1 + $0x1a0] sm:$0xff]   ;;  %v1818_v54 = vld [vmem:[%s2348_s1 + $0x158] sm:$0xff]  }
  0x12   :  { %1620 = vmatprep.subr.bf16.mxu1 %v1783_v17  ;;  %1182 = vmatprep.mubr.bf16.mxu1 %v1449_v37  ;;  %v1819_v55 = vld [vmem:[%s2348_s1 + $0x1d8] sm:$0xff]   ;;  %v1822_v58 = vld [vmem:[%s2348_s1 + $0x150] sm:$0xff]   ;;  %v1826_v62 = vld [vmem:[%s2348_s1 + $0x148] sm:$0xff]  }
  0x13   :  { %v1820_v56 = vld [vmem:[%s2348_s1 + $0x118] sm:$0xff]   ;;  %v1823_v59 = vld [vmem:[%s2348_s1 + $0x1d0] sm:$0xff]   ;;  %v1827_v63 = vld [vmem:[%s2348_s1 + $0x1c8] sm:$0xff]  }
  0x14   :  { %1599 = vmatpush3.bf16.msra.mxu0 %v1784_v18  ;;  %v1821_v57 = vld [vmem:[%s2348_s1 + $0x198] sm:$0xff]   ;;  %v1824_v60 = vld [vmem:[%s2348_s1 + $0x110] sm:$0xff]   ;;  %v1828_v0 = vld [vmem:[%s2348_s1 + $0x108] sm:$0xff]  }
  0x15   :  { %1621 = vmatpush3.bf16.msra.mxu1 %v1785_v19  ;;  %1600 = vmatprep.subr.bf16.mxu0 %v1786_v20  ;;  %v1825_v61 = vld [vmem:[%s2348_s1 + $0x190] sm:$0xff]   ;;  %v1829_v1 = vld [vmem:[%s2348_s1 + $0x188] sm:$0xff]   ;;  %v1830_v2 = vld [vmem:[%s2348_s1 + $0x140] sm:$0xff]  }
  0x16   :  { %1622 = vmatprep.subr.bf16.mxu1 %v1787_v21  ;;  %v1831_v3 = vld [vmem:[%s2348_s1 + $0x1c0] sm:$0xff]   ;;  %v17_v6 = vld [vmem:[%s2349_s0 + $0x10] sm:$0xff]  ;;  %v18_v9 = vld [vmem:[%s2349_s0 + $0x18] sm:$0xff] }
  0x17   :  { %v1832_v4 = vld [vmem:[%s2348_s1 + $0x100] sm:$0xff]   ;;  %v1450_v7 = vcombine.low %v17_v6, %v17_v6  ;;  %v1451_v8 = vcombine.high %v17_v6, %v17_v6  ;;  %v1452_v10 = vcombine.low %v18_v9, %v18_v9  ;;  %v1453_v11 = vcombine.high %v18_v9, %v18_v9  ;;  %v1838_v12 = vld [vmem:[%s2348_s1 + $0x278] sm:$0xff]   ;;  %v1842_v16 = vld [vmem:[%s2348_s1 + $0x270] sm:$0xff]  }
  0x18   :  { %1601 = vmatpush3.bf16.msra.mxu0 %v1788_v22  ;;  %v1833_v5 = vld [vmem:[%s2348_s1 + $0x180] sm:$0xff]   ;;  %v1839_v13 = vld [vmem:[%s2348_s1 + $0x2f8] sm:$0xff]   ;;  %v1843_v17 = vld [vmem:[%s2348_s1 + $0x2f0] sm:$0xff]  }
  0x19   :  { %1623 = vmatpush3.bf16.msra.mxu1 %v1789_v23  ;;  %1602 = vmatprep.subr.bf16.mxu0 %v1790_v24  ;;  %v1840_v14 = vld [vmem:[%s2348_s1 + $0x238] sm:$0xff]   ;;  %v1844_v18 = vld [vmem:[%s2348_s1 + $0x230] sm:$0xff]   ;;  %v1846_v20 = vld [vmem:[%s2348_s1 + $0x268] sm:$0xff]  }
  0x1a   :  { %1624 = vmatprep.subr.bf16.mxu1 %v1791_v25  ;;  %v1841_v15 = vld [vmem:[%s2348_s1 + $0x2b8] sm:$0xff]   ;;  %v1845_v19 = vld [vmem:[%s2348_s1 + $0x2b0] sm:$0xff]   ;;  %v1847_v21 = vld [vmem:[%s2348_s1 + $0x2e8] sm:$0xff]  }
  0x1b   :  { %v1848_v22 = vld [vmem:[%s2348_s1 + $0x228] sm:$0xff]   ;;  %v1850_v24 = vld [vmem:[%s2348_s1 + $0x260] sm:$0xff]   ;;  %v1858_v32 = vld [vmem:[%s2348_s1 + $0x250] sm:$0xff]  }
  0x1c   :  { %1603 = vmatpush3.bf16.msra.mxu0 %v1792_v26  ;;  %v1849_v23 = vld [vmem:[%s2348_s1 + $0x2a8] sm:$0xff]   ;;  %v1851_v25 = vld [vmem:[%s2348_s1 + $0x2e0] sm:$0xff]   ;;  %v1859_v33 = vld [vmem:[%s2348_s1 + $0x2d0] sm:$0xff]  }
  0x1d   :  { %1625 = vmatpush3.bf16.msra.mxu1 %v1793_v27  ;;  %1604 = vmatprep.subr.bf16.mxu0 %v1794_v28  ;;  %v1852_v26 = vld [vmem:[%s2348_s1 + $0x220] sm:$0xff]   ;;  %v1854_v28 = vld [vmem:[%s2348_s1 + $0x258] sm:$0xff]   ;;  %v1861_v35 = vld [vmem:[%s2348_s1 + $0x290] sm:$0xff]  }
  0x1e   :  { %1626 = vmatprep.subr.bf16.mxu1 %v1795_v29  ;;  %v1853_v27 = vld [vmem:[%s2348_s1 + $0x2a0] sm:$0xff]   ;;  %v1855_v29 = vld [vmem:[%s2348_s1 + $0x2d8] sm:$0xff]   ;;  %v1863_v37 = vld [vmem:[%s2348_s1 + $0x2c8] sm:$0xff]  }
  0x1f   :  { %v1894_v6 = vld [vmem:[%s2348_s1 + $0x350] sm:$0xff]  }
  0x20   :  { %1605 = vmatpush3.bf16.msra.mxu0 %v1796_v30  ;;  %v1856_v30 = vld [vmem:[%s2348_s1 + $0x218] sm:$0xff]   ;;  %v1897_v9 = vld [vmem:[%s2348_s1 + $0x390] sm:$0xff]  }
  0x21   :  { %1627 = vmatpush3.bf16.msra.mxu1 %v1797_v31  ;;  %1634 = vmatprep.subr.bf16.mxu0 %v1802_v38  ;;  %v1857_v31 = vld [vmem:[%s2348_s1 + $0x298] sm:$0xff]   ;;  %v1864_v38 = vld [vmem:[%s2348_s1 + $0x208] sm:$0xff]  }
  0x22   :  { %1656 = vmatprep.subr.bf16.mxu1 %v1803_v39  ;;  %v1865_v39 = vld [vmem:[%s2348_s1 + $0x288] sm:$0xff]  }
  0x23   :  { %1143 = vmatmul.mubr.bf16.vlgmr.msra.gmra.mxu0 %v1446_v34  ;;  %v1860_v34 = vld [vmem:[%s2348_s1 + $0x210] sm:$0xff]  }
  0x24   :  { %1183 = vmatmul.mubr.bf16.vlgmr.msra.gmra.mxu1 %v1448_v36  ;;  %1635 = vmatpush3.bf16.msra.mxu0 %v1804_v40  ;;  %v1862_v36 = vld [vmem:[%s2348_s1 + $0x248] sm:$0xff]   ;;  %v1866_v40 = vld [vmem:[%s2348_s1 + $0x240] sm:$0xff]  }
  0x25   :  { %1657 = vmatpush3.bf16.msra.mxu1 %v1805_v41  ;;  %1636 = vmatprep.subr.bf16.mxu0 %v1806_v42  ;;  %v1867_v41 = vld [vmem:[%s2348_s1 + $0x2c0] sm:$0xff]  }
  0x26   :  { %1658 = vmatprep.subr.bf16.mxu1 %v1807_v43  ;;  %1222 = vmatprep.mubr.bf16.mxu0 %v1451_v8  ;;  %v1868_v42 = vld [vmem:[%s2348_s1 + $0x200] sm:$0xff]   ;;  %v1896_v8 = vld [vmem:[%s2348_s1 + $0x310] sm:$0xff]  }
  0x27   :  { %1262 = vmatprep.mubr.bf16.mxu1 %v1453_v11  ;;  %v1869_v43 = vld [vmem:[%s2348_s1 + $0x280] sm:$0xff]   ;;  %v1899_v11 = vld [vmem:[%s2348_s1 + $0x3c8] sm:$0xff]  }
  0x28   :  { %1637 = vmatpush3.bf16.msra.mxu0 %v1808_v44  ;;  %v19_v44 = vld [vmem:[%s2349_s0 + $0x20] sm:$0xff] }
  0x29   :  { %1659 = vmatpush3.bf16.msra.mxu1 %v1809_v45  ;;  %1638 = vmatprep.subr.bf16.mxu0 %v1810_v46  ;;  %v20_v45 = vld [vmem:[%s2349_s0 + $0x28] sm:$0xff]  ;;  %v1454_v46 = vcombine.low %v19_v44, %v19_v44 }
  0x2a   :  { %1660 = vmatprep.subr.bf16.mxu1 %v1811_v47  ;;  %v1455_v47 = vcombine.high %v19_v44, %v19_v44 }
  0x2c   :  { %1639 = vmatpush3.bf16.msra.mxu0 %v1812_v48  ;;  %v1456_v48 = vcombine.low %v20_v45, %v20_v45 }
  0x2d   :  { %1661 = vmatpush3.bf16.msra.mxu1 %v1813_v49  ;;  %1640 = vmatprep.subr.bf16.mxu0 %v1814_v50  ;;  %v1457_v49 = vcombine.high %v20_v45, %v20_v45  ;;  %v1874_v50 = vld [vmem:[%s2348_s1 + $0x378] sm:$0xff]  }
  0x2e   :  { %1662 = vmatprep.subr.bf16.mxu1 %v1815_v51  ;;  %v1875_v51 = vld [vmem:[%s2348_s1 + $0x3f8] sm:$0xff]  }
  0x30   :  { %1641 = vmatpush3.bf16.msra.mxu0 %v1816_v52  ;;  %v1876_v52 = vld [vmem:[%s2348_s1 + $0x338] sm:$0xff]  }
  0x31   :  { %1663 = vmatpush3.bf16.msra.mxu1 %v1817_v53  ;;  %1642 = vmatprep.subr.bf16.mxu0 %v1818_v54  ;;  %v1877_v53 = vld [vmem:[%s2348_s1 + $0x3b8] sm:$0xff]   ;;  %v1878_v54 = vld [vmem:[%s2348_s1 + $0x370] sm:$0xff]  }
  0x32   :  { %1664 = vmatprep.subr.bf16.mxu1 %v1819_v55  ;;  %v1879_v55 = vld [vmem:[%s2348_s1 + $0x3f0] sm:$0xff]  }
  0x34   :  { %1643 = vmatpush3.bf16.msra.mxu0 %v1820_v56  ;;  %v1880_v56 = vld [vmem:[%s2348_s1 + $0x330] sm:$0xff]  }
  0x35   :  { %1665 = vmatpush3.bf16.msra.mxu1 %v1821_v57  ;;  %1644 = vmatprep.subr.bf16.mxu0 %v1822_v58  ;;  %v1881_v57 = vld [vmem:[%s2348_s1 + $0x3b0] sm:$0xff]   ;;  %v1882_v58 = vld [vmem:[%s2348_s1 + $0x368] sm:$0xff]  }
  0x36   :  { %1666 = vmatprep.subr.bf16.mxu1 %v1823_v59  ;;  %v1883_v59 = vld [vmem:[%s2348_s1 + $0x3e8] sm:$0xff]  }
  0x38   :  { %1645 = vmatpush3.bf16.msra.mxu0 %v1824_v60  ;;  %v1884_v60 = vld [vmem:[%s2348_s1 + $0x328] sm:$0xff]  }
  0x39   :  { %1667 = vmatpush3.bf16.msra.mxu1 %v1825_v61  ;;  %1646 = vmatprep.subr.bf16.mxu0 %v1826_v62  ;;  %v1885_v61 = vld [vmem:[%s2348_s1 + $0x3a8] sm:$0xff]   ;;  %v1886_v62 = vld [vmem:[%s2348_s1 + $0x360] sm:$0xff]  }
  0x3a   :  { %1668 = vmatprep.subr.bf16.mxu1 %v1827_v63  ;;  %v1887_v63 = vld [vmem:[%s2348_s1 + $0x3e0] sm:$0xff]  }
  0x3c   :  { %1647 = vmatpush3.bf16.msra.mxu0 %v1828_v0  ;;  %v1888_v0 = vld [vmem:[%s2348_s1 + $0x320] sm:$0xff]  }
  0x3d   :  { %1669 = vmatpush3.bf16.msra.mxu1 %v1829_v1  ;;  %1648 = vmatprep.subr.bf16.mxu0 %v1830_v2  ;;  %v1889_v1 = vld [vmem:[%s2348_s1 + $0x3a0] sm:$0xff]   ;;  %v1890_v2 = vld [vmem:[%s2348_s1 + $0x358] sm:$0xff]  }
  0x3e   :  { %1670 = vmatprep.subr.bf16.mxu1 %v1831_v3  ;;  %v1891_v3 = vld [vmem:[%s2348_s1 + $0x3d8] sm:$0xff]  }
  0x40   :  { %1649 = vmatpush3.bf16.msra.mxu0 %v1832_v4  ;;  %v1892_v4 = vld [vmem:[%s2348_s1 + $0x318] sm:$0xff]  }
  0x41   :  { %1671 = vmatpush3.bf16.msra.mxu1 %v1833_v5  ;;  %1678 = vmatprep.subr.bf16.mxu0 %v1838_v12  ;;  %v1893_v5 = vld [vmem:[%s2348_s1 + $0x398] sm:$0xff]   ;;  %v1900_v12 = vld [vmem:[%s2348_s1 + $0x308] sm:$0xff]  }
  0x42   :  { %1700 = vmatprep.subr.bf16.mxu1 %v1839_v13  ;;  %v1901_v13 = vld [vmem:[%s2348_s1 + $0x388] sm:$0xff]  }
  0x43   :  { %1223 = vmatmul.mubr.bf16.vlgmr.msra.gmra.mxu0 %v1450_v7  ;;  %v1895_v7 = vld [vmem:[%s2348_s1 + $0x3d0] sm:$0xff]  }
  0x44   :  { %1263 = vmatmul.mubr.bf16.vlgmr.msra.gmra.mxu1 %v1452_v10  ;;  %1679 = vmatpush3.bf16.msra.mxu0 %v1840_v14  ;;  %v1898_v10 = vld [vmem:[%s2348_s1 + $0x348] sm:$0xff]   ;;  %v1902_v14 = vld [vmem:[%s2348_s1 + $0x340] sm:$0xff]  }
  0x45   :  { %1701 = vmatpush3.bf16.msra.mxu1 %v1841_v15  ;;  %1680 = vmatprep.subr.bf16.mxu0 %v1842_v16  ;;  %v1903_v15 = vld [vmem:[%s2348_s1 + $0x3c0] sm:$0xff]  }
  0x46   :  { %1702 = vmatprep.subr.bf16.mxu1 %v1843_v17  ;;  %1302 = vmatprep.mubr.bf16.mxu0 %v1455_v47  ;;  %v1904_v16 = vld [vmem:[%s2348_s1 + $0x300] sm:$0xff]  }
  0x47   :  { %1342 = vmatprep.mubr.bf16.mxu1 %v1457_v49  ;;  %v1905_v17 = vld [vmem:[%s2348_s1 + $0x380] sm:$0xff]  }
  0x48   :  { %1681 = vmatpush3.bf16.msra.mxu0 %v1844_v18  ;;  %v21_v18 = vld [vmem:[%s2349_s0 + $0x30] sm:$0xff] }
  0x49   :  { %1703 = vmatpush3.bf16.msra.mxu1 %v1845_v19  ;;  %1682 = vmatprep.subr.bf16.mxu0 %v1846_v20  ;;  %v22_v19 = vld [vmem:[%s2349_s0 + $0x38] sm:$0xff]  ;;  %v1458_v20 = vcombine.low %v21_v18, %v21_v18 }
  0x4a   :  { %1704 = vmatprep.subr.bf16.mxu1 %v1847_v21  ;;  %v1459_v21 = vcombine.high %v21_v18, %v21_v18 }
  0x4c   :  { %1683 = vmatpush3.bf16.msra.mxu0 %v1848_v22  ;;  %v1460_v22 = vcombine.low %v22_v19, %v22_v19 }
  0x4d   :  { %1705 = vmatpush3.bf16.msra.mxu1 %v1849_v23  ;;  %1684 = vmatprep.subr.bf16.mxu0 %v1850_v24  ;;  %v1461_v23 = vcombine.high %v22_v19, %v22_v19 }
  0x4e   :  { %1706 = vmatprep.subr.bf16.mxu1 %v1851_v25 }
  0x50   :  { %1685 = vmatpush3.bf16.msra.mxu0 %v1852_v26  ;;  %v1445_v26 = vld [vmem:[%s2350_s2] ss:$0 sm:$0xff] }
  0x51   :  { %1707 = vmatpush3.bf16.msra.mxu1 %v1853_v27  ;;  %1686 = vmatprep.subr.bf16.mxu0 %v1854_v28 }
  0x52   :  { %1708 = vmatprep.subr.bf16.mxu1 %v1855_v29 }
  0x54   :  { %1687 = vmatpush3.bf16.msra.mxu0 %v1856_v30 }
  0x55   :  { %1709 = vmatpush3.bf16.msra.mxu1 %v1857_v31  ;;  %1688 = vmatprep.subr.bf16.mxu0 %v1858_v32 }
  0x56   :  { %1710 = vmatprep.subr.bf16.mxu1 %v1859_v33 }
  0x58   :  { %1689 = vmatpush3.bf16.msra.mxu0 %v1860_v34 }
  0x59   :  { %1711 = vmatpush3.bf16.msra.mxu1 %v1861_v35  ;;  %1690 = vmatprep.subr.bf16.mxu0 %v1862_v36 }
  0x5a   :  { %1712 = vmatprep.subr.bf16.mxu1 %v1863_v37 }
  0x5c   :  { %1691 = vmatpush3.bf16.msra.mxu0 %v1864_v38 }
  0x5d   :  { %1713 = vmatpush3.bf16.msra.mxu1 %v1865_v39  ;;  %1692 = vmatprep.subr.bf16.mxu0 %v1866_v40 }
  0x5e   :  { %1714 = vmatprep.subr.bf16.mxu1 %v1867_v41 }
  0x60   :  { %1693 = vmatpush3.bf16.msra.mxu0 %v1868_v42 }
  0x61   :  { %1715 = vmatpush3.bf16.msra.mxu1 %v1869_v43  ;;  %1722 = vmatprep.subr.bf16.mxu0 %v1874_v50 }
  0x62   :  { %1744 = vmatprep.subr.bf16.mxu1 %v1875_v51 }
  0x63   :  { %1303 = vmatmul.mubr.bf16.vlgmr.msra.gmra.mxu0 %v1454_v46 }
  0x64   :  { %1343 = vmatmul.mubr.bf16.vlgmr.msra.gmra.mxu1 %v1456_v48  ;;  %1723 = vmatpush3.bf16.msra.mxu0 %v1876_v52 }
  0x65   :  { %1745 = vmatpush3.bf16.msra.mxu1 %v1877_v53  ;;  %1724 = vmatprep.subr.bf16.mxu0 %v1878_v54 }
  0x66   :  { %1746 = vmatprep.subr.bf16.mxu1 %v1879_v55  ;;  %1382 = vmatprep.mubr.bf16.mxu0 %v1459_v21 }
  0x67   :  { %1422 = vmatprep.mubr.bf16.mxu1 %v1461_v23 }
  0x68   :  { %1725 = vmatpush3.bf16.msra.mxu0 %v1880_v56 }
  0x69   :  { %1747 = vmatpush3.bf16.msra.mxu1 %v1881_v57  ;;  %1726 = vmatprep.subr.bf16.mxu0 %v1882_v58 }
  0x6a   :  { %1748 = vmatprep.subr.bf16.mxu1 %v1883_v59 }
  0x6c   :  { %1727 = vmatpush3.bf16.msra.mxu0 %v1884_v60 }
  0x6d   :  { %1749 = vmatpush3.bf16.msra.mxu1 %v1885_v61  ;;  %1728 = vmatprep.subr.bf16.mxu0 %v1886_v62 }
  0x6e   :  { %1750 = vmatprep.subr.bf16.mxu1 %v1887_v63 }
  0x70   :  { %1729 = vmatpush3.bf16.msra.mxu0 %v1888_v0 }
  0x71   :  { %1751 = vmatpush3.bf16.msra.mxu1 %v1889_v1  ;;  %1730 = vmatprep.subr.bf16.mxu0 %v1890_v2 }
  0x72   :  { %1752 = vmatprep.subr.bf16.mxu1 %v1891_v3 }
  0x74   :  { %1731 = vmatpush3.bf16.msra.mxu0 %v1892_v4 }
  0x75   :  { %1753 = vmatpush3.bf16.msra.mxu1 %v1893_v5  ;;  %1732 = vmatprep.subr.bf16.mxu0 %v1894_v6 }
  0x76   :  { %1754 = vmatprep.subr.bf16.mxu1 %v1895_v7 }
  0x78   :  { %1733 = vmatpush3.bf16.msra.mxu0 %v1896_v8 }
  0x79   :  { %1755 = vmatpush3.bf16.msra.mxu1 %v1897_v9  ;;  %1734 = vmatprep.subr.bf16.mxu0 %v1898_v10 }
  0x7a   :  { %1756 = vmatprep.subr.bf16.mxu1 %v1899_v11 }
  0x7c   :  { %1735 = vmatpush3.bf16.msra.mxu0 %v1900_v12 }
  0x7d   :  { %1757 = vmatpush3.bf16.msra.mxu1 %v1901_v13  ;;  %1736 = vmatprep.subr.bf16.mxu0 %v1902_v14 }
  0x7e   :  { %1758 = vmatprep.subr.bf16.mxu1 %v1903_v15 }
  0x80   :  { %1737 = vmatpush3.bf16.msra.mxu0 %v1904_v16 }
  0x81   :  { %1759 = vmatpush3.bf16.msra.mxu1 %v1905_v17 }
  0x83   :  { %1383 = vmatmul.mubr.bf16.vlgmr.msra.gmra.mxu0 %v1458_v20 }
  0x84   :  { %1423 = vmatmul.mubr.bf16.vlgmr.msra.gmra.mxu1 %v1460_v22 }
  0xe3   :  { %v1606_v24 = vpop.f32.mrf.mxu0 }
  0xe4   :  { %v1628_v25 = vpop.f32.mrf.mxu1 }
  0xe5   :  { %v1607_v27 = vpop.f32.mrf.mxu0 }
  0xe6   :  { %v1629_v28 = vpop.f32.mrf.mxu1  ;;  %v1608_v29 = vadd.f32 %v1607_v27, %v1606_v24 }
  0xe7   :  { %v1630_v30 = vadd.f32 %v1629_v28, %v1628_v25  ;;  %v1609_v31 = vpop.f32.mrf.mxu0 }
  0xe8   :  { %v1631_v32 = vpop.f32.mrf.mxu1  ;;  %v1145_v33 = vadd.f32 %v1608_v29, %v1445_v26 }
  0xe9   :  { %v1610_v34 = vpop.f32.mrf.mxu0 }
  0xea   :  { %v1632_v35 = vpop.f32.mrf.mxu1  ;;  %v1185_v36 = vadd.f32 %v1630_v30, %v1145_v33 }
 0x103   :  { %v1650_v37 = vpop.f32.mrf.mxu0 }
 0x104   :  { %v1672_v38 = vpop.f32.mrf.mxu1 }
 0x105   :  { %v1651_v39 = vpop.f32.mrf.mxu0 }
 0x106   :  { %v1673_v40 = vpop.f32.mrf.mxu1  ;;  %v1652_v53 = vadd.f32 %v1651_v39, %v1650_v37 }
 0x107   :  { %v1653_v41 = vpop.f32.mrf.mxu0  ;;  %v1674_v55 = vadd.f32 %v1673_v40, %v1672_v38 }
 0x108   :  { %v1675_v42 = vpop.f32.mrf.mxu1  ;;  %v1225_v54 = vadd.f32 %v1652_v53, %v1185_v36 }
 0x109   :  { %v1654_v43 = vpop.f32.mrf.mxu0 }
 0x10a   :  { %v1676_v44 = vpop.f32.mrf.mxu1  ;;  %v1265_v57 = vadd.f32 %v1674_v55, %v1225_v54 }
 0x123   :  { %v1694_v45 = vpop.f32.mrf.mxu0 }
 0x124   :  { %v1716_v46 = vpop.f32.mrf.mxu1 }
 0x125   :  { %v1695_v47 = vpop.f32.mrf.mxu0 }
 0x126   :  { %v1717_v48 = vpop.f32.mrf.mxu1  ;;  %v1696_v56 = vadd.f32 %v1695_v47, %v1694_v45 }
 0x127   :  { %v1697_v49 = vpop.f32.mrf.mxu0  ;;  %v1718_v59 = vadd.f32 %v1717_v48, %v1716_v46 }
 0x128   :  { %v1719_v50 = vpop.f32.mrf.mxu1  ;;  %v1305_v58 = vadd.f32 %v1696_v56, %v1265_v57 }
 0x129   :  { %v1698_v51 = vpop.f32.mrf.mxu0 }
 0x12a   :  { %v1720_v52 = vpop.f32.mrf.mxu1  ;;  %v1345_v63 = vadd.f32 %v1718_v59, %v1305_v58 }
 0x143   :  { %v1738_v60 = vpop.f32.mrf.mxu0 }
 0x144   :  { %v1760_v61 = vpop.f32.mrf.mxu1 }
 0x145   :  { %v1739_v62 = vpop.f32.mrf.mxu0 }
 0x146   :  { %v1740_v0 = vadd.f32 %v1739_v62, %v1738_v60  ;;  %v1761_v1 = vpop.f32.mrf.mxu1 }
 0x147   :  { %v1741_v2 = vpop.f32.mrf.mxu0  ;;  %v1762_v4 = vadd.f32 %v1761_v1, %v1760_v61 }
 0x148   :  { %v1385_v3 = vadd.f32 %v1740_v0, %v1345_v63  ;;  %v1763_v5 = vpop.f32.mrf.mxu1 }
 0x149   :  { %v1742_v6 = vpop.f32.mrf.mxu0 }
 0x14a   :  { %v1425_v7 = vadd.f32 %v1762_v4, %v1385_v3  ;;  %v1764_v8 = vpop.f32.mrf.mxu1 }
 0x14c   :  { %v1430_v9 = vand.u32 2147483647, %v1425_v7  ;;  %vm1434_vm0 = vcmp.ge.f32.partialorder %v1425_v7, 0.0 }
 0x14e   :  { %v1431_v10 = vsub.f32 0.0, %v1430_v9 }
 0x150   :  { %v1432_v11 = vmul.f32 1.442695, %v1431_v10 }
 0x152   :  { %1910 = vpow2.f32 %v1432_v11 }
 0x15f   :  { %v1911_v12 = vpop.eup %1910 }
 0x160   :  { %v1435_v13 = vadd.f32 1.0, %v1911_v12 }
 0x162   :  { %1912 = vrcp.f32 %v1435_v13 }
 0x16f   :  { %v1913_v14 = vpop.eup %1912 }
 0x170   :  { %v1438_v15 = vmul.f32 %v1913_v14, %v1911_v12 }
 0x172   :  { %v1439_v16 = vsel %vm1434_vm0, %v1913_v14, %v1438_v15 }
 0x173   :  { %1440 = vst [vmem:[%s2351_s3] sm:$0xff] %v1439_v16 }

</bundles_post_ra>
